<compile_context>
chip_gen: v5e
topology: v5e:2x2
jax: 0.10.0
libtpu: 0.0.40
codegen_flags: <defaults>
</compile_context>

<pallas_src>
import numpy as np
import jax
import jax.numpy as jnp
from jax.experimental import pallas as pl
from jax.experimental.pallas import tpu as pltpu

GRID = 4             # 4x4 board
P = GRID * GRID      # 16 spatial positions
C = 256              # conv channels
HID = 256            # linear1 hidden
H2 = 64              # linear2 hidden
A = 4                # num actions
K = 9                # 3x3 taps
LANE = 128           # lane-padded output width
EPS = 1e-5


# ----------------------------------------------------------------------------
# Pallas kernel: one batch tile of the whole forward pass
# ----------------------------------------------------------------------------
def actor_kernel(patches_ref, w1_ref, b1_ref, w2_ref, b2_ref,
                 w3_ref, b3_ref, w4_ref, b4_ref, w5_ref, b5_ref,
                 legal_ref, out_ref, halo_ref, im2col_ref, l1in_ref):
    f32 = jnp.float32
    bf16 = jnp.bfloat16
    nb = out_ref.shape[0]                                        # batch tile

    # ---- input scaling log2(x+1)/11 + conv1 (1->256) as one im2col matmul ---
    xs = jnp.log2(patches_ref[...] + 1.0) * (1.0 / 11.0)         # [P, nb, 9]
    r1 = jnp.dot(xs.reshape(P * nb, K), w1_ref[...],
                 preferred_element_type=f32) + b1_ref[...]
    r1 = jnp.maximum(r1, 0.0)                                    # [P*nb, 256]

    # ---- halo: zero only the 20 border cells; interior is overwritten -------
    zrow = jnp.zeros((1, GRID + 2, nb, C), bf16)
    zcol = jnp.zeros((GRID, 1, nb, C), bf16)
    halo_ref[0:1, :, :, :] = zrow
    halo_ref[GRID + 1:GRID + 2, :, :, :] = zrow
    halo_ref[1:GRID + 1, 0:1, :, :] = zcol
    halo_ref[1:GRID + 1, GRID + 1:GRID + 2, :, :] = zcol
    halo_ref[1:GRID + 1, 1:GRID + 1, :, :] = (
        r1.reshape(GRID, GRID, nb, C).astype(bf16))

    # ---- conv2 (256->256, 3x3, pad 1): stage im2col once, single deep-K dot -
    # BN1 scale folded into w2; BN1 shift (through zero pad) + conv2 bias in b2.
    for t in range(K):
        ky, kx = t // 3, t % 3
        im2col_ref[:, t * C:(t + 1) * C] = (
            halo_ref[ky:ky + GRID, kx:kx + GRID, :, :].reshape(P * nb, C))
    c2 = jnp.dot(im2col_ref[...], w2_ref[...],
                 preferred_element_type=f32)                     # [P*nb, 256]
    r2 = jnp.maximum(c2.reshape(P, nb, C) + b2_ref[...], 0.0).astype(bf16)

    # ---- linear1 over flattened (position, channel) features (BN2 folded) ---
    for p in range(P):
        l1in_ref[:, p * C:(p + 1) * C] = r2[p]                   # [nb, P*C]
    l1 = jnp.dot(l1in_ref[...], w3_ref[...],
                 preferred_element_type=f32) + b3_ref[...]
    l1 = jnp.maximum(l1, 0.0)                                    # [nb, 256]

    # ---- linear2 + policy head (head lane-padded to 128) --------------------
    l2 = jnp.maximum(jnp.dot(l1.astype(bf16), w4_ref[...],
                             preferred_element_type=f32) + b4_ref[...], 0.0)
    logits = jnp.dot(l2.astype(bf16), w5_ref[...],
                     preferred_element_type=f32) + b5_ref[...]   # [nb, 128]

    # illegal-action mask; also kills the 124 padding lanes (legal == 0 there).
    # NOTE: a row with zero legal actions yields NaN (same as the PyTorch spec).
    logits = jnp.where(legal_ref[...] == 0.0,
                       jnp.full_like(logits, -jnp.inf), logits)

    # log_softmax along the lane dim
    m = jnp.max(logits, axis=-1, keepdims=True)
    z = logits - m
    lse = jnp.log(jnp.sum(jnp.exp(z), axis=-1, keepdims=True))
    out_ref[...] = z - lse


# ----------------------------------------------------------------------------
# Parameter init / packing (BN folding, bf16 weights, head lane padding)
# ----------------------------------------------------------------------------
def init_raw_params(key):
    ks = jax.random.split(key, 20)
    n = lambda k, s, sc: jax.random.normal(k, s, jnp.float32) * sc
    conv_out = P * C
    return {
        "conv1_w": n(ks[0], (C, 1, 3, 3), 1.0 / np.sqrt(9.0)),
        "conv1_b": n(ks[1], (C,), 0.01),
        "conv2_w": n(ks[2], (C, C, 3, 3), 1.0 / np.sqrt(9.0 * C)),
        "conv2_b": n(ks[3], (C,), 0.01),
        "bn1_gamma": 1.0 + 0.1 * n(ks[4], (C,), 1.0),
        "bn1_beta": 0.1 * n(ks[5], (C,), 1.0),
        "bn1_mean": 0.1 * n(ks[6], (C,), 1.0),
        "bn1_var": 1.0 + 0.1 * jnp.abs(n(ks[7], (C,), 1.0)),
        "bn2_gamma": 1.0 + 0.1 * n(ks[8], (C,), 1.0),
        "bn2_beta": 0.1 * n(ks[9], (C,), 1.0),
        "bn2_mean": 0.1 * n(ks[10], (C,), 1.0),
        "bn2_var": 1.0 + 0.1 * jnp.abs(n(ks[11], (C,), 1.0)),
        "lin1_w": n(ks[12], (HID, conv_out), 1.0 / np.sqrt(conv_out)),
        "lin1_b": n(ks[13], (HID,), 0.01),
        "lin2_w": n(ks[14], (H2, HID), 1.0 / np.sqrt(HID)),
        "lin2_b": n(ks[15], (H2,), 0.01),
        "head_w": n(ks[16], (A, H2), 1.0 / np.sqrt(H2)),
        "head_b": n(ks[17], (A,), 0.01),
    }


def _valid_tap_mask():
    """vm[p, k] = 1 if output position p's neighbor under tap k is inside 4x4."""
    vm = np.zeros((P, K), np.float32)
    for h in range(GRID):
        for w in range(GRID):
            for ky in range(3):
                for kx in range(3):
                    if 0 <= h + ky - 1 < GRID and 0 <= w + kx - 1 < GRID:
                        vm[h * GRID + w, ky * 3 + kx] = 1.0
    return vm


def pack_params(raw):
    f32, bf16 = jnp.float32, jnp.bfloat16
    s1 = raw["bn1_gamma"] / jnp.sqrt(raw["bn1_var"] + EPS)
    t1 = raw["bn1_beta"] - raw["bn1_mean"] * s1
    s2 = raw["bn2_gamma"] / jnp.sqrt(raw["bn2_var"] + EPS)
    t2 = raw["bn2_beta"] - raw["bn2_mean"] * s2

    # conv1 as im2col weight [9, C]
    w1 = raw["conv1_w"].reshape(C, K).T.astype(f32)
    b1 = raw["conv1_b"].reshape(1, C).astype(f32)

    # conv2 taps [9, Cin, Cout]; fold BN1 scale into the input channels;
    # flatten to [9*Cin, Cout] in the same (tap-major, cin) order as the
    # in-kernel im2col staging.
    w2 = jnp.transpose(raw["conv2_w"], (2, 3, 1, 0)).reshape(K, C, C)
    w2f = (w2 * s1[None, :, None]).reshape(K * C, C).astype(bf16)
    # BN1 shift pushed through conv2's zero padding => per-position bias
    tap = jnp.einsum("kic,i->kc", w2, t1)                        # [9, Cout]
    posb = jnp.asarray(_valid_tap_mask()) @ tap                  # [P, Cout]
    b2 = (posb + raw["conv2_b"][None, :]).reshape(P, 1, C).astype(f32)

    # linear1: PyTorch NCHW flatten is f = c*16 + p; repack to [(p, c), hid],
    # fold BN2 scale into c.
    w3r = raw["lin1_w"].reshape(HID, C, P)                       # [hid, c, p]
    w3f = (jnp.transpose(w3r, (2, 1, 0)) * s2[None, :, None]
           ).reshape(P * C, HID).astype(bf16)
    b3 = (raw["lin1_b"] + jnp.einsum("hcp,c->h", w3r, t2)
          ).reshape(1, HID).astype(f32)

    w4 = raw["lin2_w"].T.astype(bf16)                            # [256, 64]
    b4 = raw["lin2_b"].reshape(1, H2).astype(f32)

    # policy head padded to 128 output lanes (lanes >= A masked in-kernel)
    w5 = jnp.zeros((H2, LANE), f32).at[:, :A].set(raw["head_w"].T).astype(bf16)
    b5 = jnp.zeros((1, LANE), f32).at[0, :A].set(raw["head_b"])
    return {"w1": w1, "b1": b1, "w2": w2f, "b2": b2, "w3": w3f, "b3": b3,
            "w4": w4, "b4": b4, "w5": w5, "b5": b5}


# ----------------------------------------------------------------------------
# Glue: im2col, batch padding / tile balancing, pallas_call
# ----------------------------------------------------------------------------
def _im2col(xb):
    """xb: [Bp, 4, 4] raw board -> patches [P, Bp, 9] (k = ky*3+kx)."""
    bp = xb.shape[0]
    xpad = jnp.pad(xb, ((0, 0), (1, 1), (1, 1)))
    cols = [xpad[:, ky:ky + GRID, kx:kx + GRID].reshape(bp, P)
            for ky in range(3) for kx in range(3)]
    pat = jnp.stack(cols, axis=-1)                               # [Bp, P, 9]
    return jnp.transpose(pat, (1, 0, 2))                         # [P, Bp, 9]


def _cdiv(a, b):
    return -(-a // b)


def _ceil8(n):
    return _cdiv(n, 8) * 8


def actor_forward(packed, x, legal_actions=None, block_b=128):
    # block_b=128 suits v5e (MXU-bound) and is safe against v7x's 64 MiB VMEM;
    # on v6e larger tiles (e.g. 256) can be passed explicitly.
    if x.ndim == 4:                      # (B,1,4,4) -> (B,4,4)
        x = x[:, 0]
    x = x.astype(jnp.float32)
    B = x.shape[0]

    nb = max(8, min(block_b, _ceil8(B)))          # batch tile: multiple of 8
    ntiles = _cdiv(B, nb)
    if ntiles > 1 and ntiles % 2 == 1:            # balance v7x's 2 TensorCores
        nb = _ceil8(_cdiv(B, ntiles + 1))
        ntiles = _cdiv(B, nb)
    bp = ntiles * nb                              # padded batch

    xb = jnp.pad(x, ((0, bp - B), (0, 0), (0, 0)))
    patches = _im2col(xb)                                        # [P, bp, 9]

    legal = (jnp.ones((B, A), jnp.float32) if legal_actions is None
             else legal_actions.astype(jnp.float32))
    legalp = jnp.zeros((bp, LANE), jnp.float32)
    legalp = legalp.at[:B, :A].set(legal)
    legalp = legalp.at[B:, :A].set(1.0)  # keep padded batch rows NaN-free

    def _const(a):                       # whole array, VMEM-resident across steps
        nd = a.ndim
        return pl.BlockSpec(a.shape, lambda i: (0,) * nd)

    weights = (packed["w1"], packed["b1"], packed["w2"], packed["b2"],
               packed["w3"], packed["b3"], packed["w4"], packed["b4"],
               packed["w5"], packed["b5"])

    in_specs = ([pl.BlockSpec((P, nb, K), lambda i: (0, i, 0))]
                + [_const(w) for w in weights]
                + [pl.BlockSpec((nb, LANE), lambda i: (i, 0))])

    out = pl.pallas_call(
        actor_kernel,
        out_shape=jax.ShapeDtypeStruct((bp, LANE), jnp.float32),
        grid=(ntiles,),
        in_specs=in_specs,
        out_specs=pl.BlockSpec((nb, LANE), lambda i: (i, 0)),
        scratch_shapes=[
            pltpu.VMEM((GRID + 2, GRID + 2, nb, C), jnp.bfloat16),  # halo
            pltpu.VMEM((P * nb, K * C), jnp.bfloat16),              # conv2 im2col
            pltpu.VMEM((nb, P * C), jnp.bfloat16),                  # linear1 input
        ],
        compiler_params=pltpu.CompilerParams(
            dimension_semantics=("parallel",),
            vmem_limit_bytes=48 * 1024 * 1024),
    )(patches, *weights, legalp)

    return out[:B, :A]


# ----------------------------------------------------------------------------
# Pure-JAX reference (independent of the kernel's matmul formulation)
# ----------------------------------------------------------------------------
def reference_forward(raw, x, legal):
    x = x[:, None].astype(jnp.float32)
    x = jnp.log2(x + 1.0) / 11.0
    dn = ("NCHW", "OIHW", "NCHW")

    def bn(y, g, b, m, v):
        return ((y - m[None, :, None, None]) / jnp.sqrt(v + EPS)[None, :, None, None]
                * g[None, :, None, None] + b[None, :, None, None])

    y = jax.lax.conv_general_dilated(x, raw["conv1_w"], (1, 1), "SAME",
                                     dimension_numbers=dn)
    y = jnp.maximum(y + raw["conv1_b"][None, :, None, None], 0.0)
    y = bn(y, raw["bn1_gamma"], raw["bn1_beta"], raw["bn1_mean"], raw["bn1_var"])
    y = jax.lax.conv_general_dilated(y, raw["conv2_w"], (1, 1), "SAME",
                                     dimension_numbers=dn)
    y = jnp.maximum(y + raw["conv2_b"][None, :, None, None], 0.0)
    y = bn(y, raw["bn2_gamma"], raw["bn2_beta"], raw["bn2_mean"], raw["bn2_var"])
    flat = y.reshape(y.shape[0], -1)                             # NCHW: f = c*16+p
    l1 = jnp.maximum(flat @ raw["lin1_w"].T + raw["lin1_b"], 0.0)
    l2 = jnp.maximum(l1 @ raw["lin2_w"].T + raw["lin2_b"], 0.0)
    logits = l2 @ raw["head_w"].T + raw["head_b"]
    logits = jnp.where(legal == 0.0, -jnp.inf, logits)
    return jax.nn.log_softmax(logits, axis=-1)


if __name__ == "__main__":
    key = jax.random.PRNGKey(0)
    kp, kx, kb, kl = jax.random.split(key, 4)

    raw = init_raw_params(kp)
    packed = pack_params(raw)

    # -- small deterministic batch (B=2), single-tile path ---------------------
    exps = jax.random.randint(kx, (2, GRID, GRID), 0, 12)
    board = jnp.where(exps == 0, 0.0, 2.0 ** exps.astype(jnp.float32))
    legal = jnp.array([[1.0, 1.0, 0.0, 1.0],
                       [0.0, 1.0, 1.0, 1.0]], jnp.float32)

    out = jax.block_until_ready(actor_forward(packed, board, legal))
    ref = reference_forward(raw, board, legal)
    np.testing.assert_allclose(np.asarray(out), np.asarray(ref),
                               atol=6e-2, rtol=6e-2)

    # -- larger batch exercising multi-tile grid, tile balancing, batch padding -
    B2 = 300
    exps2 = jax.random.randint(kb, (B2, GRID, GRID), 0, 12)
    board2 = jnp.where(exps2 == 0, 0.0, 2.0 ** exps2.astype(jnp.float32))
    legal2 = (jax.random.uniform(kl, (B2, A)) > 0.3).astype(jnp.float32)
    legal2 = legal2.at[:, 0].set(1.0)      # guarantee >=1 legal action per row

    out2 = jax.block_until_ready(actor_forward(packed, board2, legal2))
    ref2 = reference_forward(raw, board2, legal2)
    np.testing.assert_allclose(np.asarray(out2), np.asarray(ref2),
                               atol=6e-2, rtol=6e-2)

    print("KERNEL_OK")
</pallas_src>

<mosaic_0001>
module attributes {stable_mosaic.version = 11 : i64} {
  func.func @actor_kernel(%arg0: i32, %arg1: memref<16x8x9xf32, #tpu.memory_space<vmem>>, %arg2: memref<9x256xf32, #tpu.memory_space<vmem>>, %arg3: memref<1x256xf32, #tpu.memory_space<vmem>>, %arg4: memref<2304x256xbf16, #tpu.memory_space<vmem>>, %arg5: memref<16x1x256xf32, #tpu.memory_space<vmem>>, %arg6: memref<4096x256xbf16, #tpu.memory_space<vmem>>, %arg7: memref<1x256xf32, #tpu.memory_space<vmem>>, %arg8: memref<256x64xbf16, #tpu.memory_space<vmem>>, %arg9: memref<1x64xf32, #tpu.memory_space<vmem>>, %arg10: memref<64x128xbf16, #tpu.memory_space<vmem>>, %arg11: memref<1x128xf32, #tpu.memory_space<vmem>>, %arg12: memref<8x128xf32, #tpu.memory_space<vmem>>, %arg13: memref<8x128xf32, #tpu.memory_space<vmem>>, %arg14: memref<6x6x8x256xbf16, #tpu.memory_space<vmem>>, %arg15: memref<128x2304xbf16, #tpu.memory_space<vmem>>, %arg16: memref<8x4096xbf16, #tpu.memory_space<vmem>>) attributes {dimension_semantics = [#tpu.dimension_semantics<parallel>], iteration_bounds = array<i64: 1>, scalar_prefetch = 0 : i64, scratch_operands = 3 : i64, tpu.core_type = #tpu.core_type<tc>, window_params = [{transform_indices = @transform_0, window_bounds = array<i64: 16, 8, 9>}, {pipeline_mode = #tpu.pipeline_mode<synchronous>, transform_indices = @transform_1, window_bounds = array<i64: 9, 256>}, {pipeline_mode = #tpu.pipeline_mode<synchronous>, transform_indices = @transform_2, window_bounds = array<i64: 1, 256>}, {pipeline_mode = #tpu.pipeline_mode<synchronous>, transform_indices = @transform_3, window_bounds = array<i64: 2304, 256>}, {pipeline_mode = #tpu.pipeline_mode<synchronous>, transform_indices = @transform_4, window_bounds = array<i64: 16, 1, 256>}, {pipeline_mode = #tpu.pipeline_mode<synchronous>, transform_indices = @transform_5, window_bounds = array<i64: 4096, 256>}, {pipeline_mode = #tpu.pipeline_mode<synchronous>, transform_indices = @transform_6, window_bounds = array<i64: 1, 256>}, {pipeline_mode = #tpu.pipeline_mode<synchronous>, transform_indices = @transform_7, window_bounds = array<i64: 256, 64>}, {pipeline_mode = #tpu.pipeline_mode<synchronous>, transform_indices = @transform_8, window_bounds = array<i64: 1, 64>}, {pipeline_mode = #tpu.pipeline_mode<synchronous>, transform_indices = @transform_9, window_bounds = array<i64: 64, 128>}, {pipeline_mode = #tpu.pipeline_mode<synchronous>, transform_indices = @transform_10, window_bounds = array<i64: 1, 128>}, {transform_indices = @transform_11, window_bounds = array<i64: 8, 128>}, {transform_indices = @transform_12, window_bounds = array<i64: 8, 128>}]} {
    %c0 = arith.constant 0 : index
    %c0_0 = arith.constant 0 : index
    %c0_1 = arith.constant 0 : index
    %0 = vector.load %arg1[%c0, %c0_0, %c0_1] : memref<16x8x9xf32, #tpu.memory_space<vmem>>, vector<16x8x9xf32>
    %cst = arith.constant 1.000000e+00 : f32
    %1 = vector.broadcast %cst : f32 to vector<16x8x9xf32>
    %2 = arith.addf %0, %1 : vector<16x8x9xf32>
    %3 = math.log %2 : vector<16x8x9xf32>
    %cst_2 = arith.constant 2.000000e+00 : f32
    %4 = math.log %cst_2 : f32
    %5 = vector.broadcast %4 : f32 to vector<16x8x9xf32>
    %6 = arith.divf %3, %5 : vector<16x8x9xf32>
    %cst_3 = arith.constant 0.0909090936 : f32
    %7 = vector.broadcast %cst_3 : f32 to vector<16x8x9xf32>
    %8 = arith.mulf %6, %7 : vector<16x8x9xf32>
    %9 = vector.shape_cast %8 : vector<16x8x9xf32> to vector<128x9xf32>
    %c0_4 = arith.constant 0 : index
    %c0_5 = arith.constant 0 : index
    %10 = vector.load %arg2[%c0_4, %c0_5] : memref<9x256xf32, #tpu.memory_space<vmem>>, vector<9x256xf32>
    %cst_6 = arith.constant dense<0.000000e+00> : vector<128x256xf32>
    %11 = tpu.matmul %9, %10, %cst_6 {dimension_numbers = #tpu.dot_dimension_numbers<[1], [0], [0], [1], [0, 0, 1, 1], [], []>} : vector<128x9xf32>, vector<9x256xf32>, vector<128x256xf32> -> vector<128x256xf32>
    %c0_7 = arith.constant 0 : index
    %c0_8 = arith.constant 0 : index
    %12 = vector.load %arg3[%c0_7, %c0_8] : memref<1x256xf32, #tpu.memory_space<vmem>>, vector<1x256xf32>
    %13 = vector.broadcast %12 : vector<1x256xf32> to vector<128x256xf32>
    %14 = arith.addf %11, %13 : vector<128x256xf32>
    %cst_9 = arith.constant 0.000000e+00 : f32
    %15 = vector.broadcast %cst_9 : f32 to vector<128x256xf32>
    %16 = arith.maximumf %14, %15 : vector<128x256xf32>
    %cst_10 = arith.constant 0.000000e+00 : bf16
    %17 = vector.broadcast %cst_10 : bf16 to vector<1x6x8x256xbf16>
    %cst_11 = arith.constant 0.000000e+00 : bf16
    %18 = vector.broadcast %cst_11 : bf16 to vector<4x1x8x256xbf16>
    %c0_12 = arith.constant 0 : index
    %c0_13 = arith.constant 0 : index
    %c0_14 = arith.constant 0 : index
    %c0_15 = arith.constant 0 : index
    %19 = vector.load %arg14[%c0_12, %c0_13, %c0_14, %c0_15] : memref<6x6x8x256xbf16, #tpu.memory_space<vmem>>, vector<1x6x8x256xbf16>
    tpu.vector_store %arg14[%c0_12, %c0_13, %c0_14, %c0_15], %17 {strides = array<i32>} : memref<6x6x8x256xbf16, #tpu.memory_space<vmem>>, vector<1x6x8x256xbf16>,
    %c5 = arith.constant 5 : index
    %c0_16 = arith.constant 0 : index
    %c0_17 = arith.constant 0 : index
    %c0_18 = arith.constant 0 : index
    %20 = vector.load %arg14[%c5, %c0_16, %c0_17, %c0_18] : memref<6x6x8x256xbf16, #tpu.memory_space<vmem>>, vector<1x6x8x256xbf16>
    tpu.vector_store %arg14[%c5, %c0_16, %c0_17, %c0_18], %17 {strides = array<i32>} : memref<6x6x8x256xbf16, #tpu.memory_space<vmem>>, vector<1x6x8x256xbf16>,
    %c1 = arith.constant 1 : index
    %c0_19 = arith.constant 0 : index
    %c0_20 = arith.constant 0 : index
    %c0_21 = arith.constant 0 : index
    %21 = vector.load %arg14[%c1, %c0_19, %c0_20, %c0_21] : memref<6x6x8x256xbf16, #tpu.memory_space<vmem>>, vector<4x1x8x256xbf16>
    tpu.vector_store %arg14[%c1, %c0_19, %c0_20, %c0_21], %18 {strides = array<i32>} : memref<6x6x8x256xbf16, #tpu.memory_space<vmem>>, vector<4x1x8x256xbf16>,
    %c1_22 = arith.constant 1 : index
    %c5_23 = arith.constant 5 : index
    %c0_24 = arith.constant 0 : index
    %c0_25 = arith.constant 0 : index
    %22 = vector.load %arg14[%c1_22, %c5_23, %c0_24, %c0_25] : memref<6x6x8x256xbf16, #tpu.memory_space<vmem>>, vector<4x1x8x256xbf16>
    tpu.vector_store %arg14[%c1_22, %c5_23, %c0_24, %c0_25], %18 {strides = array<i32>} : memref<6x6x8x256xbf16, #tpu.memory_space<vmem>>, vector<4x1x8x256xbf16>,
    %23 = vector.shape_cast %16 : vector<128x256xf32> to vector<4x4x8x256xf32>
    %24 = arith.truncf %23 : vector<4x4x8x256xf32> to vector<4x4x8x256xbf16>
    %c1_26 = arith.constant 1 : index
    %c1_27 = arith.constant 1 : index
    %c0_28 = arith.constant 0 : index
    %c0_29 = arith.constant 0 : index
    %25 = vector.load %arg14[%c1_26, %c1_27, %c0_28, %c0_29] : memref<6x6x8x256xbf16, #tpu.memory_space<vmem>>, vector<4x4x8x256xbf16>
    tpu.vector_store %arg14[%c1_26, %c1_27, %c0_28, %c0_29], %24 {strides = array<i32>} : memref<6x6x8x256xbf16, #tpu.memory_space<vmem>>, vector<4x4x8x256xbf16>,
    %c0_30 = arith.constant 0 : index
    %c0_31 = arith.constant 0 : index
    %c0_32 = arith.constant 0 : index
    %c0_33 = arith.constant 0 : index
    %26 = vector.load %arg14[%c0_30, %c0_31, %c0_32, %c0_33] : memref<6x6x8x256xbf16, #tpu.memory_space<vmem>>, vector<4x4x8x256xbf16>
    %27 = vector.shape_cast %26 : vector<4x4x8x256xbf16> to vector<128x256xbf16>
    %c0_34 = arith.constant 0 : index
    %c0_35 = arith.constant 0 : index
    %28 = vector.load %arg15[%c0_34, %c0_35] : memref<128x2304xbf16, #tpu.memory_space<vmem>>, vector<128x256xbf16>
    tpu.vector_store %arg15[%c0_34, %c0_35], %27 {strides = array<i32>} : memref<128x2304xbf16, #tpu.memory_space<vmem>>, vector<128x256xbf16>,
    %c0_36 = arith.constant 0 : index
    %c1_37 = arith.constant 1 : index
    %c0_38 = arith.constant 0 : index
    %c0_39 = arith.constant 0 : index
    %29 = vector.load %arg14[%c0_36, %c1_37, %c0_38, %c0_39] : memref<6x6x8x256xbf16, #tpu.memory_space<vmem>>, vector<4x4x8x256xbf16>
    %30 = vector.shape_cast %29 : vector<4x4x8x256xbf16> to vector<128x256xbf16>
    %c0_40 = arith.constant 0 : index
    %c256 = arith.constant 256 : index
    %31 = vector.load %arg15[%c0_40, %c256] : memref<128x2304xbf16, #tpu.memory_space<vmem>>, vector<128x256xbf16>
    tpu.vector_store %arg15[%c0_40, %c256], %30 {strides = array<i32>} : memref<128x2304xbf16, #tpu.memory_space<vmem>>, vector<128x256xbf16>,
    %c0_41 = arith.constant 0 : index
    %c2 = arith.constant 2 : index
    %c0_42 = arith.constant 0 : index
    %c0_43 = arith.constant 0 : index
    %32 = vector.load %arg14[%c0_41, %c2, %c0_42, %c0_43] : memref<6x6x8x256xbf16, #tpu.memory_space<vmem>>, vector<4x4x8x256xbf16>
    %33 = vector.shape_cast %32 : vector<4x4x8x256xbf16> to vector<128x256xbf16>
    %c0_44 = arith.constant 0 : index
    %c512 = arith.constant 512 : index
    %34 = vector.load %arg15[%c0_44, %c512] : memref<128x2304xbf16, #tpu.memory_space<vmem>>, vector<128x256xbf16>
    tpu.vector_store %arg15[%c0_44, %c512], %33 {strides = array<i32>} : memref<128x2304xbf16, #tpu.memory_space<vmem>>, vector<128x256xbf16>,
    %c1_45 = arith.constant 1 : index
    %c0_46 = arith.constant 0 : index
    %c0_47 = arith.constant 0 : index
    %c0_48 = arith.constant 0 : index
    %35 = vector.load %arg14[%c1_45, %c0_46, %c0_47, %c0_48] : memref<6x6x8x256xbf16, #tpu.memory_space<vmem>>, vector<4x4x8x256xbf16>
    %36 = vector.shape_cast %35 : vector<4x4x8x256xbf16> to vector<128x256xbf16>
    %c0_49 = arith.constant 0 : index
    %c768 = arith.constant 768 : index
    %37 = vector.load %arg15[%c0_49, %c768] : memref<128x2304xbf16, #tpu.memory_space<vmem>>, vector<128x256xbf16>
    tpu.vector_store %arg15[%c0_49, %c768], %36 {strides = array<i32>} : memref<128x2304xbf16, #tpu.memory_space<vmem>>, vector<128x256xbf16>,
    %c1_50 = arith.constant 1 : index
    %c1_51 = arith.constant 1 : index
    %c0_52 = arith.constant 0 : index
    %c0_53 = arith.constant 0 : index
    %38 = vector.load %arg14[%c1_50, %c1_51, %c0_52, %c0_53] : memref<6x6x8x256xbf16, #tpu.memory_space<vmem>>, vector<4x4x8x256xbf16>
    %39 = vector.shape_cast %38 : vector<4x4x8x256xbf16> to vector<128x256xbf16>
    %c0_54 = arith.constant 0 : index
    %c1024 = arith.constant 1024 : index
    %40 = vector.load %arg15[%c0_54, %c1024] : memref<128x2304xbf16, #tpu.memory_space<vmem>>, vector<128x256xbf16>
    tpu.vector_store %arg15[%c0_54, %c1024], %39 {strides = array<i32>} : memref<128x2304xbf16, #tpu.memory_space<vmem>>, vector<128x256xbf16>,
    %c1_55 = arith.constant 1 : index
    %c2_56 = arith.constant 2 : index
    %c0_57 = arith.constant 0 : index
    %c0_58 = arith.constant 0 : index
    %41 = vector.load %arg14[%c1_55, %c2_56, %c0_57, %c0_58] : memref<6x6x8x256xbf16, #tpu.memory_space<vmem>>, vector<4x4x8x256xbf16>
    %42 = vector.shape_cast %41 : vector<4x4x8x256xbf16> to vector<128x256xbf16>
    %c0_59 = arith.constant 0 : index
    %c1280 = arith.constant 1280 : index
    %43 = vector.load %arg15[%c0_59, %c1280] : memref<128x2304xbf16, #tpu.memory_space<vmem>>, vector<128x256xbf16>
    tpu.vector_store %arg15[%c0_59, %c1280], %42 {strides = array<i32>} : memref<128x2304xbf16, #tpu.memory_space<vmem>>, vector<128x256xbf16>,
    %c2_60 = arith.constant 2 : index
    %c0_61 = arith.constant 0 : index
    %c0_62 = arith.constant 0 : index
    %c0_63 = arith.constant 0 : index
    %44 = vector.load %arg14[%c2_60, %c0_61, %c0_62, %c0_63] : memref<6x6x8x256xbf16, #tpu.memory_space<vmem>>, vector<4x4x8x256xbf16>
    %45 = vector.shape_cast %44 : vector<4x4x8x256xbf16> to vector<128x256xbf16>
    %c0_64 = arith.constant 0 : index
    %c1536 = arith.constant 1536 : index
    %46 = vector.load %arg15[%c0_64, %c1536] : memref<128x2304xbf16, #tpu.memory_space<vmem>>, vector<128x256xbf16>
    tpu.vector_store %arg15[%c0_64, %c1536], %45 {strides = array<i32>} : memref<128x2304xbf16, #tpu.memory_space<vmem>>, vector<128x256xbf16>,
    %c2_65 = arith.constant 2 : index
    %c1_66 = arith.constant 1 : index
    %c0_67 = arith.constant 0 : index
    %c0_68 = arith.constant 0 : index
    %47 = vector.load %arg14[%c2_65, %c1_66, %c0_67, %c0_68] : memref<6x6x8x256xbf16, #tpu.memory_space<vmem>>, vector<4x4x8x256xbf16>
    %48 = vector.shape_cast %47 : vector<4x4x8x256xbf16> to vector<128x256xbf16>
    %c0_69 = arith.constant 0 : index
    %c1792 = arith.constant 1792 : index
    %49 = vector.load %arg15[%c0_69, %c1792] : memref<128x2304xbf16, #tpu.memory_space<vmem>>, vector<128x256xbf16>
    tpu.vector_store %arg15[%c0_69, %c1792], %48 {strides = array<i32>} : memref<128x2304xbf16, #tpu.memory_space<vmem>>, vector<128x256xbf16>,
    %c2_70 = arith.constant 2 : index
    %c2_71 = arith.constant 2 : index
    %c0_72 = arith.constant 0 : index
    %c0_73 = arith.constant 0 : index
    %50 = vector.load %arg14[%c2_70, %c2_71, %c0_72, %c0_73] : memref<6x6x8x256xbf16, #tpu.memory_space<vmem>>, vector<4x4x8x256xbf16>
    %51 = vector.shape_cast %50 : vector<4x4x8x256xbf16> to vector<128x256xbf16>
    %c0_74 = arith.constant 0 : index
    %c2048 = arith.constant 2048 : index
    %52 = vector.load %arg15[%c0_74, %c2048] : memref<128x2304xbf16, #tpu.memory_space<vmem>>, vector<128x256xbf16>
    tpu.vector_store %arg15[%c0_74, %c2048], %51 {strides = array<i32>} : memref<128x2304xbf16, #tpu.memory_space<vmem>>, vector<128x256xbf16>,
    %c0_75 = arith.constant 0 : index
    %c0_76 = arith.constant 0 : index
    %53 = vector.load %arg15[%c0_75, %c0_76] : memref<128x2304xbf16, #tpu.memory_space<vmem>>, vector<128x2304xbf16>
    %c0_77 = arith.constant 0 : index
    %c0_78 = arith.constant 0 : index
    %54 = vector.load %arg4[%c0_77, %c0_78] : memref<2304x256xbf16, #tpu.memory_space<vmem>>, vector<2304x256xbf16>
    %cst_79 = arith.constant dense<0.000000e+00> : vector<128x256xf32>
    %55 = tpu.matmul %53, %54, %cst_79 {dimension_numbers = #tpu.dot_dimension_numbers<[1], [0], [0], [1], [0, 0, 1, 1], [], []>} : vector<128x2304xbf16>, vector<2304x256xbf16>, vector<128x256xf32> -> vector<128x256xf32>
    %56 = vector.shape_cast %55 : vector<128x256xf32> to vector<16x8x256xf32>
    %c0_80 = arith.constant 0 : index
    %c0_81 = arith.constant 0 : index
    %c0_82 = arith.constant 0 : index
    %57 = vector.load %arg5[%c0_80, %c0_81, %c0_82] : memref<16x1x256xf32, #tpu.memory_space<vmem>>, vector<16x1x256xf32>
    %58 = vector.broadcast %57 : vector<16x1x256xf32> to vector<16x8x256xf32>
    %59 = arith.addf %56, %58 : vector<16x8x256xf32>
    %cst_83 = arith.constant 0.000000e+00 : f32
    %60 = vector.broadcast %cst_83 : f32 to vector<16x8x256xf32>
    %61 = arith.maximumf %59, %60 : vector<16x8x256xf32>
    %62 = arith.truncf %61 : vector<16x8x256xf32> to vector<16x8x256xbf16>
    %63 = vector.extract_strided_slice %62 {offsets = [0, 0, 0], sizes = [1, 8, 256], strides = [1, 1, 1]} : vector<16x8x256xbf16> to vector<1x8x256xbf16>
    %64 = vector.shape_cast %63 : vector<1x8x256xbf16> to vector<8x256xbf16>
    %c0_84 = arith.constant 0 : index
    %c0_85 = arith.constant 0 : index
    %65 = vector.load %arg16[%c0_84, %c0_85] : memref<8x4096xbf16, #tpu.memory_space<vmem>>, vector<8x256xbf16>
    tpu.vector_store %arg16[%c0_84, %c0_85], %64 {strides = array<i32>} : memref<8x4096xbf16, #tpu.memory_space<vmem>>, vector<8x256xbf16>,
    %66 = vector.extract_strided_slice %62 {offsets = [1, 0, 0], sizes = [1, 8, 256], strides = [1, 1, 1]} : vector<16x8x256xbf16> to vector<1x8x256xbf16>
    %67 = vector.shape_cast %66 : vector<1x8x256xbf16> to vector<8x256xbf16>
    %c0_86 = arith.constant 0 : index
    %c256_87 = arith.constant 256 : index
    %68 = vector.load %arg16[%c0_86, %c256_87] : memref<8x4096xbf16, #tpu.memory_space<vmem>>, vector<8x256xbf16>
    tpu.vector_store %arg16[%c0_86, %c256_87], %67 {strides = array<i32>} : memref<8x4096xbf16, #tpu.memory_space<vmem>>, vector<8x256xbf16>,
    %69 = vector.extract_strided_slice %62 {offsets = [2, 0, 0], sizes = [1, 8, 256], strides = [1, 1, 1]} : vector<16x8x256xbf16> to vector<1x8x256xbf16>
    %70 = vector.shape_cast %69 : vector<1x8x256xbf16> to vector<8x256xbf16>
    %c0_88 = arith.constant 0 : index
    %c512_89 = arith.constant 512 : index
    %71 = vector.load %arg16[%c0_88, %c512_89] : memref<8x4096xbf16, #tpu.memory_space<vmem>>, vector<8x256xbf16>
    tpu.vector_store %arg16[%c0_88, %c512_89], %70 {strides = array<i32>} : memref<8x4096xbf16, #tpu.memory_space<vmem>>, vector<8x256xbf16>,
    %72 = vector.extract_strided_slice %62 {offsets = [3, 0, 0], sizes = [1, 8, 256], strides = [1, 1, 1]} : vector<16x8x256xbf16> to vector<1x8x256xbf16>
    %73 = vector.shape_cast %72 : vector<1x8x256xbf16> to vector<8x256xbf16>
    %c0_90 = arith.constant 0 : index
    %c768_91 = arith.constant 768 : index
    %74 = vector.load %arg16[%c0_90, %c768_91] : memref<8x4096xbf16, #tpu.memory_space<vmem>>, vector<8x256xbf16>
    tpu.vector_store %arg16[%c0_90, %c768_91], %73 {strides = array<i32>} : memref<8x4096xbf16, #tpu.memory_space<vmem>>, vector<8x256xbf16>,
    %75 = vector.extract_strided_slice %62 {offsets = [4, 0, 0], sizes = [1, 8, 256], strides = [1, 1, 1]} : vector<16x8x256xbf16> to vector<1x8x256xbf16>
    %76 = vector.shape_cast %75 : vector<1x8x256xbf16> to vector<8x256xbf16>
    %c0_92 = arith.constant 0 : index
    %c1024_93 = arith.constant 1024 : index
    %77 = vector.load %arg16[%c0_92, %c1024_93] : memref<8x4096xbf16, #tpu.memory_space<vmem>>, vector<8x256xbf16>
    tpu.vector_store %arg16[%c0_92, %c1024_93], %76 {strides = array<i32>} : memref<8x4096xbf16, #tpu.memory_space<vmem>>, vector<8x256xbf16>,
    %78 = vector.extract_strided_slice %62 {offsets = [5, 0, 0], sizes = [1, 8, 256], strides = [1, 1, 1]} : vector<16x8x256xbf16> to vector<1x8x256xbf16>
    %79 = vector.shape_cast %78 : vector<1x8x256xbf16> to vector<8x256xbf16>
    %c0_94 = arith.constant 0 : index
    %c1280_95 = arith.constant 1280 : index
    %80 = vector.load %arg16[%c0_94, %c1280_95] : memref<8x4096xbf16, #tpu.memory_space<vmem>>, vector<8x256xbf16>
    tpu.vector_store %arg16[%c0_94, %c1280_95], %79 {strides = array<i32>} : memref<8x4096xbf16, #tpu.memory_space<vmem>>, vector<8x256xbf16>,
    %81 = vector.extract_strided_slice %62 {offsets = [6, 0, 0], sizes = [1, 8, 256], strides = [1, 1, 1]} : vector<16x8x256xbf16> to vector<1x8x256xbf16>
    %82 = vector.shape_cast %81 : vector<1x8x256xbf16> to vector<8x256xbf16>
    %c0_96 = arith.constant 0 : index
    %c1536_97 = arith.constant 1536 : index
    %83 = vector.load %arg16[%c0_96, %c1536_97] : memref<8x4096xbf16, #tpu.memory_space<vmem>>, vector<8x256xbf16>
    tpu.vector_store %arg16[%c0_96, %c1536_97], %82 {strides = array<i32>} : memref<8x4096xbf16, #tpu.memory_space<vmem>>, vector<8x256xbf16>,
    %84 = vector.extract_strided_slice %62 {offsets = [7, 0, 0], sizes = [1, 8, 256], strides = [1, 1, 1]} : vector<16x8x256xbf16> to vector<1x8x256xbf16>
    %85 = vector.shape_cast %84 : vector<1x8x256xbf16> to vector<8x256xbf16>
    %c0_98 = arith.constant 0 : index
    %c1792_99 = arith.constant 1792 : index
    %86 = vector.load %arg16[%c0_98, %c1792_99] : memref<8x4096xbf16, #tpu.memory_space<vmem>>, vector<8x256xbf16>
    tpu.vector_store %arg16[%c0_98, %c1792_99], %85 {strides = array<i32>} : memref<8x4096xbf16, #tpu.memory_space<vmem>>, vector<8x256xbf16>,
    %87 = vector.extract_strided_slice %62 {offsets = [8, 0, 0], sizes = [1, 8, 256], strides = [1, 1, 1]} : vector<16x8x256xbf16> to vector<1x8x256xbf16>
    %88 = vector.shape_cast %87 : vector<1x8x256xbf16> to vector<8x256xbf16>
    %c0_100 = arith.constant 0 : index
    %c2048_101 = arith.constant 2048 : index
    %89 = vector.load %arg16[%c0_100, %c2048_101] : memref<8x4096xbf16, #tpu.memory_space<vmem>>, vector<8x256xbf16>
    tpu.vector_store %arg16[%c0_100, %c2048_101], %88 {strides = array<i32>} : memref<8x4096xbf16, #tpu.memory_space<vmem>>, vector<8x256xbf16>,
    %90 = vector.extract_strided_slice %62 {offsets = [9, 0, 0], sizes = [1, 8, 256], strides = [1, 1, 1]} : vector<16x8x256xbf16> to vector<1x8x256xbf16>
    %91 = vector.shape_cast %90 : vector<1x8x256xbf16> to vector<8x256xbf16>
    %c0_102 = arith.constant 0 : index
    %c2304 = arith.constant 2304 : index
    %92 = vector.load %arg16[%c0_102, %c2304] : memref<8x4096xbf16, #tpu.memory_space<vmem>>, vector<8x256xbf16>
    tpu.vector_store %arg16[%c0_102, %c2304], %91 {strides = array<i32>} : memref<8x4096xbf16, #tpu.memory_space<vmem>>, vector<8x256xbf16>,
    %93 = vector.extract_strided_slice %62 {offsets = [10, 0, 0], sizes = [1, 8, 256], strides = [1, 1, 1]} : vector<16x8x256xbf16> to vector<1x8x256xbf16>
    %94 = vector.shape_cast %93 : vector<1x8x256xbf16> to vector<8x256xbf16>
    %c0_103 = arith.constant 0 : index
    %c2560 = arith.constant 2560 : index
    %95 = vector.load %arg16[%c0_103, %c2560] : memref<8x4096xbf16, #tpu.memory_space<vmem>>, vector<8x256xbf16>
    tpu.vector_store %arg16[%c0_103, %c2560], %94 {strides = array<i32>} : memref<8x4096xbf16, #tpu.memory_space<vmem>>, vector<8x256xbf16>,
    %96 = vector.extract_strided_slice %62 {offsets = [11, 0, 0], sizes = [1, 8, 256], strides = [1, 1, 1]} : vector<16x8x256xbf16> to vector<1x8x256xbf16>
    %97 = vector.shape_cast %96 : vector<1x8x256xbf16> to vector<8x256xbf16>
    %c0_104 = arith.constant 0 : index
    %c2816 = arith.constant 2816 : index
    %98 = vector.load %arg16[%c0_104, %c2816] : memref<8x4096xbf16, #tpu.memory_space<vmem>>, vector<8x256xbf16>
    tpu.vector_store %arg16[%c0_104, %c2816], %97 {strides = array<i32>} : memref<8x4096xbf16, #tpu.memory_space<vmem>>, vector<8x256xbf16>,
    %99 = vector.extract_strided_slice %62 {offsets = [12, 0, 0], sizes = [1, 8, 256], strides = [1, 1, 1]} : vector<16x8x256xbf16> to vector<1x8x256xbf16>
    %100 = vector.shape_cast %99 : vector<1x8x256xbf16> to vector<8x256xbf16>
    %c0_105 = arith.constant 0 : index
    %c3072 = arith.constant 3072 : index
    %101 = vector.load %arg16[%c0_105, %c3072] : memref<8x4096xbf16, #tpu.memory_space<vmem>>, vector<8x256xbf16>
    tpu.vector_store %arg16[%c0_105, %c3072], %100 {strides = array<i32>} : memref<8x4096xbf16, #tpu.memory_space<vmem>>, vector<8x256xbf16>,
    %102 = vector.extract_strided_slice %62 {offsets = [13, 0, 0], sizes = [1, 8, 256], strides = [1, 1, 1]} : vector<16x8x256xbf16> to vector<1x8x256xbf16>
    %103 = vector.shape_cast %102 : vector<1x8x256xbf16> to vector<8x256xbf16>
    %c0_106 = arith.constant 0 : index
    %c3328 = arith.constant 3328 : index
    %104 = vector.load %arg16[%c0_106, %c3328] : memref<8x4096xbf16, #tpu.memory_space<vmem>>, vector<8x256xbf16>
    tpu.vector_store %arg16[%c0_106, %c3328], %103 {strides = array<i32>} : memref<8x4096xbf16, #tpu.memory_space<vmem>>, vector<8x256xbf16>,
    %105 = vector.extract_strided_slice %62 {offsets = [14, 0, 0], sizes = [1, 8, 256], strides = [1, 1, 1]} : vector<16x8x256xbf16> to vector<1x8x256xbf16>
    %106 = vector.shape_cast %105 : vector<1x8x256xbf16> to vector<8x256xbf16>
    %c0_107 = arith.constant 0 : index
    %c3584 = arith.constant 3584 : index
    %107 = vector.load %arg16[%c0_107, %c3584] : memref<8x4096xbf16, #tpu.memory_space<vmem>>, vector<8x256xbf16>
    tpu.vector_store %arg16[%c0_107, %c3584], %106 {strides = array<i32>} : memref<8x4096xbf16, #tpu.memory_space<vmem>>, vector<8x256xbf16>,
    %108 = vector.extract_strided_slice %62 {offsets = [15, 0, 0], sizes = [1, 8, 256], strides = [1, 1, 1]} : vector<16x8x256xbf16> to vector<1x8x256xbf16>
    %109 = vector.shape_cast %108 : vector<1x8x256xbf16> to vector<8x256xbf16>
    %c0_108 = arith.constant 0 : index
    %c3840 = arith.constant 3840 : index
    %110 = vector.load %arg16[%c0_108, %c3840] : memref<8x4096xbf16, #tpu.memory_space<vmem>>, vector<8x256xbf16>
    tpu.vector_store %arg16[%c0_108, %c3840], %109 {strides = array<i32>} : memref<8x4096xbf16, #tpu.memory_space<vmem>>, vector<8x256xbf16>,
    %c0_109 = arith.constant 0 : index
    %c0_110 = arith.constant 0 : index
    %111 = vector.load %arg16[%c0_109, %c0_110] : memref<8x4096xbf16, #tpu.memory_space<vmem>>, vector<8x4096xbf16>
    %c0_111 = arith.constant 0 : index
    %c0_112 = arith.constant 0 : index
    %112 = vector.load %arg6[%c0_111, %c0_112] : memref<4096x256xbf16, #tpu.memory_space<vmem>>, vector<4096x256xbf16>
    %cst_113 = arith.constant dense<0.000000e+00> : vector<8x256xf32>
    %113 = tpu.matmul %111, %112, %cst_113 {dimension_numbers = #tpu.dot_dimension_numbers<[1], [0], [0], [1], [0, 0, 1, 1], [], []>} : vector<8x4096xbf16>, vector<4096x256xbf16>, vector<8x256xf32> -> vector<8x256xf32>
    %c0_114 = arith.constant 0 : index
    %c0_115 = arith.constant 0 : index
    %114 = vector.load %arg7[%c0_114, %c0_115] : memref<1x256xf32, #tpu.memory_space<vmem>>, vector<1x256xf32>
    %115 = vector.broadcast %114 : vector<1x256xf32> to vector<8x256xf32>
    %116 = arith.addf %113, %115 : vector<8x256xf32>
    %cst_116 = arith.constant 0.000000e+00 : f32
    %117 = vector.broadcast %cst_116 : f32 to vector<8x256xf32>
    %118 = arith.maximumf %116, %117 : vector<8x256xf32>
    %119 = arith.truncf %118 : vector<8x256xf32> to vector<8x256xbf16>
    %c0_117 = arith.constant 0 : index
    %c0_118 = arith.constant 0 : index
    %120 = vector.load %arg8[%c0_117, %c0_118] : memref<256x64xbf16, #tpu.memory_space<vmem>>, vector<256x64xbf16>
    %cst_119 = arith.constant dense<0.000000e+00> : vector<8x64xf32>
    %121 = tpu.matmul %119, %120, %cst_119 {dimension_numbers = #tpu.dot_dimension_numbers<[1], [0], [0], [1], [0, 0, 1, 1], [], []>} : vector<8x256xbf16>, vector<256x64xbf16>, vector<8x64xf32> -> vector<8x64xf32>
    %c0_120 = arith.constant 0 : index
    %c0_121 = arith.constant 0 : index
    %122 = vector.load %arg9[%c0_120, %c0_121] : memref<1x64xf32, #tpu.memory_space<vmem>>, vector<1x64xf32>
    %123 = vector.broadcast %122 : vector<1x64xf32> to vector<8x64xf32>
    %124 = arith.addf %121, %123 : vector<8x64xf32>
    %cst_122 = arith.constant 0.000000e+00 : f32
    %125 = vector.broadcast %cst_122 : f32 to vector<8x64xf32>
    %126 = arith.maximumf %124, %125 : vector<8x64xf32>
    %127 = arith.truncf %126 : vector<8x64xf32> to vector<8x64xbf16>
    %c0_123 = arith.constant 0 : index
    %c0_124 = arith.constant 0 : index
    %128 = vector.load %arg10[%c0_123, %c0_124] : memref<64x128xbf16, #tpu.memory_space<vmem>>, vector<64x128xbf16>
    %cst_125 = arith.constant dense<0.000000e+00> : vector<8x128xf32>
    %129 = tpu.matmul %127, %128, %cst_125 {dimension_numbers = #tpu.dot_dimension_numbers<[1], [0], [0], [1], [0, 0, 1, 1], [], []>} : vector<8x64xbf16>, vector<64x128xbf16>, vector<8x128xf32> -> vector<8x128xf32>
    %c0_126 = arith.constant 0 : index
    %c0_127 = arith.constant 0 : index
    %130 = vector.load %arg11[%c0_126, %c0_127] : memref<1x128xf32, #tpu.memory_space<vmem>>, vector<1x128xf32>
    %131 = vector.broadcast %130 : vector<1x128xf32> to vector<8x128xf32>
    %132 = arith.addf %129, %131 : vector<8x128xf32>
    %c0_128 = arith.constant 0 : index
    %c0_129 = arith.constant 0 : index
    %133 = vector.load %arg12[%c0_128, %c0_129] : memref<8x128xf32, #tpu.memory_space<vmem>>, vector<8x128xf32>
    %cst_130 = arith.constant 0.000000e+00 : f32
    %134 = vector.broadcast %cst_130 : f32 to vector<8x128xf32>
    %135 = arith.cmpf oeq, %133, %134 : vector<8x128xf32>
    %cst_131 = arith.constant 0xFF800000 : f32
    %136 = vector.broadcast %cst_131 : f32 to vector<8x128xf32>
    %137 = arith.select %135, %136, %132 : vector<8x128xi1>, vector<8x128xf32>
    %cst_132 = arith.constant dense<0xFF800000> : vector<8xf32>
    %138 = vector.multi_reduction <maximumf>, %137, %cst_132 [1] : vector<8x128xf32> to vector<8xf32>
    %139 = vector.shape_cast %138 : vector<8xf32> to vector<8x1xf32>
    %140 = vector.broadcast %139 : vector<8x1xf32> to vector<8x128xf32>
    %141 = arith.subf %137, %140 : vector<8x128xf32>
    %142 = math.exp %141 : vector<8x128xf32>
    %cst_133 = arith.constant dense<0.000000e+00> : vector<8xf32>
    %143 = vector.multi_reduction <add>, %142, %cst_133 [1] : vector<8x128xf32> to vector<8xf32>
    %144 = vector.shape_cast %143 : vector<8xf32> to vector<8x1xf32>
    %145 = math.log %144 : vector<8x1xf32>
    %146 = vector.broadcast %145 : vector<8x1xf32> to vector<8x128xf32>
    %147 = arith.subf %141, %146 : vector<8x128xf32>
    %c0_134 = arith.constant 0 : index
    %c0_135 = arith.constant 0 : index
    %148 = vector.load %arg13[%c0_134, %c0_135] : memref<8x128xf32, #tpu.memory_space<vmem>>, vector<8x128xf32>
    tpu.vector_store %arg13[%c0_134, %c0_135], %147 {strides = array<i32>} : memref<8x128xf32, #tpu.memory_space<vmem>>, vector<8x128xf32>,
    return
  }
  func.func @transform_0(%arg0: i32) -> (i32, i32, i32) {
    %c0_i32 = arith.constant 0 : i32
    %c0_i32_0 = arith.constant 0 : i32
    %c0_i32_1 = arith.constant 0 : i32
    return %c0_i32, %arg0, %c0_i32_0 : i32, i32, i32
  }
  func.func @transform_1(%arg0: i32) -> (i32, i32) {
    %c0_i32 = arith.constant 0 : i32
    %c0_i32_0 = arith.constant 0 : i32
    %c0_i32_1 = arith.constant 0 : i32
    return %c0_i32, %c0_i32_0 : i32, i32
  }
  func.func @transform_2(%arg0: i32) -> (i32, i32) {
    %c0_i32 = arith.constant 0 : i32
    %c0_i32_0 = arith.constant 0 : i32
    %c0_i32_1 = arith.constant 0 : i32
    return %c0_i32, %c0_i32_0 : i32, i32
  }
  func.func @transform_3(%arg0: i32) -> (i32, i32) {
    %c0_i32 = arith.constant 0 : i32
    %c0_i32_0 = arith.constant 0 : i32
    %c0_i32_1 = arith.constant 0 : i32
    return %c0_i32, %c0_i32_0 : i32, i32
  }
  func.func @transform_4(%arg0: i32) -> (i32, i32, i32) {
    %c0_i32 = arith.constant 0 : i32
    %c0_i32_0 = arith.constant 0 : i32
    %c0_i32_1 = arith.constant 0 : i32
    %c0_i32_2 = arith.constant 0 : i32
    return %c0_i32, %c0_i32_0, %c0_i32_1 : i32, i32, i32
  }
  func.func @transform_5(%arg0: i32) -> (i32, i32) {
    %c0_i32 = arith.constant 0 : i32
    %c0_i32_0 = arith.constant 0 : i32
    %c0_i32_1 = arith.constant 0 : i32
    return %c0_i32, %c0_i32_0 : i32, i32
  }
  func.func @transform_6(%arg0: i32) -> (i32, i32) {
    %c0_i32 = arith.constant 0 : i32
    %c0_i32_0 = arith.constant 0 : i32
    %c0_i32_1 = arith.constant 0 : i32
    return %c0_i32, %c0_i32_0 : i32, i32
  }
  func.func @transform_7(%arg0: i32) -> (i32, i32) {
    %c0_i32 = arith.constant 0 : i32
    %c0_i32_0 = arith.constant 0 : i32
    %c0_i32_1 = arith.constant 0 : i32
    return %c0_i32, %c0_i32_0 : i32, i32
  }
  func.func @transform_8(%arg0: i32) -> (i32, i32) {
    %c0_i32 = arith.constant 0 : i32
    %c0_i32_0 = arith.constant 0 : i32
    %c0_i32_1 = arith.constant 0 : i32
    return %c0_i32, %c0_i32_0 : i32, i32
  }
  func.func @transform_9(%arg0: i32) -> (i32, i32) {
    %c0_i32 = arith.constant 0 : i32
    %c0_i32_0 = arith.constant 0 : i32
    %c0_i32_1 = arith.constant 0 : i32
    return %c0_i32, %c0_i32_0 : i32, i32
  }
  func.func @transform_10(%arg0: i32) -> (i32, i32) {
    %c0_i32 = arith.constant 0 : i32
    %c0_i32_0 = arith.constant 0 : i32
    %c0_i32_1 = arith.constant 0 : i32
    return %c0_i32, %c0_i32_0 : i32, i32
  }
  func.func @transform_11(%arg0: i32) -> (i32, i32) {
    %c0_i32 = arith.constant 0 : i32
    %c0_i32_0 = arith.constant 0 : i32
    return %arg0, %c0_i32 : i32, i32
  }
  func.func @transform_12(%arg0: i32) -> (i32, i32) {
    %c0_i32 = arith.constant 0 : i32
    %c0_i32_0 = arith.constant 0 : i32
    return %arg0, %c0_i32 : i32, i32
  }
}

</mosaic_0001>

<bundles_post_ra>
// kernel: tpu_custom_call.1
= control target key start
LH: loop header
LB: loop body
LE: loop exit
PB: predicated region body
PF: predicated region fallthrough
CT: control target
= control target key end

     0   :  { %17 = vsyncpa [#allocation6], 0  ;;  %s16693_s0 = inlined_call_operand.vmem [shape: f32[16,8,9], index: 0, kind: input, shape index: {}]   ;;  %s16694_s1 = inlined_call_operand.hbm [shape: f32[9,256], index: 1, kind: input, shape index: {}]   ;;  %s16695_s2 = inlined_call_operand.hbm [shape: f32[1,256], index: 2, kind: input, shape index: {}]   ;;  %s16696_s3 = inlined_call_operand.hbm [shape: bf16[2304,256], index: 3, kind: input, shape index: {}]   ;;  %s16697_s4 = inlined_call_operand.hbm [shape: f32[16,1,256], index: 4, kind: input, shape index: {}]   ;;  %s16698_s5 = inlined_call_operand.hbm [shape: bf16[4096,256], index: 5, kind: input, shape index: {}]   ;;  %s16699_s6 = inlined_call_operand.hbm [shape: f32[1,256], index: 6, kind: input, shape index: {}]   ;;  %s16700_s7 = inlined_call_operand.vmem [shape: bf16[256,64], index: 7, kind: input, shape index: {}]   ;;  %s16701_s8 = inlined_call_operand.hbm [shape: f32[1,64], index: 8, kind: input, shape index: {}]   ;;  %s16702_s9 = inlined_call_operand.hbm [shape: bf16[64,128], index: 9, kind: input, shape index: {}]   ;;  %s16703_s10 = inlined_call_operand.hbm [shape: f32[1,128], index: 10, kind: input, shape index: {}]   ;;  %s16704_s11 = inlined_call_operand.hbm [shape: f32[8,128], index: 11, kind: input, shape index: {}]   ;;  %s16705_s12 = inlined_call_operand.hbm [shape: f32[8,128], index: 12, kind: output, shape index: {}]  }
   0x1   :  { %18 = vsyncpa [#allocation9], 0 }
   0x2   :  { %19 = vsyncpa [#allocation12], 0 }
   0x3   :  { %20 = vsyncpa [#allocation15], 0 }
   0x4   :  { %21 = vsyncpa [#allocation18], 0 }
   0x5   :  { %22 = vsyncpa [#allocation21], 0  ;;  %s44_s23 = sshll.u32 %s16695_s2, 4  ;;  %s45_s23 = int_to_ptr.hbm [resolvable:$true] %s44_s23 }
   0x6   :  { %23 = vsyncpa [#allocation7], 0  ;;  %s14904_s24 = smov [#allocation8]   ;;  %s67_s28 = sshll.u32 %s16697_s4, 4  ;;  %s68_s28 = int_to_ptr.hbm [resolvable:$true] %s67_s28 }
   0x7   :  { %s46_s25 = sshll.u32 %s14904_s24, 4  ;;  %s14905_s29 = smov [#allocation11]   ;;  %s47_s25 = int_to_ptr.vmem [resolvable:$true] %s46_s25 }
   0x8   :  { %49 = dma.hbm_to_vmem [thread:$0]  %s45_s23, 32, %s47_s25, [#allocation9]  }
   0x9   :  { %s69_s30 = sshll.u32 %s14905_s29, 4  ;;  %s14906_s13 = smov 32   ;;  %s70_s30 = int_to_ptr.vmem [resolvable:$true] %s69_s30 }
   0xa   :  { %s14907_s14 = smov 2   ;;  %s94_s2 = sshll.u32 %s16699_s6, 4  ;;  %s95_s2 = int_to_ptr.hbm [resolvable:$true] %s94_s2 }
   0xb   :  { %75 = dma.hbm_to_vmem [thread:$0]  %s68_s28, 512, %s70_s30, [#allocation12], %s14906_s13, %s14906_s13, %s14907_s14  }
   0xc   :  { %s14908_s17 = smov [#allocation14]   ;;  %s117_s4 = sshll.u32 %s16702_s9, 4  ;;  %s118_s4 = int_to_ptr.hbm [resolvable:$true] %s117_s4 }
   0xd   :  { %s96_s18 = sshll.u32 %s14908_s17, 4  ;;  %s14909_s21 = smov [#allocation17]   ;;  %s97_s18 = int_to_ptr.vmem [resolvable:$true] %s96_s18 }
   0xe   :  { %99 = dma.hbm_to_vmem [thread:$0]  %s95_s2, 32, %s97_s18, [#allocation15]  }
   0xf   :  { %s119_s22 = sshll.u32 %s14909_s21, 4  ;;  %s14910_s23 = smov 64   ;;  %s120_s22 = int_to_ptr.vmem [resolvable:$true] %s119_s22 }
  0x10   :  { %s14911_s24 = smov 4   ;;  %s30_s6 = sshll.u32 %s16694_s1, 4  ;;  %s31_s6 = int_to_ptr.hbm [resolvable:$true] %s30_s6 }
  0x11   :  { %125 = dma.hbm_to_vmem [thread:$0]  %s118_s4, 512, %s120_s22, [#allocation18], %s14910_s23, %s14910_s23, %s14911_s24  }
  0x12   :  { %s14912_s27 = smov [#allocation5]   ;;  %s54_s9 = sshll.u32 %s16696_s3, 4  ;;  %s55_s9 = int_to_ptr.hbm [resolvable:$true] %s54_s9 }
  0x13   :  { %s32_s28 = sshll.u32 %s14912_s27, 4  ;;  %s14913_s13 = smov 256   ;;  %s33_s28 = int_to_ptr.vmem [resolvable:$true] %s32_s28 }
  0x14   :  { %s14914_s14 = smov 16   ;;  %s14915_s15 = smov [#allocation10]  }
  0x15   :  { %38 = dma.hbm_to_vmem [thread:$0]  %s31_s6, 512, %s33_s28, [#allocation6], %s14913_s13, %s14913_s13, %s14914_s14  }
  0x16   :  { %s56_s16 = sshll.u32 %s14915_s15, 4  ;;  %s14916_s2 = smov 128   ;;  %s57_s16 = int_to_ptr.vmem [resolvable:$true] %s56_s16 }
  0x17   :  { %s14917_s17 = smov 8   ;;  %s80_s19 = sshll.u32 %s16698_s5, 4  ;;  %s81_s19 = int_to_ptr.hbm [resolvable:$true] %s80_s19 }
  0x18   :  { %62 = dma.hbm_to_vmem [thread:$0]  %s55_s9, 36864, %s57_s16, [#allocation9], %s14916_s2, %s14916_s2, %s14917_s17  }
  0x19   :  { %s14918_s20 = smov [#allocation13]   ;;  %s107_s22 = sshll.u32 %s16701_s8, 4  ;;  %s108_s22 = int_to_ptr.hbm [resolvable:$true] %s107_s22 }
  0x1a   :  { %s82_s4 = sshll.u32 %s14918_s20, 4  ;;  %s14919_s23 = smov [#allocation16]   ;;  %s83_s4 = int_to_ptr.vmem [resolvable:$true] %s82_s4 }
  0x1b   :  { %88 = dma.hbm_to_vmem [thread:$0]  %s81_s19, 65536, %s83_s4, [#allocation12], %s14916_s2, %s14916_s2, %s14917_s17  }
  0x1c   :  { %s109_s24 = sshll.u32 %s14919_s23, 4  ;;  %s131_s6 = sshll.u32 %s16703_s10, 4  ;;  %s110_s24 = int_to_ptr.vmem [resolvable:$true] %s109_s24  ;;  %s132_s6 = int_to_ptr.hbm [resolvable:$true] %s131_s6 }
  0x1d   :  { %112 = dma.hbm_to_vmem [thread:$0]  %s108_s22, 16, %s110_s24, [#allocation15]  }
  0x1e   :  { %s142_s28 = sshll.u32 %s16704_s11, 4  ;;  %s14920_s29 = smov [#allocation19]   ;;  %s143_s28 = int_to_ptr.hbm [resolvable:$true] %s142_s28 }
  0x1f   :  { %s133_s30 = sshll.u32 %s14920_s29, 4  ;;  %s14921_s8 = smov [#allocation20]   ;;  %s134_s30 = int_to_ptr.vmem [resolvable:$true] %s133_s30 }
  0x20   :  { %136 = dma.hbm_to_vmem [thread:$0]  %s132_s6, 16, %s134_s30, [#allocation18]  }
  0x21   :  { %s144_s9 = sshll.u32 %s14921_s8, 4  ;;  %s145_s9 = int_to_ptr.vmem [resolvable:$true] %s144_s9 }
  0x22   :  { %147 = dma.hbm_to_vmem [thread:$0]  %s143_s28, 128, %s145_s9, [#allocation21]  }
  0x23   :  { %14890 = dma.done.wait [#allocation6], 512  }
  0x24   :  { %14891 = vsyncadd [#allocation6], 4294966784 }
  0x25   :  { %14892 = dma.done.wait [#allocation9], 36896  }
  0x26   :  { %14893 = vsyncadd [#allocation9], 4294930400 }
  0x27   :  { %14894 = dma.done.wait [#allocation12], 66048  }
  0x28   :  { %14895 = vsyncadd [#allocation12], 4294901248 }
  0x29   :  { %14896 = dma.done.wait [#allocation15], 48  }
  0x2a   :  { %14897 = vsyncadd [#allocation15], 4294967248 }
  0x2b   :  { %14898 = dma.done.wait [#allocation18], 528  }
  0x2c   :  { %14899 = vsyncadd [#allocation18], 4294966768 }
  0x2d   :  { %14900 = dma.done.wait [#allocation21], 128  }
  0x2e   :  { %14901 = vsyncadd [#allocation21], 4294967168  ;;  %v14922_v0 = vmov 0.6931472   ;;  %vm351_vm0 = vcmask 1040384   ;;  %v292_v4 = vld [vmem:[#allocation5] sm:$0xff] }
  0x2f   :  { %14587 = vrcp.f32 %v14922_v0  ;;  %v294_v2 = vld [vmem:[#allocation5 + $0x10] sm:$0x1]  ;;  %v295_v3 = vld [vmem:[#allocation5 + $0x18] sm:$0x1]  ;;  %v293_v5 = vld [vmem:[#allocation5 + $0x8] sm:$0xff]  ;;  %vm302_vm2 = vcmask 72704  }
  0x30   :  { %9709 = vmatpush.msk.msra.mxu0 %vm351_vm0, %v294_v2  ;;  %9726 = vmatpush.msk.msra.mxu1 %vm351_vm0, %v295_v3  ;;  %v189_v6 = vld [vmem:[%s16693_s0] sm:$0xff]  ;;  %v190_v8 = vld [vmem:[%s16693_s0 + $0x8] sm:$0xff]  ;;  %v191_v13 = vld [vmem:[%s16693_s0 + $0x10] sm:$0xff]  ;;  %vm9656_vm3 = vcmask 523264   ;;  %s9694_s1 = sshll.u32 %s16705_s12, 4  ;;  %s9695_s1 = int_to_ptr.hbm [resolvable:$true] %s9694_s1 }
  0x31   :  { %v205_v9 = vadd.f32 1.0, %v189_v6  ;;  %v206_v10 = vadd.f32 1.0, %v190_v8  ;;  %v207_v15 = vadd.f32 1.0, %v191_v13  ;;  %v192_v22 = vld [vmem:[%s16693_s0 + $0x18] sm:$0xff]  ;;  %v193_v29 = vld [vmem:[%s16693_s0 + $0x20] sm:$0xff]  ;;  %v194_v35 = vld [vmem:[%s16693_s0 + $0x28] sm:$0xff] }
  0x32   :  { %373 = vmatpush.msra.mxu0 %v292_v4  ;;  %438 = vmatpush.msra.mxu1 %v293_v5  ;;  %v208_v24 = vadd.f32 1.0, %v192_v22  ;;  %v209_v30 = vadd.f32 1.0, %v193_v29  ;;  %v210_v36 = vadd.f32 1.0, %v194_v35  ;;  %v195_v41 = vld [vmem:[%s16693_s0 + $0x30] sm:$0xff]  ;;  %v196_v47 = vld [vmem:[%s16693_s0 + $0x38] sm:$0xff]  ;;  %v197_v53 = vld [vmem:[%s16693_s0 + $0x40] sm:$0xff] }
  0x33   :  { %14589 = vlog2.f32 %v205_v9  ;;  %v211_v42 = vadd.f32 1.0, %v195_v41  ;;  %v212_v48 = vadd.f32 1.0, %v196_v47  ;;  %v213_v54 = vadd.f32 1.0, %v197_v53  ;;  %v10377_v56 = vld [vmem:[#allocation10 + $0x70] sm:$0xf] }
  0x34   :  { %14591 = vlog2.f32 %v206_v10  ;;  %v13759_v57 = vld [vmem:[#allocation10 + $0x74] sm:$0xf0]  ;;  %v10441_v58 = vld [vmem:[#allocation10 + $0xf0] sm:$0xf]  ;;  %v10369_v5 = vld [vmem:[#allocation10 + $0x60] sm:$0xf] }
  0x35   :  { %v14588_v1 = vpop.eup %14587  ;;  %14593 = vlog2.f32 %v207_v15  ;;  %v10378_v60 = vor.u32 %v13759_v57, %v10377_v56  ;;  %v13775_v61 = vld [vmem:[#allocation10 + $0xf4] sm:$0xf0]  ;;  %v199_v3 = vld [vmem:[%s16693_s0 + $0x50] sm:$0xff]  ;;  %v13757_v6 = vld [vmem:[#allocation10 + $0x64] sm:$0xf0] }
  0x36   :  { %v254_v7 = vmul.f32 0.6931472, %v14588_v1  ;;  %vm258_vm1 = vweird.f32 %v14588_v1  ;;  %14595 = vlog2.f32 %v208_v24  ;;  %v10442_v62 = vor.u32 %v13775_v61, %v10441_v58  ;;  %v13773_v10 = vld [vmem:[#allocation10 + $0xe4] sm:$0xf0]  ;;  %v13771_v15 = vld [vmem:[#allocation10 + $0xd4] sm:$0xf0] }
  0x37   :  { %14597 = vlog2.f32 %v209_v30  ;;  %3462 = vmatpush.bf16.msra.mxu2 %v10378_v60  ;;  %v10370_v9 = vor.u32 %v13757_v6, %v10369_v5  ;;  %v13753_v24 = vld [vmem:[#allocation10 + $0x44] sm:$0xf0]  ;;  %v10345_v29 = vld [vmem:[#allocation10 + $0x30] sm:$0xf]  ;;  %v13751_v30 = vld [vmem:[#allocation10 + $0x34] sm:$0xf0] }
  0x38   :  { %v255_v11 = vsub.f32 1.0, %v254_v7  ;;  %14599 = vlog2.f32 %v210_v36  ;;  %3511 = vmatpush.bf16.msra.mxu3 %v10442_v62  ;;  %v10433_v7 = vld [vmem:[#allocation10 + $0xe0] sm:$0xf]  ;;  %v10346_v35 = vor.u32 %v13751_v30, %v10345_v29  ;;  %v10505_v41 = vld [vmem:[#allocation10 + $0x170] sm:$0xf]  ;;  %v14923_v6 = vmov 0  }
  0x39   :  { %v14590_v16 = vpop.eup %14589  ;;  %14601 = vlog2.f32 %v211_v42  ;;  %v10434_v13 = vor.u32 %v13773_v10, %v10433_v7  ;;  %v13791_v42 = vld [vmem:[#allocation10 + $0x174] sm:$0xf0]  ;;  %v13765_v53 = vld [vmem:[#allocation10 + $0xa4] sm:$0xf0]  ;;  %v10561_v57 = vld [vmem:[#allocation10 + $0x1e0] sm:$0xf] }
  0x3a   :  { %v256_v12 = vmul.f32 %v14588_v1, %v255_v11  ;;  %v14592_v18 = vpop.eup %14591  ;;  %v222_v19 = vmul.f32 0.6931472, %v14590_v16  ;;  %14603 = vlog2.f32 %v212_v48  ;;  %v10361_v11 = vld [vmem:[#allocation10 + $0x50] sm:$0xf]  ;;  %v215_v16 = vadd.f32 1.0, %v199_v3  ;;  %592 = vst [vmem:[#allocation3] sm:$0xff] %v14923_v6 }
  0x3b   :  { %v224_v21 = vmul.f32 0.6931472, %v14592_v18  ;;  %v14594_v26 = vpop.eup %14593  ;;  %14605 = vlog2.f32 %v213_v54  ;;  %3463 = vmatpush.bf16.msra.mxu2 %v10370_v9  ;;  %v10497_v54 = vld [vmem:[#allocation10 + $0x160] sm:$0xf]  ;;  %v13789_v56 = vld [vmem:[#allocation10 + $0x164] sm:$0xf0] }
  0x3c   :  { %v257_v14 = vadd.f32 %v14588_v1, %v256_v12  ;;  %v226_v28 = vmul.f32 0.6931472, %v14594_v26  ;;  %v14596_v32 = vpop.eup %14595  ;;  %v13755_v12 = vld [vmem:[#allocation10 + $0x54] sm:$0xf0]  ;;  %3512 = vmatpush.bf16.msra.mxu3 %v10434_v13  ;;  %v13805_v58 = vld [vmem:[#allocation10 + $0x1e4] sm:$0xf0] }
  0x3d   :  { %v228_v34 = vmul.f32 0.6931472, %v14596_v32  ;;  %v14598_v38 = vpop.eup %14597  ;;  %v10362_v18 = vor.u32 %v13755_v12, %v10361_v11  ;;  %v10562_v60 = vor.u32 %v13805_v58, %v10561_v57  ;;  %v10329_v61 = vld [vmem:[#allocation10 + $0x10] sm:$0xf]  ;;  %v13747_v62 = vld [vmem:[#allocation10 + $0x14] sm:$0xf0] }
  0x3e   :  { %v15029_v17 = vsel %vm258_vm1, %v14588_v1, %v257_v14  ;;  %v230_v40 = vmul.f32 0.6931472, %v14598_v38  ;;  %v14600_v44 = vpop.eup %14599  ;;  %v198_v1 = vld [vmem:[%s16693_s0 + $0x48] sm:$0xff]  ;;  %v10425_v14 = vld [vmem:[#allocation10 + $0xd0] sm:$0xf]  ;;  %v10330_v3 = vor.u32 %v13747_v62, %v10329_v61  ;;  %593 = vst [vmem:[#allocation3 + $0x48] sm:$0xff] %v14923_v6 }
  0x3f   :  { %v260_v20 = vmul.f32 %v15029_v17, %v222_v19  ;;  %v261_v25 = vmul.f32 %v15029_v17, %v224_v21  ;;  %v262_v31 = vmul.f32 %v15029_v17, %v226_v28  ;;  %v263_v37 = vmul.f32 %v15029_v17, %v228_v34  ;;  %v14602_v50 = vpop.eup %14601  ;;  %3464 = vmatpush.bf16.msra.mxu2 %v10362_v18  ;;  %v13769_v28 = vld [vmem:[#allocation10 + $0xc4] sm:$0xf0]  ;;  %v13767_v34 = vld [vmem:[#allocation10 + $0xb4] sm:$0xf0]  ;;  %v10489_v7 = vld [vmem:[#allocation10 + $0x150] sm:$0xf] }
  0x40   :  { %v264_v43 = vmul.f32 %v15029_v17, %v230_v40  ;;  %v232_v46 = vmul.f32 0.6931472, %v14600_v44  ;;  %v234_v52 = vmul.f32 0.6931472, %v14602_v50  ;;  %v14604_v59 = vpop.eup %14603  ;;  %v214_v2 = vadd.f32 1.0, %v198_v1  ;;  %594 = vst [vmem:[#allocation3 + $0x90] sm:$0xff] %v14923_v6 }
  0x41   :  { %v276_v23 = vmul.f32 0.09090909, %v260_v20  ;;  %v277_v27 = vmul.f32 0.09090909, %v261_v25  ;;  %v278_v33 = vmul.f32 0.09090909, %v262_v31  ;;  %v14606_v8 = vpop.eup %14605  ;;  %v10426_v21 = vor.u32 %v13771_v15, %v10425_v14 }
  0x42   :  { %v279_v39 = vmul.f32 0.09090909, %v263_v37  ;;  %v280_v45 = vmul.f32 0.09090909, %v264_v43  ;;  %v265_v49 = vmul.f32 %v15029_v17, %v232_v46  ;;  %v266_v55 = vmul.f32 %v15029_v17, %v234_v52  ;;  %v10417_v25 = vld [vmem:[#allocation10 + $0xc0] sm:$0xf] }
  0x43   :  { %9710 = vmatmul.msk.f32.vlgmr.msra.gmra.mxu0 %vm302_vm2, %v276_v23  ;;  %9727 = vmatmul.msk.f32.vlgmr.msra.gmra.mxu1 %vm302_vm2, %v276_v23  ;;  %v236_v0 = vmul.f32 0.6931472, %v14604_v59  ;;  %14607 = vlog2.f32 %v214_v2  ;;  %v238_v20 = vmul.f32 0.6931472, %v14606_v8  ;;  %v10353_v23 = vld [vmem:[#allocation10 + $0x40] sm:$0xf]  ;;  %v10418_v32 = vor.u32 %v13769_v28, %v10417_v25 }
  0x44   :  { %v281_v51 = vmul.f32 0.09090909, %v265_v49  ;;  %v282_v63 = vmul.f32 0.09090909, %v266_v55  ;;  %14609 = vlog2.f32 %v215_v16  ;;  %3513 = vmatpush.bf16.msra.mxu3 %v10426_v21  ;;  %v200_v31 = vld [vmem:[%s16693_s0 + $0x58] sm:$0xff]  ;;  %v10506_v44 = vor.u32 %v13791_v42, %v10505_v41  ;;  %v201_v2 = vld [vmem:[%s16693_s0 + $0x60] sm:$0xff] }
  0x45   :  { %v267_v4 = vmul.f32 %v15029_v17, %v236_v0  ;;  %v268_v22 = vmul.f32 %v15029_v17, %v238_v20  ;;  %v10569_v43 = vld [vmem:[#allocation10 + $0x1f0] sm:$0xf]  ;;  %v10337_v49 = vld [vmem:[#allocation10 + $0x20] sm:$0xf]  ;;  %v13749_v50 = vld [vmem:[#allocation10 + $0x24] sm:$0xf0]  ;;  %v10498_v59 = vor.u32 %v13789_v56, %v10497_v54 }
  0x46   :  { %3560 = vmatpush.bf16.msrb.mxu0 %v10506_v44  ;;  %v10401_v52 = vld [vmem:[#allocation10 + $0xa0] sm:$0xf]  ;;  %v13787_v8 = vld [vmem:[#allocation10 + $0x154] sm:$0xf0]  ;;  %v10553_v9 = vld [vmem:[#allocation10 + $0x1d0] sm:$0xf] }
  0x47   :  { %v283_v19 = vmul.f32 0.09090909, %v267_v4  ;;  %v284_v36 = vmul.f32 0.09090909, %v268_v22  ;;  %v10402_v55 = vor.u32 %v13765_v53, %v10401_v52  ;;  %v13763_v4 = vld [vmem:[#allocation10 + $0x94] sm:$0xf0]  ;;  %v10490_v11 = vor.u32 %v13787_v8, %v10489_v7 }
  0x48   :  { %3514 = vmatpush.bf16.msra.mxu3 %v10418_v32  ;;  %v217_v10 = vadd.f32 1.0, %v201_v2  ;;  %v13803_v12 = vld [vmem:[#allocation10 + $0x1d4] sm:$0xf0]  ;;  %v10321_v16 = vld [vmem:[#allocation10] sm:$0xf]  ;;  %v202_v30 = vld [vmem:[%s16693_s0 + $0x68] sm:$0xff] }
  0x49   :  { %v14608_v26 = vpop.eup %14607  ;;  %v10554_v15 = vor.u32 %v13803_v12, %v10553_v9  ;;  %v13745_v18 = vld [vmem:[#allocation10 + $0x4] sm:$0xf0]  ;;  %v10385_v20 = vld [vmem:[#allocation10 + $0x80] sm:$0xf]  ;;  %595 = vst [vmem:[#allocation3 + $0xd8] sm:$0xff] %v14923_v6  ;;  %v203_v52 = vld [vmem:[%s16693_s0 + $0x70] sm:$0xff] }
  0x4a   :  { %v240_v37 = vmul.f32 0.6931472, %v14608_v26  ;;  %v14610_v38 = vpop.eup %14609  ;;  %3561 = vmatpush.bf16.msrb.mxu0 %v10498_v59  ;;  %v13761_v21 = vld [vmem:[#allocation10 + $0x84] sm:$0xf0]  ;;  %v10481_v22 = vld [vmem:[#allocation10 + $0x140] sm:$0xf] }
  0x4b   :  { %9711 = vmatmul.msk.f32.gmra.mxu0 %vm302_vm2, %v277_v27  ;;  %9728 = vmatmul.msk.f32.gmra.mxu1 %vm302_vm2, %v277_v27  ;;  %v10354_v27 = vor.u32 %v13753_v24, %v10353_v23  ;;  %v242_v47 = vmul.f32 0.6931472, %v14610_v38  ;;  %v10386_v23 = vor.u32 %v13761_v21, %v10385_v20  ;;  %v13785_v24 = vld [vmem:[#allocation10 + $0x144] sm:$0xf0]  ;;  %v10545_v25 = vld [vmem:[#allocation10 + $0x1c0] sm:$0xf] }
  0x4c   :  { %v269_v46 = vmul.f32 %v15029_v17, %v240_v37  ;;  %v13801_v26 = vld [vmem:[#allocation10 + $0x1c4] sm:$0xf0]  ;;  %v10482_v28 = vor.u32 %v13785_v24, %v10481_v22  ;;  %v13600_v32 = vld [vmem:[#allocation3 + $0x4] sm:$0xf]  ;;  %596 = vst [vmem:[#allocation3 + $0x120] sm:$0xff] %v14923_v6  ;;  %v219_v57 = vadd.f32 1.0, %v203_v52 }
  0x4d   :  { %3465 = vmatpush.bf16.msra.mxu2 %v10354_v27  ;;  %v270_v1 = vmul.f32 %v15029_v17, %v242_v47  ;;  %v10546_v29 = vor.u32 %v13801_v26, %v10545_v25  ;;  %600 = vst [vmem:[#allocation3 + $0x240] sm:$0xff] %v14923_v6  ;;  %v10537_v41 = vld [vmem:[#allocation10 + $0x1b0] sm:$0xf]  ;;  %v13799_v44 = vld [vmem:[#allocation10 + $0x1b4] sm:$0xf0] }
  0x4e   :  { %v285_v0 = vmul.f32 0.09090909, %v269_v46  ;;  %3562 = vmatpush.bf16.msrb.mxu0 %v10490_v11  ;;  %604 = vst [vmem:[#allocation3 + $0x360] sm:$0xff] %v14923_v6  ;;  %v10465_v46 = vld [vmem:[#allocation10 + $0x120] sm:$0xf]  ;;  %v204_v2 = vld [vmem:[%s16693_s0 + $0x78] sm:$0xff] }
  0x4f   :  { %v286_v14 = vmul.f32 0.09090909, %v270_v1  ;;  %625 = vst [vmem:[#allocation3 + $0x8] sm:$0xff] %v14923_v6  ;;  %v13781_v47 = vld [vmem:[#allocation10 + $0x124] sm:$0xf0]  ;;  %v220_v9 = vadd.f32 1.0, %v204_v2 }
  0x50   :  { %626 = vst [vmem:[#allocation3 + $0x50] sm:$0xff] %v14923_v6  ;;  %v13797_v53 = vld [vmem:[#allocation10 + $0x1a4] sm:$0xf0]  ;;  %v13779_v56 = vld [vmem:[#allocation10 + $0x114] sm:$0xf0] }
  0x51   :  { %3466 = vmatpush.bf16.msra.mxu2 %v10346_v35  ;;  %627 = vst [vmem:[#allocation3 + $0x98] sm:$0xff] %v14923_v6  ;;  %v10521_v59 = vld [vmem:[#allocation10 + $0x190] sm:$0xf]  ;;  %v10513_v7 = vld [vmem:[#allocation10 + $0x180] sm:$0xf] }
  0x52   :  { %3563 = vmatpush.bf16.msrb.mxu0 %v10482_v28  ;;  %628 = vst [vmem:[#allocation3 + $0xe0] sm:$0xff] %v14923_v6  ;;  %v13793_v8 = vld [vmem:[#allocation10 + $0x184] sm:$0xf0]  ;;  %v9817_v11 = vld [vmem:[#allocation3 + $0x90] sm:$0xf] }
  0x53   :  { %9712 = vmatmul.msk.f32.gmra.mxu0 %vm302_vm2, %v278_v33  ;;  %9729 = vmatmul.msk.f32.gmra.mxu1 %vm302_vm2, %v278_v33  ;;  %v10409_v33 = vld [vmem:[#allocation10 + $0xb0] sm:$0xf]  ;;  %658 = vst [vmem:[#allocation3 + $0x10] sm:$0xff] %v14923_v6  ;;  %v13627_v12 = vld [vmem:[#allocation3 + $0xd4] sm:$0xf0] }
  0x54   :  { %v10410_v40 = vor.u32 %v13767_v34, %v10409_v33  ;;  %v13609_v33 = vld [vmem:[#allocation3 + $0x44] sm:$0xf0]  ;;  %v9747_v34 = vld [vmem:[#allocation3 + $0x48] sm:$0xf0]  ;;  %659 = vst [vmem:[#allocation3 + $0x58] sm:$0xff] %v14923_v6 }
  0x55   :  { %v15105_v38 = vor.u32 %v13600_v32, %v9747_v34  ;;  %660 = vst [vmem:[#allocation3 + $0xa0] sm:$0xff] %v14923_v6  ;;  %v296_v28 = vld [vmem:[#allocation8] sm:$0x3] }
  0x56   :  { %3515 = vmatpush.bf16.msra.mxu3 %v10410_v40  ;;  %v13783_v40 = vld [vmem:[#allocation10 + $0x134] sm:$0xf0]  ;;  %661 = vst [vmem:[#allocation3 + $0xe8] sm:$0xff] %v14923_v6 }
  0x57   :  { %665 = vst [vmem:[#allocation3 + $0x208] sm:$0xff] %v14923_v6  ;;  %v9755_v32 = vld [vmem:[#allocation3 + $0x50] sm:$0xf0] }
  0x58   :  { %669 = vst [vmem:[#allocation3 + $0x328] sm:$0xff] %v14923_v6  ;;  %v9825_v52 = vld [vmem:[#allocation3 + $0x98] sm:$0xf] }
  0x59   :  { %673 = vst [vmem:[#allocation3 + $0x448] sm:$0xff] %v14923_v6 }
  0x5a   :  { %3516 = vmatpush.bf16.msra.mxu3 %v10402_v55  ;;  %v10457_v55 = vld [vmem:[#allocation10 + $0x110] sm:$0xf]  ;;  %690 = vst [vmem:[#allocation3 + $0x18] sm:$0xff] %v14923_v6 }
  0x5b   :  { %9713 = vmatmul.msk.f32.gmra.mxu0 %vm302_vm2, %v279_v39  ;;  %9730 = vmatmul.msk.f32.gmra.mxu1 %vm302_vm2, %v279_v39  ;;  %v216_v39 = vadd.f32 1.0, %v200_v31  ;;  %v9745_v31 = vld [vmem:[#allocation3] sm:$0xf]  ;;  %v10458_v58 = vor.u32 %v13779_v56, %v10457_v55  ;;  %694 = vst [vmem:[#allocation3 + $0x138] sm:$0xff] %v14923_v6  ;;  %v9827_v55 = vld [vmem:[#allocation3 + $0xe0] sm:$0xf0] }
  0x5c   :  { %v15102_v37 = vor.u32 %v13609_v33, %v9745_v31  ;;  %698 = vst [vmem:[#allocation3 + $0x258] sm:$0xff] %v14923_v6  ;;  %v13601_v31 = vld [vmem:[#allocation3 + $0xc] sm:$0xf]  ;;  %v15174_v33 = vperm.slane %v296_v28, 0 }
  0x5d   :  { %14611 = vlog2.f32 %v216_v39  ;;  %v10473_v39 = vld [vmem:[#allocation10 + $0x130] sm:$0xf]  ;;  %702 = vst [vmem:[#allocation3 + $0x378] sm:$0xff] %v14923_v6 }
  0x5e   :  { %14613 = vlog2.f32 %v217_v10  ;;  %758 = vst [vmem:[#allocation3 + $0x100] sm:$0xff] %v14923_v6  ;;  %v10514_v10 = vor.u32 %v13793_v8, %v10513_v7 }
  0x5f   :  { %762 = vst [vmem:[#allocation3 + $0x220] sm:$0xff] %v14923_v6 }
  0x60   :  { %766 = vst [vmem:[#allocation3 + $0x340] sm:$0xff] %v14923_v6 }
  0x61   :  { %770 = vst [vmem:[#allocation3 + $0x460] sm:$0xff] %v14923_v6 }
  0x62   :  { %788 = vst [vmem:[#allocation3 + $0x30] sm:$0xff] %v14923_v6 }
  0x63   :  { %9714 = vmatmul.msk.f32.gmra.mxu0 %vm302_vm2, %v280_v45  ;;  %9731 = vmatmul.msk.f32.gmra.mxu1 %vm302_vm2, %v280_v45  ;;  %v13807_v45 = vld [vmem:[#allocation10 + $0x1f4] sm:$0xf0]  ;;  %v14612_v13 = vpop.eup %14611  ;;  %792 = vst [vmem:[#allocation3 + $0x150] sm:$0xff] %v14923_v6 }
  0x64   :  { %v10570_v48 = vor.u32 %v13807_v45, %v10569_v43  ;;  %v244_v27 = vmul.f32 0.6931472, %v14612_v13  ;;  %v14614_v42 = vpop.eup %14613  ;;  %v10474_v43 = vor.u32 %v13783_v40, %v10473_v39  ;;  %v10538_v45 = vor.u32 %v13799_v44, %v10537_v41  ;;  %796 = vst [vmem:[#allocation3 + $0x270] sm:$0xff] %v14923_v6 }
  0x65   :  { %800 = vst [vmem:[#allocation3 + $0x390] sm:$0xff] %v14923_v6 }
  0x66   :  { %3609 = vmatpush.bf16.msrb.mxu1 %v10570_v48  ;;  %v271_v35 = vmul.f32 %v15029_v17, %v244_v27  ;;  %3564 = vmatpush.bf16.msrb.mxu0 %v10474_v43  ;;  %801 = vst [vmem:[#allocation3 + $0x3d8] sm:$0xff] %v14923_v6 }
  0x67   :  { %802 = vst [vmem:[#allocation3 + $0x420] sm:$0xff] %v14923_v6 }
  0x68   :  { %v287_v48 = vmul.f32 0.09090909, %v271_v35  ;;  %803 = vst [vmem:[#allocation3 + $0x468] sm:$0xff] %v14923_v6  ;;  %v15180_v35 = vor.u32 %v13601_v31, %v9755_v32 }
  0x69   :  { %833 = vst [vmem:[#allocation3 + $0x398] sm:$0xff] %v14923_v6 }
  0x6a   :  { %3610 = vmatpush.bf16.msrb.mxu1 %v10562_v60  ;;  %v13795_v60 = vld [vmem:[#allocation10 + $0x194] sm:$0xf0]  ;;  %834 = vst [vmem:[#allocation3 + $0x3e0] sm:$0xff] %v14923_v6 }
  0x6b   :  { %9715 = vmatmul.msk.f32.gmra.mxu0 %vm302_vm2, %v281_v51  ;;  %9732 = vmatmul.msk.f32.gmra.mxu1 %vm302_vm2, %v281_v51  ;;  %v10338_v51 = vor.u32 %v13749_v50, %v10337_v49  ;;  %v10466_v49 = vor.u32 %v13781_v47, %v10465_v46  ;;  %v10529_v50 = vld [vmem:[#allocation10 + $0x1a0] sm:$0xf]  ;;  %835 = vst [vmem:[#allocation3 + $0x428] sm:$0xff] %v14923_v6 }
  0x6c   :  { %v10530_v54 = vor.u32 %v13797_v53, %v10529_v50  ;;  %836 = vst [vmem:[#allocation3 + $0x470] sm:$0xff] %v14923_v6  ;;  %v13628_v53 = vld [vmem:[#allocation3 + $0xdc] sm:$0xf0] }
  0x6d   :  { %3467 = vmatpush.bf16.msra.mxu2 %v10338_v51  ;;  %v246_v51 = vmul.f32 0.6931472, %v14614_v42  ;;  %3565 = vmatpush.bf16.msrb.mxu0 %v10466_v49  ;;  %857 = vst [vmem:[#allocation3 + $0x118] sm:$0xff] %v14923_v6 }
  0x6e   :  { %3611 = vmatpush.bf16.msrb.mxu1 %v10554_v15  ;;  %v13618_v15 = vld [vmem:[#allocation3 + $0x94] sm:$0xf]  ;;  %861 = vst [vmem:[#allocation3 + $0x238] sm:$0xff] %v14923_v6 }
  0x6f   :  { %v272_v61 = vmul.f32 %v15029_v17, %v246_v51  ;;  %865 = vst [vmem:[#allocation3 + $0x358] sm:$0xff] %v14923_v6  ;;  %v13636_v51 = vld [vmem:[#allocation3 + $0x124] sm:$0xf] }
  0x70   :  { %866 = vst [vmem:[#allocation3 + $0x3a0] sm:$0xff] %v14923_v6 }
  0x71   :  { %3468 = vmatpush.bf16.msra.mxu2 %v10330_v3  ;;  %3566 = vmatpush.bf16.msrb.mxu0 %v10458_v58  ;;  %v10449_v3 = vld [vmem:[#allocation10 + $0x100] sm:$0xf]  ;;  %867 = vst [vmem:[#allocation3 + $0x3e8] sm:$0xff] %v14923_v6 }
  0x72   :  { %3612 = vmatpush.bf16.msrb.mxu1 %v10546_v29  ;;  %868 = vst [vmem:[#allocation3 + $0x430] sm:$0xff] %v14923_v6  ;;  %v9753_v29 = vld [vmem:[#allocation3 + $0x8] sm:$0xf] }
  0x73   :  { %9716 = vmatmul.msk.f32.gmra.mxu0 %vm302_vm2, %v282_v63  ;;  %9733 = vmatmul.msk.f32.gmra.mxu1 %vm302_vm2, %v282_v63  ;;  %v10393_v63 = vld [vmem:[#allocation10 + $0x90] sm:$0xf]  ;;  %869 = vst [vmem:[#allocation3 + $0x478] sm:$0xff] %v14923_v6 }
  0x74   :  { %v10394_v5 = vor.u32 %v13763_v4, %v10393_v63  ;;  %v10522_v63 = vor.u32 %v13795_v60, %v10521_v59  ;;  %v13777_v4 = vld [vmem:[#allocation10 + $0x104] sm:$0xf0] }
  0x76   :  { %3517 = vmatpush.bf16.msra.mxu3 %v10394_v5  ;;  %3613 = vmatpush.bf16.msrb.mxu1 %v10538_v45  ;;  %v10450_v5 = vor.u32 %v13777_v4, %v10449_v3 }
  0x78   :  { %3567 = vmatpush.bf16.msrb.mxu0 %v10450_v5 }
  0x7a   :  { %3518 = vmatpush.bf16.msra.mxu3 %v10386_v23  ;;  %3614 = vmatpush.bf16.msrb.mxu1 %v10530_v54  ;;  %v13619_v54 = vld [vmem:[#allocation3 + $0x9c] sm:$0xf] }
  0x7b   :  { %9717 = vmatmul.msk.f32.gmra.mxu0 %vm302_vm2, %v283_v19  ;;  %9734 = vmatmul.msk.f32.gmra.mxu1 %vm302_vm2, %v283_v19  ;;  %v10322_v19 = vor.u32 %v13745_v18, %v10321_v16  ;;  %v9819_v16 = vld [vmem:[#allocation3 + $0xd8] sm:$0xf0] }
  0x7d   :  { %3469 = vmatpush.bf16.msra.mxu2 %v10322_v19  ;;  %3519 = vmatmul.bf16.vlgmr.msra.gmra.mxu3 %v15105_v38  ;;  %v15143_v19 = vor.u32 %v13618_v15, %v9819_v16 }
  0x7e   :  { %3615 = vmatpush.bf16.msrb.mxu1 %v10522_v63 }
  0x80   :  { %3470 = vmatmul.bf16.vlgmr.msra.gmra.mxu2 %v15102_v37 }
  0x82   :  { %3616 = vmatpush.bf16.msrb.mxu1 %v10514_v10 }
  0x83   :  { %9718 = vmatmul.msk.f32.gmra.mxu0 %vm302_vm2, %v284_v36  ;;  %9735 = vmatmul.msk.f32.gmra.mxu1 %vm302_vm2, %v284_v36  ;;  %v218_v36 = vadd.f32 1.0, %v202_v30  ;;  %v13610_v30 = vld [vmem:[#allocation3 + $0x4c] sm:$0xf0] }
  0x84   :  { %v15178_v34 = vor.u32 %v13610_v30, %v9753_v29 }
  0x85   :  { %14615 = vlog2.f32 %v218_v36 }
  0x86   :  { %14617 = vlog2.f32 %v219_v57 }
  0x87   :  { %14619 = vlog2.f32 %v220_v9 }
  0x8b   :  { %9719 = vmatmul.msk.f32.gmra.mxu0 %vm302_vm2, %v285_v0  ;;  %9736 = vmatmul.msk.f32.gmra.mxu1 %vm302_vm2, %v285_v0  ;;  %v14616_v62 = vpop.eup %14615  ;;  %v288_v0 = vmul.f32 0.09090909, %v272_v61  ;;  %v15192_v61 = vor.u32 %v13628_v53, %v9825_v52 }
  0x8c   :  { %v248_v1 = vmul.f32 0.6931472, %v14616_v62  ;;  %v14618_v18 = vpop.eup %14617  ;;  %v15194_v62 = vor.u32 %v13619_v54, %v9827_v55 }
  0x8d   :  { %3524 = vmatmul.bf16.gmra.mxu3 %v15143_v19  ;;  %v250_v21 = vmul.f32 0.6931472, %v14618_v18  ;;  %v14620_v23 = vpop.eup %14619 }
  0x8e   :  { %v273_v13 = vmul.f32 %v15029_v17, %v248_v1  ;;  %v252_v25 = vmul.f32 0.6931472, %v14620_v23 }
  0x8f   :  { %v274_v22 = vmul.f32 %v15029_v17, %v250_v21 }
  0x90   :  { %v289_v20 = vmul.f32 0.09090909, %v273_v13  ;;  %v275_v26 = vmul.f32 %v15029_v17, %v252_v25  ;;  %v15176_v17 = vperm.slane %v296_v28, 1 }
  0x91   :  { %v290_v24 = vmul.f32 0.09090909, %v274_v22 }
  0x92   :  { %v291_v27 = vmul.f32 0.09090909, %v275_v26 }
  0x93   :  { %9720 = vmatmul.msk.f32.gmra.mxu0 %vm302_vm2, %v286_v14  ;;  %9737 = vmatmul.msk.f32.gmra.mxu1 %vm302_vm2, %v286_v14  ;;  %v15140_v14 = vor.u32 %v13627_v12, %v9817_v11 }
  0x95   :  { %3475 = vmatmul.bf16.gmra.mxu2 %v15140_v14 }
  0x9b   :  { %9721 = vmatmul.msk.f32.gmra.mxu0 %vm302_vm2, %v287_v48  ;;  %9738 = vmatmul.msk.f32.gmra.mxu1 %vm302_vm2, %v287_v48  ;;  %v9889_v48 = vld [vmem:[#allocation3 + $0x120] sm:$0xf] }
  0xa3   :  { %9722 = vmatmul.msk.f32.gmra.mxu0 %vm302_vm2, %v288_v0  ;;  %9739 = vmatmul.msk.f32.gmra.mxu1 %vm302_vm2, %v288_v0 }
  0xab   :  { %9723 = vmatmul.msk.f32.gmra.mxu0 %vm302_vm2, %v289_v20  ;;  %9740 = vmatmul.msk.f32.gmra.mxu1 %vm302_vm2, %v289_v20 }
  0xb3   :  { %9724 = vmatmul.msk.f32.gmra.mxu0 %vm302_vm2, %v290_v24  ;;  %9741 = vmatmul.msk.f32.gmra.mxu1 %vm302_vm2, %v290_v24 }
  0xbb   :  { %9725 = vmatmul.msk.f32.gmra.mxu0 %vm302_vm2, %v291_v27  ;;  %9742 = vmatmul.msk.f32.gmra.mxu1 %vm302_vm2, %v291_v27 }
  0xc0   :  { %v375_v36 = vpop.f32.mrf.mxu0  ;;  %v440_v6 = vpop.f32.mrf.mxu1 }
  0xc1   :  { %v376_v39 = vadd.f32 %v375_v36, %v15174_v33  ;;  %v441_v40 = vadd.f32 %v440_v6, %v15176_v17 }
  0xc3   :  { %v488_v41 = vmax.f32 %v376_v39, 0.0  ;;  %v489_v42 = vmax.f32 %v441_v40, 0.0  ;;  %3568 = vmatmul.bf16.vlgmr.msrb.gmra.mxu0 %v15178_v34  ;;  %3617 = vmatmul.bf16.vlgmr.msrb.gmra.mxu1 %v15180_v35 }
  0xc5   :  { %v543_v43 = vpack.c.bf16 %v489_v42, %v488_v41 }
  0xc7   :  { %597 = vst [vmem:[#allocation3 + $0x168] sm:$0xff] %v543_v43 }
  0xc8   :  { %629 = vst [vmem:[#allocation3 + $0x128] sm:$0xff] %v543_v43  ;;  %v378_v44 = vpop.f32.mrf.mxu0  ;;  %v443_v45 = vpop.f32.mrf.mxu1 }
  0xc9   :  { %691 = vst [vmem:[#allocation3 + $0x60] sm:$0xff] %v543_v43  ;;  %v379_v46 = vadd.f32 %v378_v44, %v15174_v33  ;;  %v444_v47 = vadd.f32 %v443_v45, %v15176_v17 }
  0xca   :  { %722 = vst [vmem:[#allocation3 + $0x20] sm:$0xff] %v543_v43 }
  0xcb   :  { %v490_v49 = vmax.f32 %v379_v46, 0.0  ;;  %v491_v50 = vmax.f32 %v444_v47, 0.0  ;;  %v10033_v46 = vld [vmem:[#allocation3 + $0x240] sm:$0xf]  ;;  %v13672_v47 = vld [vmem:[#allocation3 + $0x244] sm:$0xf] }
  0xcd   :  { %v544_v56 = vpack.c.bf16 %v491_v50, %v490_v49 }
  0xce   :  { %v13645_v57 = vld [vmem:[#allocation3 + $0x164] sm:$0xf0]  ;;  %v9891_v58 = vld [vmem:[#allocation3 + $0x168] sm:$0xf0] }
  0xcf   :  { %598 = vst [vmem:[#allocation3 + $0x1b0] sm:$0xff] %v544_v56  ;;  %v15188_v59 = vor.u32 %v13645_v57, %v9889_v48  ;;  %v15190_v60 = vor.u32 %v13636_v51, %v9891_v58  ;;  %v9897_v25 = vld [vmem:[#allocation3 + $0x128] sm:$0xf]  ;;  %v13637_v29 = vld [vmem:[#allocation3 + $0x12c] sm:$0xf] }
  0xd0   :  { %630 = vst [vmem:[#allocation3 + $0x170] sm:$0xff] %v544_v56  ;;  %v381_v63 = vpop.f32.mrf.mxu0  ;;  %v446_v0 = vpop.f32.mrf.mxu1 }
  0xd1   :  { %662 = vst [vmem:[#allocation3 + $0x130] sm:$0xff] %v544_v56  ;;  %v382_v1 = vadd.f32 %v381_v63, %v15174_v33  ;;  %v447_v2 = vadd.f32 %v446_v0, %v15176_v17  ;;  %3480 = vmatmul.bf16.gmra.mxu2 %v15188_v59  ;;  %3529 = vmatmul.bf16.gmra.mxu3 %v15190_v60 }
  0xd2   :  { %692 = vst [vmem:[#allocation3 + $0xa8] sm:$0xff] %v544_v56 }
  0xd3   :  { %723 = vst [vmem:[#allocation3 + $0x68] sm:$0xff] %v544_v56  ;;  %v492_v3 = vmax.f32 %v382_v1, 0.0  ;;  %v493_v4 = vmax.f32 %v447_v2, 0.0  ;;  %3573 = vmatmul.bf16.gmra.mxu0 %v15192_v61  ;;  %3622 = vmatmul.bf16.gmra.mxu1 %v15194_v62 }
  0xd4   :  { %755 = vst [vmem:[#allocation3 + $0x28] sm:$0xff] %v544_v56 }
  0xd5   :  { %v545_v5 = vpack.c.bf16 %v493_v4, %v492_v3 }
  0xd6   :  { %v9961_v15 = vld [vmem:[#allocation3 + $0x1b0] sm:$0xf]  ;;  %v13654_v16 = vld [vmem:[#allocation3 + $0x1b4] sm:$0xf] }
  0xd7   :  { %599 = vst [vmem:[#allocation3 + $0x1f8] sm:$0xff] %v545_v5  ;;  %v13646_v18 = vld [vmem:[#allocation3 + $0x16c] sm:$0xf0]  ;;  %v9899_v22 = vld [vmem:[#allocation3 + $0x170] sm:$0xf0] }
  0xd8   :  { %631 = vst [vmem:[#allocation3 + $0x1b8] sm:$0xff] %v545_v5  ;;  %v384_v7 = vpop.f32.mrf.mxu0  ;;  %v449_v8 = vpop.f32.mrf.mxu1  ;;  %v15208_v28 = vor.u32 %v13646_v18, %v9897_v25  ;;  %v15214_v32 = vor.u32 %v13637_v29, %v9899_v22  ;;  %v10697_v18 = vld [vmem:[#allocation10 + $0x2f0] sm:$0xf] }
  0xd9   :  { %663 = vst [vmem:[#allocation3 + $0x178] sm:$0xff] %v545_v5  ;;  %v385_v9 = vadd.f32 %v384_v7, %v15174_v33  ;;  %v450_v10 = vadd.f32 %v449_v8, %v15176_v17 }
  0xda   :  { %693 = vst [vmem:[#allocation3 + $0xf0] sm:$0xff] %v545_v5 }
  0xdb   :  { %724 = vst [vmem:[#allocation3 + $0xb0] sm:$0xff] %v545_v5  ;;  %v494_v11 = vmax.f32 %v385_v9, 0.0  ;;  %v495_v12 = vmax.f32 %v450_v10, 0.0 }
  0xdc   :  { %756 = vst [vmem:[#allocation3 + $0x70] sm:$0xff] %v545_v5 }
  0xdd   :  { %v546_v13 = vpack.c.bf16 %v495_v12, %v494_v11  ;;  %16817 = vst [vmem:[#allocation30_spill] sm:$0xff] %v15208_v28  ;;  %v10633_v11 = vld [vmem:[#allocation10 + $0x270] sm:$0xf]  ;;  %v13823_v12 = vld [vmem:[#allocation10 + $0x274] sm:$0xf0] }
  0xde   :  { %v13663_v20 = vld [vmem:[#allocation3 + $0x1f4] sm:$0xf0]  ;;  %v9963_v21 = vld [vmem:[#allocation3 + $0x1f8] sm:$0xf0]  ;;  %16818 = vst [vmem:[#allocation31_spill] sm:$0xff] %v15214_v32 }
  0xdf   :  { %632 = vst [vmem:[#allocation3 + $0x200] sm:$0xff] %v546_v13  ;;  %v15204_v23 = vor.u32 %v13663_v20, %v9961_v15  ;;  %v15206_v24 = vor.u32 %v13654_v16, %v9963_v21  ;;  %v9969_v55 = vld [vmem:[#allocation3 + $0x1b8] sm:$0xf]  ;;  %v13655_v63 = vld [vmem:[#allocation3 + $0x1bc] sm:$0xf]  ;;  %v10634_v16 = vor.u32 %v13823_v12, %v10633_v11 }
  0xe0   :  { %664 = vst [vmem:[#allocation3 + $0x1c0] sm:$0xff] %v546_v13  ;;  %v387_v26 = vpop.f32.mrf.mxu0  ;;  %v452_v27 = vpop.f32.mrf.mxu1  ;;  %v13839_v20 = vld [vmem:[#allocation10 + $0x2f4] sm:$0xf0]  ;;  %v10625_v21 = vld [vmem:[#allocation10 + $0x260] sm:$0xf] }
  0xe1   :  { %725 = vst [vmem:[#allocation3 + $0xf8] sm:$0xff] %v546_v13  ;;  %v388_v30 = vadd.f32 %v387_v26, %v15174_v33  ;;  %v453_v31 = vadd.f32 %v452_v27, %v15176_v17  ;;  %3485 = vmatmul.bf16.gmra.mxu2 %v15204_v23  ;;  %3534 = vmatmul.bf16.gmra.mxu3 %v15206_v24  ;;  %v13821_v26 = vld [vmem:[#allocation10 + $0x264] sm:$0xf0]  ;;  %v10689_v27 = vld [vmem:[#allocation10 + $0x2e0] sm:$0xf] }
  0xe2   :  { %757 = vst [vmem:[#allocation3 + $0xb8] sm:$0xff] %v546_v13  ;;  %3658 = vmatpush.bf16.msrb.mxu2 %v10634_v16  ;;  %v10698_v25 = vor.u32 %v13839_v20, %v10697_v18  ;;  %v13833_v11 = vld [vmem:[#allocation10 + $0x2c4] sm:$0xf0]  ;;  %v10601_v18 = vld [vmem:[#allocation10 + $0x230] sm:$0xf] }
  0xe3   :  { %v496_v36 = vmax.f32 %v388_v30, 0.0  ;;  %v497_v6 = vmax.f32 %v453_v31, 0.0  ;;  %3578 = vmatmul.bf16.gmra.mxu0 %v15208_v28  ;;  %3627 = vmatmul.bf16.gmra.mxu1 %v15214_v32  ;;  %v10626_v31 = vor.u32 %v13821_v26, %v10625_v21  ;;  %v13815_v20 = vld [vmem:[#allocation10 + $0x234] sm:$0xf0]  ;;  %v10177_v21 = vld [vmem:[#allocation3 + $0x360] sm:$0xf] }
  0xe4   :  { %3707 = vmatpush.bf16.msrb.mxu3 %v10698_v25  ;;  %v13708_v25 = vld [vmem:[#allocation3 + $0x364] sm:$0xf]  ;;  %v10602_v26 = vor.u32 %v13815_v20, %v10601_v18 }
  0xe5   :  { %v547_v39 = vpack.c.bf16 %v497_v6, %v496_v36  ;;  %v13837_v36 = vld [vmem:[#allocation10 + $0x2e4] sm:$0xf0] }
  0xe6   :  { %v13664_v49 = vld [vmem:[#allocation3 + $0x1fc] sm:$0xf0]  ;;  %v9971_v52 = vld [vmem:[#allocation3 + $0x200] sm:$0xf0]  ;;  %3659 = vmatpush.bf16.msrb.mxu2 %v10626_v31 }
  0xe7   :  { %601 = vst [vmem:[#allocation3 + $0x288] sm:$0xff] %v547_v39  ;;  %v15224_v58 = vor.u32 %v13664_v49, %v9969_v55  ;;  %v15230_v2 = vor.u32 %v13655_v63, %v9971_v52  ;;  %v10617_v55 = vld [vmem:[#allocation10 + $0x250] sm:$0xf] }
  0xe8   :  { %633 = vst [vmem:[#allocation3 + $0x248] sm:$0xff] %v547_v39  ;;  %v390_v40 = vpop.f32.mrf.mxu0  ;;  %v455_v41 = vpop.f32.mrf.mxu1 }
  0xe9   :  { %695 = vst [vmem:[#allocation3 + $0x180] sm:$0xff] %v547_v39  ;;  %v391_v42 = vadd.f32 %v390_v40, %v15174_v33  ;;  %v456_v43 = vadd.f32 %v455_v41, %v15176_v17 }
  0xea   :  { %726 = vst [vmem:[#allocation3 + $0x140] sm:$0xff] %v547_v39 }
  0xeb   :  { %789 = vst [vmem:[#allocation3 + $0x78] sm:$0xff] %v547_v39  ;;  %v498_v44 = vmax.f32 %v391_v42, 0.0  ;;  %v499_v45 = vmax.f32 %v456_v43, 0.0 }
  0xec   :  { %821 = vst [vmem:[#allocation3 + $0x38] sm:$0xff] %v547_v39 }
  0xed   :  { %v548_v48 = vpack.c.bf16 %v499_v45, %v498_v44  ;;  %16819 = vst [vmem:[#allocation32_spill] sm:$0xff] %v15224_v58  ;;  %v10690_v44 = vor.u32 %v13837_v36, %v10689_v27  ;;  %v10665_v27 = vld [vmem:[#allocation10 + $0x2b0] sm:$0xf] }
  0xee   :  { %v13681_v50 = vld [vmem:[#allocation3 + $0x284] sm:$0xf0]  ;;  %v10035_v51 = vld [vmem:[#allocation3 + $0x288] sm:$0xf0]  ;;  %16820 = vst [vmem:[#allocation33_spill] sm:$0xff] %v15230_v2 }
  0xef   :  { %822 = vst [vmem:[#allocation3 + $0x80] sm:$0xff] %v548_v48  ;;  %v15220_v53 = vor.u32 %v13681_v50, %v10033_v46  ;;  %v15222_v54 = vor.u32 %v13672_v47, %v10035_v51  ;;  %v10041_v49 = vld [vmem:[#allocation3 + $0x248] sm:$0xf]  ;;  %v13673_v50 = vld [vmem:[#allocation3 + $0x24c] sm:$0xf]  ;;  %3708 = vmatpush.bf16.msrb.mxu3 %v10690_v44 }
  0xf0   :  { %854 = vst [vmem:[#allocation3 + $0x40] sm:$0xff] %v548_v48  ;;  %v393_v56 = vpop.f32.mrf.mxu0  ;;  %v458_v57 = vpop.f32.mrf.mxu1  ;;  %v10761_v36 = vld [vmem:[#allocation10 + $0x370] sm:$0xf]  ;;  %v13813_v44 = vld [vmem:[#allocation10 + $0x224] sm:$0xf0] }
  0xf1   :  { %602 = vst [vmem:[#allocation3 + $0x2d0] sm:$0xff] %v548_v48  ;;  %v394_v0 = vadd.f32 %v393_v56, %v15174_v33  ;;  %v459_v1 = vadd.f32 %v458_v57, %v15176_v17  ;;  %3490 = vmatmul.bf16.gmra.mxu2 %v15220_v53  ;;  %3539 = vmatmul.bf16.gmra.mxu3 %v15222_v54  ;;  %v13819_v56 = vld [vmem:[#allocation10 + $0x254] sm:$0xf0] }
  0xf2   :  { %634 = vst [vmem:[#allocation3 + $0x290] sm:$0xff] %v548_v48 }
  0xf3   :  { %666 = vst [vmem:[#allocation3 + $0x250] sm:$0xff] %v548_v48  ;;  %v500_v3 = vmax.f32 %v394_v0, 0.0  ;;  %v501_v4 = vmax.f32 %v459_v1, 0.0  ;;  %3583 = vmatmul.bf16.gmra.mxu0 %v15224_v58  ;;  %3632 = vmatmul.bf16.gmra.mxu1 %v15230_v2  ;;  %v10618_v0 = vor.u32 %v13819_v56, %v10617_v55  ;;  %v10681_v1 = vld [vmem:[#allocation10 + $0x2d0] sm:$0xf] }
  0xf4   :  { %696 = vst [vmem:[#allocation3 + $0x1c8] sm:$0xff] %v548_v48  ;;  %v13915_v2 = vld [vmem:[#allocation10 + $0x554] sm:$0xf0]  ;;  %v11065_v58 = vld [vmem:[#allocation10 + $0x5d0] sm:$0xf] }
  0xf5   :  { %727 = vst [vmem:[#allocation3 + $0x188] sm:$0xff] %v548_v48  ;;  %v549_v5 = vpack.c.bf16 %v501_v4, %v500_v3  ;;  %v13835_v3 = vld [vmem:[#allocation10 + $0x2d4] sm:$0xf0]  ;;  %v10609_v4 = vld [vmem:[#allocation10 + $0x240] sm:$0xf]  ;;  %3660 = vmatpush.bf16.msrb.mxu2 %v10618_v0 }
  0xf6   :  { %759 = vst [vmem:[#allocation3 + $0x148] sm:$0xff] %v548_v48 }
  0xf7   :  { %790 = vst [vmem:[#allocation3 + $0xc0] sm:$0xff] %v548_v48 }
  0xf8   :  { %855 = vst [vmem:[#allocation3 + $0x88] sm:$0xff] %v549_v5  ;;  %v396_v7 = vpop.f32.mrf.mxu0  ;;  %v461_v8 = vpop.f32.mrf.mxu1  ;;  %v10105_v29 = vld [vmem:[#allocation3 + $0x2d0] sm:$0xf]  ;;  %v13690_v30 = vld [vmem:[#allocation3 + $0x2d4] sm:$0xf] }
  0xf9   :  { %603 = vst [vmem:[#allocation3 + $0x318] sm:$0xff] %v549_v5  ;;  %v397_v9 = vadd.f32 %v396_v7, %v15174_v33  ;;  %v462_v10 = vadd.f32 %v461_v8, %v15176_v17  ;;  %v13682_v6 = vld [vmem:[#allocation3 + $0x28c] sm:$0xf0]  ;;  %v10043_v39 = vld [vmem:[#allocation3 + $0x290] sm:$0xf0]  ;;  %v10682_v8 = vor.u32 %v13835_v3, %v10681_v1 }
  0xfa   :  { %635 = vst [vmem:[#allocation3 + $0x2d8] sm:$0xff] %v549_v5  ;;  %v15242_v51 = vor.u32 %v13682_v6, %v10041_v49  ;;  %v15244_v52 = vor.u32 %v13673_v50, %v10043_v39  ;;  %v13817_v7 = vld [vmem:[#allocation10 + $0x244] sm:$0xf0]  ;;  %v13855_v6 = vld [vmem:[#allocation10 + $0x374] sm:$0xf0] }
  0xfb   :  { %667 = vst [vmem:[#allocation3 + $0x298] sm:$0xff] %v549_v5  ;;  %v502_v13 = vmax.f32 %v397_v9, 0.0  ;;  %v503_v15 = vmax.f32 %v462_v10, 0.0  ;;  %v10610_v9 = vor.u32 %v13817_v7, %v10609_v4  ;;  %v10673_v10 = vld [vmem:[#allocation10 + $0x2c0] sm:$0xf]  ;;  %3709 = vmatpush.bf16.msrb.mxu3 %v10682_v8 }
  0xfc   :  { %697 = vst [vmem:[#allocation3 + $0x210] sm:$0xff] %v549_v5  ;;  %v10825_v39 = vld [vmem:[#allocation10 + $0x3f0] sm:$0xf]  ;;  %v10657_v4 = vld [vmem:[#allocation10 + $0x2a0] sm:$0xf] }
  0xfd   :  { %728 = vst [vmem:[#allocation3 + $0x1d0] sm:$0xff] %v549_v5  ;;  %v550_v22 = vpack.c.bf16 %v503_v15, %v502_v13  ;;  %3661 = vmatpush.bf16.msrb.mxu2 %v10610_v9  ;;  %v13829_v8 = vld [vmem:[#allocation10 + $0x2a4] sm:$0xf0]  ;;  %v10753_v9 = vld [vmem:[#allocation10 + $0x360] sm:$0xf] }
  0xfe   :  { %760 = vst [vmem:[#allocation3 + $0x190] sm:$0xff] %v549_v5  ;;  %v10658_v18 = vor.u32 %v13829_v8, %v10657_v4  ;;  %v10641_v4 = vld [vmem:[#allocation10 + $0x280] sm:$0xf] }
  0xff   :  { %791 = vst [vmem:[#allocation3 + $0x108] sm:$0xff] %v549_v5 }
 0x100   :  { %823 = vst [vmem:[#allocation3 + $0xc8] sm:$0xff] %v549_v5  ;;  %v399_v40 = vpop.f32.mrf.mxu0  ;;  %v464_v41 = vpop.f32.mrf.mxu1  ;;  %v13699_v42 = vld [vmem:[#allocation3 + $0x314] sm:$0xf0]  ;;  %v10107_v43 = vld [vmem:[#allocation3 + $0x318] sm:$0xf0] }
 0x101   :  { %636 = vst [vmem:[#allocation3 + $0x320] sm:$0xff] %v550_v22  ;;  %v400_v45 = vadd.f32 %v399_v40, %v15174_v33  ;;  %v465_v46 = vadd.f32 %v464_v41, %v15176_v17  ;;  %v15238_v47 = vor.u32 %v13699_v42, %v10105_v29  ;;  %v15240_v48 = vor.u32 %v13690_v30, %v10107_v43  ;;  %v13831_v29 = vld [vmem:[#allocation10 + $0x2b4] sm:$0xf0]  ;;  %v10593_v43 = vld [vmem:[#allocation10 + $0x220] sm:$0xf] }
 0x102   :  { %668 = vst [vmem:[#allocation3 + $0x2e0] sm:$0xff] %v550_v22  ;;  %v10762_v41 = vor.u32 %v13855_v6, %v10761_v36  ;;  %v13871_v42 = vld [vmem:[#allocation10 + $0x3f4] sm:$0xf0]  ;;  %3662 = vmatpush.bf16.msrb.mxu2 %v10602_v26  ;;  %v10666_v55 = vor.u32 %v13831_v29, %v10665_v27 }
 0x103   :  { %16821 = vst [vmem:[#allocation34_spill] sm:$0xff] %v15242_v51  ;;  %v504_v57 = vmax.f32 %v400_v45, 0.0  ;;  %v505_v63 = vmax.f32 %v465_v46, 0.0  ;;  %3495 = vmatmul.bf16.gmra.mxu2 %v15238_v47  ;;  %3544 = vmatmul.bf16.gmra.mxu3 %v15240_v48  ;;  %v10113_v49 = vld [vmem:[#allocation3 + $0x2d8] sm:$0xf]  ;;  %v10826_v56 = vor.u32 %v13871_v42, %v10825_v39 }
 0x104   :  { %16822 = vst [vmem:[#allocation35_spill] sm:$0xff] %v15244_v52  ;;  %3588 = vmatmul.bf16.gmra.mxu0 %v15242_v51  ;;  %3637 = vmatmul.bf16.gmra.mxu1 %v15244_v52  ;;  %v13691_v1 = vld [vmem:[#allocation3 + $0x2dc] sm:$0xf]  ;;  %v10745_v39 = vld [vmem:[#allocation10 + $0x350] sm:$0xf] }
 0x105   :  { %729 = vst [vmem:[#allocation3 + $0x218] sm:$0xff] %v550_v22  ;;  %v551_v5 = vpack.c.bf16 %v505_v63, %v504_v57  ;;  %v10594_v57 = vor.u32 %v13813_v44, %v10593_v43  ;;  %3756 = vmatpush.bf16.msra.mxu0 %v10762_v41  ;;  %3805 = vmatpush.bf16.msra.mxu1 %v10826_v56  ;;  %v13811_v29 = vld [vmem:[#allocation10 + $0x214] sm:$0xf0] }
 0x106   :  { %761 = vst [vmem:[#allocation3 + $0x1d8] sm:$0xff] %v550_v22  ;;  %v13827_v36 = vld [vmem:[#allocation10 + $0x294] sm:$0xf0] }
 0x107   :  { %824 = vst [vmem:[#allocation3 + $0x110] sm:$0xff] %v550_v22  ;;  %3663 = vmatpush.bf16.msrb.mxu2 %v10594_v57  ;;  %v13851_v41 = vld [vmem:[#allocation10 + $0x354] sm:$0xf0]  ;;  %v10577_v57 = vld [vmem:[#allocation10 + $0x200] sm:$0xf] }
 0x108   :  { %856 = vst [vmem:[#allocation3 + $0xd0] sm:$0xff] %v550_v22  ;;  %v402_v12 = vpop.f32.mrf.mxu0  ;;  %v467_v13 = vpop.f32.mrf.mxu1  ;;  %v10674_v22 = vor.u32 %v13833_v11, %v10673_v10  ;;  %v13700_v50 = vld [vmem:[#allocation3 + $0x31c] sm:$0xf0]  ;;  %v10115_v3 = vld [vmem:[#allocation3 + $0x320] sm:$0xf0]  ;;  %v10746_v43 = vor.u32 %v13851_v41, %v10745_v39 }
 0x109   :  { %605 = vst [vmem:[#allocation3 + $0x3a8] sm:$0xff] %v551_v5  ;;  %v403_v15 = vadd.f32 %v402_v12, %v15174_v33  ;;  %v468_v16 = vadd.f32 %v467_v13, %v15176_v17  ;;  %v15263_v12 = vor.u32 %v13700_v50, %v10113_v49  ;;  %v13853_v13 = vld [vmem:[#allocation10 + $0x364] sm:$0xf0]  ;;  %v13867_v49 = vld [vmem:[#allocation10 + $0x3d4] sm:$0xf0] }
 0x10a   :  { %637 = vst [vmem:[#allocation3 + $0x368] sm:$0xff] %v551_v5  ;;  %3710 = vmatpush.bf16.msrb.mxu3 %v10674_v22  ;;  %v10754_v20 = vor.u32 %v13853_v13, %v10753_v9  ;;  %v10737_v9 = vld [vmem:[#allocation10 + $0x340] sm:$0xf]  ;;  %v3471_v13 = vpop.f32.mrf.mxu2 }
 0x10b   :  { %699 = vst [vmem:[#allocation3 + $0x2a0] sm:$0xff] %v551_v5  ;;  %v506_v30 = vmax.f32 %v403_v15, 0.0  ;;  %v507_v31 = vmax.f32 %v468_v16, 0.0  ;;  %v10817_v15 = vld [vmem:[#allocation10 + $0x3e0] sm:$0xf]  ;;  %v15266_v16 = vor.u32 %v13691_v1, %v10115_v3 }
 0x10c   :  { %730 = vst [vmem:[#allocation3 + $0x260] sm:$0xff] %v551_v5  ;;  %3757 = vmatpush.bf16.msra.mxu0 %v10754_v20  ;;  %v13809_v1 = vld [vmem:[#allocation10 + $0x204] sm:$0xf0] }
 0x10d   :  { %793 = vst [vmem:[#allocation3 + $0x198] sm:$0xff] %v551_v5  ;;  %v15252_v40 = vpack.c.bf16 %v507_v31, %v506_v30  ;;  %v10649_v31 = vld [vmem:[#allocation10 + $0x290] sm:$0xf]  ;;  %v10578_v3 = vor.u32 %v13809_v1, %v10577_v57 }
 0x10e   :  { %825 = vst [vmem:[#allocation3 + $0x158] sm:$0xff] %v551_v5  ;;  %3711 = vmatpush.bf16.msrb.mxu3 %v10666_v55  ;;  %v10650_v42 = vor.u32 %v13827_v36, %v10649_v31  ;;  %v10793_v57 = vld [vmem:[#allocation10 + $0x3b0] sm:$0xf] }
 0x10f   :  { %606 = vst [vmem:[#allocation3 + $0x3f0] sm:$0xff] %v15252_v40 }
 0x110   :  { %v13717_v45 = vld [vmem:[#allocation3 + $0x3a4] sm:$0xf0]  ;;  %v10179_v46 = vld [vmem:[#allocation3 + $0x3a8] sm:$0xf0]  ;;  %638 = vst [vmem:[#allocation3 + $0x3b0] sm:$0xff] %v15252_v40  ;;  %v405_v5 = vpop.f32.mrf.mxu0  ;;  %v470_v7 = vpop.f32.mrf.mxu1  ;;  %3758 = vmatpush.bf16.msra.mxu0 %v10746_v43 }
 0x111   :  { %v15255_v63 = vor.u32 %v13717_v45, %v10177_v21  ;;  %v15257_v0 = vor.u32 %v13708_v25, %v10179_v46  ;;  %670 = vst [vmem:[#allocation3 + $0x370] sm:$0xff] %v15252_v40  ;;  %v406_v10 = vadd.f32 %v405_v5, %v15174_v33  ;;  %v471_v11 = vadd.f32 %v470_v7, %v15176_v17  ;;  %v13869_v21 = vld [vmem:[#allocation10 + $0x3e4] sm:$0xf0]  ;;  %v10585_v25 = vld [vmem:[#allocation10 + $0x210] sm:$0xf] }
 0x112   :  { %16823 = vst [vmem:[#allocation36_spill] sm:$0xff] %v15263_v12  ;;  %v10818_v27 = vor.u32 %v13869_v21, %v10817_v15  ;;  %v10586_v30 = vor.u32 %v13811_v29, %v10585_v25  ;;  %3712 = vmatpush.bf16.msrb.mxu3 %v10658_v18  ;;  %v10809_v46 = vld [vmem:[#allocation10 + $0x3d0] sm:$0xf]  ;;  %v13825_v5 = vld [vmem:[#allocation10 + $0x284] sm:$0xf0]  ;;  %v3520_v15 = vpop.f32.mrf.mxu3 }
 0x113   :  { %700 = vst [vmem:[#allocation3 + $0x2e8] sm:$0xff] %v15252_v40  ;;  %v508_v22 = vmax.f32 %v406_v10, 0.0  ;;  %v509_v26 = vmax.f32 %v471_v11, 0.0  ;;  %3500 = vmatmul.bf16.gmra.mxu2 %v15255_v63  ;;  %3549 = vmatmul.bf16.gmra.mxu3 %v15257_v0  ;;  %v10810_v56 = vor.u32 %v13867_v49, %v10809_v46  ;;  %v10642_v8 = vor.u32 %v13825_v5, %v10641_v4  ;;  %v13849_v10 = vld [vmem:[#allocation10 + $0x344] sm:$0xf0] }
 0x114   :  { %16824 = vst [vmem:[#allocation37_spill] sm:$0xff] %v15266_v16  ;;  %3593 = vmatmul.bf16.gmra.mxu0 %v15263_v12  ;;  %3642 = vmatmul.bf16.gmra.mxu1 %v15266_v16  ;;  %v10801_v11 = vld [vmem:[#allocation10 + $0x3c0] sm:$0xf]  ;;  %v10738_v25 = vor.u32 %v13849_v10, %v10737_v9  ;;  %v13709_v49 = vld [vmem:[#allocation3 + $0x36c] sm:$0xf]  ;;  %v15295_v9 = vpop.f32.mrf.mxu2 }
 0x115   :  { %731 = vst [vmem:[#allocation3 + $0x2a8] sm:$0xff] %v15252_v40  ;;  %v553_v6 = vpack.c.bf16 %v509_v26, %v508_v22  ;;  %3806 = vmatpush.bf16.msra.mxu1 %v10818_v27  ;;  %3664 = vmatpush.bf16.msrb.mxu2 %v10586_v30  ;;  %v13865_v22 = vld [vmem:[#allocation10 + $0x3c4] sm:$0xf0]  ;;  %v15279_v26 = vadd.f32 %v3520_v15, %v3471_v13  ;;  %v13863_v5 = vld [vmem:[#allocation10 + $0x3b4] sm:$0xf0] }
 0x116   :  { %763 = vst [vmem:[#allocation3 + $0x268] sm:$0xff] %v15252_v40  ;;  %3713 = vmatpush.bf16.msrb.mxu3 %v10650_v42  ;;  %v10249_v20 = vld [vmem:[#allocation3 + $0x3f0] sm:$0xf]  ;;  %v13726_v21 = vld [vmem:[#allocation3 + $0x3f4] sm:$0xf]  ;;  %v10802_v30 = vor.u32 %v13865_v22, %v10801_v11  ;;  %3759 = vmatpush.bf16.msra.mxu0 %v10738_v25 }
 0x117   :  { %794 = vst [vmem:[#allocation3 + $0x1e0] sm:$0xff] %v15252_v40  ;;  %v13718_v27 = vld [vmem:[#allocation3 + $0x3ac] sm:$0xf0]  ;;  %v10187_v29 = vld [vmem:[#allocation3 + $0x3b0] sm:$0xf0] }
 0x118   :  { %826 = vst [vmem:[#allocation3 + $0x1a0] sm:$0xff] %v15252_v40  ;;  %v408_v44 = vpop.f32.mrf.mxu0  ;;  %v473_v45 = vpop.f32.mrf.mxu1  ;;  %v10785_v13 = vld [vmem:[#allocation10 + $0x3a0] sm:$0xf]  ;;  %v13861_v15 = vld [vmem:[#allocation10 + $0x3a4] sm:$0xf0] }
 0x119   :  { %858 = vst [vmem:[#allocation3 + $0x160] sm:$0xff] %v15252_v40  ;;  %v409_v50 = vadd.f32 %v408_v44, %v15174_v33  ;;  %v474_v55 = vadd.f32 %v473_v45, %v15176_v17  ;;  %3807 = vmatpush.bf16.msra.mxu1 %v10810_v56  ;;  %3665 = vmatpush.bf16.msrb.mxu2 %v10578_v3  ;;  %v10185_v44 = vld [vmem:[#allocation3 + $0x368] sm:$0xf]  ;;  %v10713_v25 = vld [vmem:[#allocation10 + $0x310] sm:$0xf] }
 0x11a   :  { %607 = vst [vmem:[#allocation3 + $0x438] sm:$0xff] %v553_v6  ;;  %3714 = vmatpush.bf16.msrb.mxu3 %v10642_v8  ;;  %v15289_v56 = vor.u32 %v13709_v49, %v10187_v29  ;;  %v13845_v8 = vld [vmem:[#allocation10 + $0x324] sm:$0xf0]  ;;  %v15297_v10 = vpop.f32.mrf.mxu3  ;;  %v13843_v22 = vld [vmem:[#allocation10 + $0x314] sm:$0xf0] }
 0x11b   :  { %639 = vst [vmem:[#allocation3 + $0x3f8] sm:$0xff] %v553_v6  ;;  %v510_v40 = vmax.f32 %v409_v50, 0.0  ;;  %v511_v7 = vmax.f32 %v474_v55, 0.0  ;;  %v10729_v50 = vld [vmem:[#allocation10 + $0x330] sm:$0xf]  ;;  %v15287_v55 = vor.u32 %v13718_v27, %v10185_v44 }
 0x11c   :  { %671 = vst [vmem:[#allocation3 + $0x3b8] sm:$0xff] %v553_v6  ;;  %v10777_v27 = vld [vmem:[#allocation10 + $0x390] sm:$0xf]  ;;  %v13859_v29 = vld [vmem:[#allocation10 + $0x394] sm:$0xf0] }
 0x11d   :  { %701 = vst [vmem:[#allocation3 + $0x330] sm:$0xff] %v553_v6  ;;  %v554_v18 = vpack.c.bf16 %v511_v7, %v510_v40  ;;  %3808 = vmatpush.bf16.msra.mxu1 %v10802_v30  ;;  %v10794_v40 = vor.u32 %v13863_v5, %v10793_v57  ;;  %v10721_v7 = vld [vmem:[#allocation10 + $0x320] sm:$0xf]  ;;  %v10778_v44 = vor.u32 %v13859_v29, %v10777_v27  ;;  %v13857_v57 = vld [vmem:[#allocation10 + $0x384] sm:$0xf0]  ;;  %v3476_v5 = vpop.f32.mrf.mxu2 }
 0x11e   :  { %732 = vst [vmem:[#allocation3 + $0x2f0] sm:$0xff] %v553_v6  ;;  %v10123_v12 = vld [vmem:[#allocation3 + $0x328] sm:$0xf0] }
 0x11f   :  { %764 = vst [vmem:[#allocation3 + $0x2b0] sm:$0xff] %v553_v6 }
 0x120   :  { %795 = vst [vmem:[#allocation3 + $0x228] sm:$0xff] %v553_v6  ;;  %v411_v39 = vpop.f32.mrf.mxu0  ;;  %v476_v41 = vpop.f32.mrf.mxu1 }
 0x121   :  { %827 = vst [vmem:[#allocation3 + $0x1e8] sm:$0xff] %v553_v6  ;;  %v13735_v31 = vld [vmem:[#allocation3 + $0x434] sm:$0xf0]  ;;  %v10251_v36 = vld [vmem:[#allocation3 + $0x438] sm:$0xf0]  ;;  %v412_v45 = vadd.f32 %v411_v39, %v15174_v33  ;;  %v477_v46 = vadd.f32 %v476_v41, %v15176_v17  ;;  %3809 = vmatpush.bf16.msra.mxu1 %v10794_v40 }
 0x122   :  { %859 = vst [vmem:[#allocation3 + $0x1a8] sm:$0xff] %v553_v6  ;;  %v15281_v42 = vor.u32 %v13735_v31, %v10249_v20  ;;  %v15283_v43 = vor.u32 %v13726_v21, %v10251_v36  ;;  %v13847_v6 = vld [vmem:[#allocation10 + $0x334] sm:$0xf0]  ;;  %v10722_v20 = vor.u32 %v13845_v8, %v10721_v7  ;;  %v10786_v21 = vor.u32 %v13861_v15, %v10785_v13  ;;  %v9761_v41 = vld [vmem:[#allocation3 + $0x10] sm:$0xf]  ;;  %v3525_v40 = vpop.f32.mrf.mxu3 }
 0x123   :  { %640 = vst [vmem:[#allocation3 + $0x440] sm:$0xff] %v554_v18  ;;  %v512_v1 = vmax.f32 %v412_v45, 0.0  ;;  %v513_v3 = vmax.f32 %v477_v46, 0.0  ;;  %v10730_v4 = vor.u32 %v13847_v6, %v10729_v50  ;;  %v10705_v45 = vld [vmem:[#allocation10 + $0x300] sm:$0xf]  ;;  %v15301_v8 = vadd.f32 %v3525_v40, %v3476_v5 }
 0x124   :  { %672 = vst [vmem:[#allocation3 + $0x400] sm:$0xff] %v554_v18  ;;  %3505 = vmatmul.bf16.gmra.mxu2 %v15281_v42  ;;  %3554 = vmatmul.bf16.gmra.mxu3 %v15283_v43  ;;  %v13841_v46 = vld [vmem:[#allocation10 + $0x304] sm:$0xf0]  ;;  %v10769_v6 = vld [vmem:[#allocation10 + $0x380] sm:$0xf] }
 0x125   :  { %16825 = vst [vmem:[#allocation38_spill] sm:$0xff] %v15287_v55  ;;  %3598 = vmatmul.bf16.gmra.mxu0 %v15287_v55  ;;  %3647 = vmatmul.bf16.gmra.mxu1 %v15289_v56  ;;  %v555_v11 = vpack.c.bf16 %v513_v3, %v512_v1  ;;  %v13611_v1 = vld [vmem:[#allocation3 + $0x54] sm:$0xf0]  ;;  %v13602_v3 = vld [vmem:[#allocation3 + $0x14] sm:$0xf]  ;;  %v10770_v13 = vor.u32 %v13857_v57, %v10769_v6 }
 0x126   :  { %16826 = vst [vmem:[#allocation39_spill] sm:$0xff] %v15289_v56  ;;  %3760 = vmatpush.bf16.msra.mxu0 %v10730_v4  ;;  %3810 = vmatpush.bf16.msra.mxu1 %v10786_v21  ;;  %v9763_v4 = vld [vmem:[#allocation3 + $0x58] sm:$0xf0]  ;;  %v15303_v15 = vor.u32 %v13611_v1, %v9761_v41  ;;  %v9833_v57 = vld [vmem:[#allocation3 + $0xa0] sm:$0xf] }
 0x127   :  { %733 = vst [vmem:[#allocation3 + $0x338] sm:$0xff] %v554_v18  ;;  %v13620_v5 = vld [vmem:[#allocation3 + $0xa4] sm:$0xf]  ;;  %v9835_v40 = vld [vmem:[#allocation3 + $0xe8] sm:$0xf0] }
 0x128   :  { %765 = vst [vmem:[#allocation3 + $0x2f8] sm:$0xff] %v554_v18  ;;  %v414_v30 = vpop.f32.mrf.mxu0  ;;  %v479_v31 = vpop.f32.mrf.mxu1 }
 0x129   :  { %828 = vst [vmem:[#allocation3 + $0x230] sm:$0xff] %v554_v18  ;;  %v415_v36 = vadd.f32 %v414_v30, %v15174_v33  ;;  %v480_v39 = vadd.f32 %v479_v31, %v15176_v17  ;;  %v10257_v31 = vld [vmem:[#allocation3 + $0x3f8] sm:$0xf] }
 0x12a   :  { %860 = vst [vmem:[#allocation3 + $0x1f0] sm:$0xff] %v554_v18  ;;  %3761 = vmatpush.bf16.msra.mxu0 %v10722_v20  ;;  %v10714_v18 = vor.u32 %v13843_v22, %v10713_v25  ;;  %3811 = vmatpush.bf16.msra.mxu1 %v10778_v44  ;;  %v15305_v20 = vor.u32 %v13602_v3, %v9763_v4  ;;  %v13736_v21 = vld [vmem:[#allocation3 + $0x43c] sm:$0xf0]  ;;  %v10259_v25 = vld [vmem:[#allocation3 + $0x440] sm:$0xf0] }
 0x12b   :  { %703 = vst [vmem:[#allocation3 + $0x3c0] sm:$0xff] %v555_v11  ;;  %v514_v49 = vmax.f32 %v415_v36, 0.0  ;;  %v515_v50 = vmax.f32 %v480_v39, 0.0  ;;  %v13727_v36 = vld [vmem:[#allocation3 + $0x3fc] sm:$0xf]  ;;  %v15309_v39 = vor.u32 %v13736_v21, %v10257_v31 }
 0x12c   :  { %734 = vst [vmem:[#allocation3 + $0x380] sm:$0xff] %v555_v11  ;;  %v13629_v4 = vld [vmem:[#allocation3 + $0xe4] sm:$0xf0] }
 0x12d   :  { %797 = vst [vmem:[#allocation3 + $0x2b8] sm:$0xff] %v555_v11  ;;  %v556_v7 = vpack.c.bf16 %v515_v50, %v514_v49  ;;  %v15319_v21 = vor.u32 %v13629_v4, %v9833_v57  ;;  %v9907_v57 = vld [vmem:[#allocation3 + $0x178] sm:$0xf0] }
 0x12e   :  { %829 = vst [vmem:[#allocation3 + $0x278] sm:$0xff] %v555_v11  ;;  %3762 = vmatpush.bf16.msra.mxu0 %v10714_v18  ;;  %v10706_v11 = vor.u32 %v13841_v46, %v10705_v45  ;;  %v15311_v18 = vor.u32 %v13727_v36, %v10259_v25  ;;  %3812 = vmatpush.bf16.msra.mxu1 %v10770_v13  ;;  %v13603_v13 = vld [vmem:[#allocation3 + $0x1c] sm:$0xf] }
 0x12f   :  { %704 = vst [vmem:[#allocation3 + $0x408] sm:$0xff] %v556_v7  ;;  %v15321_v25 = vor.u32 %v13620_v5, %v9835_v40  ;;  %v9905_v40 = vld [vmem:[#allocation3 + $0x130] sm:$0xf] }
 0x130   :  { %16827 = vst [vmem:[#allocation40_spill] sm:$0xff] %v15305_v20  ;;  %v417_v22 = vpop.f32.mrf.mxu0  ;;  %v482_v27 = vpop.f32.mrf.mxu1 }
 0x131   :  { %735 = vst [vmem:[#allocation3 + $0x3c8] sm:$0xff] %v556_v7  ;;  %v418_v29 = vadd.f32 %v417_v22, %v15174_v33  ;;  %v483_v30 = vadd.f32 %v482_v27, %v15176_v17  ;;  %v9771_v22 = vld [vmem:[#allocation3 + $0x60] sm:$0xf0] }
 0x132   :  { %767 = vst [vmem:[#allocation3 + $0x388] sm:$0xff] %v556_v7  ;;  %3763 = vmatpush.bf16.msra.mxu0 %v10706_v11  ;;  %v9769_v11 = vld [vmem:[#allocation3 + $0x18] sm:$0xf]  ;;  %v15326_v31 = vor.u32 %v13603_v13, %v9771_v22 }
 0x133   :  { %798 = vst [vmem:[#allocation3 + $0x300] sm:$0xff] %v556_v7  ;;  %v516_v41 = vmax.f32 %v418_v29, 0.0  ;;  %v517_v44 = vmax.f32 %v483_v30, 0.0 }
 0x134   :  { %16828 = vst [vmem:[#allocation41_spill] sm:$0xff] %v15309_v39  ;;  %3666 = vmatmul.bf16.vlgmr.msrb.gmra.mxu2 %v15303_v15  ;;  %3715 = vmatmul.bf16.vlgmr.msrb.gmra.mxu3 %v15305_v20 }
 0x135   :  { %16829 = vst [vmem:[#allocation42_spill] sm:$0xff] %v15311_v18  ;;  %3603 = vmatmul.bf16.gmra.mxu0 %v15309_v39  ;;  %3652 = vmatmul.bf16.gmra.mxu1 %v15311_v18  ;;  %v557_v45 = vpack.c.bf16 %v517_v44, %v516_v41  ;;  %v3523_v41 = vadd.f32 %v15297_v10, %v15295_v9  ;;  %v9841_v10 = vld [vmem:[#allocation3 + $0xa8] sm:$0xf]  ;;  %v13674_v18 = vld [vmem:[#allocation3 + $0x254] sm:$0xf] }
 0x136   :  { %830 = vst [vmem:[#allocation3 + $0x2c0] sm:$0xff] %v556_v7 }
 0x137   :  { %862 = vst [vmem:[#allocation3 + $0x280] sm:$0xff] %v556_v7 }
 0x138   :  { %705 = vst [vmem:[#allocation3 + $0x450] sm:$0xff] %v557_v45  ;;  %v420_v46 = vpop.f32.mrf.mxu0  ;;  %v485_v49 = vpop.f32.mrf.mxu1 }
 0x139   :  { %736 = vst [vmem:[#allocation3 + $0x410] sm:$0xff] %v557_v45  ;;  %v421_v50 = vadd.f32 %v420_v46, %v15174_v33  ;;  %v486_v6 = vadd.f32 %v485_v49, %v15176_v17  ;;  %v13612_v33 = vld [vmem:[#allocation3 + $0x5c] sm:$0xf0]  ;;  %v3478_v46 = vpop.f32.mrf.mxu2  ;;  %v3527_v49 = vpop.f32.mrf.mxu3 }
 0x13a   :  { %768 = vst [vmem:[#allocation3 + $0x3d0] sm:$0xff] %v557_v45  ;;  %v15324_v30 = vor.u32 %v13612_v33, %v9769_v11  ;;  %v13621_v33 = vld [vmem:[#allocation3 + $0xac] sm:$0xf] }
 0x13b   :  { %799 = vst [vmem:[#allocation3 + $0x348] sm:$0xff] %v557_v45  ;;  %v518_v1 = vmax.f32 %v421_v50, 0.0  ;;  %v519_v3 = vmax.f32 %v486_v6, 0.0  ;;  %v13647_v6 = vld [vmem:[#allocation3 + $0x174] sm:$0xf0] }
 0x13c   :  { %831 = vst [vmem:[#allocation3 + $0x308] sm:$0xff] %v557_v45  ;;  %v15339_v13 = vor.u32 %v13647_v6, %v9905_v40  ;;  %v9979_v40 = vld [vmem:[#allocation3 + $0x208] sm:$0xf0] }
 0x13d   :  { %863 = vst [vmem:[#allocation3 + $0x2c8] sm:$0xff] %v557_v45  ;;  %v558_v7 = vpack.c.bf16 %v519_v3, %v518_v1  ;;  %v13630_v1 = vld [vmem:[#allocation3 + $0xec] sm:$0xf0]  ;;  %v9843_v3 = vld [vmem:[#allocation3 + $0xf0] sm:$0xf0] }
 0x13e   :  { %16830 = vst [vmem:[#allocation43_spill] sm:$0xff] %v15319_v21  ;;  %v15343_v22 = vor.u32 %v13630_v1, %v9841_v10  ;;  %v9913_v10 = vld [vmem:[#allocation3 + $0x138] sm:$0xf] }
 0x13f   :  { %737 = vst [vmem:[#allocation3 + $0x458] sm:$0xff] %v558_v7 }
 0x140   :  { %16831 = vst [vmem:[#allocation44_spill] sm:$0xff] %v15321_v25  ;;  %v3569_v17 = vpop.f32.mrf.mxu0  ;;  %v3618_v27 = vpop.f32.mrf.mxu1 }
 0x141   :  { %769 = vst [vmem:[#allocation3 + $0x418] sm:$0xff] %v558_v7  ;;  %v3570_v29 = vadd.f32 %v3569_v17, %v15279_v26  ;;  %v15345_v17 = vor.u32 %v13621_v33, %v9843_v3  ;;  %v13648_v33 = vld [vmem:[#allocation3 + $0x17c] sm:$0xf0] }
 0x142   :  { %832 = vst [vmem:[#allocation3 + $0x350] sm:$0xff] %v558_v7 }
 0x143   :  { %864 = vst [vmem:[#allocation3 + $0x310] sm:$0xff] %v558_v7  ;;  %v15328_v36 = vadd.f32 %v3618_v27, %v3570_v29  ;;  %v13638_v7 = vld [vmem:[#allocation3 + $0x134] sm:$0xf] }
 0x144   :  { %16832 = vst [vmem:[#allocation45_spill] sm:$0xff] %v15324_v30  ;;  %3671 = vmatmul.bf16.gmra.mxu2 %v15319_v21  ;;  %3720 = vmatmul.bf16.gmra.mxu3 %v15321_v25  ;;  %v15341_v9 = vor.u32 %v13638_v7, %v9907_v57  ;;  %v9977_v7 = vld [vmem:[#allocation3 + $0x1c0] sm:$0xf]  ;;  %v13873_v25 = vld [vmem:[#allocation10 + $0x404] sm:$0xf0] }
 0x145   :  { %16833 = vst [vmem:[#allocation46_spill] sm:$0xff] %v15326_v31  ;;  %3764 = vmatmul.bf16.vlgmr.msra.gmra.mxu0 %v15324_v30  ;;  %3813 = vmatmul.bf16.vlgmr.msra.gmra.mxu1 %v15326_v31 }
 0x146   :  { %16834 = vst [vmem:[#allocation47_spill] sm:$0xff] %v15339_v13 }
 0x147   :  { %16835 = vst [vmem:[#allocation48_spill] sm:$0xff] %v15341_v9 }
 0x148   :  { %v3571_v44 = vpop.f32.mrf.mxu0  ;;  %v3620_v26 = vpop.f32.mrf.mxu1  ;;  %16836 = vst [vmem:[#allocation49_spill] sm:$0xff] %v15343_v22 }
 0x149   :  { %v3572_v45 = vadd.f32 %v3571_v44, %v3523_v41  ;;  %16837 = vst [vmem:[#allocation50_spill] sm:$0xff] %v15345_v17  ;;  %v3528_v44 = vadd.f32 %v3527_v49, %v3478_v46 }
 0x14b   :  { %v15336_v50 = vadd.f32 %v3620_v26, %v3572_v45 }
 0x150   :  { %v3574_v4 = vpop.f32.mrf.mxu0  ;;  %v3623_v5 = vpop.f32.mrf.mxu1 }
 0x151   :  { %v3575_v11 = vadd.f32 %v3574_v4, %v15301_v8 }
 0x153   :  { %v15347_v27 = vadd.f32 %v3623_v5, %v3575_v11  ;;  %v13665_v5 = vld [vmem:[#allocation3 + $0x204] sm:$0xf0]  ;;  %v13656_v11 = vld [vmem:[#allocation3 + $0x1c4] sm:$0xf] }
 0x154   :  { %3676 = vmatmul.bf16.gmra.mxu2 %v15339_v13  ;;  %3725 = vmatmul.bf16.gmra.mxu3 %v15341_v9  ;;  %v3481_v8 = vpop.f32.mrf.mxu2  ;;  %v3530_v29 = vpop.f32.mrf.mxu3  ;;  %v15355_v46 = vor.u32 %v13665_v5, %v9977_v7  ;;  %v15357_v49 = vor.u32 %v13656_v11, %v9979_v40  ;;  %v13683_v40 = vld [vmem:[#allocation3 + $0x294] sm:$0xf0]  ;;  %v10051_v7 = vld [vmem:[#allocation3 + $0x298] sm:$0xf0]  ;;  %v13666_v11 = vld [vmem:[#allocation3 + $0x20c] sm:$0xf0] }
 0x155   :  { %3769 = vmatmul.bf16.gmra.mxu0 %v15343_v22  ;;  %3818 = vmatmul.bf16.gmra.mxu1 %v15345_v17  ;;  %v3531_v41 = vadd.f32 %v3530_v29, %v3481_v8  ;;  %v13639_v22 = vld [vmem:[#allocation3 + $0x13c] sm:$0xf]  ;;  %v9915_v17 = vld [vmem:[#allocation3 + $0x180] sm:$0xf0]  ;;  %v15359_v29 = vor.u32 %v13648_v33, %v9913_v10  ;;  %v9987_v10 = vld [vmem:[#allocation3 + $0x210] sm:$0xf0] }
 0x156   :  { %16838 = vst [vmem:[#allocation51_spill] sm:$0xff] %v15355_v46  ;;  %v11001_v13 = vld [vmem:[#allocation10 + $0x550] sm:$0xf] }
 0x157   :  { %16839 = vst [vmem:[#allocation52_spill] sm:$0xff] %v15357_v49 }
 0x158   :  { %v3576_v26 = vpop.f32.mrf.mxu0  ;;  %v3625_v45 = vpop.f32.mrf.mxu1  ;;  %16840 = vst [vmem:[#allocation53_spill] sm:$0xff] %v15359_v29 }
 0x159   :  { %v3577_v6 = vadd.f32 %v3576_v26, %v3528_v44  ;;  %v15361_v44 = vor.u32 %v13639_v22, %v9915_v17 }
 0x15b   :  { %v15353_v57 = vadd.f32 %v3625_v45, %v3577_v6  ;;  %16841 = vst [vmem:[#allocation54_spill] sm:$0xff] %v15361_v44 }
 0x15c   :  { %v3483_v1 = vpop.f32.mrf.mxu2  ;;  %v3532_v3 = vpop.f32.mrf.mxu3 }
 0x15d   :  { %v3533_v4 = vadd.f32 %v3532_v3, %v3483_v1 }
 0x160   :  { %v3579_v31 = vpop.f32.mrf.mxu0  ;;  %v3628_v30 = vpop.f32.mrf.mxu1 }
 0x161   :  { %v3580_v8 = vadd.f32 %v3579_v31, %v3531_v41 }
 0x163   :  { %v15363_v26 = vadd.f32 %v3628_v30, %v3580_v8 }
 0x164   :  { %3681 = vmatmul.bf16.gmra.mxu2 %v15355_v46  ;;  %3730 = vmatmul.bf16.gmra.mxu3 %v15357_v49  ;;  %v3486_v45 = vpop.f32.mrf.mxu2  ;;  %v3535_v31 = vpop.f32.mrf.mxu3  ;;  %v10057_v49 = vld [vmem:[#allocation3 + $0x258] sm:$0xf] }
 0x165   :  { %3774 = vmatmul.bf16.gmra.mxu0 %v15359_v29  ;;  %3823 = vmatmul.bf16.gmra.mxu1 %v15361_v44  ;;  %v3536_v41 = vadd.f32 %v3535_v31, %v3486_v45  ;;  %v10049_v29 = vld [vmem:[#allocation3 + $0x250] sm:$0xf]  ;;  %v15373_v45 = vor.u32 %v13674_v18, %v10051_v7  ;;  %v9985_v31 = vld [vmem:[#allocation3 + $0x1c8] sm:$0xf] }
 0x166   :  { %v15371_v39 = vor.u32 %v13683_v40, %v10049_v29  ;;  %v10889_v18 = vld [vmem:[#allocation10 + $0x470] sm:$0xf] }
 0x167   :  { %16843 = vst [vmem:[#allocation56_spill] sm:$0xff] %v15373_v45 }
 0x168   :  { %v3581_v6 = vpop.f32.mrf.mxu0  ;;  %v3630_v1 = vpop.f32.mrf.mxu1  ;;  %16842 = vst [vmem:[#allocation55_spill] sm:$0xff] %v15371_v39 }
 0x169   :  { %v3582_v3 = vadd.f32 %v3581_v6, %v3533_v4  ;;  %v13657_v4 = vld [vmem:[#allocation3 + $0x1cc] sm:$0xf]  ;;  %v15375_v6 = vor.u32 %v13666_v11, %v9985_v31  ;;  %v13903_v11 = vld [vmem:[#allocation10 + $0x4f4] sm:$0xf0] }
 0x16b   :  { %v15369_v5 = vadd.f32 %v3630_v1, %v3582_v3  ;;  %16844 = vst [vmem:[#allocation57_spill] sm:$0xff] %v15375_v6  ;;  %v15377_v1 = vor.u32 %v13657_v4, %v9987_v10 }
 0x16c   :  { %v3488_v22 = vpop.f32.mrf.mxu2  ;;  %v3537_v17 = vpop.f32.mrf.mxu3 }
 0x16d   :  { %v3538_v30 = vadd.f32 %v3537_v17, %v3488_v22  ;;  %16845 = vst [vmem:[#allocation58_spill] sm:$0xff] %v15377_v1  ;;  %v13887_v22 = vld [vmem:[#allocation10 + $0x474] sm:$0xf0]  ;;  %v10953_v17 = vld [vmem:[#allocation10 + $0x4f0] sm:$0xf] }
 0x16e   :  { %v10890_v7 = vor.u32 %v13887_v22, %v10889_v18  ;;  %v10954_v10 = vor.u32 %v13903_v11, %v10953_v17  ;;  %v13692_v18 = vld [vmem:[#allocation3 + $0x2e4] sm:$0xf]  ;;  %v10873_v22 = vld [vmem:[#allocation10 + $0x450] sm:$0xf]  ;;  %v13883_v17 = vld [vmem:[#allocation10 + $0x454] sm:$0xf0] }
 0x16f   :  { %v15389_v51 = vor.u32 %v13692_v18, %v10123_v12  ;;  %v13879_v12 = vld [vmem:[#allocation10 + $0x434] sm:$0xf0] }
 0x170   :  { %v3584_v33 = vpop.f32.mrf.mxu0  ;;  %v3633_v8 = vpop.f32.mrf.mxu1  ;;  %3854 = vmatpush.bf16.msra.mxu2 %v10890_v7  ;;  %3903 = vmatpush.bf16.msra.mxu3 %v10954_v10  ;;  %v10937_v7 = vld [vmem:[#allocation10 + $0x4d0] sm:$0xf]  ;;  %v10874_v10 = vor.u32 %v13883_v17, %v10873_v22 }
 0x171   :  { %v3585_v44 = vadd.f32 %v3584_v33, %v3536_v41  ;;  %v13885_v33 = vld [vmem:[#allocation10 + $0x464] sm:$0xf0]  ;;  %16847 = vst [vmem:[#allocation60_spill] sm:$0xff] %v15389_v51 }
 0x173   :  { %v15379_v3 = vadd.f32 %v3633_v8, %v3585_v44  ;;  %v10881_v44 = vld [vmem:[#allocation10 + $0x460] sm:$0xf] }
 0x174   :  { %3686 = vmatmul.bf16.gmra.mxu2 %v15371_v39  ;;  %3735 = vmatmul.bf16.gmra.mxu3 %v15373_v45  ;;  %v3491_v29 = vpop.f32.mrf.mxu2  ;;  %v3540_v41 = vpop.f32.mrf.mxu3  ;;  %v10945_v8 = vld [vmem:[#allocation10 + $0x4e0] sm:$0xf]  ;;  %v10882_v56 = vor.u32 %v13885_v33, %v10881_v44  ;;  %v13899_v44 = vld [vmem:[#allocation10 + $0x4d4] sm:$0xf0] }
 0x175   :  { %3779 = vmatmul.bf16.gmra.mxu0 %v15375_v6  ;;  %3828 = vmatmul.bf16.gmra.mxu1 %v15377_v1  ;;  %v3541_v40 = vadd.f32 %v3540_v41, %v3491_v29  ;;  %v13901_v6 = vld [vmem:[#allocation10 + $0x4e4] sm:$0xf0]  ;;  %v10121_v29 = vld [vmem:[#allocation3 + $0x2e0] sm:$0xf] }
 0x176   :  { %v10946_v1 = vor.u32 %v13901_v6, %v10945_v8  ;;  %3855 = vmatpush.bf16.msra.mxu2 %v10882_v56  ;;  %v13701_v41 = vld [vmem:[#allocation3 + $0x324] sm:$0xf0]  ;;  %v13684_v33 = vld [vmem:[#allocation3 + $0x29c] sm:$0xf0]  ;;  %v10059_v6 = vld [vmem:[#allocation3 + $0x2a0] sm:$0xf0] }
 0x177   :  { %v10865_v56 = vld [vmem:[#allocation10 + $0x440] sm:$0xf]  ;;  %v13881_v8 = vld [vmem:[#allocation10 + $0x444] sm:$0xf0]  ;;  %v15387_v52 = vor.u32 %v13701_v41, %v10121_v29  ;;  %v15391_v17 = vor.u32 %v13684_v33, %v10057_v49  ;;  %v10857_v29 = vld [vmem:[#allocation10 + $0x430] sm:$0xf] }
 0x178   :  { %v3586_v31 = vpop.f32.mrf.mxu0  ;;  %v3635_v4 = vpop.f32.mrf.mxu1  ;;  %3904 = vmatpush.bf16.msra.mxu3 %v10946_v1  ;;  %v10921_v41 = vld [vmem:[#allocation10 + $0x4b0] sm:$0xf]  ;;  %v13895_v49 = vld [vmem:[#allocation10 + $0x4b4] sm:$0xf0] }
 0x179   :  { %v3587_v55 = vadd.f32 %v3586_v31, %v3538_v30  ;;  %v13675_v30 = vld [vmem:[#allocation3 + $0x25c] sm:$0xf]  ;;  %v10929_v31 = vld [vmem:[#allocation10 + $0x4c0] sm:$0xf]  ;;  %16846 = vst [vmem:[#allocation59_spill] sm:$0xff] %v15387_v52 }
 0x17a   :  { %3856 = vmatpush.bf16.msra.mxu2 %v10874_v10  ;;  %16848 = vst [vmem:[#allocation61_spill] sm:$0xff] %v15391_v17  ;;  %v15393_v9 = vor.u32 %v13675_v30, %v10059_v6  ;;  %v10922_v10 = vor.u32 %v13895_v49, %v10921_v41  ;;  %v11017_v33 = vld [vmem:[#allocation10 + $0x570] sm:$0xf]  ;;  %v13919_v30 = vld [vmem:[#allocation10 + $0x574] sm:$0xf0] }
 0x17b   :  { %v15385_v45 = vadd.f32 %v3635_v4, %v3587_v55  ;;  %v10938_v55 = vor.u32 %v13899_v44, %v10937_v7  ;;  %v13897_v4 = vld [vmem:[#allocation10 + $0x4c4] sm:$0xf0]  ;;  %v11081_v6 = vld [vmem:[#allocation10 + $0x5f0] sm:$0xf]  ;;  %v13719_v49 = vld [vmem:[#allocation3 + $0x3b4] sm:$0xf0] }
 0x17c   :  { %v3493_v39 = vpop.f32.mrf.mxu2  ;;  %v3542_v16 = vpop.f32.mrf.mxu3  ;;  %16849 = vst [vmem:[#allocation62_spill] sm:$0xff] %v15393_v9 }
 0x17d   :  { %v3543_v11 = vadd.f32 %v3542_v16, %v3493_v39  ;;  %3905 = vmatpush.bf16.msra.mxu3 %v10938_v55  ;;  %v10866_v16 = vor.u32 %v13881_v8, %v10865_v56  ;;  %v10930_v39 = vor.u32 %v13897_v4, %v10929_v31  ;;  %v11018_v55 = vor.u32 %v13919_v30, %v11017_v33  ;;  %v13935_v56 = vld [vmem:[#allocation10 + $0x5f4] sm:$0xf0]  ;;  %v10849_v8 = vld [vmem:[#allocation10 + $0x420] sm:$0xf]  ;;  %v13877_v31 = vld [vmem:[#allocation10 + $0x424] sm:$0xf0] }
 0x17e   :  { %v13702_v33 = vld [vmem:[#allocation3 + $0x32c] sm:$0xf0]  ;;  %v11009_v30 = vld [vmem:[#allocation10 + $0x560] sm:$0xf] }
 0x17f   :  { %3857 = vmatpush.bf16.msra.mxu2 %v10866_v16  ;;  %v11082_v16 = vor.u32 %v13935_v56, %v11081_v6  ;;  %3952 = vmatpush.bf16.msrb.mxu0 %v11018_v55  ;;  %v10841_v6 = vld [vmem:[#allocation10 + $0x410] sm:$0xf]  ;;  %v13875_v56 = vld [vmem:[#allocation10 + $0x414] sm:$0xf0] }
 0x181   :  { %v3589_v46 = vpop.f32.mrf.mxu0  ;;  %v3638_v1 = vpop.f32.mrf.mxu1  ;;  %3906 = vmatpush.bf16.msra.mxu3 %v10930_v39  ;;  %v10850_v39 = vor.u32 %v13877_v31, %v10849_v8  ;;  %4001 = vmatpush.bf16.msrb.mxu1 %v11082_v16  ;;  %v10129_v8 = vld [vmem:[#allocation3 + $0x2e8] sm:$0xf]  ;;  %v10131_v31 = vld [vmem:[#allocation3 + $0x330] sm:$0xf0]  ;;  %v10842_v16 = vor.u32 %v13875_v56, %v10841_v6  ;;  %v10897_v56 = vld [vmem:[#allocation10 + $0x480] sm:$0xf] }
 0x182   :  { %v3590_v22 = vadd.f32 %v3589_v46, %v3541_v40  ;;  %v10858_v46 = vor.u32 %v13879_v12, %v10857_v29  ;;  %v13893_v29 = vld [vmem:[#allocation10 + $0x4a4] sm:$0xf0] }
 0x184   :  { %3691 = vmatmul.bf16.gmra.mxu2 %v15387_v52  ;;  %3740 = vmatmul.bf16.gmra.mxu3 %v15389_v51  ;;  %v15397_v7 = vadd.f32 %v3638_v1, %v3590_v22  ;;  %v10913_v22 = vld [vmem:[#allocation10 + $0x4a0] sm:$0xf]  ;;  %v10193_v51 = vld [vmem:[#allocation3 + $0x370] sm:$0xf]  ;;  %v13710_v52 = vld [vmem:[#allocation3 + $0x374] sm:$0xf] }
 0x185   :  { %3784 = vmatmul.bf16.gmra.mxu0 %v15391_v17  ;;  %3833 = vmatmul.bf16.gmra.mxu1 %v15393_v9  ;;  %v10914_v41 = vor.u32 %v13893_v29, %v10913_v22  ;;  %v13917_v9 = vld [vmem:[#allocation10 + $0x564] sm:$0xf0]  ;;  %v11073_v17 = vld [vmem:[#allocation10 + $0x5e0] sm:$0xf]  ;;  %v13891_v22 = vld [vmem:[#allocation10 + $0x494] sm:$0xf0] }
 0x186   :  { %v3496_v40 = vpop.f32.mrf.mxu2  ;;  %v3545_v18 = vpop.f32.mrf.mxu3  ;;  %3858 = vmatpush.bf16.msra.mxu2 %v10858_v46  ;;  %3907 = vmatpush.bf16.msra.mxu3 %v10922_v10  ;;  %v11010_v46 = vor.u32 %v13917_v9, %v11009_v30  ;;  %v13933_v10 = vld [vmem:[#allocation10 + $0x5e4] sm:$0xf0]  ;;  %v10833_v30 = vld [vmem:[#allocation10 + $0x400] sm:$0xf] }
 0x187   :  { %v15401_v44 = vadd.f32 %v3545_v18, %v3496_v40  ;;  %v10195_v40 = vld [vmem:[#allocation3 + $0x3b8] sm:$0xf0] }
 0x188   :  { %3953 = vmatpush.bf16.msrb.mxu0 %v11010_v46  ;;  %v15407_v9 = vor.u32 %v13710_v52, %v10195_v40  ;;  %v11002_v46 = vor.u32 %v13915_v2, %v11001_v13  ;;  %v10834_v52 = vor.u32 %v13873_v25, %v10833_v30  ;;  %v10993_v2 = vld [vmem:[#allocation10 + $0x540] sm:$0xf]  ;;  %v13927_v30 = vld [vmem:[#allocation10 + $0x5b4] sm:$0xf0] }
 0x189   :  { %v3591_v4 = vpop.f32.mrf.mxu0  ;;  %v3640_v1 = vpop.f32.mrf.mxu1  ;;  %v11057_v13 = vld [vmem:[#allocation10 + $0x5c0] sm:$0xf] }
 0x18a   :  { %v3592_v12 = vadd.f32 %v3591_v4, %v3543_v11  ;;  %3859 = vmatpush.bf16.msra.mxu2 %v10850_v39  ;;  %3908 = vmatpush.bf16.msra.mxu3 %v10914_v41  ;;  %v11074_v4 = vor.u32 %v13933_v10, %v11073_v17  ;;  %v15405_v39 = vor.u32 %v13719_v49, %v10193_v51  ;;  %v13931_v41 = vld [vmem:[#allocation10 + $0x5d4] sm:$0xf0]  ;;  %v13693_v10 = vld [vmem:[#allocation3 + $0x2ec] sm:$0xf] }
 0x18b   :  { %16851 = vst [vmem:[#allocation64_spill] sm:$0xff] %v15407_v9  ;;  %v15409_v17 = vor.u32 %v13702_v33, %v10129_v8  ;;  %v11066_v6 = vor.u32 %v13931_v41, %v11065_v58  ;;  %v15412_v49 = vor.u32 %v13693_v10, %v10131_v31  ;;  %v13913_v58 = vld [vmem:[#allocation10 + $0x544] sm:$0xf0] }
 0x18c   :  { %v15403_v18 = vadd.f32 %v3640_v1, %v3592_v12  ;;  %v10905_v1 = vld [vmem:[#allocation10 + $0x490] sm:$0xf]  ;;  %16850 = vst [vmem:[#allocation63_spill] sm:$0xff] %v15405_v39  ;;  %4002 = vmatpush.bf16.msrb.mxu1 %v11074_v4  ;;  %3954 = vmatpush.bf16.msrb.mxu0 %v11002_v46 }
 0x18d   :  { %v10906_v12 = vor.u32 %v13891_v22, %v10905_v1  ;;  %16852 = vst [vmem:[#allocation65_spill] sm:$0xff] %v15409_v17  ;;  %v13911_v1 = vld [vmem:[#allocation10 + $0x534] sm:$0xf0]  ;;  %v11049_v22 = vld [vmem:[#allocation10 + $0x5b0] sm:$0xf] }
 0x18e   :  { %v3498_v11 = vpop.f32.mrf.mxu2  ;;  %v3547_v55 = vpop.f32.mrf.mxu3  ;;  %3860 = vmatpush.bf16.msra.mxu2 %v10842_v16  ;;  %16853 = vst [vmem:[#allocation66_spill] sm:$0xff] %v15412_v49  ;;  %v10985_v16 = vld [vmem:[#allocation10 + $0x530] sm:$0xf]  ;;  %v11050_v10 = vor.u32 %v13927_v30, %v11049_v22  ;;  %v13907_v30 = vld [vmem:[#allocation10 + $0x514] sm:$0xf0] }
 0x18f   :  { %v3548_v29 = vadd.f32 %v3547_v55, %v3498_v11  ;;  %3909 = vmatpush.bf16.msra.mxu3 %v10906_v12  ;;  %v13889_v11 = vld [vmem:[#allocation10 + $0x484] sm:$0xf0]  ;;  %v10986_v41 = vor.u32 %v13911_v1, %v10985_v16 }
 0x190   :  { %v10898_v40 = vor.u32 %v13889_v11, %v10897_v56  ;;  %4003 = vmatpush.bf16.msrb.mxu1 %v11066_v6  ;;  %v10977_v6 = vld [vmem:[#allocation10 + $0x520] sm:$0xf]  ;;  %v13909_v56 = vld [vmem:[#allocation10 + $0x524] sm:$0xf0] }
 0x191   :  { %v3594_v21 = vpop.f32.mrf.mxu0  ;;  %v3643_v32 = vpop.f32.mrf.mxu1  ;;  %v11041_v11 = vld [vmem:[#allocation10 + $0x5a0] sm:$0xf] }
 0x192   :  { %v3595_v51 = vadd.f32 %v3594_v21, %v15401_v44  ;;  %v10994_v21 = vor.u32 %v13913_v58, %v10993_v2  ;;  %v13929_v44 = vld [vmem:[#allocation10 + $0x5c4] sm:$0xf0]  ;;  %3861 = vmatpush.bf16.msra.mxu2 %v10834_v52 }
 0x193   :  { %3910 = vmatpush.bf16.msra.mxu3 %v10898_v40  ;;  %v11058_v8 = vor.u32 %v13929_v44, %v11057_v13  ;;  %v13737_v52 = vld [vmem:[#allocation3 + $0x444] sm:$0xf0]  ;;  %v10978_v40 = vor.u32 %v13909_v56, %v10977_v6  ;;  %v10267_v44 = vld [vmem:[#allocation3 + $0x448] sm:$0xf0] }
 0x194   :  { %3696 = vmatmul.bf16.gmra.mxu2 %v15405_v39  ;;  %3745 = vmatmul.bf16.gmra.mxu3 %v15407_v9  ;;  %v15416_v55 = vadd.f32 %v3643_v32, %v3595_v51  ;;  %v10265_v51 = vld [vmem:[#allocation3 + $0x400] sm:$0xf]  ;;  %v13925_v2 = vld [vmem:[#allocation10 + $0x5a4] sm:$0xf0] }
 0x195   :  { %3789 = vmatmul.bf16.gmra.mxu0 %v15409_v17  ;;  %3838 = vmatmul.bf16.gmra.mxu1 %v15412_v49  ;;  %v15422_v22 = vor.u32 %v13737_v52, %v10265_v51  ;;  %v13961_v9 = vld [vmem:[#allocation10 + $0x6c4] sm:$0xf0] }
 0x196   :  { %v3501_v33 = vpop.f32.mrf.mxu2  ;;  %v3550_v25 = vpop.f32.mrf.mxu3  ;;  %3955 = vmatpush.bf16.msrb.mxu0 %v10994_v21  ;;  %4004 = vmatpush.bf16.msrb.mxu1 %v11058_v8  ;;  %v13728_v21 = vld [vmem:[#allocation3 + $0x404] sm:$0xf]  ;;  %v13720_v8 = vld [vmem:[#allocation3 + $0x3bc] sm:$0xf0] }
 0x197   :  { %v3551_v31 = vadd.f32 %v3550_v25, %v3501_v33  ;;  %v10201_v33 = vld [vmem:[#allocation3 + $0x378] sm:$0xf]  ;;  %16854 = vst [vmem:[#allocation67_spill] sm:$0xff] %v15422_v22 }
 0x198   :  { %v15426_v56 = vor.u32 %v13720_v8, %v10201_v33 }
 0x199   :  { %v3596_v4 = vpop.f32.mrf.mxu0  ;;  %v3645_v32 = vpop.f32.mrf.mxu1 }
 0x19a   :  { %v3597_v12 = vadd.f32 %v3596_v4, %v3548_v29  ;;  %3956 = vmatpush.bf16.msrb.mxu0 %v10986_v41  ;;  %4005 = vmatpush.bf16.msrb.mxu1 %v11050_v10  ;;  %v11042_v29 = vor.u32 %v13925_v2, %v11041_v11  ;;  %v13711_v4 = vld [vmem:[#allocation3 + $0x37c] sm:$0xf]  ;;  %v10969_v41 = vld [vmem:[#allocation10 + $0x510] sm:$0xf]  ;;  %16856 = vst [vmem:[#allocation69_spill] sm:$0xff] %v15426_v56 }
 0x19b   :  { %v11033_v10 = vld [vmem:[#allocation10 + $0x590] sm:$0xf]  ;;  %v10970_v11 = vor.u32 %v13907_v30, %v10969_v41  ;;  %v13923_v2 = vld [vmem:[#allocation10 + $0x594] sm:$0xf0] }
 0x19c   :  { %v15420_v46 = vadd.f32 %v3645_v32, %v3597_v12  ;;  %v10203_v32 = vld [vmem:[#allocation3 + $0x3c0] sm:$0xf0]  ;;  %v15424_v12 = vor.u32 %v13728_v21, %v10267_v44  ;;  %v11034_v51 = vor.u32 %v13923_v2, %v11033_v10  ;;  %v13921_v21 = vld [vmem:[#allocation10 + $0x584] sm:$0xf0] }
 0x19d   :  { %v15428_v49 = vor.u32 %v13711_v4, %v10203_v32  ;;  %v13613_v10 = vld [vmem:[#allocation3 + $0x64] sm:$0xf0] }
 0x19e   :  { %v3503_v58 = vpop.f32.mrf.mxu2  ;;  %v3552_v13 = vpop.f32.mrf.mxu3  ;;  %16855 = vst [vmem:[#allocation68_spill] sm:$0xff] %v15424_v12  ;;  %3957 = vmatpush.bf16.msrb.mxu0 %v10978_v40  ;;  %4006 = vmatpush.bf16.msrb.mxu1 %v11042_v29  ;;  %v10961_v40 = vld [vmem:[#allocation10 + $0x500] sm:$0xf] }
 0x19f   :  { %v3553_v25 = vadd.f32 %v3552_v13, %v3503_v58  ;;  %16857 = vst [vmem:[#allocation70_spill] sm:$0xff] %v15428_v49  ;;  %v13905_v58 = vld [vmem:[#allocation10 + $0x504] sm:$0xf0] }
 0x1a0   :  { %v10962_v13 = vor.u32 %v13905_v58, %v10961_v40  ;;  %v9777_v40 = vld [vmem:[#allocation3 + $0x20] sm:$0xf]  ;;  %v13604_v58 = vld [vmem:[#allocation3 + $0x24] sm:$0xf] }
 0x1a2   :  { %v3599_v16 = vpop.f32.mrf.mxu0  ;;  %v3648_v1 = vpop.f32.mrf.mxu1  ;;  %3958 = vmatpush.bf16.msrb.mxu0 %v10970_v11  ;;  %4007 = vmatpush.bf16.msrb.mxu1 %v11034_v51  ;;  %v13738_v11 = vld [vmem:[#allocation3 + $0x44c] sm:$0xf0]  ;;  %v10275_v51 = vld [vmem:[#allocation3 + $0x450] sm:$0xf0] }
 0x1a3   :  { %v3600_v6 = vadd.f32 %v3599_v16, %v3551_v31  ;;  %v11025_v31 = vld [vmem:[#allocation10 + $0x580] sm:$0xf] }
 0x1a4   :  { %3701 = vmatmul.bf16.gmra.mxu2 %v15422_v22  ;;  %3750 = vmatmul.bf16.gmra.mxu3 %v15424_v12  ;;  %v11026_v29 = vor.u32 %v13921_v21, %v11025_v31  ;;  %v15438_v31 = vor.u32 %v13613_v10, %v9777_v40  ;;  %v13631_v40 = vld [vmem:[#allocation3 + $0xf4] sm:$0xf0]  ;;  %v13945_v12 = vld [vmem:[#allocation10 + $0x644] sm:$0xf0] }
 0x1a5   :  { %v15432_v52 = vadd.f32 %v3648_v1, %v3600_v6  ;;  %3794 = vmatmul.bf16.gmra.mxu0 %v15426_v56  ;;  %3843 = vmatmul.bf16.gmra.mxu1 %v15428_v49  ;;  %v9779_v6 = vld [vmem:[#allocation3 + $0x68] sm:$0xf0] }
 0x1a6   :  { %3959 = vmatpush.bf16.msrb.mxu0 %v10962_v13  ;;  %4008 = vmatpush.bf16.msrb.mxu1 %v11026_v29  ;;  %16858 = vst [vmem:[#allocation71_spill] sm:$0xff] %v15438_v31  ;;  %v15440_v21 = vor.u32 %v13604_v58, %v9779_v6  ;;  %v10273_v13 = vld [vmem:[#allocation3 + $0x408] sm:$0xf]  ;;  %v9851_v58 = vld [vmem:[#allocation3 + $0xf8] sm:$0xf0] }
 0x1a7   :  { %v3506_v44 = vpop.f32.mrf.mxu2  ;;  %v3555_v33 = vpop.f32.mrf.mxu3 }
 0x1a8   :  { %v3556_v8 = vadd.f32 %v3555_v33, %v3506_v44  ;;  %16859 = vst [vmem:[#allocation72_spill] sm:$0xff] %v15440_v21  ;;  %v13729_v44 = vld [vmem:[#allocation3 + $0x40c] sm:$0xf]  ;;  %v15442_v33 = vor.u32 %v13738_v11, %v10273_v13  ;;  %v13614_v13 = vld [vmem:[#allocation3 + $0x6c] sm:$0xf0] }
 0x1a9   :  { %v15444_v29 = vor.u32 %v13729_v44, %v10275_v51  ;;  %v9787_v44 = vld [vmem:[#allocation3 + $0x70] sm:$0xf0] }
 0x1aa   :  { %v3601_v4 = vpop.f32.mrf.mxu0  ;;  %v3650_v32 = vpop.f32.mrf.mxu1  ;;  %16860 = vst [vmem:[#allocation73_spill] sm:$0xff] %v15442_v33 }
 0x1ab   :  { %v3602_v16 = vadd.f32 %v3601_v4, %v3553_v25  ;;  %16861 = vst [vmem:[#allocation74_spill] sm:$0xff] %v15444_v29 }
 0x1ad   :  { %v15436_v1 = vadd.f32 %v3650_v32, %v3602_v16 }
 0x1af   :  { %v3508_v41 = vpop.f32.mrf.mxu2  ;;  %v3557_v30 = vpop.f32.mrf.mxu3 }
 0x1b0   :  { %v3558_v2 = vadd.f32 %v3557_v30, %v3508_v41 }
 0x1b2   :  { %v3604_v49 = vpop.f32.mrf.mxu0  ;;  %v3653_v56 = vpop.f32.mrf.mxu1 }
 0x1b3   :  { %v3605_v25 = vadd.f32 %v3604_v49, %v3556_v8 }
 0x1b4   :  { %3862 = vmatmul.bf16.vlgmr.msra.gmra.mxu2 %v15438_v31  ;;  %3911 = vmatmul.bf16.vlgmr.msra.gmra.mxu3 %v15440_v21 }
 0x1b5   :  { %v15448_v4 = vadd.f32 %v3653_v56, %v3605_v25  ;;  %3799 = vmatmul.bf16.gmra.mxu0 %v15442_v33  ;;  %3848 = vmatmul.bf16.gmra.mxu1 %v15444_v29  ;;  %v9849_v25 = vld [vmem:[#allocation3 + $0xb0] sm:$0xf]  ;;  %v13622_v29 = vld [vmem:[#allocation3 + $0xb4] sm:$0xf] }
 0x1b7   :  { %v3667_v32 = vpop.f32.mrf.mxu2  ;;  %v3716_v16 = vpop.f32.mrf.mxu3 }
 0x1b8   :  { %v3668_v41 = vadd.f32 %v3667_v32, %v15328_v36  ;;  %v15456_v36 = vor.u32 %v13631_v40, %v9849_v25  ;;  %v15458_v32 = vor.u32 %v13622_v29, %v9851_v58  ;;  %v9923_v25 = vld [vmem:[#allocation3 + $0x188] sm:$0xf0] }
 0x1ba   :  { %v3717_v30 = vadd.f32 %v3716_v16, %v3668_v41  ;;  %v3606_v49 = vpop.f32.mrf.mxu0  ;;  %v3655_v8 = vpop.f32.mrf.mxu1  ;;  %16862 = vst [vmem:[#allocation75_spill] sm:$0xff] %v15456_v36  ;;  %v13605_v16 = vld [vmem:[#allocation3 + $0x2c] sm:$0xf] }
 0x1bb   :  { %v3607_v10 = vadd.f32 %v3606_v49, %v3558_v2  ;;  %16863 = vst [vmem:[#allocation76_spill] sm:$0xff] %v15458_v32  ;;  %v9785_v2 = vld [vmem:[#allocation3 + $0x28] sm:$0xf] }
 0x1bc   :  { %v15460_v49 = vor.u32 %v13614_v13, %v9785_v2 }
 0x1bd   :  { %v15453_v6 = vadd.f32 %v3655_v8, %v3607_v10  ;;  %v15462_v8 = vor.u32 %v13605_v16, %v9787_v44  ;;  %v13649_v44 = vld [vmem:[#allocation3 + $0x184] sm:$0xf0]  ;;  %v13632_v16 = vld [vmem:[#allocation3 + $0xfc] sm:$0xf0] }
 0x1be   :  { %16864 = vst [vmem:[#allocation77_spill] sm:$0xff] %v15460_v49 }
 0x1bf   :  { %v3669_v11 = vpop.f32.mrf.mxu2  ;;  %v3718_v51 = vpop.f32.mrf.mxu3  ;;  %16865 = vst [vmem:[#allocation78_spill] sm:$0xff] %v15462_v8 }
 0x1c0   :  { %v3670_v56 = vadd.f32 %v3669_v11, %v15336_v50 }
 0x1c2   :  { %v3719_v33 = vadd.f32 %v3718_v51, %v3670_v56  ;;  %v3765_v17 = vpop.f32.mrf.mxu0  ;;  %v3814_v21 = vpop.f32.mrf.mxu1 }
 0x1c3   :  { %v3766_v41 = vadd.f32 %v3765_v17, %v3717_v30 }
 0x1c4   :  { %3867 = vmatmul.bf16.gmra.mxu2 %v15456_v36  ;;  %3916 = vmatmul.bf16.gmra.mxu3 %v15458_v32  ;;  %v13640_v32 = vld [vmem:[#allocation3 + $0x144] sm:$0xf] }
 0x1c5   :  { %v15466_v50 = vadd.f32 %v3814_v21, %v3766_v41  ;;  %3960 = vmatmul.bf16.vlgmr.msrb.gmra.mxu0 %v15460_v49  ;;  %4009 = vmatmul.bf16.vlgmr.msrb.gmra.mxu1 %v15462_v8  ;;  %v9857_v21 = vld [vmem:[#allocation3 + $0xb8] sm:$0xf]  ;;  %v13623_v41 = vld [vmem:[#allocation3 + $0xbc] sm:$0xf]  ;;  %v9859_v8 = vld [vmem:[#allocation3 + $0x100] sm:$0xf0] }
 0x1c6   :  { %v9921_v49 = vld [vmem:[#allocation3 + $0x140] sm:$0xf] }
 0x1c7   :  { %v3672_v10 = vpop.f32.mrf.mxu2  ;;  %v3721_v29 = vpop.f32.mrf.mxu3 }
 0x1c8   :  { %v3673_v11 = vadd.f32 %v3672_v10, %v15347_v27 }
 0x1ca   :  { %v3722_v51 = vadd.f32 %v3721_v29, %v3673_v11  ;;  %v3767_v17 = vpop.f32.mrf.mxu0  ;;  %v3816_v30 = vpop.f32.mrf.mxu1  ;;  %v15474_v29 = vor.u32 %v13649_v44, %v9921_v49 }
 0x1cb   :  { %v3768_v40 = vadd.f32 %v3767_v17, %v3719_v33  ;;  %v15476_v33 = vor.u32 %v13640_v32, %v9923_v25  ;;  %v15478_v17 = vor.u32 %v13632_v16, %v9857_v21  ;;  %v9995_v16 = vld [vmem:[#allocation3 + $0x218] sm:$0xf0] }
 0x1cc   :  { %16866 = vst [vmem:[#allocation79_spill] sm:$0xff] %v15474_v29 }
 0x1cd   :  { %v15471_v58 = vadd.f32 %v3816_v30, %v3768_v40  ;;  %16867 = vst [vmem:[#allocation80_spill] sm:$0xff] %v15476_v33  ;;  %v15480_v30 = vor.u32 %v13623_v41, %v9859_v8 }
 0x1ce   :  { %16868 = vst [vmem:[#allocation81_spill] sm:$0xff] %v15478_v17 }
 0x1cf   :  { %v3674_v56 = vpop.f32.mrf.mxu2  ;;  %v3723_v13 = vpop.f32.mrf.mxu3  ;;  %16869 = vst [vmem:[#allocation82_spill] sm:$0xff] %v15480_v30 }
 0x1d0   :  { %v3675_v2 = vadd.f32 %v3674_v56, %v15353_v57 }
 0x1d2   :  { %v3724_v36 = vadd.f32 %v3723_v13, %v3675_v2  ;;  %v3770_v27 = vpop.f32.mrf.mxu0  ;;  %v3819_v10 = vpop.f32.mrf.mxu1  ;;  %v13667_v2 = vld [vmem:[#allocation3 + $0x214] sm:$0xf0] }
 0x1d3   :  { %v3771_v11 = vadd.f32 %v3770_v27, %v3722_v51  ;;  %v13650_v27 = vld [vmem:[#allocation3 + $0x18c] sm:$0xf0] }
 0x1d4   :  { %3872 = vmatmul.bf16.gmra.mxu2 %v15474_v29  ;;  %3921 = vmatmul.bf16.gmra.mxu3 %v15476_v33 }
 0x1d5   :  { %v15484_v57 = vadd.f32 %v3819_v10, %v3771_v11  ;;  %3965 = vmatmul.bf16.gmra.mxu0 %v15478_v17  ;;  %4014 = vmatmul.bf16.gmra.mxu1 %v15480_v30  ;;  %v9931_v10 = vld [vmem:[#allocation3 + $0x190] sm:$0xf0]  ;;  %v9993_v11 = vld [vmem:[#allocation3 + $0x1d0] sm:$0xf] }
 0x1d6   :  { %v13658_v30 = vld [vmem:[#allocation3 + $0x1d4] sm:$0xf] }
 0x1d7   :  { %v3677_v40 = vpop.f32.mrf.mxu2  ;;  %v3726_v49 = vpop.f32.mrf.mxu3 }
 0x1d8   :  { %v3678_v32 = vadd.f32 %v3677_v40, %v15363_v26  ;;  %v15492_v26 = vor.u32 %v13667_v2, %v9993_v11  ;;  %v15494_v40 = vor.u32 %v13658_v30, %v9995_v16  ;;  %v10067_v11 = vld [vmem:[#allocation3 + $0x2a8] sm:$0xf0] }
 0x1da   :  { %v3727_v56 = vadd.f32 %v3726_v49, %v3678_v32  ;;  %v3772_v51 = vpop.f32.mrf.mxu0  ;;  %v3821_v13 = vpop.f32.mrf.mxu1  ;;  %16870 = vst [vmem:[#allocation83_spill] sm:$0xff] %v15492_v26  ;;  %v13641_v49 = vld [vmem:[#allocation3 + $0x14c] sm:$0xf] }
 0x1db   :  { %v3773_v44 = vadd.f32 %v3772_v51, %v3724_v36  ;;  %16871 = vst [vmem:[#allocation84_spill] sm:$0xff] %v15494_v40  ;;  %v9929_v36 = vld [vmem:[#allocation3 + $0x148] sm:$0xf] }
 0x1dc   :  { %v15496_v51 = vor.u32 %v13650_v27, %v9929_v36 }
 0x1dd   :  { %v15489_v8 = vadd.f32 %v3821_v13, %v3773_v44  ;;  %v15498_v13 = vor.u32 %v13641_v49, %v9931_v10  ;;  %v13685_v10 = vld [vmem:[#allocation3 + $0x2a4] sm:$0xf0]  ;;  %v13668_v49 = vld [vmem:[#allocation3 + $0x21c] sm:$0xf0] }
 0x1de   :  { %16872 = vst [vmem:[#allocation85_spill] sm:$0xff] %v15496_v51 }
 0x1df   :  { %v3679_v25 = vpop.f32.mrf.mxu2  ;;  %v3728_v21 = vpop.f32.mrf.mxu3  ;;  %16873 = vst [vmem:[#allocation86_spill] sm:$0xff] %v15498_v13 }
 0x1e0   :  { %v3680_v41 = vadd.f32 %v3679_v25, %v15369_v5 }
 0x1e2   :  { %v3729_v17 = vadd.f32 %v3728_v21, %v3680_v41  ;;  %v3775_v33 = vpop.f32.mrf.mxu0  ;;  %v3824_v29 = vpop.f32.mrf.mxu1 }
 0x1e3   :  { %v3776_v32 = vadd.f32 %v3775_v33, %v3727_v56 }
 0x1e4   :  { %3877 = vmatmul.bf16.gmra.mxu2 %v15492_v26  ;;  %3926 = vmatmul.bf16.gmra.mxu3 %v15494_v40  ;;  %v13676_v40 = vld [vmem:[#allocation3 + $0x264] sm:$0xf] }
 0x1e5   :  { %v15502_v5 = vadd.f32 %v3824_v29, %v3776_v32  ;;  %3970 = vmatmul.bf16.gmra.mxu0 %v15496_v51  ;;  %4019 = vmatmul.bf16.gmra.mxu1 %v15498_v13  ;;  %v10001_v29 = vld [vmem:[#allocation3 + $0x1d8] sm:$0xf]  ;;  %v13659_v32 = vld [vmem:[#allocation3 + $0x1dc] sm:$0xf]  ;;  %v10003_v13 = vld [vmem:[#allocation3 + $0x220] sm:$0xf0] }
 0x1e6   :  { %v10065_v51 = vld [vmem:[#allocation3 + $0x260] sm:$0xf] }
 0x1e7   :  { %v3682_v44 = vpop.f32.mrf.mxu2  ;;  %v3731_v30 = vpop.f32.mrf.mxu3 }
 0x1e8   :  { %v3683_v25 = vadd.f32 %v3682_v44, %v15379_v3 }
 0x1ea   :  { %v3732_v21 = vadd.f32 %v3731_v30, %v3683_v25  ;;  %v3777_v33 = vpop.f32.mrf.mxu0  ;;  %v3826_v56 = vpop.f32.mrf.mxu1  ;;  %v15510_v30 = vor.u32 %v13685_v10, %v10065_v51  ;;  %v13951_v51 = vld [vmem:[#allocation10 + $0x674] sm:$0xf0] }
 0x1eb   :  { %v3778_v2 = vadd.f32 %v3777_v33, %v3729_v17  ;;  %v15512_v17 = vor.u32 %v13676_v40, %v10067_v11  ;;  %v15514_v33 = vor.u32 %v13668_v49, %v10001_v29 }
 0x1ec   :  { %16874 = vst [vmem:[#allocation87_spill] sm:$0xff] %v15510_v30 }
 0x1ed   :  { %v15507_v16 = vadd.f32 %v3826_v56, %v3778_v2  ;;  %16875 = vst [vmem:[#allocation88_spill] sm:$0xff] %v15512_v17  ;;  %v15516_v56 = vor.u32 %v13659_v32, %v10003_v13  ;;  %v11145_v2 = vld [vmem:[#allocation10 + $0x670] sm:$0xf]  ;;  %v11137_v32 = vld [vmem:[#allocation10 + $0x660] sm:$0xf] }
 0x1ee   :  { %16876 = vst [vmem:[#allocation89_spill] sm:$0xff] %v15514_v33  ;;  %v11146_v40 = vor.u32 %v13951_v51, %v11145_v2  ;;  %v11129_v2 = vld [vmem:[#allocation10 + $0x650] sm:$0xf]  ;;  %v13947_v51 = vld [vmem:[#allocation10 + $0x654] sm:$0xf0] }
 0x1ef   :  { %v3684_v41 = vpop.f32.mrf.mxu2  ;;  %v3733_v27 = vpop.f32.mrf.mxu3  ;;  %16877 = vst [vmem:[#allocation90_spill] sm:$0xff] %v15516_v56 }
 0x1f0   :  { %v3685_v36 = vadd.f32 %v3684_v41, %v15385_v45  ;;  %v11209_v41 = vld [vmem:[#allocation10 + $0x6f0] sm:$0xf]  ;;  %4050 = vmatpush.bf16.msrb.mxu2 %v11146_v40  ;;  %v13963_v40 = vld [vmem:[#allocation10 + $0x6d4] sm:$0xf0] }
 0x1f2   :  { %v3734_v26 = vadd.f32 %v3733_v27, %v3685_v36  ;;  %v3780_v3 = vpop.f32.mrf.mxu0  ;;  %v3829_v44 = vpop.f32.mrf.mxu1  ;;  %v13967_v27 = vld [vmem:[#allocation10 + $0x6f4] sm:$0xf0] }
 0x1f3   :  { %v3781_v25 = vadd.f32 %v3780_v3, %v3732_v21  ;;  %v11210_v11 = vor.u32 %v13967_v27, %v11209_v41  ;;  %v13949_v3 = vld [vmem:[#allocation10 + $0x664] sm:$0xf0]  ;;  %v11193_v41 = vld [vmem:[#allocation10 + $0x6d0] sm:$0xf] }
 0x1f4   :  { %3882 = vmatmul.bf16.gmra.mxu2 %v15510_v30  ;;  %3931 = vmatmul.bf16.gmra.mxu3 %v15512_v17 }
 0x1f5   :  { %v15520_v45 = vadd.f32 %v3829_v44, %v3781_v25  ;;  %3975 = vmatmul.bf16.gmra.mxu0 %v15514_v33  ;;  %4024 = vmatmul.bf16.gmra.mxu1 %v15516_v56  ;;  %v11201_v44 = vld [vmem:[#allocation10 + $0x6e0] sm:$0xf]  ;;  %v11138_v56 = vor.u32 %v13949_v3, %v11137_v32  ;;  %v13965_v33 = vld [vmem:[#allocation10 + $0x6e4] sm:$0xf0]  ;;  %v10075_v32 = vld [vmem:[#allocation3 + $0x2b0] sm:$0xf0] }
 0x1f6   :  { %4099 = vmatpush.bf16.msrb.mxu3 %v11210_v11  ;;  %v11202_v17 = vor.u32 %v13965_v33, %v11201_v44  ;;  %v10139_v11 = vld [vmem:[#allocation3 + $0x338] sm:$0xf0]  ;;  %v10137_v33 = vld [vmem:[#allocation3 + $0x2f0] sm:$0xf]  ;;  %v13677_v3 = vld [vmem:[#allocation3 + $0x26c] sm:$0xf] }
 0x1f7   :  { %v3687_v21 = vpop.f32.mrf.mxu2  ;;  %v3736_v10 = vpop.f32.mrf.mxu3  ;;  %4051 = vmatpush.bf16.msrb.mxu2 %v11138_v56 }
 0x1f8   :  { %v3688_v13 = vadd.f32 %v3687_v21, %v15397_v7  ;;  %v11130_v7 = vor.u32 %v13947_v51, %v11129_v2  ;;  %v11121_v51 = vld [vmem:[#allocation10 + $0x640] sm:$0xf] }
 0x1f9   :  { %v11122_v22 = vor.u32 %v13945_v12, %v11121_v51 }
 0x1fa   :  { %v3737_v29 = vadd.f32 %v3736_v10, %v3688_v13  ;;  %v3782_v36 = vpop.f32.mrf.mxu0  ;;  %v3831_v49 = vpop.f32.mrf.mxu1  ;;  %4100 = vmatpush.bf16.msrb.mxu3 %v11202_v17  ;;  %v13703_v10 = vld [vmem:[#allocation3 + $0x334] sm:$0xf0]  ;;  %v11194_v13 = vor.u32 %v13963_v40, %v11193_v41  ;;  %v11185_v41 = vld [vmem:[#allocation10 + $0x6c0] sm:$0xf] }
 0x1fb   :  { %v3783_v25 = vadd.f32 %v3782_v36, %v3734_v26  ;;  %v10073_v26 = vld [vmem:[#allocation3 + $0x268] sm:$0xf]  ;;  %v13686_v36 = vld [vmem:[#allocation3 + $0x2ac] sm:$0xf0]  ;;  %4052 = vmatpush.bf16.msrb.mxu2 %v11130_v7  ;;  %v15528_v17 = vor.u32 %v13703_v10, %v10137_v33  ;;  %v13943_v10 = vld [vmem:[#allocation10 + $0x634] sm:$0xf0] }
 0x1fd   :  { %v15525_v30 = vadd.f32 %v3831_v49, %v3783_v25  ;;  %v13694_v49 = vld [vmem:[#allocation3 + $0x2f4] sm:$0xf]  ;;  %16878 = vst [vmem:[#allocation91_spill] sm:$0xff] %v15528_v17 }
 0x1fe   :  { %v15530_v2 = vor.u32 %v13694_v49, %v10139_v11  ;;  %4101 = vmatpush.bf16.msrb.mxu3 %v11194_v13  ;;  %v13959_v13 = vld [vmem:[#allocation10 + $0x6b4] sm:$0xf0] }
 0x1ff   :  { %v3689_v27 = vpop.f32.mrf.mxu2  ;;  %v3738_v21 = vpop.f32.mrf.mxu3  ;;  %4053 = vmatpush.bf16.msrb.mxu2 %v11122_v22  ;;  %v11105_v22 = vld [vmem:[#allocation10 + $0x620] sm:$0xf] }
 0x200   :  { %v3690_v31 = vadd.f32 %v3689_v27, %v15403_v18  ;;  %16879 = vst [vmem:[#allocation92_spill] sm:$0xff] %v15530_v2  ;;  %v15532_v18 = vor.u32 %v13686_v36, %v10073_v26  ;;  %v15534_v27 = vor.u32 %v13677_v3, %v10075_v32  ;;  %v11273_v3 = vld [vmem:[#allocation10 + $0x770] sm:$0xf] }
 0x202   :  { %v3739_v56 = vadd.f32 %v3738_v21, %v3690_v31  ;;  %v3785_v44 = vpop.f32.mrf.mxu0  ;;  %v3834_v25 = vpop.f32.mrf.mxu1  ;;  %16880 = vst [vmem:[#allocation93_spill] sm:$0xff] %v15532_v18  ;;  %v11186_v31 = vor.u32 %v13961_v9, %v11185_v41  ;;  %v11113_v21 = vld [vmem:[#allocation10 + $0x630] sm:$0xf] }
 0x203   :  { %v3786_v40 = vadd.f32 %v3785_v44, %v3737_v29  ;;  %16881 = vst [vmem:[#allocation94_spill] sm:$0xff] %v15534_v27  ;;  %v11177_v29 = vld [vmem:[#allocation10 + $0x6b0] sm:$0xf]  ;;  %v11114_v11 = vor.u32 %v13943_v10, %v11113_v21  ;;  %v13983_v44 = vld [vmem:[#allocation10 + $0x774] sm:$0xf0] }
 0x204   :  { %3887 = vmatmul.bf16.gmra.mxu2 %v15528_v17  ;;  %3936 = vmatmul.bf16.gmra.mxu3 %v15530_v2  ;;  %v11178_v36 = vor.u32 %v13959_v13, %v11177_v29  ;;  %v11274_v41 = vor.u32 %v13983_v44, %v11273_v3  ;;  %v13939_v3 = vld [vmem:[#allocation10 + $0x614] sm:$0xf0]  ;;  %v10147_v2 = vld [vmem:[#allocation3 + $0x340] sm:$0xf0] }
 0x205   :  { %v15538_v7 = vadd.f32 %v3834_v25, %v3786_v40  ;;  %3980 = vmatmul.bf16.gmra.mxu0 %v15532_v18  ;;  %4029 = vmatmul.bf16.gmra.mxu1 %v15534_v27  ;;  %v11337_v25 = vld [vmem:[#allocation10 + $0x7f0] sm:$0xf]  ;;  %v13999_v40 = vld [vmem:[#allocation10 + $0x7f4] sm:$0xf0]  ;;  %v11169_v27 = vld [vmem:[#allocation10 + $0x6a0] sm:$0xf] }
 0x206   :  { %4102 = vmatpush.bf16.msrb.mxu3 %v11186_v31  ;;  %4054 = vmatpush.bf16.msrb.mxu2 %v11114_v11  ;;  %v13941_v31 = vld [vmem:[#allocation10 + $0x624] sm:$0xf0]  ;;  %v11338_v21 = vor.u32 %v13999_v40, %v11337_v25 }
 0x207   :  { %v3692_v12 = vpop.f32.mrf.mxu2  ;;  %v3741_v26 = vpop.f32.mrf.mxu3  ;;  %v11106_v10 = vor.u32 %v13941_v31, %v11105_v22  ;;  %v13957_v18 = vld [vmem:[#allocation10 + $0x6a4] sm:$0xf0]  ;;  %4148 = vmatpush.bf16.msra.mxu0 %v11274_v41  ;;  %v13955_v31 = vld [vmem:[#allocation10 + $0x694] sm:$0xf0] }
 0x208   :  { %v3693_v32 = vadd.f32 %v3692_v12, %v15416_v55  ;;  %v13721_v55 = vld [vmem:[#allocation3 + $0x3c4] sm:$0xf0]  ;;  %v11170_v13 = vor.u32 %v13957_v18, %v11169_v27  ;;  %v11265_v12 = vld [vmem:[#allocation10 + $0x760] sm:$0xf]  ;;  %4197 = vmatpush.bf16.msra.mxu1 %v11338_v21  ;;  %v10211_v40 = vld [vmem:[#allocation3 + $0x3c8] sm:$0xf0] }
 0x209   :  { %v13981_v11 = vld [vmem:[#allocation10 + $0x764] sm:$0xf0]  ;;  %v13704_v27 = vld [vmem:[#allocation3 + $0x33c] sm:$0xf0]  ;;  %v13695_v41 = vld [vmem:[#allocation3 + $0x2fc] sm:$0xf] }
 0x20a   :  { %v3742_v33 = vadd.f32 %v3741_v26, %v3693_v32  ;;  %v3787_v9 = vpop.f32.mrf.mxu0  ;;  %v3836_v49 = vpop.f32.mrf.mxu1  ;;  %4103 = vmatpush.bf16.msrb.mxu3 %v11178_v36  ;;  %v11329_v26 = vld [vmem:[#allocation10 + $0x7e0] sm:$0xf]  ;;  %v10145_v36 = vld [vmem:[#allocation3 + $0x2f8] sm:$0xf]  ;;  %4055 = vmatpush.bf16.msrb.mxu2 %v11106_v10  ;;  %v13997_v32 = vld [vmem:[#allocation10 + $0x7e4] sm:$0xf0] }
 0x20b   :  { %v3788_v51 = vadd.f32 %v3787_v9, %v3739_v56  ;;  %v11266_v56 = vor.u32 %v13981_v11, %v11265_v12  ;;  %v11097_v9 = vld [vmem:[#allocation10 + $0x610] sm:$0xf]  ;;  %v11330_v22 = vor.u32 %v13997_v32, %v11329_v26  ;;  %v10209_v21 = vld [vmem:[#allocation3 + $0x380] sm:$0xf]  ;;  %v13712_v10 = vld [vmem:[#allocation3 + $0x384] sm:$0xf] }
 0x20c   :  { %v15546_v28 = vor.u32 %v13721_v55, %v10209_v21  ;;  %v15548_v20 = vor.u32 %v13712_v10, %v10211_v40  ;;  %v13979_v26 = vld [vmem:[#allocation10 + $0x754] sm:$0xf0]  ;;  %v11321_v32 = vld [vmem:[#allocation10 + $0x7d0] sm:$0xf] }
 0x20d   :  { %v15543_v29 = vadd.f32 %v3836_v49, %v3788_v51  ;;  %v11098_v49 = vor.u32 %v13939_v3, %v11097_v9  ;;  %v11161_v51 = vld [vmem:[#allocation10 + $0x690] sm:$0xf]  ;;  %4149 = vmatpush.bf16.msra.mxu0 %v11266_v56  ;;  %4198 = vmatpush.bf16.msra.mxu1 %v11330_v22  ;;  %v15550_v9 = vor.u32 %v13704_v27, %v10145_v36  ;;  %v13995_v56 = vld [vmem:[#allocation10 + $0x7d4] sm:$0xf0]  ;;  %v11153_v22 = vld [vmem:[#allocation10 + $0x680] sm:$0xf] }
 0x20e   :  { %4104 = vmatpush.bf16.msrb.mxu3 %v11170_v13  ;;  %v11162_v17 = vor.u32 %v13955_v31, %v11161_v51  ;;  %16882 = vst [vmem:[#allocation95_spill] sm:$0xff] %v15546_v28  ;;  %v11257_v13 = vld [vmem:[#allocation10 + $0x750] sm:$0xf]  ;;  %v15552_v3 = vor.u32 %v13695_v41, %v10147_v2  ;;  %v13937_v51 = vld [vmem:[#allocation10 + $0x604] sm:$0xf0]  ;;  %v11322_v55 = vor.u32 %v13995_v56, %v11321_v32 }
 0x20f   :  { %v3694_v44 = vpop.f32.mrf.mxu2  ;;  %v3743_v25 = vpop.f32.mrf.mxu3  ;;  %16883 = vst [vmem:[#allocation96_spill] sm:$0xff] %v15548_v20  ;;  %4056 = vmatpush.bf16.msrb.mxu2 %v11098_v49  ;;  %v13953_v49 = vld [vmem:[#allocation10 + $0x684] sm:$0xf0]  ;;  %v11313_v36 = vld [vmem:[#allocation10 + $0x7c0] sm:$0xf] }
 0x210   :  { %v3695_v18 = vadd.f32 %v3694_v44, %v15420_v46  ;;  %16884 = vst [vmem:[#allocation97_spill] sm:$0xff] %v15550_v9  ;;  %v11258_v44 = vor.u32 %v13979_v26, %v11257_v13  ;;  %v11154_v2 = vor.u32 %v13953_v49, %v11153_v22  ;;  %v13993_v27 = vld [vmem:[#allocation10 + $0x7c4] sm:$0xf0]  ;;  %v11241_v32 = vld [vmem:[#allocation10 + $0x730] sm:$0xf] }
 0x211   :  { %16885 = vst [vmem:[#allocation98_spill] sm:$0xff] %v15552_v3  ;;  %4199 = vmatpush.bf16.msra.mxu1 %v11322_v55  ;;  %v11314_v10 = vor.u32 %v13993_v27, %v11313_v36  ;;  %v11305_v56 = vld [vmem:[#allocation10 + $0x7b0] sm:$0xf]  ;;  %v11233_v49 = vld [vmem:[#allocation10 + $0x720] sm:$0xf] }
 0x212   :  { %v3744_v12 = vadd.f32 %v3743_v25, %v3695_v18  ;;  %v3790_v11 = vpop.f32.mrf.mxu0  ;;  %v3839_v39 = vpop.f32.mrf.mxu1  ;;  %4105 = vmatpush.bf16.msrb.mxu3 %v11162_v17  ;;  %v11089_v25 = vld [vmem:[#allocation10 + $0x600] sm:$0xf]  ;;  %4150 = vmatpush.bf16.msra.mxu0 %v11258_v44  ;;  %v10283_v27 = vld [vmem:[#allocation3 + $0x458] sm:$0xf0] }
 0x213   :  { %v3791_v46 = vadd.f32 %v3790_v11, %v3742_v33  ;;  %v11090_v40 = vor.u32 %v13937_v51, %v11089_v25  ;;  %v11249_v17 = vld [vmem:[#allocation10 + $0x740] sm:$0xf]  ;;  %v13977_v33 = vld [vmem:[#allocation10 + $0x744] sm:$0xf0]  ;;  %v13991_v51 = vld [vmem:[#allocation10 + $0x7b4] sm:$0xf0] }
 0x214   :  { %3892 = vmatmul.bf16.gmra.mxu2 %v15546_v28  ;;  %3941 = vmatmul.bf16.gmra.mxu3 %v15548_v20  ;;  %v11250_v18 = vor.u32 %v13977_v33, %v11249_v17  ;;  %v11306_v55 = vor.u32 %v13991_v51, %v11305_v56  ;;  %v13989_v17 = vld [vmem:[#allocation10 + $0x7a4] sm:$0xf0] }
 0x215   :  { %v15556_v31 = vadd.f32 %v3839_v39, %v3791_v46  ;;  %3985 = vmatmul.bf16.gmra.mxu0 %v15550_v9  ;;  %4034 = vmatmul.bf16.gmra.mxu1 %v15552_v3  ;;  %v13975_v46 = vld [vmem:[#allocation10 + $0x734] sm:$0xf0] }
 0x216   :  { %4057 = vmatpush.bf16.msrb.mxu2 %v11090_v40  ;;  %4106 = vmatpush.bf16.msrb.mxu3 %v11154_v2  ;;  %v11242_v44 = vor.u32 %v13975_v46, %v11241_v32  ;;  %v13973_v40 = vld [vmem:[#allocation10 + $0x724] sm:$0xf0]  ;;  %v11297_v2 = vld [vmem:[#allocation10 + $0x7a0] sm:$0xf]  ;;  %v13987_v3 = vld [vmem:[#allocation10 + $0x794] sm:$0xf0] }
 0x217   :  { %v3697_v41 = vpop.f32.mrf.mxu2  ;;  %v3746_v21 = vpop.f32.mrf.mxu3  ;;  %4151 = vmatpush.bf16.msra.mxu0 %v11250_v18  ;;  %4200 = vmatpush.bf16.msra.mxu1 %v11314_v10  ;;  %v13739_v18 = vld [vmem:[#allocation3 + $0x454] sm:$0xf0]  ;;  %v13722_v10 = vld [vmem:[#allocation3 + $0x3cc] sm:$0xf0]  ;;  %v13713_v32 = vld [vmem:[#allocation3 + $0x38c] sm:$0xf] }
 0x218   :  { %v3698_v39 = vadd.f32 %v3697_v41, %v15432_v52  ;;  %v11234_v52 = vor.u32 %v13973_v40, %v11233_v49  ;;  %v11298_v41 = vor.u32 %v13989_v17, %v11297_v2  ;;  %v13971_v49 = vld [vmem:[#allocation10 + $0x714] sm:$0xf0]  ;;  %v11289_v40 = vld [vmem:[#allocation10 + $0x790] sm:$0xf] }
 0x21a   :  { %v3747_v11 = vadd.f32 %v3746_v21, %v3698_v39  ;;  %v3792_v13 = vpop.f32.mrf.mxu0  ;;  %v3841_v26 = vpop.f32.mrf.mxu1  ;;  %v10219_v39 = vld [vmem:[#allocation3 + $0x3d0] sm:$0xf0] }
 0x21b   :  { %v3793_v25 = vadd.f32 %v3792_v13, %v3744_v12  ;;  %4152 = vmatpush.bf16.msra.mxu0 %v11242_v44  ;;  %4201 = vmatpush.bf16.msra.mxu1 %v11306_v55  ;;  %v10217_v12 = vld [vmem:[#allocation3 + $0x388] sm:$0xf]  ;;  %v10281_v13 = vld [vmem:[#allocation3 + $0x410] sm:$0xf]  ;;  %v15570_v17 = vor.u32 %v13713_v32, %v10219_v39 }
 0x21c   :  { %v15564_v44 = vor.u32 %v13739_v18, %v10281_v13  ;;  %v11225_v55 = vld [vmem:[#allocation10 + $0x710] sm:$0xf] }
 0x21d   :  { %v15561_v22 = vadd.f32 %v3841_v26, %v3793_v25  ;;  %v13730_v26 = vld [vmem:[#allocation3 + $0x414] sm:$0xf]  ;;  %16889 = vst [vmem:[#allocation102_spill] sm:$0xff] %v15570_v17 }
 0x21e   :  { %16886 = vst [vmem:[#allocation99_spill] sm:$0xff] %v15564_v44  ;;  %v15566_v51 = vor.u32 %v13730_v26, %v10283_v27  ;;  %v13969_v27 = vld [vmem:[#allocation10 + $0x704] sm:$0xf0] }
 0x21f   :  { %v3699_v33 = vpop.f32.mrf.mxu2  ;;  %v3748_v36 = vpop.f32.mrf.mxu3  ;;  %4153 = vmatpush.bf16.msra.mxu0 %v11234_v52  ;;  %4202 = vmatpush.bf16.msra.mxu1 %v11298_v41  ;;  %v11217_v52 = vld [vmem:[#allocation10 + $0x700] sm:$0xf] }
 0x220   :  { %v3700_v21 = vadd.f32 %v3699_v33, %v15436_v1  ;;  %16887 = vst [vmem:[#allocation100_spill] sm:$0xff] %v15566_v51  ;;  %v15568_v1 = vor.u32 %v13722_v10, %v10217_v12  ;;  %v11226_v33 = vor.u32 %v13971_v49, %v11225_v55  ;;  %v11218_v41 = vor.u32 %v13969_v27, %v11217_v52  ;;  %v9793_v55 = vld [vmem:[#allocation3 + $0x30] sm:$0xf]  ;;  %v13615_v49 = vld [vmem:[#allocation3 + $0x74] sm:$0xf0] }
 0x221   :  { %v10289_v52 = vld [vmem:[#allocation3 + $0x418] sm:$0xf] }
 0x222   :  { %v3749_v46 = vadd.f32 %v3748_v36, %v3700_v21  ;;  %v3795_v56 = vpop.f32.mrf.mxu0  ;;  %v3844_v25 = vpop.f32.mrf.mxu1  ;;  %16888 = vst [vmem:[#allocation101_spill] sm:$0xff] %v15568_v1  ;;  %v11290_v36 = vor.u32 %v13987_v3, %v11289_v40  ;;  %v13985_v21 = vld [vmem:[#allocation10 + $0x784] sm:$0xf0] }
 0x223   :  { %v3796_v2 = vadd.f32 %v3795_v56, %v3747_v11  ;;  %v11281_v11 = vld [vmem:[#allocation10 + $0x780] sm:$0xf]  ;;  %4154 = vmatpush.bf16.msra.mxu0 %v11226_v33  ;;  %v13606_v33 = vld [vmem:[#allocation3 + $0x34] sm:$0xf] }
 0x224   :  { %3897 = vmatmul.bf16.gmra.mxu2 %v15564_v44  ;;  %3946 = vmatmul.bf16.gmra.mxu3 %v15566_v51  ;;  %v11282_v39 = vor.u32 %v13985_v21, %v11281_v11  ;;  %v13740_v11 = vld [vmem:[#allocation3 + $0x45c] sm:$0xf0]  ;;  %v13731_v21 = vld [vmem:[#allocation3 + $0x41c] sm:$0xf]  ;;  %v14025_v51 = vld [vmem:[#allocation10 + $0x8c4] sm:$0xf0] }
 0x225   :  { %v15574_v18 = vadd.f32 %v3844_v25, %v3796_v2  ;;  %3990 = vmatmul.bf16.gmra.mxu0 %v15568_v1  ;;  %4039 = vmatmul.bf16.gmra.mxu1 %v15570_v17 }
 0x226   :  { %4203 = vmatpush.bf16.msra.mxu1 %v11290_v36  ;;  %v9795_v36 = vld [vmem:[#allocation3 + $0x78] sm:$0xf0] }
 0x227   :  { %v3702_v12 = vpop.f32.mrf.mxu2  ;;  %v3751_v10 = vpop.f32.mrf.mxu3  ;;  %4155 = vmatpush.bf16.msra.mxu0 %v11218_v41  ;;  %v15582_v41 = vor.u32 %v13615_v49, %v9793_v55 }
 0x228   :  { %v3703_v13 = vadd.f32 %v3702_v12, %v15448_v4  ;;  %v10291_v4 = vld [vmem:[#allocation3 + $0x460] sm:$0xf0] }
 0x229   :  { %16890 = vst [vmem:[#allocation103_spill] sm:$0xff] %v15582_v41 }
 0x22a   :  { %v3752_v26 = vadd.f32 %v3751_v10, %v3703_v13  ;;  %v3797_v3 = vpop.f32.mrf.mxu0  ;;  %v3846_v32 = vpop.f32.mrf.mxu1  ;;  %4204 = vmatpush.bf16.msra.mxu1 %v11282_v39 }
 0x22b   :  { %v3798_v56 = vadd.f32 %v3797_v3, %v3749_v46  ;;  %v15584_v46 = vor.u32 %v13606_v33, %v9795_v36  ;;  %v15586_v3 = vor.u32 %v13740_v11, %v10289_v52  ;;  %v13633_v11 = vld [vmem:[#allocation3 + $0x104] sm:$0xf0] }
 0x22d   :  { %v15579_v25 = vadd.f32 %v3846_v32, %v3798_v56  ;;  %16891 = vst [vmem:[#allocation104_spill] sm:$0xff] %v15584_v46  ;;  %v15588_v32 = vor.u32 %v13731_v21, %v10291_v4  ;;  %v9867_v21 = vld [vmem:[#allocation3 + $0x108] sm:$0xf0] }
 0x22e   :  { %16892 = vst [vmem:[#allocation105_spill] sm:$0xff] %v15586_v3 }
 0x22f   :  { %v3704_v40 = vpop.f32.mrf.mxu2  ;;  %v3753_v2 = vpop.f32.mrf.mxu3  ;;  %16893 = vst [vmem:[#allocation106_spill] sm:$0xff] %v15588_v32 }
 0x230   :  { %v3705_v27 = vadd.f32 %v3704_v40, %v15453_v6 }
 0x232   :  { %v3754_v12 = vadd.f32 %v3753_v2, %v3705_v27  ;;  %v3800_v10 = vpop.f32.mrf.mxu0  ;;  %v3849_v13 = vpop.f32.mrf.mxu1 }
 0x233   :  { %v3801_v39 = vadd.f32 %v3800_v10, %v3752_v26  ;;  %v13616_v10 = vld [vmem:[#allocation3 + $0x7c] sm:$0xf0] }
 0x234   :  { %4058 = vmatmul.bf16.vlgmr.msrb.gmra.mxu2 %v15582_v41  ;;  %4107 = vmatmul.bf16.vlgmr.msrb.gmra.mxu3 %v15584_v46  ;;  %v14009_v46 = vld [vmem:[#allocation10 + $0x844] sm:$0xf0] }
 0x235   :  { %v15592_v6 = vadd.f32 %v3849_v13, %v3801_v39  ;;  %3995 = vmatmul.bf16.gmra.mxu0 %v15586_v3  ;;  %4044 = vmatmul.bf16.gmra.mxu1 %v15588_v32  ;;  %v9803_v13 = vld [vmem:[#allocation3 + $0x80] sm:$0xf0]  ;;  %v9865_v39 = vld [vmem:[#allocation3 + $0xc0] sm:$0xf] }
 0x236   :  { %v13624_v32 = vld [vmem:[#allocation3 + $0xc4] sm:$0xf] }
 0x237   :  { %v3863_v56 = vpop.f32.mrf.mxu2  ;;  %v3912_v55 = vpop.f32.mrf.mxu3 }
 0x238   :  { %v3864_v49 = vadd.f32 %v3863_v56, %v15466_v50  ;;  %v15600_v50 = vor.u32 %v13633_v11, %v9865_v39  ;;  %v15602_v56 = vor.u32 %v13624_v32, %v9867_v21  ;;  %v13651_v39 = vld [vmem:[#allocation3 + $0x194] sm:$0xf0] }
 0x23a   :  { %v3913_v40 = vadd.f32 %v3912_v55, %v3864_v49  ;;  %v3802_v26 = vpop.f32.mrf.mxu0  ;;  %v3851_v2 = vpop.f32.mrf.mxu1  ;;  %16894 = vst [vmem:[#allocation107_spill] sm:$0xff] %v15600_v50  ;;  %v13607_v55 = vld [vmem:[#allocation3 + $0x3c] sm:$0xf] }
 0x23b   :  { %v3803_v33 = vadd.f32 %v3802_v26, %v3754_v12  ;;  %16895 = vst [vmem:[#allocation108_spill] sm:$0xff] %v15602_v56  ;;  %v9801_v12 = vld [vmem:[#allocation3 + $0x38] sm:$0xf] }
 0x23c   :  { %v15604_v26 = vor.u32 %v13616_v10, %v9801_v12  ;;  %v9939_v12 = vld [vmem:[#allocation3 + $0x198] sm:$0xf0] }
 0x23d   :  { %v15597_v36 = vadd.f32 %v3851_v2, %v3803_v33  ;;  %v15606_v2 = vor.u32 %v13607_v55, %v9803_v13 }
 0x23e   :  { %16896 = vst [vmem:[#allocation109_spill] sm:$0xff] %v15604_v26 }
 0x23f   :  { %v3865_v52 = vpop.f32.mrf.mxu2  ;;  %v3914_v27 = vpop.f32.mrf.mxu3  ;;  %16897 = vst [vmem:[#allocation110_spill] sm:$0xff] %v15606_v2 }
 0x240   :  { %v3866_v4 = vadd.f32 %v3865_v52, %v15471_v58 }
 0x242   :  { %v3915_v3 = vadd.f32 %v3914_v27, %v3866_v4  ;;  %v3961_v17 = vpop.f32.mrf.mxu0  ;;  %v4010_v1 = vpop.f32.mrf.mxu1  ;;  %v9937_v4 = vld [vmem:[#allocation3 + $0x150] sm:$0xf] }
 0x243   :  { %v3962_v49 = vadd.f32 %v3961_v17, %v3913_v40 }
 0x244   :  { %4063 = vmatmul.bf16.gmra.mxu2 %v15600_v50  ;;  %4112 = vmatmul.bf16.gmra.mxu3 %v15602_v56  ;;  %v11449_v50 = vld [vmem:[#allocation10 + $0x8d0] sm:$0xf] }
 0x245   :  { %v15610_v58 = vadd.f32 %v4010_v1, %v3962_v49  ;;  %4156 = vmatmul.bf16.vlgmr.msra.gmra.mxu0 %v15604_v26  ;;  %4205 = vmatmul.bf16.vlgmr.msra.gmra.mxu1 %v15606_v2  ;;  %v13642_v1 = vld [vmem:[#allocation3 + $0x154] sm:$0xf]  ;;  %v13634_v49 = vld [vmem:[#allocation3 + $0x10c] sm:$0xf0] }
 0x246   :  { %v9875_v2 = vld [vmem:[#allocation3 + $0x110] sm:$0xf0] }
 0x247   :  { %v3868_v33 = vpop.f32.mrf.mxu2  ;;  %v3917_v32 = vpop.f32.mrf.mxu3 }
 0x248   :  { %v3869_v52 = vadd.f32 %v3868_v33, %v15484_v57  ;;  %v15618_v57 = vor.u32 %v13651_v39, %v9937_v4  ;;  %v15620_v33 = vor.u32 %v13642_v1, %v9939_v12 }
 0x24a   :  { %v3918_v27 = vadd.f32 %v3917_v32, %v3869_v52  ;;  %v3963_v17 = vpop.f32.mrf.mxu0  ;;  %v4012_v40 = vpop.f32.mrf.mxu1  ;;  %16898 = vst [vmem:[#allocation111_spill] sm:$0xff] %v15618_v57  ;;  %v13625_v32 = vld [vmem:[#allocation3 + $0xcc] sm:$0xf] }
 0x24b   :  { %v3964_v11 = vadd.f32 %v3963_v17, %v3915_v3  ;;  %16899 = vst [vmem:[#allocation112_spill] sm:$0xff] %v15620_v33  ;;  %v9873_v3 = vld [vmem:[#allocation3 + $0xc8] sm:$0xf] }
 0x24c   :  { %v15622_v17 = vor.u32 %v13634_v49, %v9873_v3  ;;  %v10011_v49 = vld [vmem:[#allocation3 + $0x228] sm:$0xf0]  ;;  %v13652_v3 = vld [vmem:[#allocation3 + $0x19c] sm:$0xf0] }
 0x24d   :  { %v15615_v21 = vadd.f32 %v4012_v40, %v3964_v11  ;;  %v15624_v40 = vor.u32 %v13625_v32, %v9875_v2  ;;  %v9947_v32 = vld [vmem:[#allocation3 + $0x1a0] sm:$0xf0] }
 0x24e   :  { %16900 = vst [vmem:[#allocation113_spill] sm:$0xff] %v15622_v17 }
 0x24f   :  { %v3870_v10 = vpop.f32.mrf.mxu2  ;;  %v3919_v13 = vpop.f32.mrf.mxu3  ;;  %16901 = vst [vmem:[#allocation114_spill] sm:$0xff] %v15624_v40 }
 0x250   :  { %v3871_v55 = vadd.f32 %v3870_v10, %v15489_v8 }
 0x252   :  { %v3920_v26 = vadd.f32 %v3919_v13, %v3871_v55  ;;  %v3966_v9 = vpop.f32.mrf.mxu0  ;;  %v4015_v56 = vpop.f32.mrf.mxu1  ;;  %v13669_v55 = vld [vmem:[#allocation3 + $0x224] sm:$0xf0] }
 0x253   :  { %v3967_v52 = vadd.f32 %v3966_v9, %v3918_v27 }
 0x254   :  { %4068 = vmatmul.bf16.gmra.mxu2 %v15618_v57  ;;  %4117 = vmatmul.bf16.gmra.mxu3 %v15620_v33 }
 0x255   :  { %v15628_v8 = vadd.f32 %v4015_v56, %v3967_v52  ;;  %4161 = vmatmul.bf16.gmra.mxu0 %v15622_v17  ;;  %4210 = vmatmul.bf16.gmra.mxu1 %v15624_v40  ;;  %v10009_v52 = vld [vmem:[#allocation3 + $0x1e0] sm:$0xf]  ;;  %v13660_v40 = vld [vmem:[#allocation3 + $0x1e4] sm:$0xf] }
 0x257   :  { %v3873_v11 = vpop.f32.mrf.mxu2  ;;  %v3922_v4 = vpop.f32.mrf.mxu3 }
 0x258   :  { %v3874_v10 = vadd.f32 %v3873_v11, %v15502_v5  ;;  %v15636_v5 = vor.u32 %v13669_v55, %v10009_v52  ;;  %v15638_v11 = vor.u32 %v13660_v40, %v10011_v49  ;;  %v13687_v52 = vld [vmem:[#allocation3 + $0x2b4] sm:$0xf0] }
 0x25a   :  { %v3923_v13 = vadd.f32 %v3922_v4, %v3874_v10  ;;  %v3968_v9 = vpop.f32.mrf.mxu0  ;;  %v4017_v27 = vpop.f32.mrf.mxu1  ;;  %16902 = vst [vmem:[#allocation115_spill] sm:$0xff] %v15636_v5  ;;  %v13643_v4 = vld [vmem:[#allocation3 + $0x15c] sm:$0xf] }
 0x25b   :  { %v3969_v39 = vadd.f32 %v3968_v9, %v3920_v26  ;;  %16903 = vst [vmem:[#allocation116_spill] sm:$0xff] %v15638_v11  ;;  %v9945_v26 = vld [vmem:[#allocation3 + $0x158] sm:$0xf] }
 0x25c   :  { %v15640_v9 = vor.u32 %v13652_v3, %v9945_v26  ;;  %v10083_v26 = vld [vmem:[#allocation3 + $0x2b8] sm:$0xf0] }
 0x25d   :  { %v15633_v2 = vadd.f32 %v4017_v27, %v3969_v39  ;;  %v15642_v27 = vor.u32 %v13643_v4, %v9947_v32 }
 0x25e   :  { %16904 = vst [vmem:[#allocation117_spill] sm:$0xff] %v15640_v9 }
 0x25f   :  { %v3875_v1 = vpop.f32.mrf.mxu2  ;;  %v3924_v12 = vpop.f32.mrf.mxu3  ;;  %16905 = vst [vmem:[#allocation118_spill] sm:$0xff] %v15642_v27 }
 0x260   :  { %v3876_v56 = vadd.f32 %v3875_v1, %v15507_v16 }
 0x262   :  { %v3925_v17 = vadd.f32 %v3924_v12, %v3876_v56  ;;  %v3971_v33 = vpop.f32.mrf.mxu0  ;;  %v4020_v57 = vpop.f32.mrf.mxu1  ;;  %v10081_v56 = vld [vmem:[#allocation3 + $0x270] sm:$0xf] }
 0x263   :  { %v3972_v10 = vadd.f32 %v3971_v33, %v3923_v13 }
 0x264   :  { %4073 = vmatmul.bf16.gmra.mxu2 %v15636_v5  ;;  %4122 = vmatmul.bf16.gmra.mxu3 %v15638_v11 }
 0x265   :  { %v15646_v16 = vadd.f32 %v4020_v57, %v3972_v10  ;;  %4166 = vmatmul.bf16.gmra.mxu0 %v15640_v9  ;;  %4215 = vmatmul.bf16.gmra.mxu1 %v15642_v27  ;;  %v13678_v57 = vld [vmem:[#allocation3 + $0x274] sm:$0xf]  ;;  %v13670_v10 = vld [vmem:[#allocation3 + $0x22c] sm:$0xf0] }
 0x266   :  { %v10019_v27 = vld [vmem:[#allocation3 + $0x230] sm:$0xf0] }
 0x267   :  { %v3878_v39 = vpop.f32.mrf.mxu2  ;;  %v3927_v40 = vpop.f32.mrf.mxu3 }
 0x268   :  { %v3879_v1 = vadd.f32 %v3878_v39, %v15520_v45  ;;  %v15654_v45 = vor.u32 %v13687_v52, %v10081_v56  ;;  %v15656_v39 = vor.u32 %v13678_v57, %v10083_v26  ;;  %v14015_v56 = vld [vmem:[#allocation10 + $0x874] sm:$0xf0] }
 0x26a   :  { %v3928_v12 = vadd.f32 %v3927_v40, %v3879_v1  ;;  %v3973_v33 = vpop.f32.mrf.mxu0  ;;  %v4022_v13 = vpop.f32.mrf.mxu1  ;;  %16906 = vst [vmem:[#allocation119_spill] sm:$0xff] %v15654_v45  ;;  %v13661_v40 = vld [vmem:[#allocation3 + $0x1ec] sm:$0xf] }
 0x26b   :  { %v3974_v55 = vadd.f32 %v3973_v33, %v3925_v17  ;;  %16907 = vst [vmem:[#allocation120_spill] sm:$0xff] %v15656_v39  ;;  %v10017_v17 = vld [vmem:[#allocation3 + $0x1e8] sm:$0xf] }
 0x26c   :  { %v15658_v33 = vor.u32 %v13670_v10, %v10017_v17  ;;  %v14013_v17 = vld [vmem:[#allocation10 + $0x864] sm:$0xf0] }
 0x26d   :  { %v15651_v49 = vadd.f32 %v4022_v13, %v3974_v55  ;;  %v15660_v13 = vor.u32 %v13661_v40, %v10019_v27  ;;  %v11401_v55 = vld [vmem:[#allocation10 + $0x870] sm:$0xf]  ;;  %v11457_v40 = vld [vmem:[#allocation10 + $0x8e0] sm:$0xf] }
 0x26e   :  { %16908 = vst [vmem:[#allocation121_spill] sm:$0xff] %v15658_v33  ;;  %v11402_v52 = vor.u32 %v14015_v56, %v11401_v55  ;;  %v11385_v55 = vld [vmem:[#allocation10 + $0x850] sm:$0xf]  ;;  %v14011_v56 = vld [vmem:[#allocation10 + $0x854] sm:$0xf0] }
 0x26f   :  { %v3880_v3 = vpop.f32.mrf.mxu2  ;;  %v3929_v32 = vpop.f32.mrf.mxu3  ;;  %16909 = vst [vmem:[#allocation122_spill] sm:$0xff] %v15660_v13 }
 0x270   :  { %v3881_v4 = vadd.f32 %v3880_v3, %v15525_v30  ;;  %4246 = vmatpush.bf16.msra.mxu2 %v11402_v52 }
 0x272   :  { %v3930_v9 = vadd.f32 %v3929_v32, %v3881_v4  ;;  %v3976_v11 = vpop.f32.mrf.mxu0  ;;  %v4025_v5 = vpop.f32.mrf.mxu1 }
 0x273   :  { %v3977_v1 = vadd.f32 %v3976_v11, %v3928_v12  ;;  %v11465_v11 = vld [vmem:[#allocation10 + $0x8f0] sm:$0xf]  ;;  %v14031_v12 = vld [vmem:[#allocation10 + $0x8f4] sm:$0xf0] }
 0x274   :  { %4078 = vmatmul.bf16.gmra.mxu2 %v15654_v45  ;;  %4127 = vmatmul.bf16.gmra.mxu3 %v15656_v39  ;;  %v11466_v57 = vor.u32 %v14031_v12, %v11465_v11  ;;  %v13705_v11 = vld [vmem:[#allocation3 + $0x344] sm:$0xf0]  ;;  %v10155_v12 = vld [vmem:[#allocation3 + $0x348] sm:$0xf0] }
 0x275   :  { %v15664_v30 = vadd.f32 %v4025_v5, %v3977_v1  ;;  %4171 = vmatmul.bf16.gmra.mxu0 %v15658_v33  ;;  %4220 = vmatmul.bf16.gmra.mxu1 %v15660_v13  ;;  %v11393_v5 = vld [vmem:[#allocation10 + $0x860] sm:$0xf]  ;;  %v14029_v33 = vld [vmem:[#allocation10 + $0x8e4] sm:$0xf0] }
 0x276   :  { %4295 = vmatpush.bf16.msra.mxu3 %v11466_v57  ;;  %v11394_v13 = vor.u32 %v14013_v17, %v11393_v5  ;;  %v11458_v39 = vor.u32 %v14029_v33, %v11457_v40  ;;  %v10091_v5 = vld [vmem:[#allocation3 + $0x2c0] sm:$0xf0]  ;;  %v10153_v33 = vld [vmem:[#allocation3 + $0x300] sm:$0xf]  ;;  %v13679_v17 = vld [vmem:[#allocation3 + $0x27c] sm:$0xf] }
 0x277   :  { %v3883_v3 = vpop.f32.mrf.mxu2  ;;  %v3932_v32 = vpop.f32.mrf.mxu3 }
 0x278   :  { %v3884_v27 = vadd.f32 %v3883_v3, %v15538_v7  ;;  %4247 = vmatpush.bf16.msra.mxu2 %v11394_v13  ;;  %v11386_v7 = vor.u32 %v14011_v56, %v11385_v55  ;;  %v14027_v3 = vld [vmem:[#allocation10 + $0x8d4] sm:$0xf0]  ;;  %v11377_v56 = vld [vmem:[#allocation10 + $0x840] sm:$0xf] }
 0x279   :  { %v11378_v41 = vor.u32 %v14009_v46, %v11377_v56  ;;  %v11433_v46 = vld [vmem:[#allocation10 + $0x8b0] sm:$0xf] }
 0x27a   :  { %v3933_v26 = vadd.f32 %v3932_v32, %v3884_v27  ;;  %v3978_v4 = vpop.f32.mrf.mxu0  ;;  %v4027_v10 = vpop.f32.mrf.mxu1  ;;  %4296 = vmatpush.bf16.msra.mxu3 %v11458_v39  ;;  %v11450_v27 = vor.u32 %v14027_v3, %v11449_v50  ;;  %v15672_v39 = vor.u32 %v13705_v11, %v10153_v33  ;;  %v11441_v50 = vld [vmem:[#allocation10 + $0x8c0] sm:$0xf]  ;;  %v14007_v11 = vld [vmem:[#allocation10 + $0x834] sm:$0xf0]  ;;  %v10225_v56 = vld [vmem:[#allocation3 + $0x390] sm:$0xf] }
 0x27b   :  { %v3979_v1 = vadd.f32 %v3978_v4, %v3930_v9  ;;  %v10089_v9 = vld [vmem:[#allocation3 + $0x278] sm:$0xf]  ;;  %v13688_v4 = vld [vmem:[#allocation3 + $0x2bc] sm:$0xf0] }
 0x27c   :  { %4248 = vmatpush.bf16.msra.mxu2 %v11386_v7  ;;  %16910 = vst [vmem:[#allocation123_spill] sm:$0xff] %v15672_v39  ;;  %v11442_v7 = vor.u32 %v14025_v51, %v11441_v50  ;;  %v13723_v50 = vld [vmem:[#allocation3 + $0x3d4] sm:$0xf0] }
 0x27d   :  { %v15669_v45 = vadd.f32 %v4027_v10, %v3979_v1  ;;  %v13696_v10 = vld [vmem:[#allocation3 + $0x304] sm:$0xf] }
 0x27e   :  { %v15674_v55 = vor.u32 %v13696_v10, %v10155_v12  ;;  %4297 = vmatpush.bf16.msra.mxu3 %v11450_v27 }
 0x27f   :  { %v3885_v32 = vpop.f32.mrf.mxu2  ;;  %v3934_v52 = vpop.f32.mrf.mxu3 }
 0x280   :  { %v3886_v57 = vadd.f32 %v3885_v32, %v15543_v29  ;;  %16911 = vst [vmem:[#allocation124_spill] sm:$0xff] %v15674_v55  ;;  %v15676_v29 = vor.u32 %v13688_v4, %v10089_v9  ;;  %v15678_v32 = vor.u32 %v13679_v17, %v10091_v5  ;;  %4249 = vmatpush.bf16.msra.mxu2 %v11378_v41  ;;  %v14023_v9 = vld [vmem:[#allocation10 + $0x8b4] sm:$0xf0]  ;;  %v13758_v17 = vld [vmem:[#allocation10 + $0x74] sm:$0xf] }
 0x281   :  { %v11434_v5 = vor.u32 %v14023_v9, %v11433_v46  ;;  %v13756_v9 = vld [vmem:[#allocation10 + $0x64] sm:$0xf] }
 0x282   :  { %v3935_v13 = vadd.f32 %v3934_v52, %v3886_v57  ;;  %v3981_v40 = vpop.f32.mrf.mxu0  ;;  %v4030_v1 = vpop.f32.mrf.mxu1  ;;  %16912 = vst [vmem:[#allocation125_spill] sm:$0xff] %v15676_v29  ;;  %4298 = vmatpush.bf16.msra.mxu3 %v11442_v7 }
 0x283   :  { %v3982_v3 = vadd.f32 %v3981_v40, %v3933_v26  ;;  %16913 = vst [vmem:[#allocation126_spill] sm:$0xff] %v15678_v32  ;;  %v11369_v26 = vld [vmem:[#allocation10 + $0x830] sm:$0xf]  ;;  %v10379_v40 = vld [vmem:[#allocation10 + $0x78] sm:$0xf0] }
 0x284   :  { %4083 = vmatmul.bf16.gmra.mxu2 %v15672_v39  ;;  %4132 = vmatmul.bf16.gmra.mxu3 %v15674_v55  ;;  %v11370_v57 = vor.u32 %v14007_v11, %v11369_v26  ;;  %v10382_v7 = vor.u32 %v13758_v17, %v10379_v40  ;;  %v11361_v26 = vld [vmem:[#allocation10 + $0x820] sm:$0xf]  ;;  %v14005_v11 = vld [vmem:[#allocation10 + $0x824] sm:$0xf0]  ;;  %v11353_v17 = vld [vmem:[#allocation10 + $0x810] sm:$0xf] }
 0x285   :  { %v15682_v52 = vadd.f32 %v4030_v1, %v3982_v3  ;;  %4176 = vmatmul.bf16.gmra.mxu0 %v15676_v29  ;;  %4225 = vmatmul.bf16.gmra.mxu1 %v15678_v32  ;;  %v13774_v1 = vld [vmem:[#allocation10 + $0xf4] sm:$0xf]  ;;  %v10443_v32 = vld [vmem:[#allocation10 + $0xf8] sm:$0xf0]  ;;  %v14003_v40 = vld [vmem:[#allocation10 + $0x814] sm:$0xf0] }
 0x286   :  { %4250 = vmatpush.bf16.msra.mxu2 %v11370_v57  ;;  %4299 = vmatpush.bf16.msra.mxu3 %v11434_v5  ;;  %v13714_v3 = vld [vmem:[#allocation3 + $0x394] sm:$0xf]  ;;  %v10227_v29 = vld [vmem:[#allocation3 + $0x3d8] sm:$0xf0]  ;;  %v10446_v55 = vor.u32 %v13774_v1, %v10443_v32  ;;  %v13772_v5 = vld [vmem:[#allocation10 + $0xe4] sm:$0xf]  ;;  %v11354_v1 = vor.u32 %v14003_v40, %v11353_v17 }
 0x287   :  { %v3888_v12 = vpop.f32.mrf.mxu2  ;;  %v3937_v27 = vpop.f32.mrf.mxu3  ;;  %4344 = vmatpush.bf16.msrb.mxu0 %v10382_v7  ;;  %v15692_v7 = vor.u32 %v13714_v3, %v10227_v29  ;;  %v14001_v3 = vld [vmem:[#allocation10 + $0x804] sm:$0xf0]  ;;  %v11409_v40 = vld [vmem:[#allocation10 + $0x880] sm:$0xf] }
 0x288   :  { %v3889_v4 = vadd.f32 %v3888_v12, %v15556_v31  ;;  %v11362_v31 = vor.u32 %v14005_v11, %v11361_v26  ;;  %v11425_v12 = vld [vmem:[#allocation10 + $0x8a0] sm:$0xf]  ;;  %4393 = vmatpush.bf16.msrb.mxu1 %v10446_v55  ;;  %v11417_v26 = vld [vmem:[#allocation10 + $0x890] sm:$0xf]  ;;  %v14019_v11 = vld [vmem:[#allocation10 + $0x894] sm:$0xf0] }
 0x289   :  { %16914 = vst [vmem:[#allocation127_spill] sm:$0xff] %v15692_v7  ;;  %v10163_v55 = vld [vmem:[#allocation3 + $0x350] sm:$0xf0] }
 0x28a   :  { %v3938_v33 = vadd.f32 %v3937_v27, %v3889_v4  ;;  %v3983_v51 = vpop.f32.mrf.mxu0  ;;  %v4032_v10 = vpop.f32.mrf.mxu1  ;;  %v14021_v27 = vld [vmem:[#allocation10 + $0x8a4] sm:$0xf0]  ;;  %v10371_v4 = vld [vmem:[#allocation10 + $0x68] sm:$0xf0]  ;;  %4251 = vmatpush.bf16.msra.mxu2 %v11362_v31  ;;  %v11418_v31 = vor.u32 %v14019_v11, %v11417_v26  ;;  %v13768_v11 = vld [vmem:[#allocation10 + $0xc4] sm:$0xf] }
 0x28b   :  { %v3984_v41 = vadd.f32 %v3983_v51, %v3935_v13  ;;  %v11426_v57 = vor.u32 %v14021_v27, %v11425_v12  ;;  %v10374_v13 = vor.u32 %v13756_v9, %v10371_v4  ;;  %v10435_v51 = vld [vmem:[#allocation10 + $0xe8] sm:$0xf0]  ;;  %v10161_v27 = vld [vmem:[#allocation3 + $0x308] sm:$0xf] }
 0x28c   :  { %v10438_v32 = vor.u32 %v13772_v5, %v10435_v51  ;;  %v13706_v12 = vld [vmem:[#allocation3 + $0x34c] sm:$0xf0]  ;;  %v13697_v9 = vld [vmem:[#allocation3 + $0x30c] sm:$0xf]  ;;  %v10363_v5 = vld [vmem:[#allocation10 + $0x58] sm:$0xf0] }
 0x28d   :  { %v15687_v46 = vadd.f32 %v4032_v10, %v3984_v41  ;;  %4300 = vmatpush.bf16.msra.mxu3 %v11426_v57  ;;  %v15690_v41 = vor.u32 %v13723_v50, %v10225_v56  ;;  %4345 = vmatpush.bf16.msrb.mxu0 %v10374_v13  ;;  %v13754_v57 = vld [vmem:[#allocation10 + $0x54] sm:$0xf]  ;;  %v10427_v56 = vld [vmem:[#allocation10 + $0xd8] sm:$0xf0]  ;;  %v11345_v50 = vld [vmem:[#allocation10 + $0x800] sm:$0xf] }
 0x28e   :  { %4394 = vmatpush.bf16.msrb.mxu1 %v10438_v32  ;;  %4252 = vmatpush.bf16.msra.mxu2 %v11354_v1  ;;  %v13770_v51 = vld [vmem:[#allocation10 + $0xd4] sm:$0xf]  ;;  %v10366_v29 = vor.u32 %v13754_v57, %v10363_v5  ;;  %v11346_v13 = vor.u32 %v14001_v3, %v11345_v50  ;;  %v14017_v32 = vld [vmem:[#allocation10 + $0x884] sm:$0xf0]  ;;  %v10355_v26 = vld [vmem:[#allocation10 + $0x48] sm:$0xf0] }
 0x28f   :  { %v3890_v39 = vpop.f32.mrf.mxu2  ;;  %v3939_v44 = vpop.f32.mrf.mxu3  ;;  %v13741_v3 = vld [vmem:[#allocation3 + $0x464] sm:$0xf0] }
 0x290   :  { %v3891_v10 = vadd.f32 %v3890_v39, %v15561_v22  ;;  %v15694_v22 = vor.u32 %v13706_v12, %v10161_v27  ;;  %v15696_v39 = vor.u32 %v13697_v9, %v10163_v55  ;;  %v10419_v12 = vld [vmem:[#allocation10 + $0xc8] sm:$0xf0] }
 0x291   :  { %4301 = vmatpush.bf16.msra.mxu3 %v11418_v31  ;;  %4346 = vmatpush.bf16.msrb.mxu0 %v10366_v29  ;;  %v10422_v27 = vor.u32 %v13768_v11, %v10419_v12  ;;  %v10297_v29 = vld [vmem:[#allocation3 + $0x420] sm:$0xf]  ;;  %v10339_v12 = vld [vmem:[#allocation10 + $0x28] sm:$0xf0] }
 0x292   :  { %v3940_v4 = vadd.f32 %v3939_v44, %v3891_v10  ;;  %v3986_v20 = vpop.f32.mrf.mxu0  ;;  %v4035_v28 = vpop.f32.mrf.mxu1  ;;  %16915 = vst [vmem:[#allocation128_spill] sm:$0xff] %v15694_v22  ;;  %v10430_v44 = vor.u32 %v13770_v51, %v10427_v56  ;;  %4253 = vmatpush.bf16.msra.mxu2 %v11346_v13  ;;  %v13750_v51 = vld [vmem:[#allocation10 + $0x34] sm:$0xf] }
 0x293   :  { %v3987_v17 = vadd.f32 %v3986_v20, %v3938_v33  ;;  %16916 = vst [vmem:[#allocation129_spill] sm:$0xff] %v15696_v39  ;;  %v11410_v20 = vor.u32 %v14017_v32, %v11409_v40  ;;  %v13752_v33 = vld [vmem:[#allocation10 + $0x44] sm:$0xf]  ;;  %v13766_v56 = vld [vmem:[#allocation10 + $0xb4] sm:$0xf] }
 0x294   :  { %4088 = vmatmul.bf16.gmra.mxu2 %v15690_v41  ;;  %4137 = vmatmul.bf16.gmra.mxu3 %v15692_v7  ;;  %v10358_v10 = vor.u32 %v13752_v33, %v10355_v26  ;;  %v10411_v32 = vld [vmem:[#allocation10 + $0xb8] sm:$0xf0]  ;;  %v10299_v33 = vld [vmem:[#allocation3 + $0x468] sm:$0xf0]  ;;  %v10233_v13 = vld [vmem:[#allocation3 + $0x398] sm:$0xf] }
 0x295   :  { %v15700_v1 = vadd.f32 %v4035_v28, %v3987_v17  ;;  %4181 = vmatmul.bf16.gmra.mxu0 %v15694_v22  ;;  %4230 = vmatmul.bf16.gmra.mxu1 %v15696_v39  ;;  %v10347_v17 = vld [vmem:[#allocation10 + $0x38] sm:$0xf0]  ;;  %v10414_v26 = vor.u32 %v13766_v56, %v10411_v32 }
 0x296   :  { %4395 = vmatpush.bf16.msrb.mxu1 %v10430_v44  ;;  %4302 = vmatpush.bf16.msra.mxu3 %v11410_v20  ;;  %v13732_v44 = vld [vmem:[#allocation3 + $0x424] sm:$0xf]  ;;  %v10350_v40 = vor.u32 %v13750_v51, %v10347_v17  ;;  %v13724_v20 = vld [vmem:[#allocation3 + $0x3dc] sm:$0xf0]  ;;  %v15708_v17 = vor.u32 %v13741_v3, %v10297_v29 }
 0x297   :  { %v3893_v55 = vpop.f32.mrf.mxu2  ;;  %v3942_v31 = vpop.f32.mrf.mxu3  ;;  %4347 = vmatpush.bf16.msrb.mxu0 %v10358_v10  ;;  %v13715_v10 = vld [vmem:[#allocation3 + $0x39c] sm:$0xf]  ;;  %v15710_v22 = vor.u32 %v13732_v44, %v10299_v33  ;;  %v13744_v3 = vld [vmem:[#allocation10 + $0x4] sm:$0xf]  ;;  %v10323_v44 = vld [vmem:[#allocation10 + $0x8] sm:$0xf0] }
 0x298   :  { %v3894_v28 = vadd.f32 %v3893_v55, %v15574_v18  ;;  %v13748_v18 = vld [vmem:[#allocation10 + $0x24] sm:$0xf]  ;;  %v10326_v33 = vor.u32 %v13744_v3, %v10323_v44  ;;  %v9809_v44 = vld [vmem:[#allocation3 + $0x40] sm:$0xf] }
 0x299   :  { %v13764_v55 = vld [vmem:[#allocation10 + $0xa4] sm:$0xf] }
 0x29a   :  { %v3943_v9 = vadd.f32 %v3942_v31, %v3894_v28  ;;  %v3988_v57 = vpop.f32.mrf.mxu0  ;;  %v4037_v5 = vpop.f32.mrf.mxu1  ;;  %4396 = vmatpush.bf16.msrb.mxu1 %v10422_v27  ;;  %v10235_v31 = vld [vmem:[#allocation3 + $0x3e0] sm:$0xf0]  ;;  %v10342_v27 = vor.u32 %v13748_v18, %v10339_v12  ;;  %v13762_v18 = vld [vmem:[#allocation10 + $0x94] sm:$0xf] }
 0x29b   :  { %v3989_v50 = vadd.f32 %v3988_v57, %v3940_v4  ;;  %4348 = vmatpush.bf16.msrb.mxu0 %v10350_v40  ;;  %v10403_v4 = vld [vmem:[#allocation10 + $0xa8] sm:$0xf0]  ;;  %v15714_v56 = vor.u32 %v13715_v10, %v10235_v31  ;;  %v13746_v40 = vld [vmem:[#allocation10 + $0x14] sm:$0xf] }
 0x29c   :  { %v10406_v39 = vor.u32 %v13764_v55, %v10403_v4  ;;  %v10395_v4 = vld [vmem:[#allocation10 + $0x98] sm:$0xf0] }
 0x29d   :  { %v15705_v11 = vadd.f32 %v4037_v5, %v3989_v50  ;;  %v15712_v5 = vor.u32 %v13724_v20, %v10233_v13  ;;  %16918 = vst [vmem:[#allocation131_spill] sm:$0xff] %v15714_v56 }
 0x29e   :  { %4397 = vmatpush.bf16.msrb.mxu1 %v10414_v26  ;;  %v10331_v26 = vld [vmem:[#allocation10 + $0x18] sm:$0xf0] }
 0x29f   :  { %v3895_v28 = vpop.f32.mrf.mxu2  ;;  %v3944_v57 = vpop.f32.mrf.mxu3  ;;  %16917 = vst [vmem:[#allocation130_spill] sm:$0xff] %v15712_v5  ;;  %4349 = vmatpush.bf16.msrb.mxu0 %v10342_v27  ;;  %v10334_v55 = vor.u32 %v13746_v40, %v10331_v26  ;;  %v13742_v40 = vld [vmem:[#allocation3 + $0x46c] sm:$0xf0]  ;;  %v13733_v26 = vld [vmem:[#allocation3 + $0x42c] sm:$0xf] }
 0x2a0   :  { %v3896_v51 = vadd.f32 %v3895_v28, %v15579_v25  ;;  %v10398_v25 = vor.u32 %v13762_v18, %v10395_v4  ;;  %v10307_v18 = vld [vmem:[#allocation3 + $0x470] sm:$0xf0]  ;;  %v13617_v4 = vld [vmem:[#allocation3 + $0x84] sm:$0xf0] }
 0x2a2   :  { %v3945_v50 = vadd.f32 %v3944_v57, %v3896_v51  ;;  %v3991_v32 = vpop.f32.mrf.mxu0  ;;  %v4040_v7 = vpop.f32.mrf.mxu1  ;;  %4398 = vmatpush.bf16.msrb.mxu1 %v10406_v39  ;;  %v13760_v39 = vld [vmem:[#allocation10 + $0x84] sm:$0xf] }
 0x2a3   :  { %v3992_v12 = vadd.f32 %v3991_v32, %v3943_v9  ;;  %4350 = vmatpush.bf16.msrb.mxu0 %v10334_v55  ;;  %v10387_v9 = vld [vmem:[#allocation10 + $0x88] sm:$0xf0]  ;;  %v10305_v32 = vld [vmem:[#allocation3 + $0x428] sm:$0xf] }
 0x2a4   :  { %4093 = vmatmul.bf16.gmra.mxu2 %v15708_v17  ;;  %4142 = vmatmul.bf16.gmra.mxu3 %v15710_v22  ;;  %v10390_v10 = vor.u32 %v13760_v39, %v10387_v9  ;;  %v15726_v39 = vor.u32 %v13742_v40, %v10305_v32  ;;  %v15728_v9 = vor.u32 %v13733_v26, %v10307_v18 }
 0x2a5   :  { %v15718_v29 = vadd.f32 %v4040_v7, %v3992_v12  ;;  %4186 = vmatmul.bf16.gmra.mxu0 %v15712_v5  ;;  %4235 = vmatmul.bf16.gmra.mxu1 %v15714_v56  ;;  %v13802_v56 = vld [vmem:[#allocation10 + $0x1d4] sm:$0xf] }
 0x2a6   :  { %4399 = vmatpush.bf16.msrb.mxu1 %v10398_v25  ;;  %v9811_v25 = vld [vmem:[#allocation3 + $0x88] sm:$0xf0]  ;;  %16919 = vst [vmem:[#allocation132_spill] sm:$0xff] %v15726_v39 }
 0x2a7   :  { %v3898_v13 = vpop.f32.mrf.mxu2  ;;  %v3947_v20 = vpop.f32.mrf.mxu3  ;;  %4351 = vmatpush.bf16.msrb.mxu0 %v10326_v33  ;;  %16920 = vst [vmem:[#allocation133_spill] sm:$0xff] %v15728_v9 }
 0x2a8   :  { %v3899_v31 = vadd.f32 %v3898_v13, %v15592_v6  ;;  %v13608_v6 = vld [vmem:[#allocation3 + $0x44] sm:$0xf] }
 0x2aa   :  { %v3948_v27 = vadd.f32 %v3947_v20, %v3899_v31  ;;  %v3993_v28 = vpop.f32.mrf.mxu0  ;;  %v4042_v7 = vpop.f32.mrf.mxu1  ;;  %4400 = vmatpush.bf16.msrb.mxu1 %v10390_v10  ;;  %v15730_v20 = vor.u32 %v13617_v4, %v9809_v44  ;;  %v15732_v10 = vor.u32 %v13608_v6, %v9811_v25  ;;  %v13635_v25 = vld [vmem:[#allocation3 + $0x114] sm:$0xf0]  ;;  %v9883_v44 = vld [vmem:[#allocation3 + $0x118] sm:$0xf0] }
 0x2ab   :  { %v3994_v57 = vadd.f32 %v3993_v28, %v3945_v50 }
 0x2ad   :  { %v15723_v51 = vadd.f32 %v4042_v7, %v3994_v57 }
 0x2af   :  { %v3900_v12 = vpop.f32.mrf.mxu2  ;;  %v3949_v55 = vpop.f32.mrf.mxu3 }
 0x2b0   :  { %v3901_v3 = vadd.f32 %v3900_v12, %v15597_v36 }
 0x2b2   :  { %v3950_v33 = vadd.f32 %v3949_v55, %v3901_v3  ;;  %v3996_v50 = vpop.f32.mrf.mxu0  ;;  %v4045_v13 = vpop.f32.mrf.mxu1  ;;  %v13626_v3 = vld [vmem:[#allocation3 + $0xd4] sm:$0xf] }
 0x2b3   :  { %v3997_v31 = vadd.f32 %v3996_v50, %v3948_v27  ;;  %v9881_v27 = vld [vmem:[#allocation3 + $0xd0] sm:$0xf] }
 0x2b4   :  { %4254 = vmatmul.bf16.vlgmr.msra.gmra.mxu2 %v15730_v20  ;;  %4303 = vmatmul.bf16.vlgmr.msra.gmra.mxu3 %v15732_v10 }
 0x2b5   :  { %v15736_v28 = vadd.f32 %v4045_v13, %v3997_v31  ;;  %4191 = vmatmul.bf16.gmra.mxu0 %v15726_v39  ;;  %4240 = vmatmul.bf16.gmra.mxu1 %v15728_v9  ;;  %v15744_v9 = vor.u32 %v13635_v25, %v9881_v27  ;;  %v13653_v25 = vld [vmem:[#allocation3 + $0x1a4] sm:$0xf0] }
 0x2b7   :  { %v4059_v36 = vpop.f32.mrf.mxu2  ;;  %v4108_v7 = vpop.f32.mrf.mxu3 }
 0x2b8   :  { %v4060_v57 = vadd.f32 %v4059_v36, %v15610_v58  ;;  %v15746_v58 = vor.u32 %v13626_v3, %v9883_v44  ;;  %v9955_v3 = vld [vmem:[#allocation3 + $0x1a8] sm:$0xf0] }
 0x2ba   :  { %v4109_v32 = vadd.f32 %v4108_v7, %v4060_v57  ;;  %v3998_v40 = vpop.f32.mrf.mxu0  ;;  %v4047_v26 = vpop.f32.mrf.mxu1 }
 0x2bb   :  { %v3999_v18 = vadd.f32 %v3998_v40, %v3950_v33 }
 0x2bd   :  { %v15741_v12 = vadd.f32 %v4047_v26, %v3999_v18 }
 0x2bf   :  { %v4061_v55 = vpop.f32.mrf.mxu2  ;;  %v4110_v4 = vpop.f32.mrf.mxu3 }
 0x2c0   :  { %v4062_v6 = vadd.f32 %v4061_v55, %v15615_v21 }
 0x2c2   :  { %v4111_v50 = vadd.f32 %v4110_v4, %v4062_v6  ;;  %v4157_v13 = vpop.f32.mrf.mxu0  ;;  %v4206_v31 = vpop.f32.mrf.mxu1  ;;  %v9953_v6 = vld [vmem:[#allocation3 + $0x160] sm:$0xf] }
 0x2c3   :  { %v4158_v36 = vadd.f32 %v4157_v13, %v4109_v32 }
 0x2c4   :  { %4259 = vmatmul.bf16.gmra.mxu2 %v15744_v9  ;;  %4308 = vmatmul.bf16.gmra.mxu3 %v15746_v58 }
 0x2c5   :  { %v15750_v33 = vadd.f32 %v4206_v31, %v4158_v36  ;;  %4352 = vmatmul.bf16.vlgmr.msrb.gmra.mxu0 %v15102_v37  ;;  %4401 = vmatmul.bf16.vlgmr.msrb.gmra.mxu1 %v15105_v38  ;;  %v13644_v37 = vld [vmem:[#allocation3 + $0x164] sm:$0xf]  ;;  %v15758_v36 = vor.u32 %v13653_v25, %v9953_v6  ;;  %v13662_v6 = vld [vmem:[#allocation3 + $0x1f4] sm:$0xf] }
 0x2c7   :  { %v4064_v7 = vpop.f32.mrf.mxu2  ;;  %v4113_v21 = vpop.f32.mrf.mxu3 }
 0x2c8   :  { %v4065_v57 = vadd.f32 %v4064_v7, %v15628_v8  ;;  %v15760_v8 = vor.u32 %v13644_v37, %v9955_v3  ;;  %v10027_v37 = vld [vmem:[#allocation3 + $0x238] sm:$0xf0] }
 0x2ca   :  { %v4114_v40 = vadd.f32 %v4113_v21, %v4065_v57  ;;  %v4159_v26 = vpop.f32.mrf.mxu0  ;;  %v4208_v18 = vpop.f32.mrf.mxu1 }
 0x2cb   :  { %v4160_v27 = vadd.f32 %v4159_v26, %v4111_v50 }
 0x2cd   :  { %v15755_v55 = vadd.f32 %v4208_v18, %v4160_v27 }
 0x2cf   :  { %v4066_v32 = vpop.f32.mrf.mxu2  ;;  %v4115_v4 = vpop.f32.mrf.mxu3 }
 0x2d0   :  { %v4067_v44 = vadd.f32 %v4066_v32, %v15633_v2 }
 0x2d2   :  { %v4116_v13 = vadd.f32 %v4115_v4, %v4067_v44  ;;  %v4162_v38 = vpop.f32.mrf.mxu0  ;;  %v4211_v31 = vpop.f32.mrf.mxu1  ;;  %v13671_v44 = vld [vmem:[#allocation3 + $0x234] sm:$0xf0] }
 0x2d3   :  { %v4163_v7 = vadd.f32 %v4162_v38, %v4114_v40  ;;  %v10025_v40 = vld [vmem:[#allocation3 + $0x1f0] sm:$0xf] }
 0x2d4   :  { %4264 = vmatmul.bf16.gmra.mxu2 %v15758_v36  ;;  %4313 = vmatmul.bf16.gmra.mxu3 %v15760_v8 }
 0x2d5   :  { %v15764_v50 = vadd.f32 %v4211_v31, %v4163_v7  ;;  %4357 = vmatmul.bf16.gmra.mxu0 %v15140_v14  ;;  %4406 = vmatmul.bf16.gmra.mxu1 %v15143_v19  ;;  %v15772_v7 = vor.u32 %v13671_v44, %v10025_v40  ;;  %v13689_v44 = vld [vmem:[#allocation3 + $0x2c4] sm:$0xf0] }
 0x2d7   :  { %v4069_v2 = vpop.f32.mrf.mxu2  ;;  %v4118_v21 = vpop.f32.mrf.mxu3 }
 0x2d8   :  { %v4070_v57 = vadd.f32 %v4069_v2, %v15646_v16  ;;  %v15774_v16 = vor.u32 %v13662_v6, %v10027_v37  ;;  %v10099_v6 = vld [vmem:[#allocation3 + $0x2c8] sm:$0xf0] }
 0x2da   :  { %v4119_v26 = vadd.f32 %v4118_v21, %v4070_v57  ;;  %v4164_v18 = vpop.f32.mrf.mxu0  ;;  %v4213_v27 = vpop.f32.mrf.mxu1 }
 0x2db   :  { %v4165_v32 = vadd.f32 %v4164_v18, %v4116_v13 }
 0x2dd   :  { %v15769_v4 = vadd.f32 %v4213_v27, %v4165_v32 }
 0x2df   :  { %v4071_v25 = vpop.f32.mrf.mxu2  ;;  %v4120_v3 = vpop.f32.mrf.mxu3 }
 0x2e0   :  { %v4072_v14 = vadd.f32 %v4071_v25, %v15651_v49 }
 0x2e2   :  { %v4121_v38 = vadd.f32 %v4120_v3, %v4072_v14  ;;  %v4167_v19 = vpop.f32.mrf.mxu0  ;;  %v4216_v31 = vpop.f32.mrf.mxu1  ;;  %v10097_v14 = vld [vmem:[#allocation3 + $0x280] sm:$0xf] }
 0x2e3   :  { %v4168_v2 = vadd.f32 %v4167_v19, %v4119_v26 }
 0x2e4   :  { %4269 = vmatmul.bf16.gmra.mxu2 %v15772_v7  ;;  %4318 = vmatmul.bf16.gmra.mxu3 %v15774_v16 }
 0x2e5   :  { %v15778_v13 = vadd.f32 %v4216_v31, %v4168_v2  ;;  %4362 = vmatmul.bf16.gmra.mxu0 %v15188_v59  ;;  %4411 = vmatmul.bf16.gmra.mxu1 %v15190_v60  ;;  %v13680_v59 = vld [vmem:[#allocation3 + $0x284] sm:$0xf]  ;;  %v15786_v2 = vor.u32 %v13689_v44, %v10097_v14 }
 0x2e6   :  { %v13788_v14 = vld [vmem:[#allocation10 + $0x164] sm:$0xf] }
 0x2e7   :  { %v4074_v21 = vpop.f32.mrf.mxu2  ;;  %v4123_v49 = vpop.f32.mrf.mxu3 }
 0x2e8   :  { %v4075_v57 = vadd.f32 %v4074_v21, %v15664_v30  ;;  %v15788_v30 = vor.u32 %v13680_v59, %v10099_v6  ;;  %v10499_v59 = vld [vmem:[#allocation10 + $0x168] sm:$0xf0] }
 0x2ea   :  { %v4124_v18 = vadd.f32 %v4123_v49, %v4075_v57  ;;  %v4169_v27 = vpop.f32.mrf.mxu0  ;;  %v4218_v32 = vpop.f32.mrf.mxu1  ;;  %16921 = vst [vmem:[#allocation134_spill] sm:$0xff] %v15788_v30  ;;  %v10507_v49 = vld [vmem:[#allocation10 + $0x178] sm:$0xf0] }
 0x2eb   :  { %v4170_v40 = vadd.f32 %v4169_v27, %v4121_v38 }
 0x2ed   :  { %v15783_v25 = vadd.f32 %v4218_v32, %v4170_v40  ;;  %v13806_v40 = vld [vmem:[#allocation10 + $0x1f4] sm:$0xf] }
 0x2ef   :  { %v4076_v26 = vpop.f32.mrf.mxu2  ;;  %v4125_v3 = vpop.f32.mrf.mxu3 }
 0x2f0   :  { %v4077_v37 = vadd.f32 %v4076_v26, %v15669_v45  ;;  %v13790_v45 = vld [vmem:[#allocation10 + $0x174] sm:$0xf]  ;;  %v10571_v26 = vld [vmem:[#allocation10 + $0x1f8] sm:$0xf0] }
 0x2f1   :  { %v10510_v32 = vor.u32 %v13790_v45, %v10507_v49  ;;  %v13786_v45 = vld [vmem:[#allocation10 + $0x154] sm:$0xf]  ;;  %v10491_v49 = vld [vmem:[#allocation10 + $0x158] sm:$0xf0] }
 0x2f2   :  { %v4126_v19 = vadd.f32 %v4125_v3, %v4077_v37  ;;  %v4172_v60 = vpop.f32.mrf.mxu0  ;;  %v4221_v31 = vpop.f32.mrf.mxu1 }
 0x2f3   :  { %v4173_v21 = vadd.f32 %v4172_v60, %v4124_v18  ;;  %v10574_v18 = vor.u32 %v13806_v40, %v10571_v26  ;;  %4442 = vmatpush.bf16.msrb.mxu2 %v10510_v32  ;;  %v13707_v26 = vld [vmem:[#allocation3 + $0x354] sm:$0xf0] }
 0x2f4   :  { %4274 = vmatmul.bf16.gmra.mxu2 %v15786_v2  ;;  %4323 = vmatmul.bf16.gmra.mxu3 %v15788_v30 }
 0x2f5   :  { %v15792_v38 = vadd.f32 %v4221_v31, %v4173_v21  ;;  %4367 = vmatmul.bf16.gmra.mxu0 %v15204_v23  ;;  %4416 = vmatmul.bf16.gmra.mxu1 %v15206_v24  ;;  %v13804_v23 = vld [vmem:[#allocation10 + $0x1e4] sm:$0xf]  ;;  %v10502_v24 = vor.u32 %v13788_v14, %v10499_v59  ;;  %v10563_v31 = vld [vmem:[#allocation10 + $0x1e8] sm:$0xf0] }
 0x2f6   :  { %4491 = vmatpush.bf16.msrb.mxu3 %v10574_v18  ;;  %v10566_v21 = vor.u32 %v13804_v23, %v10563_v31  ;;  %v10171_v18 = vld [vmem:[#allocation3 + $0x358] sm:$0xf0]  ;;  %v13800_v31 = vld [vmem:[#allocation10 + $0x1c4] sm:$0xf] }
 0x2f7   :  { %v4079_v57 = vpop.f32.mrf.mxu2  ;;  %v4128_v27 = vpop.f32.mrf.mxu3  ;;  %4443 = vmatpush.bf16.msrb.mxu2 %v10502_v24  ;;  %v10483_v24 = vld [vmem:[#allocation10 + $0x148] sm:$0xf0] }
 0x2f8   :  { %v4080_v3 = vadd.f32 %v4079_v57, %v15682_v52  ;;  %v10169_v52 = vld [vmem:[#allocation3 + $0x310] sm:$0xf]  ;;  %v10494_v57 = vor.u32 %v13786_v45, %v10491_v49 }
 0x2f9   :  { %v15800_v59 = vor.u32 %v13707_v26, %v10169_v52  ;;  %v10547_v49 = vld [vmem:[#allocation10 + $0x1c8] sm:$0xf0]  ;;  %v10475_v52 = vld [vmem:[#allocation10 + $0x138] sm:$0xf0] }
 0x2fa   :  { %v4129_v44 = vadd.f32 %v4128_v27, %v4080_v3  ;;  %v4174_v6 = vpop.f32.mrf.mxu0  ;;  %v4223_v37 = vpop.f32.mrf.mxu1  ;;  %4492 = vmatpush.bf16.msrb.mxu3 %v10566_v21  ;;  %v10555_v27 = vld [vmem:[#allocation10 + $0x1d8] sm:$0xf0]  ;;  %v13698_v3 = vld [vmem:[#allocation3 + $0x314] sm:$0xf] }
 0x2fb   :  { %v4175_v60 = vadd.f32 %v4174_v6, %v4126_v19  ;;  %v10558_v5 = vor.u32 %v13802_v56, %v10555_v27  ;;  %4444 = vmatpush.bf16.msrb.mxu2 %v10494_v57  ;;  %16922 = vst [vmem:[#allocation135_spill] sm:$0xff] %v15800_v59  ;;  %v15802_v23 = vor.u32 %v13698_v3, %v10171_v18 }
 0x2fd   :  { %v15797_v39 = vadd.f32 %v4223_v37, %v4175_v60  ;;  %16923 = vst [vmem:[#allocation136_spill] sm:$0xff] %v15802_v23  ;;  %v13784_v60 = vld [vmem:[#allocation10 + $0x144] sm:$0xf] }
 0x2fe   :  { %4493 = vmatpush.bf16.msrb.mxu3 %v10558_v5  ;;  %v10486_v45 = vor.u32 %v13784_v60, %v10483_v24  ;;  %v13782_v5 = vld [vmem:[#allocation10 + $0x134] sm:$0xf]  ;;  %v10241_v24 = vld [vmem:[#allocation3 + $0x3a0] sm:$0xf] }
 0x2ff   :  { %v4081_v32 = vpop.f32.mrf.mxu2  ;;  %v4130_v40 = vpop.f32.mrf.mxu3 }
 0x300   :  { %v4082_v19 = vadd.f32 %v4081_v32, %v15687_v46  ;;  %v10550_v46 = vor.u32 %v13800_v31, %v10547_v49  ;;  %4445 = vmatpush.bf16.msrb.mxu2 %v10486_v45  ;;  %v13798_v32 = vld [vmem:[#allocation10 + $0x1b4] sm:$0xf]  ;;  %v13725_v31 = vld [vmem:[#allocation3 + $0x3e4] sm:$0xf0]  ;;  %v10699_v49 = vld [vmem:[#allocation10 + $0x2f8] sm:$0xf0] }
 0x302   :  { %v4131_v6 = vadd.f32 %v4130_v40, %v4082_v19  ;;  %v4177_v37 = vpop.f32.mrf.mxu0  ;;  %v4226_v14 = vpop.f32.mrf.mxu1  ;;  %4494 = vmatpush.bf16.msrb.mxu3 %v10550_v46  ;;  %v10539_v40 = vld [vmem:[#allocation10 + $0x1b8] sm:$0xf0]  ;;  %v13780_v46 = vld [vmem:[#allocation10 + $0x124] sm:$0xf] }
 0x303   :  { %v4178_v21 = vadd.f32 %v4177_v37, %v4129_v44  ;;  %v10478_v44 = vor.u32 %v13782_v5, %v10475_v52  ;;  %v10542_v3 = vor.u32 %v13798_v32, %v10539_v40  ;;  %v10467_v5 = vld [vmem:[#allocation10 + $0x128] sm:$0xf0]  ;;  %v13820_v40 = vld [vmem:[#allocation10 + $0x264] sm:$0xf] }
 0x304   :  { %4279 = vmatmul.bf16.gmra.mxu2 %v15800_v59  ;;  %4328 = vmatmul.bf16.gmra.mxu3 %v15802_v23  ;;  %v10243_v52 = vld [vmem:[#allocation3 + $0x3e8] sm:$0xf0] }
 0x305   :  { %v15806_v56 = vadd.f32 %v4226_v14, %v4178_v21  ;;  %4372 = vmatmul.bf16.gmra.mxu0 %v15220_v53  ;;  %4421 = vmatmul.bf16.gmra.mxu1 %v15222_v54  ;;  %v13822_v53 = vld [vmem:[#allocation10 + $0x274] sm:$0xf]  ;;  %v10635_v14 = vld [vmem:[#allocation10 + $0x278] sm:$0xf0]  ;;  %v13716_v21 = vld [vmem:[#allocation3 + $0x3a4] sm:$0xf] }
 0x306   :  { %4446 = vmatpush.bf16.msrb.mxu2 %v10478_v44  ;;  %4495 = vmatpush.bf16.msrb.mxu3 %v10542_v3  ;;  %v13838_v54 = vld [vmem:[#allocation10 + $0x2f4] sm:$0xf]  ;;  %v10638_v45 = vor.u32 %v13822_v53, %v10635_v14  ;;  %v13836_v3 = vld [vmem:[#allocation10 + $0x2e4] sm:$0xf]  ;;  %v10459_v14 = vld [vmem:[#allocation10 + $0x118] sm:$0xf0] }
 0x307   :  { %v4084_v57 = vpop.f32.mrf.mxu2  ;;  %v4133_v27 = vpop.f32.mrf.mxu3  ;;  %v10702_v23 = vor.u32 %v13838_v54, %v10699_v49  ;;  %v13778_v53 = vld [vmem:[#allocation10 + $0x114] sm:$0xf] }
 0x308   :  { %v4085_v26 = vadd.f32 %v4084_v57, %v15700_v1  ;;  %v10470_v1 = vor.u32 %v13780_v46, %v10467_v5  ;;  %v13796_v57 = vld [vmem:[#allocation10 + $0x1a4] sm:$0xf]  ;;  %4540 = vmatpush.bf16.msra.mxu0 %v10638_v45  ;;  %v10462_v49 = vor.u32 %v13778_v53, %v10459_v14  ;;  %v13794_v46 = vld [vmem:[#allocation10 + $0x194] sm:$0xf]  ;;  %v10523_v5 = vld [vmem:[#allocation10 + $0x198] sm:$0xf0]  ;;  %v15816_v45 = vor.u32 %v13716_v21, %v10243_v52 }
 0x309   :  { %4589 = vmatpush.bf16.msra.mxu1 %v10702_v23  ;;  %v10683_v53 = vld [vmem:[#allocation10 + $0x2d8] sm:$0xf0]  ;;  %v13776_v14 = vld [vmem:[#allocation10 + $0x104] sm:$0xf] }
 0x30a   :  { %v4134_v18 = vadd.f32 %v4133_v27, %v4085_v26  ;;  %v4179_v19 = vpop.f32.mrf.mxu0  ;;  %v4228_v37 = vpop.f32.mrf.mxu1  ;;  %v10531_v27 = vld [vmem:[#allocation10 + $0x1a8] sm:$0xf0]  ;;  %4447 = vmatpush.bf16.msrb.mxu2 %v10470_v1  ;;  %v13816_v52 = vld [vmem:[#allocation10 + $0x244] sm:$0xf] }
 0x30b   :  { %v4180_v60 = vadd.f32 %v4179_v19, %v4131_v6  ;;  %v10534_v44 = vor.u32 %v13796_v57, %v10531_v27  ;;  %v10627_v26 = vld [vmem:[#allocation10 + $0x268] sm:$0xf0]  ;;  %v10526_v57 = vor.u32 %v13794_v46, %v10523_v5 }
 0x30c   :  { %v10630_v6 = vor.u32 %v13820_v40, %v10627_v26  ;;  %v10691_v19 = vld [vmem:[#allocation10 + $0x2e8] sm:$0xf0]  ;;  %v13818_v40 = vld [vmem:[#allocation10 + $0x254] sm:$0xf]  ;;  %v10619_v26 = vld [vmem:[#allocation10 + $0x258] sm:$0xf0] }
 0x30d   :  { %v15811_v32 = vadd.f32 %v4228_v37, %v4180_v60  ;;  %4496 = vmatpush.bf16.msrb.mxu3 %v10534_v44  ;;  %v10694_v54 = vor.u32 %v13836_v3, %v10691_v19  ;;  %v15814_v60 = vor.u32 %v13725_v31, %v10241_v24  ;;  %v13834_v44 = vld [vmem:[#allocation10 + $0x2d4] sm:$0xf]  ;;  %v10622_v19 = vor.u32 %v13818_v40, %v10619_v26  ;;  %v10515_v31 = vld [vmem:[#allocation10 + $0x188] sm:$0xf0] }
 0x30e   :  { %4541 = vmatpush.bf16.msra.mxu0 %v10630_v6  ;;  %4448 = vmatpush.bf16.msrb.mxu2 %v10462_v49  ;;  %v10611_v6 = vld [vmem:[#allocation10 + $0x248] sm:$0xf0] }
 0x30f   :  { %v4086_v59 = vpop.f32.mrf.mxu2  ;;  %v4135_v30 = vpop.f32.mrf.mxu3  ;;  %4590 = vmatpush.bf16.msra.mxu1 %v10694_v54  ;;  %v13832_v54 = vld [vmem:[#allocation10 + $0x2c4] sm:$0xf]  ;;  %v10614_v49 = vor.u32 %v13816_v52, %v10611_v6  ;;  %v10675_v46 = vld [vmem:[#allocation10 + $0x2c8] sm:$0xf0] }
 0x310   :  { %v4087_v37 = vadd.f32 %v4086_v59, %v15705_v11  ;;  %v10451_v11 = vld [vmem:[#allocation10 + $0x108] sm:$0xf0]  ;;  %v10686_v59 = vor.u32 %v13834_v44, %v10683_v53  ;;  %v10315_v53 = vld [vmem:[#allocation3 + $0x478] sm:$0xf0] }
 0x311   :  { %4497 = vmatpush.bf16.msrb.mxu3 %v10526_v57  ;;  %v10454_v24 = vor.u32 %v13776_v14, %v10451_v11  ;;  %v10678_v57 = vor.u32 %v13832_v54, %v10675_v46  ;;  %v10313_v26 = vld [vmem:[#allocation3 + $0x430] sm:$0xf]  ;;  %v13814_v14 = vld [vmem:[#allocation10 + $0x234] sm:$0xf]  ;;  %v10603_v11 = vld [vmem:[#allocation10 + $0x238] sm:$0xf0] }
 0x312   :  { %v4136_v23 = vadd.f32 %v4135_v30, %v4087_v37  ;;  %v4182_v1 = vpop.f32.mrf.mxu0  ;;  %v4231_v27 = vpop.f32.mrf.mxu1  ;;  %v13792_v30 = vld [vmem:[#allocation10 + $0x184] sm:$0xf]  ;;  %4542 = vmatpush.bf16.msra.mxu0 %v10622_v19  ;;  %v13734_v19 = vld [vmem:[#allocation3 + $0x434] sm:$0xf]  ;;  %v10595_v52 = vld [vmem:[#allocation10 + $0x228] sm:$0xf0] }
 0x313   :  { %v4183_v3 = vadd.f32 %v4182_v1, %v4134_v18  ;;  %v10518_v18 = vor.u32 %v13792_v30, %v10515_v31  ;;  %4591 = vmatpush.bf16.msra.mxu1 %v10686_v59  ;;  %4449 = vmatpush.bf16.msrb.mxu2 %v10454_v24  ;;  %v13830_v59 = vld [vmem:[#allocation10 + $0x2b4] sm:$0xf]  ;;  %v10606_v31 = vor.u32 %v13814_v14, %v10603_v11  ;;  %v13828_v46 = vld [vmem:[#allocation10 + $0x2a4] sm:$0xf] }
 0x314   :  { %4284 = vmatmul.bf16.gmra.mxu2 %v15814_v60  ;;  %4333 = vmatmul.bf16.gmra.mxu3 %v15816_v45 }
 0x315   :  { %v15820_v21 = vadd.f32 %v4231_v27, %v4183_v3  ;;  %4377 = vmatmul.bf16.gmra.mxu0 %v15238_v47  ;;  %4426 = vmatmul.bf16.gmra.mxu1 %v15240_v48  ;;  %v13743_v3 = vld [vmem:[#allocation3 + $0x474] sm:$0xf0] }
 0x316   :  { %4498 = vmatpush.bf16.msrb.mxu3 %v10518_v18  ;;  %4543 = vmatpush.bf16.msra.mxu0 %v10614_v49  ;;  %v10667_v18 = vld [vmem:[#allocation10 + $0x2b8] sm:$0xf0]  ;;  %v15828_v54 = vor.u32 %v13743_v3, %v10313_v26  ;;  %v13810_v26 = vld [vmem:[#allocation10 + $0x214] sm:$0xf] }
 0x317   :  { %v4089_v5 = vpop.f32.mrf.mxu2  ;;  %v4138_v37 = vpop.f32.mrf.mxu3  ;;  %4592 = vmatpush.bf16.msra.mxu1 %v10678_v57  ;;  %v10670_v49 = vor.u32 %v13830_v59, %v10667_v18  ;;  %v10587_v3 = vld [vmem:[#allocation10 + $0x218] sm:$0xf0]  ;;  %v13824_v18 = vld [vmem:[#allocation10 + $0x284] sm:$0xf] }
 0x318   :  { %v4090_v1 = vadd.f32 %v4089_v5, %v15718_v29  ;;  %v13812_v29 = vld [vmem:[#allocation10 + $0x224] sm:$0xf]  ;;  %v10659_v5 = vld [vmem:[#allocation10 + $0x2a8] sm:$0xf0]  ;;  %v10590_v11 = vor.u32 %v13810_v26, %v10587_v3  ;;  %v10651_v59 = vld [vmem:[#allocation10 + $0x298] sm:$0xf0] }
 0x31a   :  { %v4139_v27 = vadd.f32 %v4138_v37, %v4090_v1  ;;  %v4184_v40 = vpop.f32.mrf.mxu0  ;;  %v4233_v47 = vpop.f32.mrf.mxu1  ;;  %4544 = vmatpush.bf16.msra.mxu0 %v10606_v31 }
 0x31b   :  { %v4185_v48 = vadd.f32 %v4184_v40, %v4136_v23  ;;  %v15830_v23 = vor.u32 %v13734_v19, %v10315_v53  ;;  %4593 = vmatpush.bf16.msra.mxu1 %v10670_v49  ;;  %v10598_v40 = vor.u32 %v13812_v29, %v10595_v52  ;;  %v13826_v19 = vld [vmem:[#allocation10 + $0x294] sm:$0xf]  ;;  %v10643_v29 = vld [vmem:[#allocation10 + $0x288] sm:$0xf0] }
 0x31c   :  { %v10654_v31 = vor.u32 %v13826_v19, %v10651_v59  ;;  %v10646_v49 = vor.u32 %v13824_v18, %v10643_v29 }
 0x31d   :  { %v15825_v44 = vadd.f32 %v4233_v47, %v4185_v48  ;;  %v10662_v47 = vor.u32 %v13828_v46, %v10659_v5 }
 0x31e   :  { %4545 = vmatpush.bf16.msra.mxu0 %v10598_v40 }
 0x31f   :  { %v4091_v24 = vpop.f32.mrf.mxu2  ;;  %v4140_v30 = vpop.f32.mrf.mxu3  ;;  %4594 = vmatpush.bf16.msra.mxu1 %v10662_v47 }
 0x320   :  { %v4092_v6 = vadd.f32 %v4091_v24, %v15723_v51  ;;  %v10579_v24 = vld [vmem:[#allocation10 + $0x208] sm:$0xf0] }
 0x322   :  { %v4141_v37 = vadd.f32 %v4140_v30, %v4092_v6  ;;  %v4187_v57 = vpop.f32.mrf.mxu0  ;;  %v4236_v1 = vpop.f32.mrf.mxu1  ;;  %4546 = vmatpush.bf16.msra.mxu0 %v10590_v11 }
 0x323   :  { %v4188_v48 = vadd.f32 %v4187_v57, %v4139_v27  ;;  %v13808_v27 = vld [vmem:[#allocation10 + $0x204] sm:$0xf]  ;;  %4595 = vmatpush.bf16.msra.mxu1 %v10654_v31 }
 0x324   :  { %4289 = vmatmul.bf16.gmra.mxu2 %v15828_v54  ;;  %4338 = vmatmul.bf16.gmra.mxu3 %v15830_v23 }
 0x325   :  { %v15834_v51 = vadd.f32 %v4236_v1, %v4188_v48  ;;  %4382 = vmatmul.bf16.gmra.mxu0 %v15255_v63  ;;  %4431 = vmatmul.bf16.gmra.mxu1 %v15257_v0  ;;  %v10582_v0 = vor.u32 %v13808_v27, %v10579_v24 }
 0x327   :  { %v4094_v53 = vpop.f32.mrf.mxu2  ;;  %v4143_v14 = vpop.f32.mrf.mxu3  ;;  %4547 = vmatpush.bf16.msra.mxu0 %v10582_v0  ;;  %4596 = vmatpush.bf16.msra.mxu1 %v10646_v49 }
 0x328   :  { %v4095_v30 = vadd.f32 %v4094_v53, %v15736_v28 }
 0x32a   :  { %v4144_v52 = vadd.f32 %v4143_v14, %v4095_v30  ;;  %v4189_v63 = vpop.f32.mrf.mxu0  ;;  %v4238_v6 = vpop.f32.mrf.mxu1 }
 0x32b   :  { %v4190_v46 = vadd.f32 %v4189_v63, %v4141_v37 }
 0x32d   :  { %v15839_v5 = vadd.f32 %v4238_v6, %v4190_v46 }
 0x32f   :  { %v4096_v57 = vpop.f32.mrf.mxu2  ;;  %v4145_v1 = vpop.f32.mrf.mxu3 }
 0x330   :  { %v4097_v40 = vadd.f32 %v4096_v57, %v15741_v12 }
 0x332   :  { %v4146_v28 = vadd.f32 %v4145_v1, %v4097_v40  ;;  %v4192_v47 = vpop.f32.mrf.mxu0  ;;  %v4241_v48 = vpop.f32.mrf.mxu1  ;;  %v16925_v40 = vld [vmem:[#allocation30_spill] sm:$0xff] }
 0x333   :  { %v4193_v26 = vadd.f32 %v4192_v47, %v4144_v52  ;;  %v16928_v47 = vld [vmem:[#allocation44_spill] sm:$0xff] }
 0x334   :  { %4450 = vmatmul.bf16.vlgmr.msrb.gmra.mxu2 %v15178_v34  ;;  %4499 = vmatmul.bf16.vlgmr.msrb.gmra.mxu3 %v15180_v35 }
 0x335   :  { %v15844_v3 = vadd.f32 %v4241_v48, %v4193_v26  ;;  %4387 = vmatmul.bf16.gmra.mxu0 %v15281_v42  ;;  %4436 = vmatmul.bf16.gmra.mxu1 %v15283_v43 }
 0x337   :  { %v4255_v37 = vpop.f32.mrf.mxu2  ;;  %v4304_v19 = vpop.f32.mrf.mxu3 }
 0x338   :  { %v4256_v53 = vadd.f32 %v4255_v37, %v15750_v33  ;;  %v16924_v33 = vld [vmem:[#allocation40_spill] sm:$0xff] }
 0x33a   :  { %v15849_v14 = vadd.f32 %v4304_v19, %v4256_v53  ;;  %v4194_v12 = vpop.f32.mrf.mxu0  ;;  %v4243_v11 = vpop.f32.mrf.mxu1 }
 0x33b   :  { %v4195_v59 = vadd.f32 %v4194_v12, %v4146_v28  ;;  %v16926_v28 = vld [vmem:[#allocation31_spill] sm:$0xff] }
 0x33d   :  { %v15851_v27 = vadd.f32 %v4243_v11, %v4195_v59 }
 0x33f   :  { %v4257_v34 = vpop.f32.mrf.mxu2  ;;  %v4306_v24 = vpop.f32.mrf.mxu3 }
 0x340   :  { %v4258_v35 = vadd.f32 %v4257_v34, %v15755_v55 }
 0x342   :  { %v15854_v30 = vadd.f32 %v4306_v24, %v4258_v35  ;;  %v4353_v42 = vpop.f32.mrf.mxu0  ;;  %v4402_v31 = vpop.f32.mrf.mxu1 }
 0x343   :  { %v15856_v43 = vadd.f32 %v4402_v31, %v4353_v42 }
 0x344   :  { %4455 = vmatmul.bf16.gmra.mxu2 %v15192_v61  ;;  %4504 = vmatmul.bf16.gmra.mxu3 %v15194_v62 }
 0x345   :  { %4548 = vmatmul.bf16.vlgmr.msra.gmra.mxu0 %v15303_v15  ;;  %4597 = vmatmul.bf16.vlgmr.msra.gmra.mxu1 %v16924_v33  ;;  %v16929_v33 = vld [vmem:[#allocation32_spill] sm:$0xff] }
 0x347   :  { %v4260_v18 = vpop.f32.mrf.mxu2  ;;  %v4309_v29 = vpop.f32.mrf.mxu3 }
 0x348   :  { %v4261_v52 = vadd.f32 %v4260_v18, %v15764_v50  ;;  %v16927_v50 = vld [vmem:[#allocation43_spill] sm:$0xff]  ;;  %v16930_v18 = vld [vmem:[#allocation33_spill] sm:$0xff] }
 0x34a   :  { %v15863_v63 = vadd.f32 %v4309_v29, %v4261_v52  ;;  %v4355_v55 = vpop.f32.mrf.mxu0  ;;  %v4404_v6 = vpop.f32.mrf.mxu1  ;;  %v16932_v29 = vld [vmem:[#allocation48_spill] sm:$0xff] }
 0x34b   :  { %v15865_v0 = vadd.f32 %v4404_v6, %v4355_v55 }
 0x34f   :  { %v4262_v49 = vpop.f32.mrf.mxu2  ;;  %v4311_v46 = vpop.f32.mrf.mxu3 }
 0x350   :  { %v4263_v61 = vadd.f32 %v4262_v49, %v15769_v4 }
 0x352   :  { %v15868_v57 = vadd.f32 %v4311_v46, %v4263_v61  ;;  %v4358_v62 = vpop.f32.mrf.mxu0  ;;  %v4407_v15 = vpop.f32.mrf.mxu1 }
 0x353   :  { %v15870_v1 = vadd.f32 %v4407_v15, %v4358_v62 }
 0x354   :  { %4460 = vmatmul.bf16.gmra.mxu2 %v16925_v40  ;;  %4509 = vmatmul.bf16.gmra.mxu3 %v16926_v28 }
 0x355   :  { %4553 = vmatmul.bf16.gmra.mxu0 %v16927_v50  ;;  %4602 = vmatmul.bf16.gmra.mxu1 %v16928_v47 }
 0x357   :  { %v4265_v48 = vpop.f32.mrf.mxu2  ;;  %v4314_v26 = vpop.f32.mrf.mxu3 }
 0x358   :  { %v4266_v37 = vadd.f32 %v4265_v48, %v15778_v13  ;;  %v16931_v13 = vld [vmem:[#allocation47_spill] sm:$0xff] }
 0x35a   :  { %v15877_v19 = vadd.f32 %v4314_v26, %v4266_v37  ;;  %v4360_v4 = vpop.f32.mrf.mxu0  ;;  %v4409_v53 = vpop.f32.mrf.mxu1  ;;  %v16933_v26 = vld [vmem:[#allocation34_spill] sm:$0xff]  ;;  %v16934_v37 = vld [vmem:[#allocation35_spill] sm:$0xff] }
 0x35b   :  { %v15879_v12 = vadd.f32 %v4409_v53, %v4360_v4  ;;  %v16936_v4 = vld [vmem:[#allocation52_spill] sm:$0xff]  ;;  %v13854_v53 = vld [vmem:[#allocation10 + $0x374] sm:$0xf] }
 0x35f   :  { %v4267_v11 = vpop.f32.mrf.mxu2  ;;  %v4316_v59 = vpop.f32.mrf.mxu3 }
 0x360   :  { %v4268_v34 = vadd.f32 %v4267_v11, %v15783_v25  ;;  %v10763_v11 = vld [vmem:[#allocation10 + $0x378] sm:$0xf0] }
 0x362   :  { %v15882_v24 = vadd.f32 %v4316_v59, %v4268_v34  ;;  %v4363_v35 = vpop.f32.mrf.mxu0  ;;  %v4412_v42 = vpop.f32.mrf.mxu1 }
 0x363   :  { %v15884_v31 = vadd.f32 %v4412_v42, %v4363_v35  ;;  %v10766_v35 = vor.u32 %v13854_v53, %v10763_v11  ;;  %v10827_v42 = vld [vmem:[#allocation10 + $0x3f8] sm:$0xf0] }
 0x364   :  { %4465 = vmatmul.bf16.gmra.mxu2 %v16929_v33  ;;  %4514 = vmatmul.bf16.gmra.mxu3 %v16930_v18 }
 0x365   :  { %4558 = vmatmul.bf16.gmra.mxu0 %v16931_v13  ;;  %4607 = vmatmul.bf16.gmra.mxu1 %v16932_v29 }
 0x366   :  { %4638 = vmatpush.bf16.msra.mxu2 %v10766_v35 }
 0x367   :  { %v4270_v52 = vpop.f32.mrf.mxu2  ;;  %v4319_v55 = vpop.f32.mrf.mxu3 }
 0x368   :  { %v4271_v6 = vadd.f32 %v4270_v52, %v15792_v38  ;;  %v16935_v38 = vld [vmem:[#allocation51_spill] sm:$0xff] }
 0x36a   :  { %v15891_v49 = vadd.f32 %v4319_v55, %v4271_v6  ;;  %v4365_v25 = vpop.f32.mrf.mxu0  ;;  %v4414_v46 = vpop.f32.mrf.mxu1  ;;  %v13852_v6 = vld [vmem:[#allocation10 + $0x364] sm:$0xf] }
 0x36b   :  { %v15893_v61 = vadd.f32 %v4414_v46, %v4365_v25  ;;  %v10755_v25 = vld [vmem:[#allocation10 + $0x368] sm:$0xf0] }
 0x36f   :  { %v4272_v62 = vpop.f32.mrf.mxu2  ;;  %v4321_v15 = vpop.f32.mrf.mxu3 }
 0x370   :  { %v4273_v40 = vadd.f32 %v4272_v62, %v15797_v39  ;;  %v13870_v39 = vld [vmem:[#allocation10 + $0x3f4] sm:$0xf] }
 0x371   :  { %v10830_v18 = vor.u32 %v13870_v39, %v10827_v42  ;;  %v16937_v42 = vld [vmem:[#allocation36_spill] sm:$0xff] }
 0x372   :  { %v15896_v28 = vadd.f32 %v4321_v15, %v4273_v40  ;;  %v4368_v50 = vpop.f32.mrf.mxu0  ;;  %v4417_v47 = vpop.f32.mrf.mxu1  ;;  %v10758_v15 = vor.u32 %v13852_v6, %v10755_v25  ;;  %v13868_v40 = vld [vmem:[#allocation10 + $0x3e4] sm:$0xf] }
 0x373   :  { %v15898_v48 = vadd.f32 %v4417_v47, %v4368_v50  ;;  %4687 = vmatpush.bf16.msra.mxu3 %v10830_v18  ;;  %v10819_v50 = vld [vmem:[#allocation10 + $0x3e8] sm:$0xf0]  ;;  %v13850_v47 = vld [vmem:[#allocation10 + $0x354] sm:$0xf]  ;;  %v16939_v18 = vld [vmem:[#allocation55_spill] sm:$0xff] }
 0x374   :  { %4470 = vmatmul.bf16.gmra.mxu2 %v16933_v26  ;;  %4519 = vmatmul.bf16.gmra.mxu3 %v16934_v37  ;;  %v10747_v37 = vld [vmem:[#allocation10 + $0x358] sm:$0xf0] }
 0x375   :  { %4563 = vmatmul.bf16.gmra.mxu0 %v16935_v38  ;;  %4612 = vmatmul.bf16.gmra.mxu1 %v16936_v4  ;;  %v13866_v38 = vld [vmem:[#allocation10 + $0x3d4] sm:$0xf]  ;;  %v10811_v4 = vld [vmem:[#allocation10 + $0x3d8] sm:$0xf0] }
 0x376   :  { %4639 = vmatpush.bf16.msra.mxu2 %v10758_v15  ;;  %v10814_v35 = vor.u32 %v13866_v38, %v10811_v4  ;;  %v10803_v15 = vld [vmem:[#allocation10 + $0x3c8] sm:$0xf0] }
 0x377   :  { %v4275_v59 = vpop.f32.mrf.mxu2  ;;  %v4324_v34 = vpop.f32.mrf.mxu3 }
 0x378   :  { %v4276_v33 = vadd.f32 %v4275_v59, %v15806_v56  ;;  %v10822_v56 = vor.u32 %v13868_v40, %v10819_v50  ;;  %v13846_v40 = vld [vmem:[#allocation10 + $0x334] sm:$0xf] }
 0x37a   :  { %v15905_v13 = vadd.f32 %v4324_v34, %v4276_v33  ;;  %v4370_v29 = vpop.f32.mrf.mxu0  ;;  %v4419_v52 = vpop.f32.mrf.mxu1  ;;  %4688 = vmatpush.bf16.msra.mxu3 %v10822_v56  ;;  %v10750_v34 = vor.u32 %v13850_v47, %v10747_v37  ;;  %v16938_v33 = vld [vmem:[#allocation37_spill] sm:$0xff]  ;;  %v10795_v37 = vld [vmem:[#allocation10 + $0x3b8] sm:$0xf0] }
 0x37b   :  { %v15907_v55 = vadd.f32 %v4419_v52, %v4370_v29  ;;  %v13848_v29 = vld [vmem:[#allocation10 + $0x344] sm:$0xf]  ;;  %v10739_v52 = vld [vmem:[#allocation10 + $0x348] sm:$0xf0]  ;;  %v13862_v56 = vld [vmem:[#allocation10 + $0x3b4] sm:$0xf] }
 0x37c   :  { %4640 = vmatpush.bf16.msra.mxu2 %v10750_v34  ;;  %v10798_v34 = vor.u32 %v13862_v56, %v10795_v37  ;;  %v10883_v56 = vld [vmem:[#allocation10 + $0x468] sm:$0xf0]  ;;  %v13900_v37 = vld [vmem:[#allocation10 + $0x4e4] sm:$0xf] }
 0x37e   :  { %4689 = vmatpush.bf16.msra.mxu3 %v10814_v35 }
 0x37f   :  { %v4277_v46 = vpop.f32.mrf.mxu2  ;;  %v4326_v62 = vpop.f32.mrf.mxu3 }
 0x380   :  { %v4278_v26 = vadd.f32 %v4277_v46, %v15811_v32  ;;  %v16940_v32 = vld [vmem:[#allocation56_spill] sm:$0xff]  ;;  %v10742_v46 = vor.u32 %v13848_v29, %v10739_v52  ;;  %v13902_v29 = vld [vmem:[#allocation10 + $0x4f4] sm:$0xf]  ;;  %v10955_v52 = vld [vmem:[#allocation10 + $0x4f8] sm:$0xf0] }
 0x382   :  { %v15910_v53 = vadd.f32 %v4326_v62, %v4278_v26  ;;  %v4373_v11 = vpop.f32.mrf.mxu0  ;;  %v4422_v59 = vpop.f32.mrf.mxu1  ;;  %v13864_v62 = vld [vmem:[#allocation10 + $0x3c4] sm:$0xf]  ;;  %v10731_v26 = vld [vmem:[#allocation10 + $0x338] sm:$0xf0]  ;;  %4641 = vmatpush.bf16.msra.mxu2 %v10742_v46 }
 0x383   :  { %v15912_v39 = vadd.f32 %v4422_v59, %v4373_v11  ;;  %v10806_v47 = vor.u32 %v13864_v62, %v10803_v15  ;;  %v10734_v59 = vor.u32 %v13846_v40, %v10731_v26  ;;  %v10958_v62 = vor.u32 %v13902_v29, %v10955_v52  ;;  %v10723_v15 = vld [vmem:[#allocation10 + $0x328] sm:$0xf0]  ;;  %v13860_v46 = vld [vmem:[#allocation10 + $0x3a4] sm:$0xf]  ;;  %v13858_v29 = vld [vmem:[#allocation10 + $0x394] sm:$0xf] }
 0x384   :  { %4475 = vmatmul.bf16.gmra.mxu2 %v16937_v42  ;;  %4524 = vmatmul.bf16.gmra.mxu3 %v16938_v33  ;;  %v13886_v42 = vld [vmem:[#allocation10 + $0x474] sm:$0xf]  ;;  %v10891_v33 = vld [vmem:[#allocation10 + $0x478] sm:$0xf0]  ;;  %v13884_v26 = vld [vmem:[#allocation10 + $0x464] sm:$0xf] }
 0x385   :  { %4568 = vmatmul.bf16.gmra.mxu0 %v16939_v18  ;;  %4617 = vmatmul.bf16.gmra.mxu1 %v16940_v32  ;;  %v10894_v32 = vor.u32 %v13886_v42, %v10891_v33  ;;  %v10947_v42 = vld [vmem:[#allocation10 + $0x4e8] sm:$0xf0]  ;;  %v13842_v33 = vld [vmem:[#allocation10 + $0x314] sm:$0xf]  ;;  %v10779_v52 = vld [vmem:[#allocation10 + $0x398] sm:$0xf0] }
 0x386   :  { %4690 = vmatpush.bf16.msra.mxu3 %v10806_v47  ;;  %4642 = vmatpush.bf16.msra.mxu2 %v10734_v59 }
 0x387   :  { %v4280_v6 = vpop.f32.mrf.mxu2  ;;  %v4329_v25 = vpop.f32.mrf.mxu3  ;;  %4736 = vmatpush.bf16.msrb.mxu0 %v10894_v32  ;;  %4785 = vmatpush.bf16.msrb.mxu1 %v10958_v62  ;;  %v16946_v62 = vld [vmem:[#allocation60_spill] sm:$0xff] }
 0x388   :  { %v4281_v50 = vadd.f32 %v4280_v6, %v15820_v21  ;;  %v13844_v6 = vld [vmem:[#allocation10 + $0x324] sm:$0xf] }
 0x389   :  { %v10726_v40 = vor.u32 %v13844_v6, %v10723_v15  ;;  %v16943_v6 = vld [vmem:[#allocation38_spill] sm:$0xff]  ;;  %v16944_v15 = vld [vmem:[#allocation39_spill] sm:$0xff] }
 0x38a   :  { %v15919_v38 = vadd.f32 %v4329_v25, %v4281_v50  ;;  %v4375_v4 = vpop.f32.mrf.mxu0  ;;  %v4424_v11 = vpop.f32.mrf.mxu1  ;;  %4691 = vmatpush.bf16.msra.mxu3 %v10798_v34  ;;  %v10787_v50 = vld [vmem:[#allocation10 + $0x3a8] sm:$0xf0]  ;;  %v10886_v34 = vor.u32 %v13884_v26, %v10883_v56  ;;  %v10939_v56 = vld [vmem:[#allocation10 + $0x4d8] sm:$0xf0] }
 0x38b   :  { %v15921_v35 = vadd.f32 %v4424_v11, %v4375_v4  ;;  %v10790_v47 = vor.u32 %v13860_v46, %v10787_v50  ;;  %4643 = vmatpush.bf16.msra.mxu2 %v10726_v40  ;;  %v13882_v46 = vld [vmem:[#allocation10 + $0x454] sm:$0xf]  ;;  %v10875_v50 = vld [vmem:[#allocation10 + $0x458] sm:$0xf0] }
 0x38c   :  { %16941 = vst [vmem:[#allocation40_spill] sm:$0xff] %v15919_v38  ;;  %v10715_v38 = vld [vmem:[#allocation10 + $0x318] sm:$0xf0]  ;;  %4737 = vmatpush.bf16.msrb.mxu0 %v10886_v34  ;;  %v13880_v34 = vld [vmem:[#allocation10 + $0x444] sm:$0xf] }
 0x38d   :  { %v10718_v32 = vor.u32 %v13842_v33, %v10715_v38  ;;  %v10878_v38 = vor.u32 %v13882_v46, %v10875_v50  ;;  %v13856_v33 = vld [vmem:[#allocation10 + $0x384] sm:$0xf]  ;;  %v10931_v46 = vld [vmem:[#allocation10 + $0x4c8] sm:$0xf0]  ;;  %v13878_v50 = vld [vmem:[#allocation10 + $0x434] sm:$0xf] }
 0x38e   :  { %4692 = vmatpush.bf16.msra.mxu3 %v10790_v47  ;;  %v13898_v47 = vld [vmem:[#allocation10 + $0x4d4] sm:$0xf] }
 0x38f   :  { %v4282_v18 = vpop.f32.mrf.mxu2  ;;  %v4331_v21 = vpop.f32.mrf.mxu3  ;;  %4644 = vmatpush.bf16.msra.mxu2 %v10718_v32 }
 0x390   :  { %v4283_v25 = vadd.f32 %v4282_v18, %v15825_v44  ;;  %v10950_v18 = vor.u32 %v13900_v37, %v10947_v42  ;;  %v13840_v37 = vld [vmem:[#allocation10 + $0x304] sm:$0xf]  ;;  %v10707_v42 = vld [vmem:[#allocation10 + $0x308] sm:$0xf0]  ;;  %4738 = vmatpush.bf16.msrb.mxu0 %v10878_v38 }
 0x391   :  { %v10851_v38 = vld [vmem:[#allocation10 + $0x428] sm:$0xf0] }
 0x392   :  { %v15924_v4 = vadd.f32 %v4331_v21, %v4283_v25  ;;  %v4378_v11 = vpop.f32.mrf.mxu0  ;;  %v4427_v59 = vpop.f32.mrf.mxu1  ;;  %v10782_v21 = vor.u32 %v13858_v29, %v10779_v52  ;;  %v16945_v25 = vld [vmem:[#allocation59_spill] sm:$0xff]  ;;  %4786 = vmatpush.bf16.msrb.mxu1 %v10950_v18  ;;  %v10771_v29 = vld [vmem:[#allocation10 + $0x388] sm:$0xf0]  ;;  %v10710_v52 = vor.u32 %v13840_v37, %v10707_v42 }
 0x393   :  { %v15926_v44 = vadd.f32 %v4427_v59, %v4378_v11  ;;  %v10942_v59 = vor.u32 %v13898_v47, %v10939_v56  ;;  %v10867_v18 = vld [vmem:[#allocation10 + $0x448] sm:$0xf0]  ;;  %v13894_v47 = vld [vmem:[#allocation10 + $0x4b4] sm:$0xf]  ;;  %v10923_v56 = vld [vmem:[#allocation10 + $0x4b8] sm:$0xf0] }
 0x394   :  { %16942 = vst [vmem:[#allocation30_spill] sm:$0xff] %v15924_v4  ;;  %4480 = vmatmul.bf16.gmra.mxu2 %v16943_v6  ;;  %4529 = vmatmul.bf16.gmra.mxu3 %v16944_v15  ;;  %v10774_v6 = vor.u32 %v13856_v33, %v10771_v29  ;;  %v13896_v15 = vld [vmem:[#allocation10 + $0x4c4] sm:$0xf]  ;;  %v10915_v29 = vld [vmem:[#allocation10 + $0x4a8] sm:$0xf0] }
 0x395   :  { %4573 = vmatmul.bf16.gmra.mxu0 %v16945_v25  ;;  %4622 = vmatmul.bf16.gmra.mxu1 %v16946_v62 }
 0x396   :  { %4693 = vmatpush.bf16.msra.mxu3 %v10782_v21  ;;  %4787 = vmatpush.bf16.msrb.mxu1 %v10942_v59  ;;  %v10870_v21 = vor.u32 %v13880_v34, %v10867_v18  ;;  %v13892_v59 = vld [vmem:[#allocation10 + $0x4a4] sm:$0xf] }
 0x397   :  { %v4285_v26 = vpop.f32.mrf.mxu2  ;;  %v4334_v40 = vpop.f32.mrf.mxu3  ;;  %4645 = vmatpush.bf16.msra.mxu2 %v10710_v52 }
 0x398   :  { %v4286_v11 = vadd.f32 %v4285_v26, %v15834_v51  ;;  %v10934_v51 = vor.u32 %v13896_v15, %v10931_v46  ;;  %v10859_v26 = vld [vmem:[#allocation10 + $0x438] sm:$0xf0]  ;;  %4739 = vmatpush.bf16.msrb.mxu0 %v10870_v21 }
 0x399   :  { %v10862_v37 = vor.u32 %v13878_v50, %v10859_v26  ;;  %v10843_v46 = vld [vmem:[#allocation10 + $0x418] sm:$0xf0]  ;;  %v13890_v50 = vld [vmem:[#allocation10 + $0x494] sm:$0xf] }
 0x39a   :  { %v15933_v25 = vadd.f32 %v4334_v40, %v4286_v11  ;;  %v4380_v62 = vpop.f32.mrf.mxu0  ;;  %v4429_v32 = vpop.f32.mrf.mxu1  ;;  %4694 = vmatpush.bf16.msra.mxu3 %v10774_v6  ;;  %4788 = vmatpush.bf16.msrb.mxu1 %v10934_v51  ;;  %v10926_v40 = vor.u32 %v13894_v47, %v10923_v56  ;;  %v13876_v11 = vld [vmem:[#allocation10 + $0x424] sm:$0xf]  ;;  %v10907_v51 = vld [vmem:[#allocation10 + $0x498] sm:$0xf0]  ;;  %v16949_v26 = vld [vmem:[#allocation41_spill] sm:$0xff] }
 0x39b   :  { %v15935_v4 = vadd.f32 %v4429_v32, %v4380_v62  ;;  %v10854_v15 = vor.u32 %v13876_v11, %v10851_v38  ;;  %v10918_v62 = vor.u32 %v13892_v59, %v10915_v29  ;;  %v13874_v32 = vld [vmem:[#allocation10 + $0x414] sm:$0xf]  ;;  %v16951_v56 = vld [vmem:[#allocation63_spill] sm:$0xff]  ;;  %v10835_v38 = vld [vmem:[#allocation10 + $0x408] sm:$0xf0] }
 0x39c   :  { %16947 = vst [vmem:[#allocation31_spill] sm:$0xff] %v15933_v25  ;;  %4740 = vmatpush.bf16.msrb.mxu0 %v10862_v37  ;;  %v16950_v47 = vld [vmem:[#allocation42_spill] sm:$0xff]  ;;  %v10846_v37 = vor.u32 %v13874_v32, %v10843_v46  ;;  %v13872_v11 = vld [vmem:[#allocation10 + $0x404] sm:$0xf]  ;;  %v10899_v29 = vld [vmem:[#allocation10 + $0x488] sm:$0xf0] }
 0x39d   :  { %v13888_v59 = vld [vmem:[#allocation10 + $0x484] sm:$0xf]  ;;  %v11043_v25 = vld [vmem:[#allocation10 + $0x5a8] sm:$0xf0] }
 0x39e   :  { %4789 = vmatpush.bf16.msrb.mxu1 %v10926_v40  ;;  %v10910_v40 = vor.u32 %v13890_v50, %v10907_v51 }
 0x39f   :  { %v4287_v42 = vpop.f32.mrf.mxu2  ;;  %v4336_v33 = vpop.f32.mrf.mxu3 }
 0x3a0   :  { %v4288_v34 = vadd.f32 %v4287_v42, %v15839_v5  ;;  %v16952_v5 = vld [vmem:[#allocation64_spill] sm:$0xff]  ;;  %4741 = vmatpush.bf16.msrb.mxu0 %v10854_v15 }
 0x3a2   :  { %v15938_v18 = vadd.f32 %v4336_v33, %v4288_v34  ;;  %v4383_v52 = vpop.f32.mrf.mxu0  ;;  %v4432_v6 = vpop.f32.mrf.mxu1  ;;  %4790 = vmatpush.bf16.msrb.mxu1 %v10918_v62 }
 0x3a3   :  { %v15940_v21 = vadd.f32 %v4432_v6, %v4383_v52 }
 0x3a4   :  { %16948 = vst [vmem:[#allocation43_spill] sm:$0xff] %v15938_v18  ;;  %4485 = vmatmul.bf16.gmra.mxu2 %v16949_v26  ;;  %4534 = vmatmul.bf16.gmra.mxu3 %v16950_v47  ;;  %v10838_v47 = vor.u32 %v13872_v11, %v10835_v38  ;;  %v16958_v11 = vld [vmem:[#allocation68_spill] sm:$0xff] }
 0x3a5   :  { %4578 = vmatmul.bf16.gmra.mxu0 %v16951_v56  ;;  %4627 = vmatmul.bf16.gmra.mxu1 %v16952_v5  ;;  %v10902_v56 = vor.u32 %v13888_v59, %v10899_v29  ;;  %v13924_v18 = vld [vmem:[#allocation10 + $0x5a4] sm:$0xf] }
 0x3a6   :  { %4742 = vmatpush.bf16.msrb.mxu0 %v10846_v37  ;;  %4791 = vmatpush.bf16.msrb.mxu1 %v10910_v40  ;;  %v16956_v37 = vld [vmem:[#allocation46_spill] sm:$0xff]  ;;  %v16957_v40 = vld [vmem:[#allocation67_spill] sm:$0xff] }
 0x3a7   :  { %v4290_v42 = vpop.f32.mrf.mxu2  ;;  %v4339_v33 = vpop.f32.mrf.mxu3 }
 0x3a8   :  { %v4291_v34 = vadd.f32 %v4290_v42, %v15844_v3  ;;  %v16955_v42 = vld [vmem:[#allocation45_spill] sm:$0xff] }
 0x3aa   :  { %v15947_v52 = vadd.f32 %v4339_v33, %v4291_v34  ;;  %v4385_v6 = vpop.f32.mrf.mxu0  ;;  %v4434_v26 = vpop.f32.mrf.mxu1  ;;  %4743 = vmatpush.bf16.msrb.mxu0 %v10838_v47  ;;  %4792 = vmatpush.bf16.msrb.mxu1 %v10902_v56 }
 0x3ab   :  { %v15949_v15 = vadd.f32 %v4434_v26, %v4385_v6 }
 0x3ac   :  { %16953 = vst [vmem:[#allocation44_spill] sm:$0xff] %v15947_v52 }
 0x3af   :  { %v4292_v62 = vpop.f32.mrf.mxu2  ;;  %v4341_v32 = vpop.f32.mrf.mxu3 }
 0x3b0   :  { %v4293_v46 = vadd.f32 %v4292_v62, %v15851_v27 }
 0x3b2   :  { %v15952_v50 = vadd.f32 %v4341_v32, %v4293_v46  ;;  %v4388_v51 = vpop.f32.mrf.mxu0  ;;  %v4437_v3 = vpop.f32.mrf.mxu1 }
 0x3b3   :  { %v15954_v5 = vadd.f32 %v4437_v3, %v4388_v51  ;;  %v16959_v3 = vld [vmem:[#allocation49_spill] sm:$0xff] }
 0x3b4   :  { %16954 = vst [vmem:[#allocation32_spill] sm:$0xff] %v15952_v50  ;;  %4646 = vmatmul.bf16.vlgmr.msra.gmra.mxu2 %v16955_v42  ;;  %4695 = vmatmul.bf16.vlgmr.msra.gmra.mxu3 %v16956_v37  ;;  %v16960_v42 = vld [vmem:[#allocation50_spill] sm:$0xff] }
 0x3b5   :  { %4583 = vmatmul.bf16.gmra.mxu0 %v16957_v40  ;;  %4632 = vmatmul.bf16.gmra.mxu1 %v16958_v11  ;;  %v16962_v40 = vld [vmem:[#allocation72_spill] sm:$0xff] }
 0x3b7   :  { %v4451_v33 = vpop.f32.mrf.mxu2  ;;  %v4500_v38 = vpop.f32.mrf.mxu3 }
 0x3b8   :  { %v4452_v59 = vadd.f32 %v4451_v33, %v15856_v43  ;;  %v16961_v43 = vld [vmem:[#allocation71_spill] sm:$0xff] }
 0x3ba   :  { %v4501_v29 = vadd.f32 %v4500_v38, %v4452_v59  ;;  %v4390_v27 = vpop.f32.mrf.mxu0  ;;  %v4439_v34 = vpop.f32.mrf.mxu1 }
 0x3bb   :  { %v15961_v6 = vadd.f32 %v4439_v34, %v4390_v27 }
 0x3bf   :  { %v4453_v26 = vpop.f32.mrf.mxu2  ;;  %v4502_v47 = vpop.f32.mrf.mxu3 }
 0x3c0   :  { %v4454_v56 = vadd.f32 %v4453_v26, %v15865_v0 }
 0x3c2   :  { %v4503_v62 = vadd.f32 %v4502_v47, %v4454_v56  ;;  %v4549_v32 = vpop.f32.mrf.mxu0  ;;  %v4598_v46 = vpop.f32.mrf.mxu1 }
 0x3c3   :  { %v4550_v51 = vadd.f32 %v4549_v32, %v4501_v29 }
 0x3c4   :  { %4651 = vmatmul.bf16.gmra.mxu2 %v16959_v3  ;;  %4700 = vmatmul.bf16.gmra.mxu3 %v16960_v42  ;;  %v16963_v42 = vld [vmem:[#allocation53_spill] sm:$0xff] }
 0x3c5   :  { %v15966_v37 = vadd.f32 %v4598_v46, %v4550_v51  ;;  %4744 = vmatmul.bf16.vlgmr.msrb.gmra.mxu0 %v16961_v43  ;;  %4793 = vmatmul.bf16.vlgmr.msrb.gmra.mxu1 %v16962_v40  ;;  %v16964_v43 = vld [vmem:[#allocation54_spill] sm:$0xff] }
 0x3c7   :  { %v4456_v11 = vpop.f32.mrf.mxu2  ;;  %v4505_v33 = vpop.f32.mrf.mxu3 }
 0x3c8   :  { %v4457_v38 = vadd.f32 %v4456_v11, %v15870_v1  ;;  %v16965_v1 = vld [vmem:[#allocation75_spill] sm:$0xff]  ;;  %v16966_v11 = vld [vmem:[#allocation76_spill] sm:$0xff] }
 0x3ca   :  { %v4506_v59 = vadd.f32 %v4505_v33, %v4457_v38  ;;  %v4551_v0 = vpop.f32.mrf.mxu0  ;;  %v4600_v27 = vpop.f32.mrf.mxu1 }
 0x3cb   :  { %v4552_v34 = vadd.f32 %v4551_v0, %v4503_v62 }
 0x3cd   :  { %v15971_v26 = vadd.f32 %v4600_v27, %v4552_v34 }
 0x3cf   :  { %v4458_v29 = vpop.f32.mrf.mxu2  ;;  %v4507_v47 = vpop.f32.mrf.mxu3 }
 0x3d0   :  { %v4459_v56 = vadd.f32 %v4458_v29, %v15879_v12 }
 0x3d2   :  { %v4508_v32 = vadd.f32 %v4507_v47, %v4459_v56  ;;  %v4554_v46 = vpop.f32.mrf.mxu0  ;;  %v4603_v51 = vpop.f32.mrf.mxu1 }
 0x3d3   :  { %v4555_v3 = vadd.f32 %v4554_v46, %v4506_v59 }
 0x3d4   :  { %4656 = vmatmul.bf16.gmra.mxu2 %v16963_v42  ;;  %4705 = vmatmul.bf16.gmra.mxu3 %v16964_v43  ;;  %v16967_v43 = vld [vmem:[#allocation57_spill] sm:$0xff] }
 0x3d5   :  { %v15976_v40 = vadd.f32 %v4603_v51, %v4555_v3  ;;  %4749 = vmatmul.bf16.gmra.mxu0 %v16965_v1  ;;  %4798 = vmatmul.bf16.gmra.mxu1 %v16966_v11  ;;  %v16968_v1 = vld [vmem:[#allocation58_spill] sm:$0xff] }
 0x3d7   :  { %v4461_v62 = vpop.f32.mrf.mxu2  ;;  %v4510_v33 = vpop.f32.mrf.mxu3 }
 0x3d8   :  { %v4462_v38 = vadd.f32 %v4461_v62, %v15884_v31  ;;  %v16969_v31 = vld [vmem:[#allocation79_spill] sm:$0xff]  ;;  %v16970_v62 = vld [vmem:[#allocation80_spill] sm:$0xff] }
 0x3da   :  { %v4511_v0 = vadd.f32 %v4510_v33, %v4462_v38  ;;  %v4556_v12 = vpop.f32.mrf.mxu0  ;;  %v4605_v27 = vpop.f32.mrf.mxu1 }
 0x3db   :  { %v4557_v34 = vadd.f32 %v4556_v12, %v4508_v32 }
 0x3dd   :  { %v15981_v29 = vadd.f32 %v4605_v27, %v4557_v34 }
 0x3df   :  { %v4463_v59 = vpop.f32.mrf.mxu2  ;;  %v4512_v47 = vpop.f32.mrf.mxu3 }
 0x3e0   :  { %v4464_v56 = vadd.f32 %v4463_v59, %v15893_v61 }
 0x3e2   :  { %v4513_v46 = vadd.f32 %v4512_v47, %v4464_v56  ;;  %v4559_v51 = vpop.f32.mrf.mxu0  ;;  %v4608_v3 = vpop.f32.mrf.mxu1 }
 0x3e3   :  { %v4560_v42 = vadd.f32 %v4559_v51, %v4511_v0 }
 0x3e4   :  { %4661 = vmatmul.bf16.gmra.mxu2 %v16967_v43  ;;  %4710 = vmatmul.bf16.gmra.mxu3 %v16968_v1  ;;  %v16971_v1 = vld [vmem:[#allocation61_spill] sm:$0xff] }
 0x3e5   :  { %v15986_v11 = vadd.f32 %v4608_v3, %v4560_v42  ;;  %4754 = vmatmul.bf16.gmra.mxu0 %v16969_v31  ;;  %4803 = vmatmul.bf16.gmra.mxu1 %v16970_v62  ;;  %v16972_v31 = vld [vmem:[#allocation62_spill] sm:$0xff] }
 0x3e7   :  { %v4466_v32 = vpop.f32.mrf.mxu2  ;;  %v4515_v33 = vpop.f32.mrf.mxu3 }
 0x3e8   :  { %v4467_v38 = vadd.f32 %v4466_v32, %v15898_v48  ;;  %v16973_v48 = vld [vmem:[#allocation83_spill] sm:$0xff]  ;;  %v16974_v32 = vld [vmem:[#allocation84_spill] sm:$0xff] }
 0x3ea   :  { %v4516_v12 = vadd.f32 %v4515_v33, %v4467_v38  ;;  %v4561_v61 = vpop.f32.mrf.mxu0  ;;  %v4610_v27 = vpop.f32.mrf.mxu1  ;;  %v11019_v33 = vld [vmem:[#allocation10 + $0x578] sm:$0xf0]  ;;  %v13934_v38 = vld [vmem:[#allocation10 + $0x5f4] sm:$0xf] }
 0x3eb   :  { %v4562_v34 = vadd.f32 %v4561_v61, %v4513_v46  ;;  %v13918_v46 = vld [vmem:[#allocation10 + $0x574] sm:$0xf] }
 0x3ec   :  { %v11022_v61 = vor.u32 %v13918_v46, %v11019_v33  ;;  %v13914_v46 = vld [vmem:[#allocation10 + $0x554] sm:$0xf]  ;;  %v11003_v33 = vld [vmem:[#allocation10 + $0x558] sm:$0xf0] }
 0x3ed   :  { %v15991_v59 = vadd.f32 %v4610_v27, %v4562_v34  ;;  %v11083_v27 = vld [vmem:[#allocation10 + $0x5f8] sm:$0xf0] }
 0x3ee   :  { %4834 = vmatpush.bf16.msrb.mxu2 %v11022_v61  ;;  %v11067_v61 = vld [vmem:[#allocation10 + $0x5d8] sm:$0xf0] }
 0x3ef   :  { %v4468_v0 = vpop.f32.mrf.mxu2  ;;  %v4517_v47 = vpop.f32.mrf.mxu3 }
 0x3f0   :  { %v4469_v56 = vadd.f32 %v4468_v0, %v15907_v55  ;;  %v11086_v0 = vor.u32 %v13934_v38, %v11083_v27  ;;  %v13930_v38 = vld [vmem:[#allocation10 + $0x5d4] sm:$0xf] }
 0x3f2   :  { %v4518_v51 = vadd.f32 %v4517_v47, %v4469_v56  ;;  %v4564_v3 = vpop.f32.mrf.mxu0  ;;  %v4613_v42 = vpop.f32.mrf.mxu1  ;;  %4883 = vmatpush.bf16.msrb.mxu3 %v11086_v0 }
 0x3f3   :  { %v4565_v43 = vadd.f32 %v4564_v3, %v4516_v12 }
 0x3f4   :  { %4666 = vmatmul.bf16.gmra.mxu2 %v16971_v1  ;;  %4715 = vmatmul.bf16.gmra.mxu3 %v16972_v31  ;;  %v13932_v1 = vld [vmem:[#allocation10 + $0x5e4] sm:$0xf] }
 0x3f5   :  { %v15996_v62 = vadd.f32 %v4613_v42, %v4565_v43  ;;  %4759 = vmatmul.bf16.gmra.mxu0 %v16973_v48  ;;  %4808 = vmatmul.bf16.gmra.mxu1 %v16974_v32  ;;  %v13916_v42 = vld [vmem:[#allocation10 + $0x564] sm:$0xf]  ;;  %v11011_v43 = vld [vmem:[#allocation10 + $0x568] sm:$0xf0] }
 0x3f6   :  { %v11014_v48 = vor.u32 %v13916_v42, %v11011_v43  ;;  %v11075_v32 = vld [vmem:[#allocation10 + $0x5e8] sm:$0xf0]  ;;  %v13912_v42 = vld [vmem:[#allocation10 + $0x544] sm:$0xf] }
 0x3f7   :  { %v4471_v55 = vpop.f32.mrf.mxu2  ;;  %v4520_v34 = vpop.f32.mrf.mxu3  ;;  %v11078_v50 = vor.u32 %v13932_v1, %v11075_v32  ;;  %v13928_v43 = vld [vmem:[#allocation10 + $0x5c4] sm:$0xf]  ;;  %v16975_v32 = vld [vmem:[#allocation65_spill] sm:$0xff] }
 0x3f8   :  { %v4472_v12 = vadd.f32 %v4471_v55, %v15912_v39  ;;  %4835 = vmatpush.bf16.msrb.mxu2 %v11014_v48  ;;  %v11006_v39 = vor.u32 %v13914_v46, %v11003_v33  ;;  %v11059_v48 = vld [vmem:[#allocation10 + $0x5c8] sm:$0xf0] }
 0x3f9   :  { %4884 = vmatpush.bf16.msrb.mxu3 %v11078_v50  ;;  %v16976_v50 = vld [vmem:[#allocation66_spill] sm:$0xff]  ;;  %v11062_v46 = vor.u32 %v13928_v43, %v11059_v48 }
 0x3fa   :  { %v4521_v47 = vadd.f32 %v4520_v34, %v4472_v12  ;;  %v4566_v56 = vpop.f32.mrf.mxu0  ;;  %v4615_v3 = vpop.f32.mrf.mxu1  ;;  %v11070_v34 = vor.u32 %v13930_v38, %v11067_v61  ;;  %v16977_v38 = vld [vmem:[#allocation87_spill] sm:$0xff] }
 0x3fb   :  { %v4567_v31 = vadd.f32 %v4566_v56, %v4518_v51  ;;  %v10987_v61 = vld [vmem:[#allocation10 + $0x538] sm:$0xf0] }
 0x3fc   :  { %4836 = vmatpush.bf16.msrb.mxu2 %v11006_v39  ;;  %v13910_v39 = vld [vmem:[#allocation10 + $0x534] sm:$0xf]  ;;  %v11147_v48 = vld [vmem:[#allocation10 + $0x678] sm:$0xf0] }
 0x3fd   :  { %v16001_v52 = vadd.f32 %v4615_v3, %v4567_v31  ;;  %4885 = vmatpush.bf16.msrb.mxu3 %v11070_v34  ;;  %v10995_v3 = vld [vmem:[#allocation10 + $0x548] sm:$0xf0] }
 0x3fe   :  { %v10998_v31 = vor.u32 %v13912_v42, %v10995_v3 }
 0x3ff   :  { %v4473_v27 = vpop.f32.mrf.mxu2  ;;  %v4522_v55 = vpop.f32.mrf.mxu3 }
 0x400   :  { %v4474_v0 = vadd.f32 %v4473_v27, %v15921_v35  ;;  %v16978_v35 = vld [vmem:[#allocation88_spill] sm:$0xff]  ;;  %v13926_v27 = vld [vmem:[#allocation10 + $0x5b4] sm:$0xf]  ;;  %4837 = vmatpush.bf16.msrb.mxu2 %v10998_v31 }
 0x401   :  { %4886 = vmatpush.bf16.msrb.mxu3 %v11062_v46  ;;  %v13908_v31 = vld [vmem:[#allocation10 + $0x524] sm:$0xf]  ;;  %v10979_v46 = vld [vmem:[#allocation10 + $0x528] sm:$0xf0] }
 0x402   :  { %v4523_v12 = vadd.f32 %v4522_v55, %v4474_v0  ;;  %v4569_v51 = vpop.f32.mrf.mxu0  ;;  %v4618_v56 = vpop.f32.mrf.mxu1  ;;  %v10990_v55 = vor.u32 %v13910_v39, %v10987_v61  ;;  %v10982_v61 = vor.u32 %v13908_v31, %v10979_v46  ;;  %v11035_v31 = vld [vmem:[#allocation10 + $0x598] sm:$0xf0]  ;;  %v13946_v46 = vld [vmem:[#allocation10 + $0x654] sm:$0xf] }
 0x403   :  { %v4570_v1 = vadd.f32 %v4569_v51, %v4521_v47  ;;  %v11051_v47 = vld [vmem:[#allocation10 + $0x5b8] sm:$0xf0] }
 0x404   :  { %4671 = vmatmul.bf16.gmra.mxu2 %v16975_v32  ;;  %4720 = vmatmul.bf16.gmra.mxu3 %v16976_v50  ;;  %v11054_v51 = vor.u32 %v13926_v27, %v11051_v47  ;;  %v13966_v32 = vld [vmem:[#allocation10 + $0x6f4] sm:$0xf]  ;;  %v13948_v47 = vld [vmem:[#allocation10 + $0x664] sm:$0xf] }
 0x405   :  { %v16006_v33 = vadd.f32 %v4618_v56, %v4570_v1  ;;  %4764 = vmatmul.bf16.gmra.mxu0 %v16977_v38  ;;  %4813 = vmatmul.bf16.gmra.mxu1 %v16978_v35  ;;  %v13950_v1 = vld [vmem:[#allocation10 + $0x674] sm:$0xf]  ;;  %v11211_v35 = vld [vmem:[#allocation10 + $0x6f8] sm:$0xf0] }
 0x406   :  { %4838 = vmatpush.bf16.msrb.mxu2 %v10990_v55  ;;  %4887 = vmatpush.bf16.msrb.mxu3 %v11054_v51  ;;  %v11150_v38 = vor.u32 %v13950_v1, %v11147_v48  ;;  %v11214_v39 = vor.u32 %v13966_v32, %v11211_v35  ;;  %v13964_v55 = vld [vmem:[#allocation10 + $0x6e4] sm:$0xf]  ;;  %v11203_v51 = vld [vmem:[#allocation10 + $0x6e8] sm:$0xf0]  ;;  %v13922_v35 = vld [vmem:[#allocation10 + $0x594] sm:$0xf] }
 0x407   :  { %v4476_v34 = vpop.f32.mrf.mxu2  ;;  %v4525_v0 = vpop.f32.mrf.mxu3  ;;  %v11206_v48 = vor.u32 %v13964_v55, %v11203_v51  ;;  %v13904_v55 = vld [vmem:[#allocation10 + $0x504] sm:$0xf]  ;;  %v10963_v51 = vld [vmem:[#allocation10 + $0x508] sm:$0xf0] }
 0x408   :  { %v4477_v42 = vadd.f32 %v4476_v34, %v15926_v44  ;;  %4932 = vmatpush.bf16.msra.mxu0 %v11150_v38  ;;  %v11046_v44 = vor.u32 %v13924_v18, %v11043_v25  ;;  %v11139_v34 = vld [vmem:[#allocation10 + $0x668] sm:$0xf0]  ;;  %4981 = vmatpush.bf16.msra.mxu1 %v11214_v39  ;;  %v11131_v39 = vld [vmem:[#allocation10 + $0x658] sm:$0xf0] }
 0x40a   :  { %v4526_v3 = vadd.f32 %v4525_v0, %v4477_v42  ;;  %v4571_v43 = vpop.f32.mrf.mxu0  ;;  %v4620_v56 = vpop.f32.mrf.mxu1  ;;  %4839 = vmatpush.bf16.msrb.mxu2 %v10982_v61  ;;  %v11142_v0 = vor.u32 %v13948_v47, %v11139_v34  ;;  %v10971_v42 = vld [vmem:[#allocation10 + $0x518] sm:$0xf0]  ;;  %4888 = vmatpush.bf16.msrb.mxu3 %v11046_v44  ;;  %v13962_v61 = vld [vmem:[#allocation10 + $0x6d4] sm:$0xf]  ;;  %v11134_v34 = vor.u32 %v13946_v46, %v11131_v39  ;;  %v11187_v46 = vld [vmem:[#allocation10 + $0x6c8] sm:$0xf0] }
 0x40b   :  { %v4572_v50 = vadd.f32 %v4571_v43, %v4523_v12  ;;  %v13906_v12 = vld [vmem:[#allocation10 + $0x514] sm:$0xf]  ;;  %v11195_v44 = vld [vmem:[#allocation10 + $0x6d8] sm:$0xf0] }
 0x40c   :  { %v10974_v32 = vor.u32 %v13906_v12, %v10971_v42  ;;  %4933 = vmatpush.bf16.msra.mxu0 %v11142_v0  ;;  %4982 = vmatpush.bf16.msra.mxu1 %v11206_v48  ;;  %v16979_v12 = vld [vmem:[#allocation69_spill] sm:$0xff]  ;;  %v16980_v42 = vld [vmem:[#allocation70_spill] sm:$0xff]  ;;  %v10966_v0 = vor.u32 %v13904_v55, %v10963_v51  ;;  %v16981_v48 = vld [vmem:[#allocation91_spill] sm:$0xff] }
 0x40d   :  { %v16011_v27 = vadd.f32 %v4620_v56, %v4572_v50  ;;  %v11038_v50 = vor.u32 %v13922_v35, %v11035_v31  ;;  %v13944_v31 = vld [vmem:[#allocation10 + $0x644] sm:$0xf]  ;;  %v13942_v51 = vld [vmem:[#allocation10 + $0x634] sm:$0xf] }
 0x40e   :  { %4840 = vmatpush.bf16.msrb.mxu2 %v10974_v32  ;;  %v16982_v32 = vld [vmem:[#allocation92_spill] sm:$0xff] }
 0x40f   :  { %v4478_v43 = vpop.f32.mrf.mxu2  ;;  %v4527_v1 = vpop.f32.mrf.mxu3  ;;  %4889 = vmatpush.bf16.msrb.mxu3 %v11038_v50  ;;  %v13960_v50 = vld [vmem:[#allocation10 + $0x6c4] sm:$0xf] }
 0x410   :  { %v4479_v56 = vadd.f32 %v4478_v43, %v15935_v4  ;;  %v11198_v4 = vor.u32 %v13962_v61, %v11195_v44  ;;  %v13920_v43 = vld [vmem:[#allocation10 + $0x584] sm:$0xf]  ;;  %4934 = vmatpush.bf16.msra.mxu0 %v11134_v34  ;;  %v11190_v61 = vor.u32 %v13960_v50, %v11187_v46 }
 0x412   :  { %v4528_v25 = vadd.f32 %v4527_v1, %v4479_v56  ;;  %v4574_v18 = vpop.f32.mrf.mxu0  ;;  %v4623_v38 = vpop.f32.mrf.mxu1  ;;  %v11027_v1 = vld [vmem:[#allocation10 + $0x588] sm:$0xf0]  ;;  %4983 = vmatpush.bf16.msra.mxu1 %v11198_v4  ;;  %4841 = vmatpush.bf16.msrb.mxu2 %v10966_v0  ;;  %v11179_v4 = vld [vmem:[#allocation10 + $0x6b8] sm:$0xf0] }
 0x413   :  { %v4575_v47 = vadd.f32 %v4574_v18, %v4526_v3  ;;  %v11030_v3 = vor.u32 %v13920_v43, %v11027_v1  ;;  %v11123_v56 = vld [vmem:[#allocation10 + $0x648] sm:$0xf0]  ;;  %v13958_v43 = vld [vmem:[#allocation10 + $0x6b4] sm:$0xf] }
 0x414   :  { %4676 = vmatmul.bf16.gmra.mxu2 %v16979_v12  ;;  %4725 = vmatmul.bf16.gmra.mxu3 %v16980_v42  ;;  %v11126_v18 = vor.u32 %v13944_v31, %v11123_v56  ;;  %v11115_v42 = vld [vmem:[#allocation10 + $0x638] sm:$0xf0]  ;;  %v13940_v31 = vld [vmem:[#allocation10 + $0x624] sm:$0xf]  ;;  %v11107_v0 = vld [vmem:[#allocation10 + $0x628] sm:$0xf0] }
 0x415   :  { %v16016_v35 = vadd.f32 %v4623_v38, %v4575_v47  ;;  %4769 = vmatmul.bf16.gmra.mxu0 %v16981_v48  ;;  %4818 = vmatmul.bf16.gmra.mxu1 %v16982_v32  ;;  %v11118_v34 = vor.u32 %v13942_v51, %v11115_v42  ;;  %v11182_v48 = vor.u32 %v13958_v43, %v11179_v4  ;;  %v11171_v56 = vld [vmem:[#allocation10 + $0x6a8] sm:$0xf0]  ;;  %v11163_v43 = vld [vmem:[#allocation10 + $0x698] sm:$0xf0] }
 0x416   :  { %4890 = vmatpush.bf16.msrb.mxu3 %v11030_v3  ;;  %4935 = vmatpush.bf16.msra.mxu0 %v11126_v18  ;;  %v13956_v3 = vld [vmem:[#allocation10 + $0x6a4] sm:$0xf] }
 0x417   :  { %v4481_v39 = vpop.f32.mrf.mxu2  ;;  %v4530_v12 = vpop.f32.mrf.mxu3  ;;  %4984 = vmatpush.bf16.msra.mxu1 %v11190_v61  ;;  %v11174_v18 = vor.u32 %v13956_v3, %v11171_v56  ;;  %v11091_v3 = vld [vmem:[#allocation10 + $0x608] sm:$0xf0] }
 0x418   :  { %v4482_v38 = vadd.f32 %v4481_v39, %v15940_v21  ;;  %v11110_v21 = vor.u32 %v13940_v31, %v11107_v0  ;;  %v16985_v31 = vld [vmem:[#allocation95_spill] sm:$0xff] }
 0x419   :  { %v13936_v0 = vld [vmem:[#allocation10 + $0x604] sm:$0xf] }
 0x41a   :  { %v4531_v47 = vadd.f32 %v4530_v12, %v4482_v38  ;;  %v4576_v44 = vpop.f32.mrf.mxu0  ;;  %v4625_v55 = vpop.f32.mrf.mxu1  ;;  %4936 = vmatpush.bf16.msra.mxu0 %v11118_v34  ;;  %v13938_v38 = vld [vmem:[#allocation10 + $0x614] sm:$0xf]  ;;  %v11094_v56 = vor.u32 %v13936_v0, %v11091_v3  ;;  %v16989_v3 = vld [vmem:[#allocation99_spill] sm:$0xff] }
 0x41b   :  { %v4577_v1 = vadd.f32 %v4576_v44, %v4528_v25  ;;  %4985 = vmatpush.bf16.msra.mxu1 %v11182_v48  ;;  %v11099_v44 = vld [vmem:[#allocation10 + $0x618] sm:$0xf0] }
 0x41c   :  { %v11102_v42 = vor.u32 %v13938_v38, %v11099_v44  ;;  %v16984_v34 = vld [vmem:[#allocation74_spill] sm:$0xff] }
 0x41d   :  { %v16021_v32 = vadd.f32 %v4625_v55, %v4577_v1  ;;  %v13954_v55 = vld [vmem:[#allocation10 + $0x694] sm:$0xf] }
 0x41e   :  { %4937 = vmatpush.bf16.msra.mxu0 %v11110_v21  ;;  %v16983_v1 = vld [vmem:[#allocation73_spill] sm:$0xff]  ;;  %v11166_v4 = vor.u32 %v13954_v55, %v11163_v43  ;;  %v13952_v21 = vld [vmem:[#allocation10 + $0x684] sm:$0xf]  ;;  %v16988_v0 = vld [vmem:[#allocation78_spill] sm:$0xff] }
 0x41f   :  { %v4483_v50 = vpop.f32.mrf.mxu2  ;;  %v4532_v46 = vpop.f32.mrf.mxu3  ;;  %4986 = vmatpush.bf16.msra.mxu1 %v11174_v18 }
 0x420   :  { %v4484_v39 = vadd.f32 %v4483_v50, %v15949_v15  ;;  %v16986_v15 = vld [vmem:[#allocation96_spill] sm:$0xff] }
 0x422   :  { %v4533_v12 = vadd.f32 %v4532_v46, %v4484_v39  ;;  %v4579_v61 = vpop.f32.mrf.mxu0  ;;  %v4628_v25 = vpop.f32.mrf.mxu1  ;;  %4938 = vmatpush.bf16.msra.mxu0 %v11102_v42 }
 0x423   :  { %v4580_v51 = vadd.f32 %v4579_v61, %v4531_v47  ;;  %4987 = vmatpush.bf16.msra.mxu1 %v11166_v4  ;;  %v11155_v47 = vld [vmem:[#allocation10 + $0x688] sm:$0xf0] }
 0x424   :  { %4681 = vmatmul.bf16.gmra.mxu2 %v16983_v1  ;;  %4730 = vmatmul.bf16.gmra.mxu3 %v16984_v34  ;;  %v11158_v18 = vor.u32 %v13952_v21, %v11155_v47  ;;  %v16990_v21 = vld [vmem:[#allocation100_spill] sm:$0xff] }
 0x425   :  { %v16026_v48 = vadd.f32 %v4628_v25, %v4580_v51  ;;  %4774 = vmatmul.bf16.gmra.mxu0 %v16985_v31  ;;  %4823 = vmatmul.bf16.gmra.mxu1 %v16986_v15  ;;  %v16987_v15 = vld [vmem:[#allocation77_spill] sm:$0xff] }
 0x426   :  { %4939 = vmatpush.bf16.msra.mxu0 %v11094_v56 }
 0x427   :  { %v4486_v50 = vpop.f32.mrf.mxu2  ;;  %v4535_v46 = vpop.f32.mrf.mxu3  ;;  %4988 = vmatpush.bf16.msra.mxu1 %v11158_v18 }
 0x428   :  { %v4487_v39 = vadd.f32 %v4486_v50, %v15954_v5 }
 0x42a   :  { %v4536_v61 = vadd.f32 %v4535_v46, %v4487_v39  ;;  %v4581_v38 = vpop.f32.mrf.mxu0  ;;  %v4630_v25 = vpop.f32.mrf.mxu1 }
 0x42b   :  { %v4582_v44 = vadd.f32 %v4581_v38, %v4533_v12 }
 0x42d   :  { %v16031_v55 = vadd.f32 %v4630_v25, %v4582_v44 }
 0x42f   :  { %v4488_v51 = vpop.f32.mrf.mxu2  ;;  %v4537_v43 = vpop.f32.mrf.mxu3 }
 0x430   :  { %v4489_v42 = vadd.f32 %v4488_v51, %v15961_v6 }
 0x432   :  { %v4538_v1 = vadd.f32 %v4537_v43, %v4489_v42  ;;  %v4584_v34 = vpop.f32.mrf.mxu0  ;;  %v4633_v4 = vpop.f32.mrf.mxu1 }
 0x433   :  { %v4585_v31 = vadd.f32 %v4584_v34, %v4536_v61  ;;  %v16991_v34 = vld [vmem:[#allocation81_spill] sm:$0xff] }
 0x434   :  { %4842 = vmatmul.bf16.vlgmr.msrb.gmra.mxu2 %v16987_v15  ;;  %4891 = vmatmul.bf16.vlgmr.msrb.gmra.mxu3 %v16988_v0  ;;  %v16994_v15 = vld [vmem:[#allocation104_spill] sm:$0xff] }
 0x435   :  { %v16036_v5 = vadd.f32 %v4633_v4, %v4585_v31  ;;  %4779 = vmatmul.bf16.gmra.mxu0 %v16989_v3  ;;  %4828 = vmatmul.bf16.gmra.mxu1 %v16990_v21  ;;  %v16992_v4 = vld [vmem:[#allocation82_spill] sm:$0xff] }
 0x437   :  { %v4647_v12 = vpop.f32.mrf.mxu2  ;;  %v4696_v56 = vpop.f32.mrf.mxu3 }
 0x438   :  { %v4648_v47 = vadd.f32 %v4647_v12, %v15966_v37  ;;  %v16993_v37 = vld [vmem:[#allocation103_spill] sm:$0xff] }
 0x43a   :  { %v4697_v50 = vadd.f32 %v4696_v56, %v4648_v47  ;;  %v4586_v6 = vpop.f32.mrf.mxu0  ;;  %v4635_v46 = vpop.f32.mrf.mxu1 }
 0x43b   :  { %v4587_v18 = vadd.f32 %v4586_v6, %v4538_v1 }
 0x43d   :  { %v16041_v39 = vadd.f32 %v4635_v46, %v4587_v18 }
 0x43f   :  { %v4649_v61 = vpop.f32.mrf.mxu2  ;;  %v4698_v38 = vpop.f32.mrf.mxu3 }
 0x440   :  { %v4650_v25 = vadd.f32 %v4649_v61, %v15971_v26 }
 0x442   :  { %v4699_v44 = vadd.f32 %v4698_v38, %v4650_v25  ;;  %v4745_v51 = vpop.f32.mrf.mxu0  ;;  %v4794_v43 = vpop.f32.mrf.mxu1 }
 0x443   :  { %v4746_v42 = vadd.f32 %v4745_v51, %v4697_v50  ;;  %v16995_v51 = vld [vmem:[#allocation85_spill] sm:$0xff] }
 0x444   :  { %4847 = vmatmul.bf16.gmra.mxu2 %v16991_v34  ;;  %4896 = vmatmul.bf16.gmra.mxu3 %v16992_v4  ;;  %v16998_v34 = vld [vmem:[#allocation108_spill] sm:$0xff] }
 0x445   :  { %v16046_v31 = vadd.f32 %v4794_v43, %v4746_v42  ;;  %4940 = vmatmul.bf16.vlgmr.msra.gmra.mxu0 %v16993_v37  ;;  %4989 = vmatmul.bf16.vlgmr.msra.gmra.mxu1 %v16994_v15  ;;  %v16996_v43 = vld [vmem:[#allocation86_spill] sm:$0xff] }
 0x447   :  { %v4652_v1 = vpop.f32.mrf.mxu2  ;;  %v4701_v0 = vpop.f32.mrf.mxu3 }
 0x448   :  { %v4653_v3 = vadd.f32 %v4652_v1, %v15976_v40  ;;  %v16997_v40 = vld [vmem:[#allocation107_spill] sm:$0xff] }
 0x44a   :  { %v4702_v21 = vadd.f32 %v4701_v0, %v4653_v3  ;;  %v4747_v26 = vpop.f32.mrf.mxu0  ;;  %v4796_v12 = vpop.f32.mrf.mxu1 }
 0x44b   :  { %v4748_v56 = vadd.f32 %v4747_v26, %v4699_v44 }
 0x44d   :  { %v16051_v47 = vadd.f32 %v4796_v12, %v4748_v56 }
 0x44f   :  { %v4654_v50 = vpop.f32.mrf.mxu2  ;;  %v4703_v6 = vpop.f32.mrf.mxu3 }
 0x450   :  { %v4655_v46 = vadd.f32 %v4654_v50, %v15981_v29 }
 0x452   :  { %v4704_v18 = vadd.f32 %v4703_v6, %v4655_v46  ;;  %v4750_v61 = vpop.f32.mrf.mxu0  ;;  %v4799_v38 = vpop.f32.mrf.mxu1 }
 0x453   :  { %v4751_v25 = vadd.f32 %v4750_v61, %v4702_v21  ;;  %v16999_v61 = vld [vmem:[#allocation89_spill] sm:$0xff] }
 0x454   :  { %4852 = vmatmul.bf16.gmra.mxu2 %v16995_v51  ;;  %4901 = vmatmul.bf16.gmra.mxu3 %v16996_v43  ;;  %v17002_v51 = vld [vmem:[#allocation112_spill] sm:$0xff] }
 0x455   :  { %v16056_v42 = vadd.f32 %v4799_v38, %v4751_v25  ;;  %4945 = vmatmul.bf16.gmra.mxu0 %v16997_v40  ;;  %4994 = vmatmul.bf16.gmra.mxu1 %v16998_v34  ;;  %v17000_v38 = vld [vmem:[#allocation90_spill] sm:$0xff] }
 0x457   :  { %v4657_v44 = vpop.f32.mrf.mxu2  ;;  %v4706_v4 = vpop.f32.mrf.mxu3 }
 0x458   :  { %v4658_v37 = vadd.f32 %v4657_v44, %v15986_v11  ;;  %v17001_v11 = vld [vmem:[#allocation111_spill] sm:$0xff] }
 0x45a   :  { %v4707_v15 = vadd.f32 %v4706_v4, %v4658_v37  ;;  %v4752_v29 = vpop.f32.mrf.mxu0  ;;  %v4801_v1 = vpop.f32.mrf.mxu1 }
 0x45b   :  { %v4753_v0 = vadd.f32 %v4752_v29, %v4704_v18 }
 0x45d   :  { %v16061_v3 = vadd.f32 %v4801_v1, %v4753_v0 }
 0x45f   :  { %v4659_v21 = vpop.f32.mrf.mxu2  ;;  %v4708_v26 = vpop.f32.mrf.mxu3 }
 0x460   :  { %v4660_v12 = vadd.f32 %v4659_v21, %v15991_v59 }
 0x462   :  { %v4709_v56 = vadd.f32 %v4708_v26, %v4660_v12  ;;  %v4755_v50 = vpop.f32.mrf.mxu0  ;;  %v4804_v6 = vpop.f32.mrf.mxu1 }
 0x463   :  { %v4756_v46 = vadd.f32 %v4755_v50, %v4707_v15  ;;  %v17003_v50 = vld [vmem:[#allocation93_spill] sm:$0xff] }
 0x464   :  { %4857 = vmatmul.bf16.gmra.mxu2 %v16999_v61  ;;  %4906 = vmatmul.bf16.gmra.mxu3 %v17000_v38  ;;  %v17006_v61 = vld [vmem:[#allocation116_spill] sm:$0xff]  ;;  %v11275_v38 = vld [vmem:[#allocation10 + $0x778] sm:$0xf0] }
 0x465   :  { %v16066_v25 = vadd.f32 %v4804_v6, %v4756_v46  ;;  %4950 = vmatmul.bf16.gmra.mxu0 %v17001_v11  ;;  %4999 = vmatmul.bf16.gmra.mxu1 %v17002_v51  ;;  %v17004_v6 = vld [vmem:[#allocation94_spill] sm:$0xff] }
 0x466   :  { %v13998_v11 = vld [vmem:[#allocation10 + $0x7f4] sm:$0xf] }
 0x467   :  { %v4662_v18 = vpop.f32.mrf.mxu2  ;;  %v4711_v43 = vpop.f32.mrf.mxu3 }
 0x468   :  { %v4663_v40 = vadd.f32 %v4662_v18, %v15996_v62  ;;  %v17005_v62 = vld [vmem:[#allocation115_spill] sm:$0xff] }
 0x469   :  { %v11339_v18 = vld [vmem:[#allocation10 + $0x7f8] sm:$0xf0] }
 0x46a   :  { %v4712_v34 = vadd.f32 %v4711_v43, %v4663_v40  ;;  %v4757_v59 = vpop.f32.mrf.mxu0  ;;  %v4806_v44 = vpop.f32.mrf.mxu1  ;;  %v11342_v40 = vor.u32 %v13998_v11, %v11339_v18 }
 0x46b   :  { %v4758_v4 = vadd.f32 %v4757_v59, %v4709_v56  ;;  %v13982_v56 = vld [vmem:[#allocation10 + $0x774] sm:$0xf] }
 0x46c   :  { %v11278_v51 = vor.u32 %v13982_v56, %v11275_v38  ;;  %5079 = vmatpush.bf16.msra.mxu3 %v11342_v40  ;;  %v13994_v56 = vld [vmem:[#allocation10 + $0x7d4] sm:$0xf]  ;;  %v11323_v38 = vld [vmem:[#allocation10 + $0x7d8] sm:$0xf0] }
 0x46d   :  { %v16071_v37 = vadd.f32 %v4806_v44, %v4758_v4  ;;  %v11326_v18 = vor.u32 %v13994_v56, %v11323_v38  ;;  %v11243_v56 = vld [vmem:[#allocation10 + $0x738] sm:$0xf0] }
 0x46e   :  { %5030 = vmatpush.bf16.msra.mxu2 %v11278_v51 }
 0x46f   :  { %v4664_v15 = vpop.f32.mrf.mxu2  ;;  %v4713_v29 = vpop.f32.mrf.mxu3 }
 0x470   :  { %v4665_v1 = vadd.f32 %v4664_v15, %v16001_v52  ;;  %v13980_v15 = vld [vmem:[#allocation10 + $0x764] sm:$0xf] }
 0x472   :  { %v4714_v0 = vadd.f32 %v4713_v29, %v4665_v1  ;;  %v4760_v21 = vpop.f32.mrf.mxu0  ;;  %v4809_v26 = vpop.f32.mrf.mxu1  ;;  %v11267_v29 = vld [vmem:[#allocation10 + $0x768] sm:$0xf0]  ;;  %v13996_v1 = vld [vmem:[#allocation10 + $0x7e4] sm:$0xf] }
 0x473   :  { %v4761_v12 = vadd.f32 %v4760_v21, %v4712_v34 }
 0x474   :  { %4862 = vmatmul.bf16.gmra.mxu2 %v17003_v50  ;;  %4911 = vmatmul.bf16.gmra.mxu3 %v17004_v6 }
 0x475   :  { %v16076_v46 = vadd.f32 %v4809_v26, %v4761_v12  ;;  %4955 = vmatmul.bf16.gmra.mxu0 %v17005_v62  ;;  %5004 = vmatmul.bf16.gmra.mxu1 %v17006_v61  ;;  %v11270_v26 = vor.u32 %v13980_v15, %v11267_v29  ;;  %v11331_v12 = vld [vmem:[#allocation10 + $0x7e8] sm:$0xf0]  ;;  %v13978_v62 = vld [vmem:[#allocation10 + $0x754] sm:$0xf]  ;;  %v11259_v61 = vld [vmem:[#allocation10 + $0x758] sm:$0xf0] }
 0x476   :  { %v11334_v50 = vor.u32 %v13996_v1, %v11331_v12  ;;  %v11315_v1 = vld [vmem:[#allocation10 + $0x7c8] sm:$0xf0] }
 0x477   :  { %v4667_v52 = vpop.f32.mrf.mxu2  ;;  %v4716_v43 = vpop.f32.mrf.mxu3  ;;  %5031 = vmatpush.bf16.msra.mxu2 %v11270_v26  ;;  %v17008_v26 = vld [vmem:[#allocation98_spill] sm:$0xff] }
 0x478   :  { %v4668_v34 = vadd.f32 %v4667_v52, %v16006_v33  ;;  %5080 = vmatpush.bf16.msra.mxu3 %v11334_v50  ;;  %v11262_v33 = vor.u32 %v13978_v62, %v11259_v61  ;;  %v17009_v62 = vld [vmem:[#allocation119_spill] sm:$0xff]  ;;  %v13974_v61 = vld [vmem:[#allocation10 + $0x734] sm:$0xf] }
 0x479   :  { %v11246_v38 = vor.u32 %v13974_v61, %v11243_v56  ;;  %v13988_v61 = vld [vmem:[#allocation10 + $0x7a4] sm:$0xf]  ;;  %v11299_v56 = vld [vmem:[#allocation10 + $0x7a8] sm:$0xf0] }
 0x47a   :  { %v4717_v59 = vadd.f32 %v4716_v43, %v4668_v34  ;;  %v4762_v44 = vpop.f32.mrf.mxu0  ;;  %v4811_v4 = vpop.f32.mrf.mxu1  ;;  %v13976_v34 = vld [vmem:[#allocation10 + $0x744] sm:$0xf] }
 0x47b   :  { %v4763_v21 = vadd.f32 %v4762_v44, %v4714_v0  ;;  %5032 = vmatpush.bf16.msra.mxu2 %v11262_v33  ;;  %v11251_v44 = vld [vmem:[#allocation10 + $0x748] sm:$0xf0]  ;;  %v13990_v33 = vld [vmem:[#allocation10 + $0x7b4] sm:$0xf] }
 0x47c   :  { %5081 = vmatpush.bf16.msra.mxu3 %v11326_v18  ;;  %v11254_v29 = vor.u32 %v13976_v34, %v11251_v44  ;;  %v14014_v44 = vld [vmem:[#allocation10 + $0x874] sm:$0xf] }
 0x47d   :  { %v16081_v6 = vadd.f32 %v4811_v4, %v4763_v21  ;;  %v13992_v4 = vld [vmem:[#allocation10 + $0x7c4] sm:$0xf]  ;;  %v17007_v21 = vld [vmem:[#allocation97_spill] sm:$0xff] }
 0x47e   :  { %v11318_v12 = vor.u32 %v13992_v4, %v11315_v1  ;;  %v11403_v4 = vld [vmem:[#allocation10 + $0x878] sm:$0xf0] }
 0x47f   :  { %v4669_v11 = vpop.f32.mrf.mxu2  ;;  %v4718_v51 = vpop.f32.mrf.mxu3  ;;  %5033 = vmatpush.bf16.msra.mxu2 %v11254_v29  ;;  %v13972_v29 = vld [vmem:[#allocation10 + $0x724] sm:$0xf] }
 0x480   :  { %v4670_v52 = vadd.f32 %v4669_v11, %v16011_v27  ;;  %v17010_v27 = vld [vmem:[#allocation120_spill] sm:$0xff]  ;;  %5082 = vmatpush.bf16.msra.mxu3 %v11318_v12 }
 0x481   :  { %v11235_v12 = vld [vmem:[#allocation10 + $0x728] sm:$0xf0] }
 0x482   :  { %v4719_v43 = vadd.f32 %v4718_v51, %v4670_v52  ;;  %v4765_v0 = vpop.f32.mrf.mxu0  ;;  %v4814_v40 = vpop.f32.mrf.mxu1 }
 0x483   :  { %v4766_v15 = vadd.f32 %v4765_v0, %v4717_v59  ;;  %v11307_v59 = vld [vmem:[#allocation10 + $0x7b8] sm:$0xf0]  ;;  %5034 = vmatpush.bf16.msra.mxu2 %v11246_v38  ;;  %v14028_v38 = vld [vmem:[#allocation10 + $0x8e4] sm:$0xf] }
 0x484   :  { %4867 = vmatmul.bf16.gmra.mxu2 %v17007_v21  ;;  %4916 = vmatmul.bf16.gmra.mxu3 %v17008_v26  ;;  %v11310_v18 = vor.u32 %v13990_v33, %v11307_v59  ;;  %v11406_v21 = vor.u32 %v14014_v44, %v11403_v4  ;;  %v11467_v26 = vld [vmem:[#allocation10 + $0x8f8] sm:$0xf0]  ;;  %v14012_v59 = vld [vmem:[#allocation10 + $0x864] sm:$0xf] }
 0x485   :  { %v16086_v50 = vadd.f32 %v4814_v40, %v4766_v15  ;;  %4960 = vmatmul.bf16.gmra.mxu0 %v17009_v62  ;;  %5009 = vmatmul.bf16.gmra.mxu1 %v17010_v27  ;;  %v14030_v15 = vld [vmem:[#allocation10 + $0x8f4] sm:$0xf]  ;;  %v11238_v27 = vor.u32 %v13972_v29, %v11235_v12  ;;  %v11291_v29 = vld [vmem:[#allocation10 + $0x798] sm:$0xf0] }
 0x486   :  { %5083 = vmatpush.bf16.msra.mxu3 %v11310_v18  ;;  %v11470_v62 = vor.u32 %v14030_v15, %v11467_v26  ;;  %5128 = vmatpush.bf16.msrb.mxu0 %v11406_v21  ;;  %v11459_v18 = vld [vmem:[#allocation10 + $0x8e8] sm:$0xf0]  ;;  %v13986_v26 = vld [vmem:[#allocation10 + $0x794] sm:$0xf] }
 0x487   :  { %v4672_v11 = vpop.f32.mrf.mxu2  ;;  %v4721_v51 = vpop.f32.mrf.mxu3  ;;  %5035 = vmatpush.bf16.msra.mxu2 %v11238_v27  ;;  %v11462_v4 = vor.u32 %v14028_v38, %v11459_v18  ;;  %v11387_v27 = vld [vmem:[#allocation10 + $0x858] sm:$0xf0]  ;;  %v13968_v38 = vld [vmem:[#allocation10 + $0x704] sm:$0xf]  ;;  %v11219_v18 = vld [vmem:[#allocation10 + $0x708] sm:$0xf0] }
 0x488   :  { %v4673_v52 = vadd.f32 %v4672_v11, %v16016_v35  ;;  %v11302_v35 = vor.u32 %v13988_v61, %v11299_v56  ;;  %v11395_v11 = vld [vmem:[#allocation10 + $0x868] sm:$0xf0]  ;;  %5177 = vmatpush.bf16.msrb.mxu1 %v11470_v62  ;;  %v14010_v62 = vld [vmem:[#allocation10 + $0x854] sm:$0xf] }
 0x489   :  { %v14026_v56 = vld [vmem:[#allocation10 + $0x8d4] sm:$0xf] }
 0x48a   :  { %v4722_v0 = vadd.f32 %v4721_v51, %v4673_v52  ;;  %v4767_v34 = vpop.f32.mrf.mxu0  ;;  %v4816_v40 = vpop.f32.mrf.mxu1  ;;  %v11398_v51 = vor.u32 %v14012_v59, %v11395_v11  ;;  %v11227_v52 = vld [vmem:[#allocation10 + $0x718] sm:$0xf0]  ;;  %5084 = vmatpush.bf16.msra.mxu3 %v11302_v35  ;;  %v11390_v11 = vor.u32 %v14010_v62, %v11387_v27  ;;  %v11443_v62 = vld [vmem:[#allocation10 + $0x8c8] sm:$0xf0] }
 0x48b   :  { %v4768_v1 = vadd.f32 %v4767_v34, %v4719_v43  ;;  %v13970_v43 = vld [vmem:[#allocation10 + $0x714] sm:$0xf]  ;;  %v11451_v35 = vld [vmem:[#allocation10 + $0x8d8] sm:$0xf0] }
 0x48c   :  { %v11230_v15 = vor.u32 %v13970_v43, %v11227_v52  ;;  %5129 = vmatpush.bf16.msrb.mxu0 %v11398_v51  ;;  %5178 = vmatpush.bf16.msrb.mxu1 %v11462_v4  ;;  %v17011_v43 = vld [vmem:[#allocation101_spill] sm:$0xff]  ;;  %v17012_v52 = vld [vmem:[#allocation102_spill] sm:$0xff]  ;;  %v11222_v51 = vor.u32 %v13968_v38, %v11219_v18  ;;  %v17013_v4 = vld [vmem:[#allocation123_spill] sm:$0xff] }
 0x48d   :  { %v16091_v33 = vadd.f32 %v4816_v40, %v4768_v1  ;;  %v11294_v1 = vor.u32 %v13986_v26, %v11291_v29  ;;  %v14008_v29 = vld [vmem:[#allocation10 + $0x844] sm:$0xf]  ;;  %v14006_v18 = vld [vmem:[#allocation10 + $0x834] sm:$0xf] }
 0x48e   :  { %5036 = vmatpush.bf16.msra.mxu2 %v11230_v15  ;;  %v17014_v15 = vld [vmem:[#allocation124_spill] sm:$0xff] }
 0x48f   :  { %v4674_v34 = vpop.f32.mrf.mxu2  ;;  %v4723_v44 = vpop.f32.mrf.mxu3  ;;  %5085 = vmatpush.bf16.msra.mxu3 %v11294_v1  ;;  %v14024_v1 = vld [vmem:[#allocation10 + $0x8c4] sm:$0xf] }
 0x490   :  { %v4675_v40 = vadd.f32 %v4674_v34, %v16021_v32  ;;  %v11454_v32 = vor.u32 %v14026_v56, %v11451_v35  ;;  %v13984_v34 = vld [vmem:[#allocation10 + $0x784] sm:$0xf]  ;;  %5130 = vmatpush.bf16.msrb.mxu0 %v11390_v11  ;;  %v11446_v56 = vor.u32 %v14024_v1, %v11443_v62 }
 0x492   :  { %v4724_v21 = vadd.f32 %v4723_v44, %v4675_v40  ;;  %v4770_v12 = vpop.f32.mrf.mxu0  ;;  %v4819_v61 = vpop.f32.mrf.mxu1  ;;  %v11283_v44 = vld [vmem:[#allocation10 + $0x788] sm:$0xf0]  ;;  %5179 = vmatpush.bf16.msrb.mxu1 %v11454_v32  ;;  %5037 = vmatpush.bf16.msra.mxu2 %v11222_v51  ;;  %v11435_v32 = vld [vmem:[#allocation10 + $0x8b8] sm:$0xf0] }
 0x493   :  { %v4771_v59 = vadd.f32 %v4770_v12, %v4722_v0  ;;  %v11286_v0 = vor.u32 %v13984_v34, %v11283_v44  ;;  %v11379_v40 = vld [vmem:[#allocation10 + $0x848] sm:$0xf0]  ;;  %v14022_v34 = vld [vmem:[#allocation10 + $0x8b4] sm:$0xf] }
 0x494   :  { %4872 = vmatmul.bf16.gmra.mxu2 %v17011_v43  ;;  %4921 = vmatmul.bf16.gmra.mxu3 %v17012_v52  ;;  %v11382_v12 = vor.u32 %v14008_v29, %v11379_v40  ;;  %v11371_v52 = vld [vmem:[#allocation10 + $0x838] sm:$0xf0]  ;;  %v14004_v29 = vld [vmem:[#allocation10 + $0x824] sm:$0xf]  ;;  %v11363_v51 = vld [vmem:[#allocation10 + $0x828] sm:$0xf0] }
 0x495   :  { %v16096_v26 = vadd.f32 %v4819_v61, %v4771_v59  ;;  %4965 = vmatmul.bf16.gmra.mxu0 %v17013_v4  ;;  %5014 = vmatmul.bf16.gmra.mxu1 %v17014_v15  ;;  %v11374_v11 = vor.u32 %v14006_v18, %v11371_v52  ;;  %v11438_v4 = vor.u32 %v14022_v34, %v11435_v32  ;;  %v11427_v40 = vld [vmem:[#allocation10 + $0x8a8] sm:$0xf0]  ;;  %v11419_v34 = vld [vmem:[#allocation10 + $0x898] sm:$0xf0] }
 0x496   :  { %5086 = vmatpush.bf16.msra.mxu3 %v11286_v0  ;;  %5131 = vmatpush.bf16.msrb.mxu0 %v11382_v12  ;;  %v14020_v0 = vld [vmem:[#allocation10 + $0x8a4] sm:$0xf] }
 0x497   :  { %v4677_v27 = vpop.f32.mrf.mxu2  ;;  %v4726_v43 = vpop.f32.mrf.mxu3  ;;  %5180 = vmatpush.bf16.msrb.mxu1 %v11446_v56  ;;  %v11430_v12 = vor.u32 %v14020_v0, %v11427_v40  ;;  %v14016_v0 = vld [vmem:[#allocation10 + $0x884] sm:$0xf] }
 0x498   :  { %v4678_v61 = vadd.f32 %v4677_v27, %v16026_v48  ;;  %v11366_v48 = vor.u32 %v14004_v29, %v11363_v51  ;;  %v14000_v29 = vld [vmem:[#allocation10 + $0x804] sm:$0xf]  ;;  %v11347_v51 = vld [vmem:[#allocation10 + $0x808] sm:$0xf0] }
 0x49a   :  { %v4727_v59 = vadd.f32 %v4726_v43, %v4678_v61  ;;  %v4772_v35 = vpop.f32.mrf.mxu0  ;;  %v4821_v38 = vpop.f32.mrf.mxu1  ;;  %5132 = vmatpush.bf16.msrb.mxu0 %v11374_v11  ;;  %v14002_v61 = vld [vmem:[#allocation10 + $0x814] sm:$0xf] }
 0x49b   :  { %v4773_v44 = vadd.f32 %v4772_v35, %v4724_v21  ;;  %5181 = vmatpush.bf16.msrb.mxu1 %v11438_v4  ;;  %v11355_v35 = vld [vmem:[#allocation10 + $0x818] sm:$0xf0] }
 0x49c   :  { %v11358_v52 = vor.u32 %v14002_v61, %v11355_v35  ;;  %v17016_v11 = vld [vmem:[#allocation106_spill] sm:$0xff] }
 0x49d   :  { %v16101_v15 = vadd.f32 %v4821_v38, %v4773_v44  ;;  %v14018_v38 = vld [vmem:[#allocation10 + $0x894] sm:$0xf] }
 0x49e   :  { %5133 = vmatpush.bf16.msrb.mxu0 %v11366_v48  ;;  %v17015_v44 = vld [vmem:[#allocation105_spill] sm:$0xff]  ;;  %v11422_v32 = vor.u32 %v14018_v38, %v11419_v34  ;;  %v11350_v48 = vor.u32 %v14000_v29, %v11347_v51 }
 0x49f   :  { %v4679_v1 = vpop.f32.mrf.mxu2  ;;  %v4728_v62 = vpop.f32.mrf.mxu3  ;;  %5182 = vmatpush.bf16.msrb.mxu1 %v11430_v12 }
 0x4a0   :  { %v4680_v27 = vadd.f32 %v4679_v1, %v16031_v55  ;;  %v17017_v55 = vld [vmem:[#allocation127_spill] sm:$0xff] }
 0x4a2   :  { %v4729_v43 = vadd.f32 %v4728_v62, %v4680_v27  ;;  %v4775_v56 = vpop.f32.mrf.mxu0  ;;  %v4824_v21 = vpop.f32.mrf.mxu1  ;;  %5134 = vmatpush.bf16.msrb.mxu0 %v11358_v52 }
 0x4a3   :  { %v4776_v18 = vadd.f32 %v4775_v56, %v4727_v59  ;;  %5183 = vmatpush.bf16.msrb.mxu1 %v11422_v32  ;;  %v11411_v59 = vld [vmem:[#allocation10 + $0x888] sm:$0xf0] }
 0x4a4   :  { %4877 = vmatmul.bf16.gmra.mxu2 %v17015_v44  ;;  %4926 = vmatmul.bf16.gmra.mxu3 %v17016_v11  ;;  %v11414_v62 = vor.u32 %v14016_v0, %v11411_v59  ;;  %v17018_v32 = vld [vmem:[#allocation109_spill] sm:$0xff] }
 0x4a5   :  { %v16106_v4 = vadd.f32 %v4824_v21, %v4776_v18  ;;  %4970 = vmatmul.bf16.gmra.mxu0 %v15690_v41  ;;  %5019 = vmatmul.bf16.gmra.mxu1 %v17017_v55  ;;  %v17019_v55 = vld [vmem:[#allocation110_spill] sm:$0xff] }
 0x4a6   :  { %5135 = vmatpush.bf16.msrb.mxu0 %v11350_v48 }
 0x4a7   :  { %v4682_v40 = vpop.f32.mrf.mxu2  ;;  %v4731_v1 = vpop.f32.mrf.mxu3  ;;  %5184 = vmatpush.bf16.msrb.mxu1 %v11414_v62 }
 0x4a8   :  { %v4683_v12 = vadd.f32 %v4682_v40, %v16036_v5 }
 0x4aa   :  { %v4732_v27 = vadd.f32 %v4731_v1, %v4683_v12  ;;  %v4777_v56 = vpop.f32.mrf.mxu0  ;;  %v4826_v21 = vpop.f32.mrf.mxu1 }
 0x4ab   :  { %v4778_v41 = vadd.f32 %v4777_v56, %v4729_v43 }
 0x4ad   :  { %v16111_v61 = vadd.f32 %v4826_v21, %v4778_v41  ;;  %v17021_v41 = vld [vmem:[#allocation113_spill] sm:$0xff] }
 0x4af   :  { %v4684_v35 = vpop.f32.mrf.mxu2  ;;  %v4733_v38 = vpop.f32.mrf.mxu3 }
 0x4b0   :  { %v4685_v18 = vadd.f32 %v4684_v35, %v16041_v39 }
 0x4b2   :  { %v4734_v52 = vadd.f32 %v4733_v38, %v4685_v18  ;;  %v4780_v34 = vpop.f32.mrf.mxu0  ;;  %v4829_v44 = vpop.f32.mrf.mxu1 }
 0x4b3   :  { %v4781_v11 = vadd.f32 %v4780_v34, %v4732_v27 }
 0x4b4   :  { %5038 = vmatmul.bf16.vlgmr.msra.gmra.mxu2 %v17018_v32  ;;  %5087 = vmatmul.bf16.vlgmr.msra.gmra.mxu3 %v17019_v55 }
 0x4b5   :  { %v16116_v5 = vadd.f32 %v4829_v44, %v4781_v11  ;;  %4975 = vmatmul.bf16.gmra.mxu0 %v15708_v17  ;;  %5024 = vmatmul.bf16.gmra.mxu1 %v15710_v22  ;;  %v17022_v22 = vld [vmem:[#allocation114_spill] sm:$0xff] }
 0x4b7   :  { %v4843_v43 = vpop.f32.mrf.mxu2  ;;  %v4892_v29 = vpop.f32.mrf.mxu3 }
 0x4b8   :  { %v4844_v51 = vadd.f32 %v4843_v43, %v16046_v31 }
 0x4ba   :  { %v4893_v0 = vadd.f32 %v4892_v29, %v4844_v51  ;;  %v4782_v39 = vpop.f32.mrf.mxu0  ;;  %v4831_v48 = vpop.f32.mrf.mxu1 }
 0x4bb   :  { %v4783_v59 = vadd.f32 %v4782_v39, %v4734_v52  ;;  %v17023_v39 = vld [vmem:[#allocation117_spill] sm:$0xff] }
 0x4bd   :  { %v16121_v40 = vadd.f32 %v4831_v48, %v4783_v59 }
 0x4bf   :  { %17020 = vst [vmem:[#allocation33_spill] sm:$0xff] %v16121_v40  ;;  %v4845_v1 = vpop.f32.mrf.mxu2  ;;  %v4894_v62 = vpop.f32.mrf.mxu3 }
 0x4c0   :  { %v4846_v12 = vadd.f32 %v4845_v1, %v16051_v47 }
 0x4c2   :  { %v4895_v27 = vadd.f32 %v4894_v62, %v4846_v12  ;;  %v4941_v56 = vpop.f32.mrf.mxu0  ;;  %v4990_v21 = vpop.f32.mrf.mxu1 }
 0x4c3   :  { %v4942_v17 = vadd.f32 %v4941_v56, %v4893_v0 }
 0x4c4   :  { %5043 = vmatmul.bf16.gmra.mxu2 %v17021_v41  ;;  %5092 = vmatmul.bf16.gmra.mxu3 %v17022_v22 }
 0x4c5   :  { %v16126_v35 = vadd.f32 %v4990_v21, %v4942_v17  ;;  %5136 = vmatmul.bf16.vlgmr.msrb.gmra.mxu0 %v15730_v20  ;;  %5185 = vmatmul.bf16.vlgmr.msrb.gmra.mxu1 %v15732_v10  ;;  %v17024_v10 = vld [vmem:[#allocation118_spill] sm:$0xff] }
 0x4c7   :  { %v4848_v31 = vpop.f32.mrf.mxu2  ;;  %v4897_v38 = vpop.f32.mrf.mxu3 }
 0x4c8   :  { %v4849_v18 = vadd.f32 %v4848_v31, %v16056_v42 }
 0x4ca   :  { %v4898_v52 = vadd.f32 %v4897_v38, %v4849_v18  ;;  %v4943_v47 = vpop.f32.mrf.mxu0  ;;  %v4992_v34 = vpop.f32.mrf.mxu1  ;;  %v17025_v18 = vld [vmem:[#allocation121_spill] sm:$0xff] }
 0x4cb   :  { %v4944_v44 = vadd.f32 %v4943_v47, %v4895_v27 }
 0x4cd   :  { %v16131_v11 = vadd.f32 %v4992_v34, %v4944_v44 }
 0x4cf   :  { %v4850_v32 = vpop.f32.mrf.mxu2  ;;  %v4899_v55 = vpop.f32.mrf.mxu3 }
 0x4d0   :  { %v4851_v43 = vadd.f32 %v4850_v32, %v16061_v3 }
 0x4d2   :  { %v4900_v29 = vadd.f32 %v4899_v55, %v4851_v43  ;;  %v4946_v51 = vpop.f32.mrf.mxu0  ;;  %v4995_v0 = vpop.f32.mrf.mxu1 }
 0x4d3   :  { %v4947_v20 = vadd.f32 %v4946_v51, %v4898_v52 }
 0x4d4   :  { %5048 = vmatmul.bf16.gmra.mxu2 %v17023_v39  ;;  %5097 = vmatmul.bf16.gmra.mxu3 %v17024_v10 }
 0x4d5   :  { %v16136_v48 = vadd.f32 %v4995_v0, %v4947_v20  ;;  %5141 = vmatmul.bf16.gmra.mxu0 %v15744_v9  ;;  %5190 = vmatmul.bf16.gmra.mxu1 %v15746_v58  ;;  %v17026_v58 = vld [vmem:[#allocation122_spill] sm:$0xff] }
 0x4d7   :  { %v4853_v42 = vpop.f32.mrf.mxu2  ;;  %v4902_v59 = vpop.f32.mrf.mxu3 }
 0x4d8   :  { %v4854_v1 = vadd.f32 %v4853_v42, %v16066_v25  ;;  %v17027_v42 = vld [vmem:[#allocation125_spill] sm:$0xff] }
 0x4da   :  { %v4903_v62 = vadd.f32 %v4902_v59, %v4854_v1  ;;  %v4948_v3 = vpop.f32.mrf.mxu0  ;;  %v4997_v12 = vpop.f32.mrf.mxu1 }
 0x4db   :  { %v4949_v27 = vadd.f32 %v4948_v3, %v4900_v29 }
 0x4dd   :  { %v16141_v56 = vadd.f32 %v4997_v12, %v4949_v27  ;;  %v11529_v27 = vld [vmem:[#allocation13 + $0x70] sm:$0xf] }
 0x4df   :  { %v4855_v21 = vpop.f32.mrf.mxu2  ;;  %v4904_v17 = vpop.f32.mrf.mxu3 }
 0x4e0   :  { %v4856_v41 = vadd.f32 %v4855_v21, %v16071_v37  ;;  %v14047_v21 = vld [vmem:[#allocation13 + $0x74] sm:$0xf0] }
 0x4e2   :  { %v4905_v22 = vadd.f32 %v4904_v17, %v4856_v41  ;;  %v4951_v31 = vpop.f32.mrf.mxu0  ;;  %v5000_v38 = vpop.f32.mrf.mxu1  ;;  %v11593_v17 = vld [vmem:[#allocation13 + $0xf0] sm:$0xf] }
 0x4e3   :  { %v4952_v9 = vadd.f32 %v4951_v31, %v4903_v62  ;;  %v14063_v31 = vld [vmem:[#allocation13 + $0xf4] sm:$0xf0] }
 0x4e4   :  { %5053 = vmatmul.bf16.gmra.mxu2 %v17025_v18  ;;  %5102 = vmatmul.bf16.gmra.mxu3 %v17026_v58  ;;  %v14045_v18 = vld [vmem:[#allocation13 + $0x64] sm:$0xf0] }
 0x4e5   :  { %v16146_v52 = vadd.f32 %v5000_v38, %v4952_v9  ;;  %5146 = vmatmul.bf16.gmra.mxu0 %v15758_v36  ;;  %5195 = vmatmul.bf16.gmra.mxu1 %v15760_v8  ;;  %v17028_v8 = vld [vmem:[#allocation126_spill] sm:$0xff]  ;;  %v11594_v38 = vor.u32 %v14063_v31, %v11593_v17 }
 0x4e7   :  { %v4858_v25 = vpop.f32.mrf.mxu2  ;;  %v4907_v47 = vpop.f32.mrf.mxu3  ;;  %8637 = vmatpush.bf16.msrb.mxu3 %v11594_v38  ;;  %v14039_v38 = vld [vmem:[#allocation13 + $0x34] sm:$0xf0] }
 0x4e8   :  { %v4859_v34 = vadd.f32 %v4858_v25, %v16076_v46  ;;  %v14061_v25 = vld [vmem:[#allocation13 + $0xe4] sm:$0xf0] }
 0x4ea   :  { %v4908_v44 = vadd.f32 %v4907_v47, %v4859_v34  ;;  %v4953_v37 = vpop.f32.mrf.mxu0  ;;  %v5002_v32 = vpop.f32.mrf.mxu1 }
 0x4eb   :  { %v4954_v55 = vadd.f32 %v4953_v37, %v4905_v22  ;;  %v11530_v22 = vor.u32 %v14047_v21, %v11529_v27 }
 0x4ed   :  { %v16151_v43 = vadd.f32 %v5002_v32, %v4954_v55  ;;  %8624 = vmatpush.bf16.msrb.mxu2 %v11530_v22  ;;  %v11513_v32 = vld [vmem:[#allocation13 + $0x50] sm:$0xf]  ;;  %v14043_v55 = vld [vmem:[#allocation13 + $0x54] sm:$0xf0] }
 0x4ef   :  { %v4860_v29 = vpop.f32.mrf.mxu2  ;;  %v4909_v51 = vpop.f32.mrf.mxu3 }
 0x4f0   :  { %v4861_v0 = vadd.f32 %v4860_v29, %v16081_v6  ;;  %v11577_v29 = vld [vmem:[#allocation13 + $0xd0] sm:$0xf] }
 0x4f2   :  { %v4910_v20 = vadd.f32 %v4909_v51, %v4861_v0  ;;  %v4956_v39 = vpop.f32.mrf.mxu0  ;;  %v5005_v10 = vpop.f32.mrf.mxu1  ;;  %v11514_v0 = vor.u32 %v14043_v55, %v11513_v32 }
 0x4f3   :  { %v4957_v36 = vadd.f32 %v4956_v39, %v4908_v44  ;;  %v17029_v39 = vld [vmem:[#allocation128_spill] sm:$0xff] }
 0x4f4   :  { %5058 = vmatmul.bf16.gmra.mxu2 %v17027_v42  ;;  %5107 = vmatmul.bf16.gmra.mxu3 %v17028_v8  ;;  %v17031_v8 = vld [vmem:[#allocation134_spill] sm:$0xff] }
 0x4f5   :  { %v16156_v59 = vadd.f32 %v5005_v10, %v4957_v36  ;;  %5151 = vmatmul.bf16.gmra.mxu0 %v15772_v7  ;;  %5200 = vmatmul.bf16.gmra.mxu1 %v15774_v16  ;;  %v11521_v7 = vld [vmem:[#allocation13 + $0x60] sm:$0xf]  ;;  %v17030_v10 = vld [vmem:[#allocation129_spill] sm:$0xff] }
 0x4f6   :  { %v11585_v16 = vld [vmem:[#allocation13 + $0xe0] sm:$0xf]  ;;  %v11522_v58 = vor.u32 %v14045_v18, %v11521_v7  ;;  %v11561_v7 = vld [vmem:[#allocation13 + $0xb0] sm:$0xf] }
 0x4f7   :  { %v4863_v46 = vpop.f32.mrf.mxu2  ;;  %v4912_v1 = vpop.f32.mrf.mxu3  ;;  %v11586_v34 = vor.u32 %v14061_v25, %v11585_v16  ;;  %v14055_v16 = vld [vmem:[#allocation13 + $0xb4] sm:$0xf0]  ;;  %v11489_v25 = vld [vmem:[#allocation13 + $0x20] sm:$0xf] }
 0x4f8   :  { %v4864_v62 = vadd.f32 %v4863_v46, %v16086_v50  ;;  %8625 = vmatpush.bf16.msrb.mxu2 %v11522_v58  ;;  %v11505_v46 = vld [vmem:[#allocation13 + $0x40] sm:$0xf]  ;;  %v11562_v58 = vor.u32 %v14055_v16, %v11561_v7  ;;  %v11657_v7 = vld [vmem:[#allocation13 + $0x170] sm:$0xf] }
 0x4f9   :  { %8638 = vmatpush.bf16.msrb.mxu3 %v11586_v34  ;;  %v14037_v34 = vld [vmem:[#allocation13 + $0x24] sm:$0xf0] }
 0x4fa   :  { %v4913_v3 = vadd.f32 %v4912_v1, %v4864_v62  ;;  %v4958_v6 = vpop.f32.mrf.mxu0  ;;  %v5007_v12 = vpop.f32.mrf.mxu1  ;;  %v14041_v1 = vld [vmem:[#allocation13 + $0x44] sm:$0xf0]  ;;  %v11569_v62 = vld [vmem:[#allocation13 + $0xc0] sm:$0xf] }
 0x4fb   :  { %v4959_v41 = vadd.f32 %v4958_v6, %v4910_v20  ;;  %v14059_v20 = vld [vmem:[#allocation13 + $0xd4] sm:$0xf0]  ;;  %v11506_v6 = vor.u32 %v14041_v1, %v11505_v46 }
 0x4fc   :  { %v11578_v36 = vor.u32 %v14059_v20, %v11577_v29  ;;  %8626 = vmatpush.bf16.msrb.mxu2 %v11514_v0  ;;  %v11481_v20 = vld [vmem:[#allocation13 + $0x10] sm:$0xf]  ;;  %v14051_v46 = vld [vmem:[#allocation13 + $0x94] sm:$0xf0] }
 0x4fd   :  { %v16161_v9 = vadd.f32 %v5007_v12, %v4959_v41  ;;  %v17032_v1 = vld [vmem:[#allocation130_spill] sm:$0xff] }
 0x4fe   :  { %8639 = vmatpush.bf16.msrb.mxu3 %v11578_v36 }
 0x4ff   :  { %v16163_v50 = vpop.f32.mrf.mxu2  ;;  %v16165_v47 = vpop.f32.mrf.mxu3 }
 0x500   :  { %8627 = vmatpush.bf16.msrb.mxu2 %v11506_v6 }
 0x502   :  { %v4961_v44 = vpop.f32.mrf.mxu0  ;;  %v5010_v37 = vpop.f32.mrf.mxu1 }
 0x503   :  { %v4962_v51 = vadd.f32 %v4961_v44, %v4913_v3  ;;  %v14057_v3 = vld [vmem:[#allocation13 + $0xc4] sm:$0xf0]  ;;  %v11553_v44 = vld [vmem:[#allocation13 + $0xa0] sm:$0xf] }
 0x504   :  { %5063 = vmatmul.bf16.gmra.mxu2 %v17029_v39  ;;  %5112 = vmatmul.bf16.gmra.mxu3 %v17030_v10  ;;  %v11570_v21 = vor.u32 %v14057_v3, %v11569_v62  ;;  %v14035_v39 = vld [vmem:[#allocation13 + $0x14] sm:$0xf0]  ;;  %v11545_v10 = vld [vmem:[#allocation13 + $0x90] sm:$0xf]  ;;  %v17033_v62 = vld [vmem:[#allocation131_spill] sm:$0xff] }
 0x505   :  { %v16169_v42 = vadd.f32 %v5010_v37, %v4962_v51  ;;  %5156 = vmatmul.bf16.gmra.mxu0 %v15786_v2  ;;  %5205 = vmatmul.bf16.gmra.mxu1 %v17031_v8  ;;  %v11497_v2 = vld [vmem:[#allocation13 + $0x30] sm:$0xf]  ;;  %v11490_v37 = vor.u32 %v14037_v34, %v11489_v25  ;;  %v11482_v8 = vor.u32 %v14035_v39, %v11481_v20 }
 0x506   :  { %8640 = vmatpush.bf16.msrb.mxu3 %v11570_v21  ;;  %v11498_v18 = vor.u32 %v14039_v38, %v11497_v2  ;;  %v11546_v6 = vor.u32 %v14051_v46, %v11545_v10  ;;  %v11473_v21 = vld [vmem:[#allocation13] sm:$0xf]  ;;  %v12041_v39 = vld [vmem:[#allocation13 + $0x470] sm:$0xf]  ;;  %v14175_v10 = vld [vmem:[#allocation13 + $0x474] sm:$0xf0] }
 0x507   :  { %v4868_v12 = vpop.f32.mrf.mxu2  ;;  %v4917_v27 = vpop.f32.mrf.mxu3  ;;  %v11537_v2 = vld [vmem:[#allocation13 + $0x80] sm:$0xf]  ;;  %v14191_v46 = vld [vmem:[#allocation13 + $0x4f4] sm:$0xf0] }
 0x508   :  { %v4869_v17 = vadd.f32 %v4868_v12, %v16096_v26  ;;  %8628 = vmatpush.bf16.msrb.mxu2 %v11498_v18  ;;  %v14053_v26 = vld [vmem:[#allocation13 + $0xa4] sm:$0xf0]  ;;  %v17034_v12 = vld [vmem:[#allocation135_spill] sm:$0xff]  ;;  %v14079_v18 = vld [vmem:[#allocation13 + $0x174] sm:$0xf0] }
 0x509   :  { %v11554_v29 = vor.u32 %v14053_v26, %v11553_v44  ;;  %v11658_v34 = vor.u32 %v14079_v18, %v11657_v7  ;;  %v11721_v44 = vld [vmem:[#allocation13 + $0x1f0] sm:$0xf]  ;;  %v14189_v7 = vld [vmem:[#allocation13 + $0x4e4] sm:$0xf0] }
 0x50a   :  { %v4918_v41 = vadd.f32 %v4917_v27, %v4869_v17  ;;  %v16174_v22 = vpop.f32.mrf.mxu0  ;;  %v16176_v31 = vpop.f32.mrf.mxu1  ;;  %8641 = vmatpush.bf16.msrb.mxu3 %v11562_v58  ;;  %v17035_v27 = vld [vmem:[#allocation136_spill] sm:$0xff]  ;;  %v11641_v18 = vld [vmem:[#allocation13 + $0x150] sm:$0xf] }
 0x50b   :  { %v14033_v17 = vld [vmem:[#allocation13 + $0x4] sm:$0xf0] }
 0x50c   :  { %8629 = vmatpush.bf16.msrb.mxu2 %v11490_v37  ;;  %v11474_v38 = vor.u32 %v14033_v17, %v11473_v21  ;;  %v14095_v37 = vld [vmem:[#allocation13 + $0x1f4] sm:$0xf0]  ;;  %v12033_v17 = vld [vmem:[#allocation13 + $0x460] sm:$0xf] }
 0x50e   :  { %8642 = vmatpush.bf16.msrb.mxu3 %v11554_v29  ;;  %v11722_v29 = vor.u32 %v14095_v37, %v11721_v44  ;;  %v11705_v37 = vld [vmem:[#allocation13 + $0x1d0] sm:$0xf] }
 0x50f   :  { %v16178_v32 = vpop.f32.mrf.mxu2  ;;  %v16180_v55 = vpop.f32.mrf.mxu3 }
 0x510   :  { %8630 = vmatpush.bf16.msrb.mxu2 %v11482_v8  ;;  %v12042_v8 = vor.u32 %v14175_v10, %v12041_v39 }
 0x512   :  { %v4966_v51 = vpop.f32.mrf.mxu0  ;;  %v5015_v0 = vpop.f32.mrf.mxu1  ;;  %8643 = vmatpush.bf16.msrb.mxu3 %v11546_v6  ;;  %8728 = vmatpush.bf16.msra.mxu0 %v12042_v8  ;;  %v14171_v8 = vld [vmem:[#allocation13 + $0x454] sm:$0xf0] }
 0x513   :  { %v4967_v36 = vadd.f32 %v4966_v51, %v4918_v41  ;;  %v14049_v41 = vld [vmem:[#allocation13 + $0x84] sm:$0xf0] }
 0x514   :  { %5068 = vmatmul.bf16.gmra.mxu2 %v17032_v1  ;;  %5117 = vmatmul.bf16.gmra.mxu3 %v17033_v62  ;;  %v11538_v25 = vor.u32 %v14049_v41, %v11537_v2  ;;  %v11649_v1 = vld [vmem:[#allocation13 + $0x160] sm:$0xf]  ;;  %v14077_v62 = vld [vmem:[#allocation13 + $0x164] sm:$0xf0] }
 0x515   :  { %v16184_v3 = vadd.f32 %v5015_v0, %v4967_v36  ;;  %5161 = vmatmul.bf16.gmra.mxu0 %v17034_v12  ;;  %5210 = vmatmul.bf16.gmra.mxu1 %v17035_v27  ;;  %v12105_v36 = vld [vmem:[#allocation13 + $0x4f0] sm:$0xf]  ;;  %v11650_v12 = vor.u32 %v14077_v62, %v11649_v1  ;;  %v14093_v27 = vld [vmem:[#allocation13 + $0x1e4] sm:$0xf0]  ;;  %v12097_v41 = vld [vmem:[#allocation13 + $0x4e0] sm:$0xf] }
 0x516   :  { %8631 = vmatpush.bf16.msrb.mxu2 %v11474_v38  ;;  %8644 = vmatpush.bf16.msrb.mxu3 %v11538_v25  ;;  %v12106_v6 = vor.u32 %v14191_v46, %v12105_v36  ;;  %v14173_v2 = vld [vmem:[#allocation13 + $0x464] sm:$0xf0]  ;;  %v12025_v36 = vld [vmem:[#allocation13 + $0x450] sm:$0xf] }
 0x517   :  { %v4873_v16 = vpop.f32.mrf.mxu2  ;;  %v4922_v58 = vpop.f32.mrf.mxu3  ;;  %v12034_v38 = vor.u32 %v14173_v2, %v12033_v17  ;;  %v12089_v46 = vld [vmem:[#allocation13 + $0x4d0] sm:$0xf]  ;;  %v12026_v62 = vor.u32 %v14171_v8, %v12025_v36  ;;  %v14185_v8 = vld [vmem:[#allocation13 + $0x4c4] sm:$0xf0] }
 0x518   :  { %v4874_v26 = vadd.f32 %v4873_v16, %v16106_v4  ;;  %v11713_v4 = vld [vmem:[#allocation13 + $0x1e0] sm:$0xf]  ;;  %8741 = vmatpush.bf16.msra.mxu1 %v12106_v6  ;;  %v14075_v16 = vld [vmem:[#allocation13 + $0x154] sm:$0xf0] }
 0x519   :  { %v11714_v21 = vor.u32 %v14093_v27, %v11713_v4  ;;  %v11642_v44 = vor.u32 %v14075_v16, %v11641_v18  ;;  %8729 = vmatpush.bf16.msra.mxu0 %v12034_v38  ;;  %v14187_v6 = vld [vmem:[#allocation13 + $0x4d4] sm:$0xf0]  ;;  %v11633_v4 = vld [vmem:[#allocation13 + $0x140] sm:$0xf]  ;;  %v17036_v27 = vld [vmem:[#allocation132_spill] sm:$0xff] }
 0x51a   :  { %v4923_v51 = vadd.f32 %v4922_v58, %v4874_v26  ;;  %v16189_v0 = vpop.f32.mrf.mxu0  ;;  %v16191_v20 = vpop.f32.mrf.mxu1  ;;  %8650 = vmatpush.bf16.msra.mxu2 %v11658_v34  ;;  %8663 = vmatpush.bf16.msra.mxu3 %v11722_v29  ;;  %v12098_v34 = vor.u32 %v14189_v7, %v12097_v41  ;;  %v14091_v26 = vld [vmem:[#allocation13 + $0x1d4] sm:$0xf0]  ;;  %v12090_v17 = vor.u32 %v14187_v6, %v12089_v46  ;;  %v11697_v41 = vld [vmem:[#allocation13 + $0x1c0] sm:$0xf]  ;;  %v14089_v38 = vld [vmem:[#allocation13 + $0x1c4] sm:$0xf0] }
 0x51b   :  { %v11706_v29 = vor.u32 %v14091_v26, %v11705_v37  ;;  %v11625_v46 = vld [vmem:[#allocation13 + $0x130] sm:$0xf] }
 0x51c   :  { %8742 = vmatpush.bf16.msra.mxu1 %v12098_v34 }
 0x51d   :  { %8730 = vmatpush.bf16.msra.mxu0 %v12026_v62 }
 0x51e   :  { %8651 = vmatpush.bf16.msra.mxu2 %v11650_v12  ;;  %8664 = vmatpush.bf16.msra.mxu3 %v11714_v21  ;;  %v14073_v12 = vld [vmem:[#allocation13 + $0x144] sm:$0xf0]  ;;  %v17037_v21 = vld [vmem:[#allocation133_spill] sm:$0xff] }
 0x51f   :  { %v16193_v58 = vpop.f32.mrf.mxu2  ;;  %v16195_v25 = vpop.f32.mrf.mxu3  ;;  %v11634_v2 = vor.u32 %v14073_v12, %v11633_v4  ;;  %v11689_v4 = vld [vmem:[#allocation13 + $0x1b0] sm:$0xf] }
 0x520   :  { %8743 = vmatpush.bf16.msra.mxu1 %v12090_v17  ;;  %v12009_v12 = vld [vmem:[#allocation13 + $0x430] sm:$0xf] }
 0x522   :  { %v4971_v39 = vpop.f32.mrf.mxu0  ;;  %v5020_v10 = vpop.f32.mrf.mxu1  ;;  %8652 = vmatpush.bf16.msra.mxu2 %v11642_v44  ;;  %8665 = vmatpush.bf16.msra.mxu3 %v11706_v29 }
 0x523   :  { %v4972_v1 = vadd.f32 %v4971_v39, %v4923_v51  ;;  %v11698_v51 = vor.u32 %v14089_v38, %v11697_v41  ;;  %v12073_v41 = vld [vmem:[#allocation13 + $0x4b0] sm:$0xf]  ;;  %v14183_v38 = vld [vmem:[#allocation13 + $0x4b4] sm:$0xf0] }
 0x524   :  { %5073 = vmatmul.bf16.gmra.mxu2 %v17036_v27  ;;  %5122 = vmatmul.bf16.gmra.mxu3 %v17037_v21 }
 0x525   :  { %v16199_v7 = vadd.f32 %v5020_v10, %v4972_v1  ;;  %5166 = vmatmul.bf16.gmra.mxu0 %v15814_v60  ;;  %5215 = vmatmul.bf16.gmra.mxu1 %v15816_v45  ;;  %v12017_v60 = vld [vmem:[#allocation13 + $0x440] sm:$0xf]  ;;  %v14169_v45 = vld [vmem:[#allocation13 + $0x444] sm:$0xf0]  ;;  %v14071_v1 = vld [vmem:[#allocation13 + $0x134] sm:$0xf0] }
 0x526   :  { %8653 = vmatpush.bf16.msra.mxu2 %v11634_v2  ;;  %8666 = vmatpush.bf16.msra.mxu3 %v11698_v51  ;;  %v12081_v10 = vld [vmem:[#allocation13 + $0x4c0] sm:$0xf]  ;;  %v12018_v36 = vor.u32 %v14169_v45, %v12017_v60  ;;  %v11626_v6 = vor.u32 %v14071_v1, %v11625_v46  ;;  %v14167_v2 = vld [vmem:[#allocation13 + $0x434] sm:$0xf0]  ;;  %v14069_v60 = vld [vmem:[#allocation13 + $0x124] sm:$0xf0] }
 0x527   :  { %v4878_v18 = vpop.f32.mrf.mxu2  ;;  %v4927_v16 = vpop.f32.mrf.mxu3  ;;  %v12082_v62 = vor.u32 %v14185_v8, %v12081_v10  ;;  %v11681_v45 = vld [vmem:[#allocation13 + $0x1a0] sm:$0xf]  ;;  %v14085_v8 = vld [vmem:[#allocation13 + $0x1a4] sm:$0xf0] }
 0x528   :  { %v4879_v34 = vadd.f32 %v4878_v18, %v16116_v5  ;;  %v14087_v5 = vld [vmem:[#allocation13 + $0x1b4] sm:$0xf0]  ;;  %8731 = vmatpush.bf16.msra.mxu0 %v12018_v36  ;;  %v12010_v18 = vor.u32 %v14167_v2, %v12009_v12  ;;  %v11682_v36 = vor.u32 %v14085_v8, %v11681_v45  ;;  %v14181_v12 = vld [vmem:[#allocation13 + $0x4a4] sm:$0xf0] }
 0x529   :  { %v11690_v17 = vor.u32 %v14087_v5, %v11689_v4  ;;  %8744 = vmatpush.bf16.msra.mxu1 %v12082_v62  ;;  %v12001_v62 = vld [vmem:[#allocation13 + $0x420] sm:$0xf]  ;;  %v14179_v45 = vld [vmem:[#allocation13 + $0x494] sm:$0xf0] }
 0x52a   :  { %v4928_v44 = vadd.f32 %v4927_v16, %v4879_v34  ;;  %v16204_v37 = vpop.f32.mrf.mxu0  ;;  %v16206_v26 = vpop.f32.mrf.mxu1  ;;  %8654 = vmatpush.bf16.msra.mxu2 %v11626_v6  ;;  %v12074_v16 = vor.u32 %v14183_v38, %v12073_v41  ;;  %v11617_v34 = vld [vmem:[#allocation13 + $0x120] sm:$0xf]  ;;  %v14165_v6 = vld [vmem:[#allocation13 + $0x424] sm:$0xf0]  ;;  %v11673_v41 = vld [vmem:[#allocation13 + $0x190] sm:$0xf] }
 0x52b   :  { %8667 = vmatpush.bf16.msra.mxu3 %v11690_v17  ;;  %v11618_v10 = vor.u32 %v14069_v60, %v11617_v34  ;;  %v12065_v4 = vld [vmem:[#allocation13 + $0x4a0] sm:$0xf]  ;;  %v12002_v5 = vor.u32 %v14165_v6, %v12001_v62  ;;  %v14067_v17 = vld [vmem:[#allocation13 + $0x114] sm:$0xf0]  ;;  %v11993_v38 = vld [vmem:[#allocation13 + $0x410] sm:$0xf] }
 0x52c   :  { %8732 = vmatpush.bf16.msra.mxu0 %v12010_v18  ;;  %v12066_v2 = vor.u32 %v14181_v12, %v12065_v4  ;;  %v14163_v34 = vld [vmem:[#allocation13 + $0x414] sm:$0xf0]  ;;  %v12057_v60 = vld [vmem:[#allocation13 + $0x490] sm:$0xf]  ;;  %v14065_v62 = vld [vmem:[#allocation13 + $0x104] sm:$0xf0] }
 0x52d   :  { %8745 = vmatpush.bf16.msra.mxu1 %v12074_v16  ;;  %v12058_v8 = vor.u32 %v14179_v45, %v12057_v60  ;;  %v11665_v6 = vld [vmem:[#allocation13 + $0x180] sm:$0xf]  ;;  %v14081_v12 = vld [vmem:[#allocation13 + $0x184] sm:$0xf0]  ;;  %v12297_v60 = vld [vmem:[#allocation13 + $0x670] sm:$0xf] }
 0x52e   :  { %8655 = vmatpush.bf16.msra.mxu2 %v11618_v10  ;;  %v11994_v10 = vor.u32 %v14163_v34, %v11993_v38  ;;  %v14177_v34 = vld [vmem:[#allocation13 + $0x484] sm:$0xf0] }
 0x52f   :  { %v16208_v29 = vpop.f32.mrf.mxu2  ;;  %v16210_v39 = vpop.f32.mrf.mxu3  ;;  %8668 = vmatpush.bf16.msra.mxu3 %v11682_v36  ;;  %v11601_v36 = vld [vmem:[#allocation13 + $0x100] sm:$0xf] }
 0x530   :  { %17038 = vst [vmem:[#allocation47_spill] sm:$0xff] %v16208_v29  ;;  %8733 = vmatpush.bf16.msra.mxu0 %v12002_v5  ;;  %v11602_v4 = vor.u32 %v14065_v62, %v11601_v36  ;;  %v14127_v29 = vld [vmem:[#allocation13 + $0x2f4] sm:$0xf0] }
 0x531   :  { %17039 = vst [vmem:[#allocation48_spill] sm:$0xff] %v16210_v39  ;;  %8746 = vmatpush.bf16.msra.mxu1 %v12066_v2  ;;  %v11985_v2 = vld [vmem:[#allocation13 + $0x400] sm:$0xf]  ;;  %v14111_v39 = vld [vmem:[#allocation13 + $0x274] sm:$0xf0] }
 0x532   :  { %v4976_v27 = vpop.f32.mrf.mxu0  ;;  %v5025_v21 = vpop.f32.mrf.mxu1 }
 0x533   :  { %v4977_v51 = vadd.f32 %v4976_v27, %v4928_v44  ;;  %v11609_v27 = vld [vmem:[#allocation13 + $0x110] sm:$0xf] }
 0x534   :  { %8734 = vmatpush.bf16.msra.mxu0 %v11994_v10 }
 0x535   :  { %v16212_v46 = vadd.f32 %v5025_v21, %v4977_v51  ;;  %5171 = vmatmul.bf16.gmra.mxu0 %v15828_v54  ;;  %5220 = vmatmul.bf16.gmra.mxu1 %v15830_v23  ;;  %v16216_v21 = vld [vmem:[#allocation11] sm:$0x3]  ;;  %v11610_v54 = vor.u32 %v14067_v17, %v11609_v27  ;;  %v14083_v23 = vld [vmem:[#allocation13 + $0x194] sm:$0xf0]  ;;  %v11666_v17 = vor.u32 %v14081_v12, %v11665_v6 }
 0x536   :  { %v11674_v16 = vor.u32 %v14083_v23, %v11673_v41  ;;  %8747 = vmatpush.bf16.msra.mxu1 %v12058_v8  ;;  %v12049_v23 = vld [vmem:[#allocation13 + $0x480] sm:$0xf]  ;;  %v5259_v10 = vperm.slane %v16216_v21, 1 }
 0x537   :  { %17040 = vst [vmem:[#allocation34_spill] sm:$0xff] %v16212_v46  ;;  %v5039_v1 = vpop.f32.mrf.mxu2  ;;  %v5088_v44 = vpop.f32.mrf.mxu3  ;;  %8656 = vmatpush.bf16.msra.mxu2 %v11610_v54  ;;  %v14161_v54 = vld [vmem:[#allocation13 + $0x404] sm:$0xf0]  ;;  %v12050_v36 = vor.u32 %v14177_v34, %v12049_v23  ;;  %v5227_v23 = vld [vmem:[#allocation11 + $0x2] sm:$0x3] }
 0x538   :  { %8669 = vmatpush.bf16.msra.mxu3 %v11674_v16  ;;  %v5040_v27 = vadd.f32 %v5039_v1, %v16126_v35  ;;  %v11986_v38 = vor.u32 %v14161_v54, %v11985_v2  ;;  %v14239_v16 = vld [vmem:[#allocation13 + $0x674] sm:$0xf0]  ;;  %v12361_v35 = vld [vmem:[#allocation13 + $0x6f0] sm:$0xf]  ;;  %v12353_v2 = vld [vmem:[#allocation13 + $0x6e0] sm:$0xf] }
 0x539   :  { %v12298_v62 = vor.u32 %v14239_v16, %v12297_v60  ;;  %v14255_v1 = vld [vmem:[#allocation13 + $0x6f4] sm:$0xf0] }
 0x53a   :  { %v16218_v51 = vpop.f32.mrf.mxu0  ;;  %v16220_v18 = vpop.f32.mrf.mxu1  ;;  %v5089_v45 = vadd.f32 %v5088_v44, %v5040_v27  ;;  %8735 = vmatpush.bf16.msra.mxu0 %v11986_v38  ;;  %v12362_v8 = vor.u32 %v14255_v1, %v12361_v35  ;;  %8748 = vmatpush.bf16.msra.mxu1 %v12050_v36  ;;  %v14253_v27 = vld [vmem:[#allocation13 + $0x6e4] sm:$0xf0]  ;;  %v14235_v36 = vld [vmem:[#allocation13 + $0x654] sm:$0xf0]  ;;  %v5260_v1 = vperm.slane %v5227_v23, 0 }
 0x53b   :  { %17041 = vst [vmem:[#allocation35_spill] sm:$0xff] %v16218_v51  ;;  %8657 = vmatpush.bf16.msra.mxu2 %v11602_v4  ;;  %v12289_v51 = vld [vmem:[#allocation13 + $0x660] sm:$0xf]  ;;  %v12354_v16 = vor.u32 %v14253_v27, %v12353_v2 }
 0x53c   :  { %17042 = vst [vmem:[#allocation51_spill] sm:$0xff] %v16220_v18  ;;  %v5258_v18 = vperm.slane %v16216_v21, 0  ;;  %8670 = vmatpush.bf16.msra.mxu3 %v11666_v17  ;;  %v14237_v17 = vld [vmem:[#allocation13 + $0x664] sm:$0xf0]  ;;  %v12337_v2 = vld [vmem:[#allocation13 + $0x6c0] sm:$0xf] }
 0x53d   :  { %v12290_v44 = vor.u32 %v14237_v17, %v12289_v51  ;;  %v11785_v17 = vld [vmem:[#allocation13 + $0x270] sm:$0xf] }
 0x53e   :  { %8780 = vmatpush.bf16.msrb.mxu0 %v12298_v62  ;;  %v5322_v54 = vadd.f32 %v5258_v18, %v15849_v14  ;;  %8793 = vmatpush.bf16.msrb.mxu1 %v12362_v8  ;;  %v12345_v62 = vld [vmem:[#allocation13 + $0x6d0] sm:$0xf]  ;;  %v14251_v14 = vld [vmem:[#allocation13 + $0x6d4] sm:$0xf0]  ;;  %v5261_v8 = vperm.slane %v5227_v23, 1  ;;  %v11786_v40 = vor.u32 %v14111_v39, %v11785_v17 }
 0x53f   :  { %v5041_v5 = vpop.f32.mrf.mxu2  ;;  %v5090_v41 = vpop.f32.mrf.mxu3 }
 0x540   :  { %v5042_v34 = vadd.f32 %v5041_v5, %v16131_v11  ;;  %v5354_v35 = vmax.f32 %v5322_v54, 0.0  ;;  %v12346_v11 = vor.u32 %v14251_v14, %v12345_v62  ;;  %v11777_v14 = vld [vmem:[#allocation13 + $0x260] sm:$0xf] }
 0x542   :  { %v5137_v6 = vpop.f32.mrf.mxu0  ;;  %v5186_v12 = vpop.f32.mrf.mxu1  ;;  %8781 = vmatpush.bf16.msrb.mxu0 %v12290_v44  ;;  %8794 = vmatpush.bf16.msrb.mxu1 %v12354_v16  ;;  %v5091_v18 = vadd.f32 %v5090_v41, %v5042_v34  ;;  %v14249_v16 = vld [vmem:[#allocation13 + $0x6c4] sm:$0xf0]  ;;  %v16228_v41 = vld [vmem:[#allocation11 + $0x4] sm:$0x3] }
 0x543   :  { %v5138_v4 = vadd.f32 %v5137_v6, %v5089_v45  ;;  %v12281_v45 = vld [vmem:[#allocation13 + $0x650] sm:$0xf] }
 0x544   :  { %v12282_v6 = vor.u32 %v14235_v36, %v12281_v45  ;;  %v5324_v45 = vadd.f32 %v5260_v1, %v15854_v30 }
 0x545   :  { %v5187_v60 = vadd.f32 %v5186_v12, %v5138_v4  ;;  %v14233_v4 = vld [vmem:[#allocation13 + $0x644] sm:$0xf0] }
 0x546   :  { %8782 = vmatpush.bf16.msrb.mxu0 %v12282_v6  ;;  %8795 = vmatpush.bf16.msrb.mxu1 %v12346_v11 }
 0x547   :  { %v5323_v46 = vadd.f32 %v5259_v10, %v5187_v60  ;;  %v5044_v21 = vpop.f32.mrf.mxu2  ;;  %v5093_v38 = vpop.f32.mrf.mxu3  ;;  %v12273_v10 = vld [vmem:[#allocation13 + $0x640] sm:$0xf]  ;;  %v11849_v60 = vld [vmem:[#allocation13 + $0x2f0] sm:$0xf] }
 0x548   :  { %v12274_v54 = vor.u32 %v14233_v4, %v12273_v10  ;;  %v5045_v36 = vadd.f32 %v5044_v21, %v16136_v48  ;;  %v12265_v4 = vld [vmem:[#allocation13 + $0x630] sm:$0xf]  ;;  %v5262_v48 = vperm.slane %v16228_v41, 0 }
 0x549   :  { %v5355_v51 = vmax.f32 %v5323_v46, 0.0  ;;  %v12338_v46 = vor.u32 %v14249_v16, %v12337_v2  ;;  %v14231_v2 = vld [vmem:[#allocation13 + $0x634] sm:$0xf0]  ;;  %v5356_v16 = vmax.f32 %v5324_v45, 0.0 }
 0x54a   :  { %v5139_v5 = vpop.f32.mrf.mxu0  ;;  %v5188_v12 = vpop.f32.mrf.mxu1  ;;  %8783 = vmatpush.bf16.msrb.mxu0 %v12274_v54  ;;  %v12266_v39 = vor.u32 %v14231_v2, %v12265_v4  ;;  %v5094_v21 = vadd.f32 %v5093_v38, %v5045_v36  ;;  %v12321_v4 = vld [vmem:[#allocation13 + $0x6a0] sm:$0xf]  ;;  %v14123_v2 = vld [vmem:[#allocation13 + $0x2d4] sm:$0xf0] }
 0x54b   :  { %v5386_v44 = vpack.c.bf16 %v5355_v51, %v5354_v35  ;;  %v5140_v27 = vadd.f32 %v5139_v5, %v5091_v18  ;;  %v11850_v35 = vor.u32 %v14127_v29, %v11849_v60  ;;  %v14109_v18 = vld [vmem:[#allocation13 + $0x264] sm:$0xf0]  ;;  %v11841_v51 = vld [vmem:[#allocation13 + $0x2e0] sm:$0xf]  ;;  %8796 = vmatpush.bf16.msrb.mxu1 %v12338_v46  ;;  %v14247_v29 = vld [vmem:[#allocation13 + $0x6b4] sm:$0xf0] }
 0x54c   :  { %v14125_v5 = vld [vmem:[#allocation13 + $0x2e4] sm:$0xf0]  ;;  %v12257_v46 = vld [vmem:[#allocation13 + $0x620] sm:$0xf] }
 0x54d   :  { %v5968_v23 = vunpack.c.l.b16 %v5386_v44  ;;  %v5969_v34 = vunpack.c.h.b16 %v5386_v44  ;;  %v5189_v62 = vadd.f32 %v5188_v12, %v5140_v27  ;;  %v12329_v44 = vld [vmem:[#allocation13 + $0x6b0] sm:$0xf]  ;;  %v14107_v27 = vld [vmem:[#allocation13 + $0x254] sm:$0xf0] }
 0x54e   :  { %v11769_v12 = vld [vmem:[#allocation13 + $0x250] sm:$0xf]  ;;  %v12330_v60 = vor.u32 %v14247_v29, %v12329_v44  ;;  %8784 = vmatpush.bf16.msrb.mxu0 %v12266_v39  ;;  %v11825_v29 = vld [vmem:[#allocation13 + $0x2c0] sm:$0xf] }
 0x54f   :  { %v16231_v6 = vpack.c.b16 %v5968_v23, %v5968_v23  ;;  %v16233_v10 = vpack.c.b16 %v5969_v34, %v5969_v34  ;;  %v5325_v30 = vadd.f32 %v5261_v8, %v5189_v62  ;;  %v5046_v1 = vpop.f32.mrf.mxu2  ;;  %v5095_v11 = vpop.f32.mrf.mxu3  ;;  %v5263_v8 = vperm.slane %v16228_v41, 1  ;;  %v14229_v62 = vld [vmem:[#allocation13 + $0x624] sm:$0xf0] }
 0x550   :  { %v11778_v23 = vor.u32 %v14109_v18, %v11777_v14  ;;  %v11842_v34 = vor.u32 %v14125_v5, %v11841_v51  ;;  %v14245_v41 = vld [vmem:[#allocation13 + $0x6a4] sm:$0xf0]  ;;  %8797 = vmatpush.bf16.msrb.mxu1 %v12330_v60  ;;  %v5047_v44 = vadd.f32 %v5046_v1, %v16141_v56  ;;  %v11761_v18 = vld [vmem:[#allocation13 + $0x240] sm:$0xf]  ;;  %v11770_v51 = vor.u32 %v14107_v27, %v11769_v12  ;;  %v14243_v1 = vld [vmem:[#allocation13 + $0x694] sm:$0xf0] }
 0x551   :  { %17043 = vst [vmem:[#allocation52_spill] sm:$0xff] %v16231_v6  ;;  %v5357_v17 = vmax.f32 %v5325_v30, 0.0  ;;  %8632 = vmatmul.bf16.vlgmr.msrb.gmra.mxu2 %v16231_v6  ;;  %8645 = vmatmul.bf16.vlgmr.msrb.gmra.mxu3 %v16233_v10  ;;  %v11833_v30 = vld [vmem:[#allocation13 + $0x2d0] sm:$0xf]  ;;  %v5326_v6 = vadd.f32 %v5262_v48, %v15863_v63  ;;  %v14227_v63 = vld [vmem:[#allocation13 + $0x614] sm:$0xf0] }
 0x552   :  { %17044 = vst [vmem:[#allocation36_spill] sm:$0xff] %v16233_v10  ;;  %8676 = vmatpush.bf16.msrb.mxu2 %v11786_v40  ;;  %8689 = vmatpush.bf16.msrb.mxu3 %v11850_v35  ;;  %v5142_v54 = vpop.f32.mrf.mxu0  ;;  %v5191_v45 = vpop.f32.mrf.mxu1  ;;  %v12258_v10 = vor.u32 %v14229_v62, %v12257_v46  ;;  %v12322_v40 = vor.u32 %v14245_v41, %v12321_v4  ;;  %v5229_v35 = vld [vmem:[#allocation11 + $0x6] sm:$0x3]  ;;  %v12249_v46 = vld [vmem:[#allocation13 + $0x610] sm:$0xf] }
 0x553   :  { %v16239_v38 = vpack.c.bf16 %v5357_v17, %v5356_v16  ;;  %v5143_v36 = vadd.f32 %v5142_v54, %v5094_v21  ;;  %v11834_v5 = vor.u32 %v14123_v2, %v11833_v30  ;;  %v14105_v16 = vld [vmem:[#allocation13 + $0x244] sm:$0xf0]  ;;  %v12313_v48 = vld [vmem:[#allocation13 + $0x690] sm:$0xf]  ;;  %v5358_v60 = vmax.f32 %v5326_v6, 0.0 }
 0x554   :  { %v14121_v21 = vld [vmem:[#allocation13 + $0x2c4] sm:$0xf0]  ;;  %8785 = vmatpush.bf16.msrb.mxu0 %v12258_v10  ;;  %v5264_v62 = vperm.slane %v5229_v35, 0  ;;  %8798 = vmatpush.bf16.msrb.mxu1 %v12322_v40  ;;  %v12250_v56 = vor.u32 %v14227_v63, %v12249_v46  ;;  %v5265_v27 = vperm.slane %v5229_v35, 1  ;;  %v11753_v30 = vld [vmem:[#allocation13 + $0x230] sm:$0xf] }
 0x555   :  { %v5192_v14 = vadd.f32 %v5191_v45, %v5143_v36  ;;  %v16243_v45 = vld [vmem:[#allocation11 + $0x8] sm:$0x3]  ;;  %v11762_v36 = vor.u32 %v14105_v16, %v11761_v18  ;;  %v11826_v10 = vor.u32 %v14121_v21, %v11825_v29  ;;  %v14103_v2 = vld [vmem:[#allocation13 + $0x234] sm:$0xf0]  ;;  %v11817_v41 = vld [vmem:[#allocation13 + $0x2b0] sm:$0xf]  ;;  %v5970_v6 = vunpack.c.l.b16 %v16239_v38 }
 0x556   :  { %8677 = vmatpush.bf16.msrb.mxu2 %v11778_v23  ;;  %8690 = vmatpush.bf16.msrb.mxu3 %v11842_v34  ;;  %v5096_v23 = vadd.f32 %v5095_v11, %v5047_v44  ;;  %v12314_v34 = vor.u32 %v14243_v1, %v12313_v48  ;;  %v5971_v40 = vunpack.c.h.b16 %v16239_v38  ;;  %v14119_v11 = vld [vmem:[#allocation13 + $0x2b4] sm:$0xf0]  ;;  %v12241_v35 = vld [vmem:[#allocation13 + $0x600] sm:$0xf]  ;;  %v14225_v44 = vld [vmem:[#allocation13 + $0x604] sm:$0xf0]  ;;  %v5328_v18 = vadd.f32 %v5264_v62, %v15868_v57 }
 0x557   :  { %v5327_v17 = vadd.f32 %v5263_v8, %v5192_v14  ;;  %v5049_v39 = vpop.f32.mrf.mxu2  ;;  %v5098_v54 = vpop.f32.mrf.mxu3  ;;  %v5266_v63 = vperm.slane %v16243_v45, 0  ;;  %v11754_v38 = vor.u32 %v14103_v2, %v11753_v30  ;;  %v11818_v48 = vor.u32 %v14119_v11, %v11817_v41  ;;  %v11809_v57 = vld [vmem:[#allocation13 + $0x2a0] sm:$0xf]  ;;  %v14117_v62 = vld [vmem:[#allocation13 + $0x2a4] sm:$0xf0] }
 0x558   :  { %8786 = vmatpush.bf16.msrb.mxu0 %v12250_v56  ;;  %8799 = vmatpush.bf16.msrb.mxu1 %v12314_v34  ;;  %v5050_v16 = vadd.f32 %v5049_v39, %v16146_v52  ;;  %v16252_v56 = vpack.c.b16 %v5970_v6, %v5970_v6  ;;  %v16254_v1 = vpack.c.b16 %v5971_v40, %v5971_v40  ;;  %v5360_v52 = vmax.f32 %v5328_v18, 0.0  ;;  %v11737_v40 = vld [vmem:[#allocation13 + $0x210] sm:$0xf]  ;;  %v14099_v11 = vld [vmem:[#allocation13 + $0x214] sm:$0xf0] }
 0x559   :  { %v5359_v12 = vmax.f32 %v5327_v17, 0.0  ;;  %v14241_v17 = vld [vmem:[#allocation13 + $0x684] sm:$0xf0]  ;;  %v5267_v2 = vperm.slane %v16243_v45, 1  ;;  %v11810_v6 = vor.u32 %v14117_v62, %v11809_v57  ;;  %v11738_v18 = vor.u32 %v14099_v11, %v11737_v40  ;;  %v11729_v45 = vld [vmem:[#allocation13 + $0x200] sm:$0xf] }
 0x55a   :  { %8678 = vmatpush.bf16.msrb.mxu2 %v11770_v51  ;;  %8691 = vmatpush.bf16.msrb.mxu3 %v11834_v5  ;;  %v5144_v8 = vpop.f32.mrf.mxu0  ;;  %v5193_v4 = vpop.f32.mrf.mxu1  ;;  %v12242_v51 = vor.u32 %v14225_v44, %v12241_v35  ;;  %v12305_v5 = vld [vmem:[#allocation13 + $0x680] sm:$0xf]  ;;  %17045 = vst [vmem:[#allocation37_spill] sm:$0xff] %v16252_v56  ;;  %v5099_v39 = vadd.f32 %v5098_v54, %v5050_v16  ;;  %v11801_v35 = vld [vmem:[#allocation13 + $0x290] sm:$0xf] }
 0x55b   :  { %v16247_v14 = vpack.c.bf16 %v5359_v12, %v5358_v60  ;;  %v5145_v46 = vadd.f32 %v5144_v8, %v5096_v23  ;;  %v12306_v21 = vor.u32 %v14241_v17, %v12305_v5  ;;  %v11745_v60 = vld [vmem:[#allocation13 + $0x220] sm:$0xf]  ;;  %17046 = vst [vmem:[#allocation55_spill] sm:$0xff] %v16254_v1  ;;  %v14101_v8 = vld [vmem:[#allocation13 + $0x224] sm:$0xf0] }
 0x55c   :  { %8787 = vmatpush.bf16.msrb.mxu0 %v12242_v51  ;;  %v11746_v41 = vor.u32 %v14101_v8, %v11745_v60  ;;  %v14115_v44 = vld [vmem:[#allocation13 + $0x294] sm:$0xf0]  ;;  %v14113_v60 = vld [vmem:[#allocation13 + $0x284] sm:$0xf0]  ;;  %v11977_v57 = vld [vmem:[#allocation13 + $0x3f0] sm:$0xf] }
 0x55d   :  { %v5194_v29 = vadd.f32 %v5193_v4, %v5145_v46  ;;  %8800 = vmatpush.bf16.msrb.mxu1 %v12306_v21  ;;  %v11802_v16 = vor.u32 %v14115_v44, %v11801_v35  ;;  %v14143_v8 = vld [vmem:[#allocation13 + $0x374] sm:$0xf0]  ;;  %v16269_v40 = vld [vmem:[#allocation11 + $0xc] sm:$0x3]  ;;  %v12617_v44 = vld [vmem:[#allocation13 + $0x8f0] sm:$0xf] }
 0x55e   :  { %8679 = vmatpush.bf16.msrb.mxu2 %v11762_v36  ;;  %8692 = vmatpush.bf16.msrb.mxu3 %v11826_v10  ;;  %v5330_v36 = vadd.f32 %v5266_v63, %v15877_v19  ;;  %v16259_v10 = vld [vmem:[#allocation11 + $0xa] sm:$0x3]  ;;  %v14159_v62 = vld [vmem:[#allocation13 + $0x3f4] sm:$0xf0] }
 0x55f   :  { %v5329_v23 = vadd.f32 %v5265_v27, %v5194_v29  ;;  %v5051_v12 = vpop.f32.mrf.mxu2  ;;  %v5100_v34 = vpop.f32.mrf.mxu3  ;;  %v5268_v17 = vperm.slane %v16259_v10, 0  ;;  %v14097_v29 = vld [vmem:[#allocation13 + $0x204] sm:$0xf0]  ;;  %v11978_v35 = vor.u32 %v14159_v62, %v11977_v57 }
 0x560   :  { %v5052_v51 = vadd.f32 %v5051_v12, %v16151_v43  ;;  %v5362_v5 = vmax.f32 %v5330_v36, 0.0  ;;  %v5972_v36 = vunpack.c.l.b16 %v16247_v14  ;;  %v14301_v62 = vld [vmem:[#allocation13 + $0x864] sm:$0xf0] }
 0x561   :  { %v5361_v4 = vmax.f32 %v5329_v23, 0.0  ;;  %8658 = vmatmul.bf16.vlgmr.msra.gmra.mxu2 %v16252_v56  ;;  %8671 = vmatmul.bf16.vlgmr.msra.gmra.mxu3 %v16254_v1  ;;  %v11913_v23 = vld [vmem:[#allocation13 + $0x370] sm:$0xf]  ;;  %v14141_v56 = vld [vmem:[#allocation13 + $0x364] sm:$0xf0] }
 0x562   :  { %8680 = vmatpush.bf16.msrb.mxu2 %v11754_v38  ;;  %8693 = vmatpush.bf16.msrb.mxu3 %v11818_v48  ;;  %v5147_v27 = vpop.f32.mrf.mxu0  ;;  %v5196_v30 = vpop.f32.mrf.mxu1  ;;  %v11793_v48 = vld [vmem:[#allocation13 + $0x280] sm:$0xf]  ;;  %v5101_v43 = vadd.f32 %v5100_v34, %v5052_v51  ;;  %v11914_v34 = vor.u32 %v14143_v8, %v11913_v23  ;;  %v5332_v51 = vadd.f32 %v5268_v17, %v15882_v24 }
 0x563   :  { %v16262_v46 = vpack.c.bf16 %v5361_v4, %v5360_v52  ;;  %v5148_v54 = vadd.f32 %v5147_v27, %v5099_v39  ;;  %v5269_v52 = vperm.slane %v16259_v10, 1  ;;  %v12553_v39 = vld [vmem:[#allocation13 + $0x870] sm:$0xf]  ;;  %v14303_v4 = vld [vmem:[#allocation13 + $0x874] sm:$0xf0]  ;;  %v5973_v27 = vunpack.c.h.b16 %v16247_v14 }
 0x564   :  { %v14319_v10 = vld [vmem:[#allocation13 + $0x8f4] sm:$0xf0] }
 0x565   :  { %v5197_v19 = vadd.f32 %v5196_v30, %v5148_v54  ;;  %v12618_v23 = vor.u32 %v14319_v10, %v12617_v44  ;;  %v12537_v10 = vld [vmem:[#allocation13 + $0x850] sm:$0xf] }
 0x566   :  { %8681 = vmatpush.bf16.msrb.mxu2 %v11746_v41  ;;  %8694 = vmatpush.bf16.msrb.mxu3 %v11810_v6  ;;  %v11730_v41 = vor.u32 %v14097_v29, %v11729_v45  ;;  %v11794_v6 = vor.u32 %v14113_v60, %v11793_v48  ;;  %v11969_v45 = vld [vmem:[#allocation13 + $0x3e0] sm:$0xf]  ;;  %v14157_v29 = vld [vmem:[#allocation13 + $0x3e4] sm:$0xf0]  ;;  %v5270_v48 = vperm.slane %v16269_v40, 0  ;;  %v16276_v60 = vpack.c.b16 %v5973_v27, %v5973_v27 }
 0x567   :  { %v5331_v21 = vadd.f32 %v5267_v2, %v5197_v19  ;;  %v5054_v63 = vpop.f32.mrf.mxu2  ;;  %v5103_v38 = vpop.f32.mrf.mxu3  ;;  %v12554_v19 = vor.u32 %v14303_v4, %v12553_v39  ;;  %v11970_v39 = vor.u32 %v14157_v29, %v11969_v45  ;;  %v14317_v4 = vld [vmem:[#allocation13 + $0x8e4] sm:$0xf0]  ;;  %v14139_v27 = vld [vmem:[#allocation13 + $0x354] sm:$0xf0]  ;;  %v11889_v45 = vld [vmem:[#allocation13 + $0x340] sm:$0xf] }
 0x568   :  { %v5334_v29 = vadd.f32 %v5270_v48, %v15891_v49  ;;  %v12529_v48 = vld [vmem:[#allocation13 + $0x840] sm:$0xf] }
 0x569   :  { %v5363_v12 = vmax.f32 %v5331_v21, 0.0  ;;  %v11905_v21 = vld [vmem:[#allocation13 + $0x360] sm:$0xf] }
 0x56a   :  { %8682 = vmatpush.bf16.msrb.mxu2 %v11738_v18  ;;  %8695 = vmatpush.bf16.msrb.mxu3 %v11802_v16  ;;  %v5149_v30 = vpop.f32.mrf.mxu0  ;;  %v5198_v2 = vpop.f32.mrf.mxu1  ;;  %v5055_v18 = vadd.f32 %v5054_v63, %v16156_v59  ;;  %v12545_v63 = vld [vmem:[#allocation13 + $0x860] sm:$0xf] }
 0x56b   :  { %v5390_v54 = vpack.c.bf16 %v5363_v12, %v5362_v5  ;;  %v5150_v11 = vadd.f32 %v5149_v30, %v5101_v43  ;;  %v16274_v5 = vpack.c.b16 %v5972_v36, %v5972_v36  ;;  %v12609_v43 = vld [vmem:[#allocation13 + $0x8e0] sm:$0xf]  ;;  %v11906_v12 = vor.u32 %v14141_v56, %v11905_v21  ;;  %v11897_v36 = vld [vmem:[#allocation13 + $0x350] sm:$0xf] }
 0x56c   :  { %v5364_v30 = vmax.f32 %v5332_v51, 0.0  ;;  %v12610_v44 = vor.u32 %v14317_v4, %v12609_v43  ;;  %v14299_v51 = vld [vmem:[#allocation13 + $0x854] sm:$0xf0]  ;;  %v11898_v21 = vor.u32 %v14139_v27, %v11897_v36  ;;  %v16296_v43 = vld [vmem:[#allocation11 + $0x10] sm:$0x3] }
 0x56d   :  { %v5976_v1 = vunpack.c.l.b16 %v5390_v54  ;;  %v5977_v14 = vunpack.c.h.b16 %v5390_v54  ;;  %v5199_v16 = vadd.f32 %v5198_v2, %v5150_v11  ;;  %v5104_v2 = vadd.f32 %v5103_v38, %v5055_v18  ;;  %v12601_v18 = vld [vmem:[#allocation13 + $0x8d0] sm:$0xf] }
 0x56e   :  { %8683 = vmatpush.bf16.msrb.mxu2 %v11730_v41  ;;  %8696 = vmatpush.bf16.msrb.mxu3 %v11794_v6  ;;  %v14155_v41 = vld [vmem:[#allocation13 + $0x3d4] sm:$0xf0]  ;;  %v16286_v6 = vld [vmem:[#allocation11 + $0xe] sm:$0x3]  ;;  %v12546_v11 = vor.u32 %v14301_v62, %v12545_v63  ;;  %v14153_v62 = vld [vmem:[#allocation13 + $0x3c4] sm:$0xf0]  ;;  %v12538_v27 = vor.u32 %v14299_v51, %v12537_v10 }
 0x56f   :  { %v16278_v24 = vpack.c.b16 %v5976_v1, %v5976_v1  ;;  %v16280_v17 = vpack.c.b16 %v5977_v14, %v5977_v14  ;;  %v5333_v8 = vadd.f32 %v5269_v52, %v5199_v16  ;;  %v5056_v57 = vpop.f32.mrf.mxu2  ;;  %v16282_v59 = vpop.f32.mrf.mxu3  ;;  %v11961_v52 = vld [vmem:[#allocation13 + $0x3d0] sm:$0xf]  ;;  %v14315_v16 = vld [vmem:[#allocation13 + $0x8d4] sm:$0xf0]  ;;  %v5274_v51 = vperm.slane %v16296_v43, 0 }
 0x570   :  { %v11962_v14 = vor.u32 %v14155_v41, %v11961_v52  ;;  %v16298_v4 = vld [vmem:[#allocation11 + $0x12] sm:$0x3]  ;;  %v12602_v49 = vor.u32 %v14315_v16, %v12601_v18  ;;  %v14313_v52 = vld [vmem:[#allocation13 + $0x8c4] sm:$0xf0] }
 0x571   :  { %v5365_v1 = vmax.f32 %v5333_v8, 0.0  ;;  %8684 = vmatmul.bf16.vlgmr.msrb.gmra.mxu2 %v16274_v5  ;;  %8697 = vmatmul.bf16.vlgmr.msrb.gmra.mxu3 %v16276_v60  ;;  %v5057_v8 = vadd.f32 %v5056_v57, %v16161_v9  ;;  %v14297_v9 = vld [vmem:[#allocation13 + $0x844] sm:$0xf0]  ;;  %v12593_v57 = vld [vmem:[#allocation13 + $0x8c0] sm:$0xf] }
 0x572   :  { %8702 = vmatpush.bf16.msra.mxu2 %v11914_v34  ;;  %8715 = vmatpush.bf16.msra.mxu3 %v11978_v35  ;;  %v5152_v56 = vpop.f32.mrf.mxu0  ;;  %v5201_v54 = vpop.f32.mrf.mxu1  ;;  %v5271_v35 = vperm.slane %v16269_v40, 1  ;;  %v5272_v40 = vperm.slane %v16286_v6, 0  ;;  %v11881_v41 = vld [vmem:[#allocation13 + $0x330] sm:$0xf] }
 0x573   :  { %8736 = vmatmul.bf16.vlgmr.msra.gmra.mxu0 %v16278_v24  ;;  %8749 = vmatmul.bf16.vlgmr.msra.gmra.mxu1 %v16280_v17  ;;  %v16290_v34 = vpack.c.bf16 %v5365_v1, %v5364_v30  ;;  %v5153_v38 = vadd.f32 %v5152_v56, %v5104_v2  ;;  %v4866_v30 = vadd.f32 %v16163_v50, %v16091_v33  ;;  %v14135_v56 = vld [vmem:[#allocation13 + $0x334] sm:$0xf0]  ;;  %v5273_v50 = vperm.slane %v16286_v6, 1 }
 0x574   :  { %8832 = vmatpush.bf16.msra.mxu0 %v12554_v19  ;;  %8845 = vmatpush.bf16.msra.mxu1 %v12618_v23  ;;  %v14137_v19 = vld [vmem:[#allocation13 + $0x344] sm:$0xf0]  ;;  %v11953_v23 = vld [vmem:[#allocation13 + $0x3c0] sm:$0xf]  ;;  %v16306_v10 = vadd.f32 %v5272_v40, %v15896_v28 }
 0x575   :  { %v5202_v63 = vadd.f32 %v5201_v54, %v5153_v38  ;;  %v11890_v2 = vor.u32 %v14137_v19, %v11889_v45  ;;  %v11954_v1 = vor.u32 %v14153_v62, %v11953_v23  ;;  %v5366_v54 = vmax.f32 %v5334_v29, 0.0  ;;  %v11873_v40 = vld [vmem:[#allocation13 + $0x320] sm:$0xf] }
 0x576   :  { %8703 = vmatpush.bf16.msra.mxu2 %v11906_v12  ;;  %8716 = vmatpush.bf16.msra.mxu3 %v11970_v39  ;;  %v12594_v29 = vor.u32 %v14313_v52, %v12593_v57  ;;  %v5276_v19 = vperm.slane %v16298_v4, 0  ;;  %v4915_v28 = vadd.f32 %v16165_v47, %v4866_v30  ;;  %v11882_v23 = vor.u32 %v14135_v56, %v11881_v41  ;;  %v14149_v57 = vld [vmem:[#allocation13 + $0x3a4] sm:$0xf0] }
 0x577   :  { %v5335_v12 = vadd.f32 %v5271_v35, %v5202_v63  ;;  %v5059_v39 = vpop.f32.mrf.mxu2  ;;  %v16300_v36 = vpop.f32.mrf.mxu3  ;;  %v11945_v35 = vld [vmem:[#allocation13 + $0x3b0] sm:$0xf]  ;;  %v14311_v63 = vld [vmem:[#allocation13 + $0x8b4] sm:$0xf0]  ;;  %v16314_v52 = vadd.f32 %v5274_v51, %v15905_v13  ;;  %v14293_v56 = vld [vmem:[#allocation13 + $0x824] sm:$0xf0] }
 0x578   :  { %8833 = vmatpush.bf16.msra.mxu0 %v12546_v11  ;;  %8846 = vmatpush.bf16.msra.mxu1 %v12610_v44  ;;  %v5106_v11 = vadd.f32 %v16282_v59, %v5057_v8  ;;  %v14151_v44 = vld [vmem:[#allocation13 + $0x3b4] sm:$0xf0]  ;;  %v12585_v8 = vld [vmem:[#allocation13 + $0x8b0] sm:$0xf] }
 0x579   :  { %v5367_v38 = vmax.f32 %v5335_v12, 0.0  ;;  %v14295_v59 = vld [vmem:[#allocation13 + $0x834] sm:$0xf0]  ;;  %v11946_v62 = vor.u32 %v14151_v44, %v11945_v35  ;;  %v12586_v47 = vor.u32 %v14311_v63, %v12585_v8  ;;  %v11865_v44 = vld [vmem:[#allocation13 + $0x310] sm:$0xf]  ;;  %v5275_v8 = vperm.slane %v16296_v43, 1 }
 0x57a   :  { %8704 = vmatpush.bf16.msra.mxu2 %v11898_v21  ;;  %8717 = vmatpush.bf16.msra.mxu3 %v11962_v14  ;;  %v5154_v18 = vpop.f32.mrf.mxu0  ;;  %v5203_v33 = vpop.f32.mrf.mxu1  ;;  %v12530_v21 = vor.u32 %v14297_v9, %v12529_v48  ;;  %v12521_v14 = vld [vmem:[#allocation13 + $0x830] sm:$0xf]  ;;  %v5060_v48 = vadd.f32 %v5059_v39, %v16169_v42  ;;  %v11937_v9 = vld [vmem:[#allocation13 + $0x3a0] sm:$0xf]  ;;  %v14131_v51 = vld [vmem:[#allocation13 + $0x314] sm:$0xf0] }
 0x57b   :  { %v5392_v16 = vpack.c.bf16 %v5367_v38, %v5366_v54  ;;  %v5155_v45 = vadd.f32 %v5154_v18, %v5106_v11  ;;  %v4964_v54 = vadd.f32 %v16174_v22, %v4915_v28  ;;  %v12522_v11 = vor.u32 %v14295_v59, %v12521_v14  ;;  %v12513_v39 = vld [vmem:[#allocation13 + $0x820] sm:$0xf]  ;;  %v14309_v22 = vld [vmem:[#allocation13 + $0x8a4] sm:$0xf0]  ;;  %v14147_v14 = vld [vmem:[#allocation13 + $0x394] sm:$0xf0] }
 0x57c   :  { %8834 = vmatpush.bf16.msra.mxu0 %v12538_v27  ;;  %8847 = vmatpush.bf16.msra.mxu1 %v12602_v49  ;;  %v14133_v49 = vld [vmem:[#allocation13 + $0x324] sm:$0xf0]  ;;  %v12577_v38 = vld [vmem:[#allocation13 + $0x8a0] sm:$0xf]  ;;  %v11938_v35 = vor.u32 %v14149_v57, %v11937_v9  ;;  %v5368_v18 = vmax.f32 %v16306_v10, 0.0  ;;  %v12514_v63 = vor.u32 %v14293_v56, %v12513_v39 }
 0x57d   :  { %v5980_v6 = vunpack.c.l.b16 %v5392_v16  ;;  %v5981_v12 = vunpack.c.h.b16 %v5392_v16  ;;  %v5204_v27 = vadd.f32 %v5203_v33, %v5155_v45  ;;  %v11874_v13 = vor.u32 %v14133_v49, %v11873_v40  ;;  %v12569_v40 = vld [vmem:[#allocation13 + $0x890] sm:$0xf]  ;;  %v11921_v43 = vld [vmem:[#allocation13 + $0x380] sm:$0xf]  ;;  %v14145_v57 = vld [vmem:[#allocation13 + $0x384] sm:$0xf0] }
 0x57e   :  { %8705 = vmatpush.bf16.msra.mxu2 %v11890_v2  ;;  %8718 = vmatpush.bf16.msra.mxu3 %v11954_v1  ;;  %v5109_v33 = vadd.f32 %v16300_v36, %v5060_v48  ;;  %v5370_v16 = vmax.f32 %v16314_v52, 0.0  ;;  %v5013_v45 = vadd.f32 %v16176_v31, %v4964_v54  ;;  %v12578_v10 = vor.u32 %v14309_v22, %v12577_v38  ;;  %v11857_v48 = vld [vmem:[#allocation13 + $0x300] sm:$0xf]  ;;  %v12169_v54 = vld [vmem:[#allocation13 + $0x570] sm:$0xf] }
 0x57f   :  { %v16317_v30 = vpack.c.b16 %v5980_v6, %v5980_v6  ;;  %v16319_v2 = vpack.c.b16 %v5981_v12, %v5981_v12  ;;  %v5337_v1 = vadd.f32 %v5273_v50, %v5204_v27  ;;  %v5061_v41 = vpop.f32.mrf.mxu2  ;;  %v16321_v42 = vpop.f32.mrf.mxu3  ;;  %v11866_v31 = vor.u32 %v14131_v51, %v11865_v44  ;;  %v14307_v12 = vld [vmem:[#allocation13 + $0x894] sm:$0xf0]  ;;  %v14129_v27 = vld [vmem:[#allocation13 + $0x304] sm:$0xf0]  ;;  %v12233_v56 = vld [vmem:[#allocation13 + $0x5f0] sm:$0xf] }
 0x580   :  { %8835 = vmatpush.bf16.msra.mxu0 %v12530_v21  ;;  %8848 = vmatpush.bf16.msra.mxu1 %v12594_v29  ;;  %v11929_v21 = vld [vmem:[#allocation13 + $0x390] sm:$0xf]  ;;  %v5062_v49 = vadd.f32 %v5061_v41, %v5013_v45  ;;  %v14207_v39 = vld [vmem:[#allocation13 + $0x574] sm:$0xf0]  ;;  %v12570_v44 = vor.u32 %v14307_v12, %v12569_v40  ;;  %v16338_v51 = vld [vmem:[#allocation13 + $0x800] sm:$0xf] }
 0x581   :  { %v5369_v50 = vmax.f32 %v5337_v1, 0.0  ;;  %v11930_v6 = vor.u32 %v14147_v14, %v11929_v21  ;;  %v5975_v1 = vunpack.c.h.b16 %v16262_v46  ;;  %v14223_v38 = vld [vmem:[#allocation13 + $0x5f4] sm:$0xf0]  ;;  %v12809_v21 = vld [vmem:[#allocation13 + $0xa70] sm:$0xf]  ;;  %v5277_v40 = vperm.slane %v16298_v4, 1 }
 0x582   :  { %8706 = vmatpush.bf16.msra.mxu2 %v11882_v23  ;;  %8719 = vmatpush.bf16.msra.mxu3 %v11946_v62  ;;  %v5157_v29 = vpop.f32.mrf.mxu0  ;;  %v5206_v59 = vpop.f32.mrf.mxu1  ;;  %v12505_v23 = vld [vmem:[#allocation13 + $0x810] sm:$0xf]  ;;  %v14291_v62 = vld [vmem:[#allocation13 + $0x814] sm:$0xf0]  ;;  %v5111_v45 = vadd.f32 %v16321_v42, %v5062_v49  ;;  %v16361_v4 = vld [vmem:[#allocation11 + $0x14] sm:$0x3] }
 0x583   :  { %8788 = vmatmul.bf16.vlgmr.msrb.gmra.mxu0 %v16317_v30  ;;  %8801 = vmatmul.bf16.vlgmr.msrb.gmra.mxu1 %v16319_v2  ;;  %v16330_v28 = vpack.c.bf16 %v5369_v50, %v5368_v18  ;;  %v5158_v36 = vadd.f32 %v5157_v29, %v5109_v33  ;;  %v12506_v41 = vor.u32 %v14291_v62, %v12505_v23  ;;  %v16340_v18 = vld [vmem:[#allocation13 + $0x804] sm:$0xf0]  ;;  %v14367_v14 = vld [vmem:[#allocation13 + $0xa74] sm:$0xf0] }
 0x584   :  { %8836 = vmatpush.bf16.msra.mxu0 %v12522_v11  ;;  %8849 = vmatpush.bf16.msra.mxu1 %v12586_v47  ;;  %v4871_v11 = vadd.f32 %v16178_v32, %v16101_v15  ;;  %v5974_v47 = vunpack.c.l.b16 %v16262_v46  ;;  %v16342_v15 = vld [vmem:[#allocation13 + $0x880] sm:$0xf]  ;;  %v16347_v32 = vadd.f32 %v5276_v19, %v15910_v53  ;;  %v11858_v46 = vor.u32 %v14129_v27, %v11857_v48  ;;  %v14305_v50 = vld [vmem:[#allocation13 + $0x884] sm:$0xf0] }
 0x585   :  { %v5207_v9 = vadd.f32 %v5206_v59, %v5158_v36  ;;  %v11922_v33 = vor.u32 %v14145_v57, %v11921_v43  ;;  %v12170_v59 = vor.u32 %v14207_v39, %v12169_v54  ;;  %v14383_v36 = vld [vmem:[#allocation13 + $0xaf4] sm:$0xf0]  ;;  %v16353_v53 = vpack.c.b16 %v5975_v1, %v5975_v1  ;;  %v14205_v48 = vld [vmem:[#allocation13 + $0x564] sm:$0xf0] }
 0x586   :  { %8707 = vmatpush.bf16.msra.mxu2 %v11874_v13  ;;  %8720 = vmatpush.bf16.msra.mxu3 %v11938_v35  ;;  %v16351_v23 = vpack.c.b16 %v5974_v47, %v5974_v47  ;;  %v12498_v12 = vor.u32 %v16340_v18, %v16338_v51  ;;  %v14221_v27 = vld [vmem:[#allocation13 + $0x5e4] sm:$0xf0]  ;;  %v12562_v49 = vor.u32 %v14305_v50, %v16342_v15  ;;  %v14203_v15 = vld [vmem:[#allocation13 + $0x554] sm:$0xf0]  ;;  %v5278_v50 = vperm.slane %v16361_v4, 0 }
 0x587   :  { %v5339_v13 = vadd.f32 %v5275_v8, %v5207_v9  ;;  %v5064_v35 = vpop.f32.mrf.mxu2  ;;  %v16336_v22 = vpop.f32.mrf.mxu3  ;;  %v12234_v8 = vor.u32 %v14223_v38, %v12233_v56  ;;  %v12810_v9 = vor.u32 %v14367_v14, %v12809_v21  ;;  %v14365_v47 = vld [vmem:[#allocation13 + $0xa64] sm:$0xf0]  ;;  %v12865_v38 = vld [vmem:[#allocation13 + $0xae0] sm:$0xf]  ;;  %v5279_v21 = vperm.slane %v16361_v4, 1 }
 0x588   :  { %8837 = vmatpush.bf16.msra.mxu0 %v12514_v63  ;;  %8850 = vmatpush.bf16.msra.mxu1 %v12578_v10  ;;  %v12873_v63 = vld [vmem:[#allocation13 + $0xaf0] sm:$0xf]  ;;  %v4920_v10 = vadd.f32 %v16180_v55, %v4871_v11  ;;  %v12225_v55 = vld [vmem:[#allocation13 + $0x5e0] sm:$0xf] }
 0x589   :  { %v5371_v29 = vmax.f32 %v5339_v13, 0.0  ;;  %v12874_v43 = vor.u32 %v14383_v36, %v12873_v63  ;;  %v12801_v11 = vld [vmem:[#allocation13 + $0xa60] sm:$0xf]  ;;  %v12226_v56 = vor.u32 %v14221_v27, %v12225_v55  ;;  %v14381_v13 = vld [vmem:[#allocation13 + $0xae4] sm:$0xf0] }
 0x58a   :  { %8708 = vmatpush.bf16.msra.mxu2 %v11866_v31  ;;  %8721 = vmatpush.bf16.msra.mxu3 %v11930_v6  ;;  %v5159_v19 = vpop.f32.mrf.mxu0  ;;  %v5208_v62 = vpop.f32.mrf.mxu1  ;;  %v12161_v31 = vld [vmem:[#allocation13 + $0x560] sm:$0xf]  ;;  %v4969_v1 = vadd.f32 %v16189_v0, %v4920_v10  ;;  %v5372_v0 = vmax.f32 %v16347_v32, 0.0  ;;  %v14363_v63 = vld [vmem:[#allocation13 + $0xa54] sm:$0xf0]  ;;  %v17047_v27 = vld [vmem:[#allocation40_spill] sm:$0xff] }
 0x58b   :  { %v5394_v6 = vpack.c.bf16 %v5371_v29, %v5370_v16  ;;  %v5160_v42 = vadd.f32 %v5159_v19, %v5111_v45  ;;  %v5065_v16 = vadd.f32 %v5064_v35, %v16184_v3  ;;  %v12162_v39 = vor.u32 %v14205_v48, %v12161_v31  ;;  %v12145_v31 = vld [vmem:[#allocation13 + $0x540] sm:$0xf]  ;;  %v14217_v55 = vld [vmem:[#allocation13 + $0x5c4] sm:$0xf0] }
 0x58c   :  { %8838 = vmatpush.bf16.msra.mxu0 %v12506_v41  ;;  %8851 = vmatpush.bf16.msra.mxu1 %v12570_v44  ;;  %v12153_v41 = vld [vmem:[#allocation13 + $0x550] sm:$0xf]  ;;  %v12802_v29 = vor.u32 %v14365_v47, %v12801_v11  ;;  %v12209_v48 = vld [vmem:[#allocation13 + $0x5c0] sm:$0xf] }
 0x58d   :  { %v5984_v57 = vunpack.c.l.b16 %v5394_v6  ;;  %v5985_v52 = vunpack.c.h.b16 %v5394_v6  ;;  %v5209_v54 = vadd.f32 %v5208_v62, %v5160_v42  ;;  %v5114_v14 = vadd.f32 %v16336_v22, %v5065_v16  ;;  %v12857_v62 = vld [vmem:[#allocation13 + $0xad0] sm:$0xf]  ;;  %v14361_v16 = vld [vmem:[#allocation13 + $0xa44] sm:$0xf0]  ;;  %v12849_v47 = vld [vmem:[#allocation13 + $0xac0] sm:$0xf] }
 0x58e   :  { %8709 = vmatpush.bf16.msra.mxu2 %v11858_v46  ;;  %8722 = vmatpush.bf16.msra.mxu3 %v11922_v33  ;;  %v12217_v46 = vld [vmem:[#allocation13 + $0x5d0] sm:$0xf]  ;;  %v14219_v33 = vld [vmem:[#allocation13 + $0x5d4] sm:$0xf0]  ;;  %v12154_v32 = vor.u32 %v14203_v15, %v12153_v41  ;;  %v5018_v6 = vadd.f32 %v16191_v20, %v4969_v1  ;;  %v12210_v11 = vor.u32 %v14217_v55, %v12209_v48  ;;  %v14377_v1 = vld [vmem:[#allocation13 + $0xac4] sm:$0xf0] }
 0x58f   :  { %v16365_v44 = vpack.c.b16 %v5984_v57, %v5984_v57  ;;  %v16367_v51 = vpack.c.b16 %v5985_v52, %v5985_v52  ;;  %v5341_v18 = vadd.f32 %v5277_v40, %v5209_v54  ;;  %v5066_v3 = vpop.f32.mrf.mxu2  ;;  %v5115_v35 = vpop.f32.mrf.mxu3  ;;  %v12218_v19 = vor.u32 %v14219_v33, %v12217_v46  ;;  %v14379_v40 = vld [vmem:[#allocation13 + $0xad4] sm:$0xf0]  ;;  %v12785_v52 = vld [vmem:[#allocation13 + $0xa40] sm:$0xf] }
 0x590   :  { %8839 = vmatpush.bf16.msra.mxu0 %v12498_v12  ;;  %8852 = vmatpush.bf16.msra.mxu1 %v12562_v49  ;;  %v14201_v12 = vld [vmem:[#allocation13 + $0x544] sm:$0xf0]  ;;  %v5342_v49 = vadd.f32 %v5278_v50, %v17047_v27  ;;  %v5067_v4 = vadd.f32 %v5066_v3, %v5018_v6  ;;  %v12858_v20 = vor.u32 %v14379_v40, %v12857_v62  ;;  %v14199_v41 = vld [vmem:[#allocation13 + $0x534] sm:$0xf0]  ;;  %v12129_v62 = vld [vmem:[#allocation13 + $0x520] sm:$0xf] }
 0x591   :  { %8710 = vmatmul.bf16.vlgmr.msra.gmra.mxu2 %v16351_v23  ;;  %8723 = vmatmul.bf16.vlgmr.msra.gmra.mxu3 %v16353_v53  ;;  %v5373_v45 = vmax.f32 %v5341_v18, 0.0  ;;  %v12146_v54 = vor.u32 %v14201_v12, %v12145_v31  ;;  %v12201_v18 = vld [vmem:[#allocation13 + $0x5b0] sm:$0xf]  ;;  %v14215_v15 = vld [vmem:[#allocation13 + $0x5b4] sm:$0xf0]  ;;  %v4876_v33 = vadd.f32 %v16193_v58, %v16111_v61 }
 0x592   :  { %8754 = vmatpush.bf16.msrb.mxu2 %v12170_v59  ;;  %8767 = vmatpush.bf16.msrb.mxu3 %v12234_v8  ;;  %v12866_v59 = vor.u32 %v14381_v13, %v12865_v38  ;;  %v12793_v8 = vld [vmem:[#allocation13 + $0xa50] sm:$0xf]  ;;  %v5162_v36 = vpop.f32.mrf.mxu0  ;;  %v5211_v10 = vpop.f32.mrf.mxu1  ;;  %v5374_v3 = vmax.f32 %v5342_v49, 0.0  ;;  %v5116_v50 = vadd.f32 %v5115_v35, %v5067_v4  ;;  %v14197_v35 = vld [vmem:[#allocation13 + $0x524] sm:$0xf0]  ;;  %v17048_v6 = vld [vmem:[#allocation30_spill] sm:$0xff] }
 0x593   :  { %v16376_v42 = vpack.c.bf16 %v5373_v45, %v5372_v0  ;;  %8840 = vmatmul.bf16.vlgmr.msra.gmra.mxu0 %v16365_v44  ;;  %8853 = vmatmul.bf16.vlgmr.msra.gmra.mxu1 %v16367_v51  ;;  %v5163_v22 = vadd.f32 %v5162_v36, %v5114_v14  ;;  %v12786_v45 = vor.u32 %v14361_v16, %v12785_v52  ;;  %v12193_v40 = vld [vmem:[#allocation13 + $0x5a0] sm:$0xf]  ;;  %v14213_v31 = vld [vmem:[#allocation13 + $0x5a4] sm:$0xf0]  ;;  %v16391_v55 = vld [vmem:[#allocation11 + $0x18] sm:$0x3] }
 0x594   :  { %8884 = vmatpush.bf16.msrb.mxu0 %v12810_v9  ;;  %8897 = vmatpush.bf16.msrb.mxu1 %v12874_v43  ;;  %v12794_v9 = vor.u32 %v14363_v63, %v12793_v8  ;;  %v16381_v43 = vld [vmem:[#allocation11 + $0x16] sm:$0x3]  ;;  %v4925_v12 = vadd.f32 %v16195_v25, %v4876_v33  ;;  %v14357_v4 = vld [vmem:[#allocation13 + $0xa24] sm:$0xf0]  ;;  %v12833_v52 = vld [vmem:[#allocation13 + $0xaa0] sm:$0xf] }
 0x595   :  { %v5212_v57 = vadd.f32 %v5211_v10, %v5163_v22  ;;  %v5280_v46 = vperm.slane %v16381_v43, 0  ;;  %v5281_v0 = vperm.slane %v16381_v43, 1  ;;  %v12202_v10 = vor.u32 %v14215_v15, %v12201_v18  ;;  %v12769_v43 = vld [vmem:[#allocation13 + $0xa20] sm:$0xf]  ;;  %v14373_v16 = vld [vmem:[#allocation13 + $0xaa4] sm:$0xf0] }
 0x596   :  { %8755 = vmatpush.bf16.msrb.mxu2 %v12162_v39  ;;  %8768 = vmatpush.bf16.msrb.mxu3 %v12226_v56  ;;  %v12137_v39 = vld [vmem:[#allocation13 + $0x530] sm:$0xf]  ;;  %v4974_v25 = vadd.f32 %v16204_v37, %v4925_v12  ;;  %v12770_v33 = vor.u32 %v14357_v4, %v12769_v43  ;;  %v14355_v37 = vld [vmem:[#allocation13 + $0xa14] sm:$0xf0]  ;;  %v16410_v43 = vld [vmem:[#allocation13 + $0xa04] sm:$0xf0] }
 0x597   :  { %v5343_v56 = vadd.f32 %v5279_v21, %v5212_v57  ;;  %v5069_v38 = vpop.f32.mrf.mxu2  ;;  %v5118_v13 = vpop.f32.mrf.mxu3  ;;  %v12777_v21 = vld [vmem:[#allocation13 + $0xa30] sm:$0xf]  ;;  %v12138_v36 = vor.u32 %v14199_v41, %v12137_v39  ;;  %v5344_v22 = vadd.f32 %v5280_v46, %v17048_v6  ;;  %v12130_v57 = vor.u32 %v14197_v35, %v12129_v62  ;;  %v14271_v6 = vld [vmem:[#allocation13 + $0x774] sm:$0xf0] }
 0x598   :  { %8885 = vmatpush.bf16.msrb.mxu0 %v12802_v29  ;;  %8898 = vmatpush.bf16.msrb.mxu1 %v12866_v59  ;;  %v12850_v29 = vor.u32 %v14377_v1, %v12849_v47  ;;  %v14359_v59 = vld [vmem:[#allocation13 + $0xa34] sm:$0xf0]  ;;  %v5070_v27 = vadd.f32 %v5069_v38, %v16199_v7  ;;  %v12185_v39 = vld [vmem:[#allocation13 + $0x590] sm:$0xf]  ;;  %v5282_v38 = vperm.slane %v16391_v55, 0  ;;  %v5283_v41 = vperm.slane %v16391_v55, 1 }
 0x599   :  { %v5375_v14 = vmax.f32 %v5343_v56, 0.0  ;;  %v12778_v48 = vor.u32 %v14359_v59, %v12777_v21  ;;  %v14195_v1 = vld [vmem:[#allocation13 + $0x514] sm:$0xf0]  ;;  %v5376_v56 = vmax.f32 %v5344_v22, 0.0  ;;  %v16397_v18 = vld [vmem:[#allocation13 + $0xa10] sm:$0xf]  ;;  %v5979_v55 = vunpack.c.h.b16 %v16290_v34 }
 0x59a   :  { %8756 = vmatpush.bf16.msrb.mxu2 %v12154_v32  ;;  %8769 = vmatpush.bf16.msrb.mxu3 %v12218_v19  ;;  %v5164_v8 = vpop.f32.mrf.mxu0  ;;  %v5213_v63 = vpop.f32.mrf.mxu1  ;;  %v12841_v32 = vld [vmem:[#allocation13 + $0xab0] sm:$0xf]  ;;  %v14375_v19 = vld [vmem:[#allocation13 + $0xab4] sm:$0xf0]  ;;  %v5119_v15 = vadd.f32 %v5118_v13, %v5070_v27 }
 0x59b   :  { %v16387_v61 = vpack.c.bf16 %v5375_v14, %v5374_v3  ;;  %v5165_v58 = vadd.f32 %v5164_v8, %v5116_v50  ;;  %v14211_v7 = vld [vmem:[#allocation13 + $0x594] sm:$0xf0]  ;;  %v12834_v50 = vor.u32 %v14373_v16, %v12833_v52  ;;  %v12113_v8 = vld [vmem:[#allocation13 + $0x500] sm:$0xf]  ;;  %v12425_v62 = vld [vmem:[#allocation13 + $0x770] sm:$0xf] }
 0x59c   :  { %8886 = vmatpush.bf16.msrb.mxu0 %v12794_v9  ;;  %8899 = vmatpush.bf16.msrb.mxu1 %v12858_v20  ;;  %v12842_v9 = vor.u32 %v14375_v19, %v12841_v32  ;;  %v12194_v20 = vor.u32 %v14213_v31, %v12193_v40  ;;  %v14371_v59 = vld [vmem:[#allocation13 + $0xa94] sm:$0xf0]  ;;  %v12177_v32 = vld [vmem:[#allocation13 + $0x580] sm:$0xf]  ;;  %v14209_v19 = vld [vmem:[#allocation13 + $0x584] sm:$0xf0]  ;;  %v5978_v40 = vunpack.c.l.b16 %v16290_v34  ;;  %v12762_v31 = vor.u32 %v14355_v37, %v16397_v18 }
 0x59d   :  { %v5214_v49 = vadd.f32 %v5213_v63, %v5165_v58  ;;  %v14193_v63 = vld [vmem:[#allocation13 + $0x504] sm:$0xf0]  ;;  %v17049_v58 = vld [vmem:[#allocation31_spill] sm:$0xff]  ;;  %v12489_v22 = vld [vmem:[#allocation13 + $0x7f0] sm:$0xf]  ;;  %v16417_v37 = vpack.c.b16 %v5979_v55, %v5979_v55 }
 0x59e   :  { %8757 = vmatpush.bf16.msrb.mxu2 %v12146_v54  ;;  %8770 = vmatpush.bf16.msrb.mxu3 %v12210_v11  ;;  %v12121_v54 = vld [vmem:[#allocation13 + $0x510] sm:$0xf]  ;;  %v5346_v35 = vadd.f32 %v5282_v38, %v17049_v58  ;;  %v14287_v12 = vld [vmem:[#allocation13 + $0x7f4] sm:$0xf0]  ;;  %v12114_v4 = vor.u32 %v14193_v63, %v12113_v8  ;;  %v14369_v52 = vld [vmem:[#allocation13 + $0xa84] sm:$0xf0] }
 0x59f   :  { %v5345_v11 = vadd.f32 %v5281_v0, %v5214_v49  ;;  %v5071_v47 = vpop.f32.mrf.mxu2  ;;  %v5120_v46 = vpop.f32.mrf.mxu3  ;;  %v12825_v0 = vld [vmem:[#allocation13 + $0xa90] sm:$0xf]  ;;  %v12490_v34 = vor.u32 %v14287_v12, %v12489_v22  ;;  %v17051_v18 = vld [vmem:[#allocation47_spill] sm:$0xff]  ;;  %v17052_v22 = vld [vmem:[#allocation48_spill] sm:$0xff] }
 0x5a0   :  { %8887 = vmatpush.bf16.msrb.mxu0 %v12786_v45  ;;  %8900 = vmatpush.bf16.msrb.mxu1 %v12850_v29  ;;  %v12122_v45 = vor.u32 %v14195_v1, %v12121_v54  ;;  %v12186_v29 = vor.u32 %v14211_v7, %v12185_v39  ;;  %v12826_v49 = vor.u32 %v14371_v59, %v12825_v0  ;;  %v13065_v16 = vld [vmem:[#allocation13 + $0xc70] sm:$0xf]  ;;  %v14447_v39 = vld [vmem:[#allocation13 + $0xcf4] sm:$0xf0]  ;;  %v5378_v7 = vmax.f32 %v5346_v35, 0.0 }
 0x5a1   :  { %v5377_v3 = vmax.f32 %v5345_v11, 0.0  ;;  %v12426_v11 = vor.u32 %v14271_v6, %v12425_v62  ;;  %v13129_v1 = vld [vmem:[#allocation13 + $0xcf0] sm:$0xf]  ;;  %v5989_v62 = vunpack.c.h.b16 %v16387_v61  ;;  %v14445_v6 = vld [vmem:[#allocation13 + $0xce4] sm:$0xf0] }
 0x5a2   :  { %8758 = vmatpush.bf16.msrb.mxu2 %v12138_v36  ;;  %8771 = vmatpush.bf16.msrb.mxu3 %v12202_v10  ;;  %v5167_v14 = vpop.f32.mrf.mxu0  ;;  %v5216_v21 = vpop.f32.mrf.mxu1  ;;  %v5023_v36 = vadd.f32 %v16206_v26, %v4974_v25  ;;  %v17050_v38 = vld [vmem:[#allocation33_spill] sm:$0xff] }
 0x5a3   :  { %v16400_v13 = vpack.c.bf16 %v5377_v3, %v5376_v56  ;;  %v5168_v10 = vadd.f32 %v5167_v14, %v5119_v15  ;;  %v4881_v15 = vadd.f32 %v17051_v18, %v17050_v38  ;;  %v16415_v3 = vpack.c.b16 %v5978_v40, %v5978_v40  ;;  %v14429_v40 = vld [vmem:[#allocation13 + $0xc64] sm:$0xf0]  ;;  %v13113_v38 = vld [vmem:[#allocation13 + $0xcd0] sm:$0xf] }
 0x5a4   :  { %8888 = vmatpush.bf16.msrb.mxu0 %v12778_v48  ;;  %8901 = vmatpush.bf16.msrb.mxu1 %v12842_v9  ;;  %v16405_v48 = vld [vmem:[#allocation11 + $0x1a] sm:$0x3]  ;;  %v5072_v26 = vadd.f32 %v5071_v47, %v5023_v36  ;;  %v16408_v9 = vld [vmem:[#allocation13 + $0xa00] sm:$0xf]  ;;  %v13130_v36 = vor.u32 %v14447_v39, %v13129_v1  ;;  %v16437_v39 = vpack.c.b16 %v5989_v62, %v5989_v62 }
 0x5a5   :  { %v5217_v27 = vadd.f32 %v5216_v21, %v5168_v10  ;;  %v14431_v47 = vld [vmem:[#allocation13 + $0xc74] sm:$0xf0]  ;;  %v5284_v56 = vperm.slane %v16405_v48, 0  ;;  %v12754_v14 = vor.u32 %v16410_v43, %v16408_v9  ;;  %v16421_v21 = vld [vmem:[#allocation11 + $0x1c] sm:$0x3]  ;;  %v4930_v12 = vadd.f32 %v17052_v22, %v4881_v15 }
 0x5a6   :  { %8759 = vmatpush.bf16.msrb.mxu2 %v12130_v57  ;;  %8772 = vmatpush.bf16.msrb.mxu3 %v12194_v20  ;;  %v12178_v57 = vor.u32 %v14209_v19, %v12177_v32  ;;  %v12817_v20 = vld [vmem:[#allocation13 + $0xa80] sm:$0xf]  ;;  %v5121_v0 = vadd.f32 %v5120_v46, %v5072_v26  ;;  %v13066_v63 = vor.u32 %v14431_v47, %v13065_v16  ;;  %v5285_v32 = vperm.slane %v16405_v48, 1  ;;  %v17054_v43 = vld [vmem:[#allocation34_spill] sm:$0xff]  ;;  %v14425_v22 = vld [vmem:[#allocation13 + $0xc44] sm:$0xf0] }
 0x5a7   :  { %v5347_v54 = vadd.f32 %v5283_v41, %v5217_v27  ;;  %v5074_v25 = vpop.f32.mrf.mxu2  ;;  %v12818_v8 = vor.u32 %v14369_v52, %v12817_v20  ;;  %v13057_v46 = vld [vmem:[#allocation13 + $0xc60] sm:$0xf]  ;;  %v5988_v19 = vunpack.c.l.b16 %v16387_v61  ;;  %v5123_v55 = vpop.f32.mrf.mxu3  ;;  %v12473_v20 = vld [vmem:[#allocation13 + $0x7d0] sm:$0xf]  ;;  %v14283_v52 = vld [vmem:[#allocation13 + $0x7d4] sm:$0xf0] }
 0x5a8   :  { %8889 = vmatpush.bf16.msrb.mxu0 %v12770_v33  ;;  %8902 = vmatpush.bf16.msrb.mxu1 %v12834_v50  ;;  %v12417_v33 = vld [vmem:[#allocation13 + $0x760] sm:$0xf]  ;;  %v14269_v50 = vld [vmem:[#allocation13 + $0x764] sm:$0xf0]  ;;  %v5286_v16 = vperm.slane %v16421_v21, 0  ;;  %v12474_v15 = vor.u32 %v14283_v52, %v12473_v20 }
 0x5a9   :  { %v5379_v41 = vmax.f32 %v5347_v54, 0.0  ;;  %v12418_v26 = vor.u32 %v14269_v50, %v12417_v33  ;;  %v17053_v48 = vld [vmem:[#allocation43_spill] sm:$0xff]  ;;  %v16435_v1 = vpack.c.b16 %v5988_v19, %v5988_v19  ;;  %v14443_v33 = vld [vmem:[#allocation13 + $0xcd4] sm:$0xf0] }
 0x5aa   :  { %8760 = vmatpush.bf16.msrb.mxu2 %v12122_v45  ;;  %8773 = vmatpush.bf16.msrb.mxu3 %v12186_v29  ;;  %v12481_v45 = vld [vmem:[#allocation13 + $0x7e0] sm:$0xf]  ;;  %v14285_v29 = vld [vmem:[#allocation13 + $0x7e4] sm:$0xf0]  ;;  %v5169_v59 = vpop.f32.mrf.mxu0  ;;  %v5218_v10 = vpop.f32.mrf.mxu1  ;;  %v5348_v9 = vadd.f32 %v5284_v56, %v17053_v48  ;;  %v14427_v56 = vld [vmem:[#allocation13 + $0xc54] sm:$0xf0] }
 0x5ab   :  { %v16426_v58 = vpack.c.bf16 %v5379_v41, %v5378_v7  ;;  %v5170_v35 = vadd.f32 %v5169_v59, %v5121_v0  ;;  %v12482_v27 = vor.u32 %v14285_v29, %v12481_v45  ;;  %v17055_v54 = vld [vmem:[#allocation35_spill] sm:$0xff]  ;;  %v13049_v7 = vld [vmem:[#allocation13 + $0xc50] sm:$0xf]  ;;  %v14265_v0 = vld [vmem:[#allocation13 + $0x744] sm:$0xf0] }
 0x5ac   :  { %8890 = vmatpush.bf16.msrb.mxu0 %v12762_v31  ;;  %8903 = vmatpush.bf16.msrb.mxu1 %v12826_v49  ;;  %v13121_v31 = vld [vmem:[#allocation13 + $0xce0] sm:$0xf]  ;;  %v12409_v49 = vld [vmem:[#allocation13 + $0x750] sm:$0xf]  ;;  %v5380_v41 = vmax.f32 %v5348_v9, 0.0  ;;  %v17057_v48 = vld [vmem:[#allocation44_spill] sm:$0xff] }
 0x5ad   :  { %v5219_v61 = vadd.f32 %v5218_v10, %v5170_v35  ;;  %v13122_v47 = vor.u32 %v14445_v6, %v13121_v31  ;;  %v12401_v50 = vld [vmem:[#allocation13 + $0x740] sm:$0xf]  ;;  %v5287_v31 = vperm.slane %v16421_v21, 1  ;;  %v5350_v9 = vadd.f32 %v5286_v16, %v17057_v48  ;;  %v14279_v20 = vld [vmem:[#allocation13 + $0x7b4] sm:$0xf0] }
 0x5ae   :  { %8761 = vmatpush.bf16.msrb.mxu2 %v12114_v4  ;;  %8774 = vmatpush.bf16.msrb.mxu3 %v12178_v57  ;;  %v5075_v4 = vadd.f32 %v5074_v25, %v17054_v43  ;;  %v14267_v57 = vld [vmem:[#allocation13 + $0x754] sm:$0xf0]  ;;  %v12465_v59 = vld [vmem:[#allocation13 + $0x7c0] sm:$0xf] }
 0x5af   :  { %v5349_v25 = vadd.f32 %v5285_v32, %v5219_v61  ;;  %v12410_v18 = vor.u32 %v14267_v57, %v12409_v49  ;;  %v5076_v29 = vpop.f32.mrf.mxu2  ;;  %v13041_v6 = vld [vmem:[#allocation13 + $0xc40] sm:$0xf]  ;;  %v12393_v49 = vld [vmem:[#allocation13 + $0x730] sm:$0xf]  ;;  %v14263_v61 = vld [vmem:[#allocation13 + $0x734] sm:$0xf0] }
 0x5b0   :  { %8891 = vmatpush.bf16.msrb.mxu0 %v12754_v14  ;;  %8904 = vmatpush.bf16.msrb.mxu1 %v12818_v8  ;;  %v5124_v14 = vadd.f32 %v5123_v55, %v5075_v4  ;;  %v14281_v8 = vld [vmem:[#allocation13 + $0x7c4] sm:$0xf0]  ;;  %v12457_v57 = vld [vmem:[#allocation13 + $0x7b0] sm:$0xf]  ;;  %v14275_v48 = vld [vmem:[#allocation13 + $0x794] sm:$0xf0] }
 0x5b1   :  { %8762 = vmatmul.bf16.vlgmr.msrb.gmra.mxu2 %v16415_v3  ;;  %8775 = vmatmul.bf16.vlgmr.msrb.gmra.mxu3 %v16417_v37  ;;  %v5381_v45 = vmax.f32 %v5349_v25, 0.0  ;;  %v12466_v55 = vor.u32 %v14281_v8, %v12465_v59  ;;  %v14423_v25 = vld [vmem:[#allocation13 + $0xc34] sm:$0xf0]  ;;  %v12458_v16 = vor.u32 %v14279_v20, %v12457_v57  ;;  %v13081_v57 = vld [vmem:[#allocation13 + $0xc90] sm:$0xf] }
 0x5b2   :  { %8806 = vmatpush.bf16.msra.mxu2 %v12426_v11  ;;  %8819 = vmatpush.bf16.msra.mxu3 %v12490_v34  ;;  %v4979_v11 = vadd.f32 %v17055_v54, %v4930_v12  ;;  %v13058_v34 = vor.u32 %v14429_v40, %v13057_v46  ;;  %v5172_v32 = vpop.f32.mrf.mxu0  ;;  %v13050_v46 = vor.u32 %v14427_v56, %v13049_v7  ;;  %v5221_v19 = vpop.f32.mrf.mxu1  ;;  %v13097_v7 = vld [vmem:[#allocation13 + $0xcb0] sm:$0xf]  ;;  %v14435_v20 = vld [vmem:[#allocation13 + $0xc94] sm:$0xf0] }
 0x5b3   :  { %8892 = vmatmul.bf16.vlgmr.msrb.gmra.mxu0 %v16435_v1  ;;  %8905 = vmatmul.bf16.vlgmr.msrb.gmra.mxu1 %v16437_v39  ;;  %v16444_v62 = vpack.c.bf16 %v5381_v45, %v5380_v41  ;;  %v5173_v35 = vadd.f32 %v5172_v32, %v5124_v14  ;;  %v13114_v40 = vor.u32 %v14443_v33, %v13113_v38  ;;  %v5125_v54 = vpop.f32.mrf.mxu3  ;;  %v14439_v38 = vld [vmem:[#allocation13 + $0xcb4] sm:$0xf0]  ;;  %v5382_v33 = vmax.f32 %v5350_v9, 0.0  ;;  %v12449_v41 = vld [vmem:[#allocation13 + $0x7a0] sm:$0xf] }
 0x5b4   :  { %8936 = vmatpush.bf16.msra.mxu0 %v13066_v63  ;;  %8949 = vmatpush.bf16.msra.mxu1 %v13130_v36  ;;  %v16441_v63 = vld [vmem:[#allocation11 + $0x1e] sm:$0x3]  ;;  %v12402_v12 = vor.u32 %v14265_v0, %v12401_v50  ;;  %v12394_v56 = vor.u32 %v14263_v61, %v12393_v49  ;;  %v14277_v14 = vld [vmem:[#allocation13 + $0x7a4] sm:$0xf0]  ;;  %v12441_v49 = vld [vmem:[#allocation13 + $0x790] sm:$0xf] }
 0x5b5   :  { %v17056_v36 = vld [vmem:[#allocation51_spill] sm:$0xff]  ;;  %v5222_v4 = vadd.f32 %v5221_v19, %v5173_v35  ;;  %v5288_v52 = vperm.slane %v16441_v63, 0  ;;  %v5289_v32 = vperm.slane %v16441_v63, 1  ;;  %v14421_v19 = vld [vmem:[#allocation13 + $0xc24] sm:$0xf0] }
 0x5b6   :  { %8807 = vmatpush.bf16.msra.mxu2 %v12418_v26  ;;  %8820 = vmatpush.bf16.msra.mxu3 %v12482_v27  ;;  %v5028_v10 = vadd.f32 %v17056_v36, %v4979_v11  ;;  %v13105_v26 = vld [vmem:[#allocation13 + $0xcc0] sm:$0xf]  ;;  %v14441_v27 = vld [vmem:[#allocation13 + $0xcc4] sm:$0xf0]  ;;  %v13042_v11 = vor.u32 %v14425_v22, %v13041_v6  ;;  %v12377_v22 = vld [vmem:[#allocation13 + $0x710] sm:$0xf] }
 0x5b7   :  { %v5351_v21 = vadd.f32 %v5287_v31, %v5222_v4  ;;  %v13089_v31 = vld [vmem:[#allocation13 + $0xca0] sm:$0xf]  ;;  %v14437_v6 = vld [vmem:[#allocation13 + $0xca4] sm:$0xf0]  ;;  %v13017_v9 = vld [vmem:[#allocation13 + $0xc10] sm:$0xf] }
 0x5b8   :  { %8937 = vmatpush.bf16.msra.mxu0 %v13058_v34  ;;  %8950 = vmatpush.bf16.msra.mxu1 %v13122_v47  ;;  %v5077_v43 = vadd.f32 %v5076_v29, %v5028_v10  ;;  %v13106_v34 = vor.u32 %v14441_v27, %v13105_v26  ;;  %v13033_v47 = vld [vmem:[#allocation13 + $0xc30] sm:$0xf]  ;;  %v13098_v10 = vor.u32 %v14439_v38, %v13097_v7  ;;  %v14259_v27 = vld [vmem:[#allocation13 + $0x714] sm:$0xf0]  ;;  %v14273_v7 = vld [vmem:[#allocation13 + $0x784] sm:$0xf0] }
 0x5b9   :  { %v5383_v0 = vmax.f32 %v5351_v21, 0.0  ;;  %v13034_v29 = vor.u32 %v14423_v25, %v13033_v47  ;;  %v13090_v4 = vor.u32 %v14437_v6, %v13089_v31  ;;  %v14419_v61 = vld [vmem:[#allocation13 + $0xc14] sm:$0xf0]  ;;  %v12442_v21 = vor.u32 %v14275_v48, %v12441_v49  ;;  %v12745_v38 = vld [vmem:[#allocation13 + $0x9f0] sm:$0xf] }
 0x5ba   :  { %8808 = vmatpush.bf16.msra.mxu2 %v12410_v18  ;;  %8821 = vmatpush.bf16.msra.mxu3 %v12474_v15  ;;  %v12385_v18 = vld [vmem:[#allocation13 + $0x720] sm:$0xf]  ;;  %v14261_v15 = vld [vmem:[#allocation13 + $0x724] sm:$0xf0]  ;;  %v5126_v50 = vadd.f32 %v5125_v54, %v5077_v43  ;;  %v5174_v45 = vpop.f32.mrf.mxu0  ;;  %v5223_v59 = vpop.f32.mrf.mxu1  ;;  %v12378_v54 = vor.u32 %v14259_v27, %v12377_v22  ;;  %v14511_v31 = vld [vmem:[#allocation13 + $0xef4] sm:$0xf0]  ;;  %v5992_v27 = vunpack.c.l.b16 %v16426_v58 }
 0x5bb   :  { %v16449_v8 = vpack.c.bf16 %v5383_v0, %v5382_v33  ;;  %v12386_v35 = vor.u32 %v14261_v15, %v12385_v18  ;;  %v14351_v18 = vld [vmem:[#allocation13 + $0x9f4] sm:$0xf0]  ;;  %v13018_v33 = vor.u32 %v14419_v61, %v13017_v9  ;;  %v5982_v0 = vunpack.c.l.b16 %v16330_v28  ;;  %v12673_v6 = vld [vmem:[#allocation13 + $0x960] sm:$0xf]  ;;  %v14333_v22 = vld [vmem:[#allocation13 + $0x964] sm:$0xf0] }
 0x5bc   :  { %8938 = vmatpush.bf16.msra.mxu0 %v13050_v46  ;;  %8951 = vmatpush.bf16.msra.mxu1 %v13114_v40  ;;  %v5175_v36 = vadd.f32 %v5174_v45, %v5126_v50  ;;  %v13025_v46 = vld [vmem:[#allocation13 + $0xc20] sm:$0xf]  ;;  %v12450_v40 = vor.u32 %v14277_v14, %v12449_v41  ;;  %v13082_v50 = vor.u32 %v14435_v20, %v13081_v57  ;;  %v5993_v9 = vunpack.c.h.b16 %v16426_v58  ;;  %v14493_v61 = vld [vmem:[#allocation13 + $0xe64] sm:$0xf0] }
 0x5bd   :  { %v13026_v63 = vor.u32 %v14421_v19, %v13025_v46  ;;  %v13009_v45 = vld [vmem:[#allocation13 + $0xc00] sm:$0xf]  ;;  %v14433_v46 = vld [vmem:[#allocation13 + $0xc84] sm:$0xf0]  ;;  %v13321_v19 = vld [vmem:[#allocation13 + $0xe70] sm:$0xf]  ;;  %v12674_v57 = vor.u32 %v14333_v22, %v12673_v6 }
 0x5be   :  { %8809 = vmatpush.bf16.msra.mxu2 %v12402_v12  ;;  %8822 = vmatpush.bf16.msra.mxu3 %v12466_v55  ;;  %v17058_v12 = vld [vmem:[#allocation32_spill] sm:$0xff]  ;;  %v5224_v26 = vadd.f32 %v5223_v59, %v5175_v36  ;;  %v13073_v59 = vld [vmem:[#allocation13 + $0xc80] sm:$0xf]  ;;  %v5983_v36 = vunpack.c.h.b16 %v16330_v28  ;;  %v16467_v58 = vpack.c.b16 %v5993_v9, %v5993_v9  ;;  %v12649_v22 = vld [vmem:[#allocation13 + $0x930] sm:$0xf] }
 0x5bf   :  { %v5352_v55 = vadd.f32 %v5288_v52, %v17058_v12  ;;  %v12433_v52 = vld [vmem:[#allocation13 + $0x780] sm:$0xf]  ;;  %v13074_v49 = vor.u32 %v14433_v46, %v13073_v59  ;;  %v14345_v59 = vld [vmem:[#allocation13 + $0x9c4] sm:$0xf0] }
 0x5c0   :  { %8939 = vmatpush.bf16.msra.mxu0 %v13042_v11  ;;  %8952 = vmatpush.bf16.msra.mxu1 %v13106_v34  ;;  %v5353_v43 = vadd.f32 %v5289_v32, %v5224_v26  ;;  %v12369_v11 = vld [vmem:[#allocation13 + $0x700] sm:$0xf]  ;;  %v14257_v34 = vld [vmem:[#allocation13 + $0x704] sm:$0xf0]  ;;  %v12434_v14 = vor.u32 %v14273_v7, %v12433_v52  ;;  %v12746_v32 = vor.u32 %v14351_v18, %v12745_v38  ;;  %v12729_v52 = vld [vmem:[#allocation13 + $0x9d0] sm:$0xf] }
 0x5c1   :  { %v5384_v47 = vmax.f32 %v5352_v55, 0.0  ;;  %v12370_v41 = vor.u32 %v14257_v34, %v12369_v11  ;;  %v12737_v12 = vld [vmem:[#allocation13 + $0x9e0] sm:$0xf]  ;;  %v14349_v55 = vld [vmem:[#allocation13 + $0x9e4] sm:$0xf0]  ;;  %v16457_v26 = vpack.c.b16 %v5982_v0, %v5982_v0  ;;  %v16460_v48 = vpack.c.b16 %v5983_v36, %v5983_v36 }
 0x5c2   :  { %8810 = vmatpush.bf16.msra.mxu2 %v12394_v56  ;;  %8823 = vmatpush.bf16.msra.mxu3 %v12458_v16  ;;  %v5385_v25 = vmax.f32 %v5353_v43, 0.0  ;;  %v12681_v56 = vld [vmem:[#allocation13 + $0x970] sm:$0xf]  ;;  %v14335_v16 = vld [vmem:[#allocation13 + $0x974] sm:$0xf0]  ;;  %v12738_v20 = vor.u32 %v14349_v55, %v12737_v12 }
 0x5c3   :  { %v12665_v11 = vld [vmem:[#allocation13 + $0x950] sm:$0xf]  ;;  %v14331_v34 = vld [vmem:[#allocation13 + $0x954] sm:$0xf0]  ;;  %v13297_v46 = vld [vmem:[#allocation13 + $0xe40] sm:$0xf] }
 0x5c4   :  { %8940 = vmatpush.bf16.msra.mxu0 %v13034_v29  ;;  %8953 = vmatpush.bf16.msra.mxu1 %v13098_v10  ;;  %v16453_v15 = vpack.c.bf16 %v5385_v25, %v5384_v47  ;;  %v14417_v29 = vld [vmem:[#allocation13 + $0xc04] sm:$0xf0]  ;;  %v12682_v10 = vor.u32 %v14335_v16, %v12681_v56  ;;  %v14347_v47 = vld [vmem:[#allocation13 + $0x9d4] sm:$0xf0]  ;;  %v16465_v25 = vpack.c.b16 %v5992_v27, %v5992_v27  ;;  %v13305_v16 = vld [vmem:[#allocation13 + $0xe50] sm:$0xf] }
 0x5c5   :  { %v13010_v28 = vor.u32 %v14417_v29, %v13009_v45  ;;  %v14491_v38 = vld [vmem:[#allocation13 + $0xe54] sm:$0xf0]  ;;  %v13369_v18 = vld [vmem:[#allocation13 + $0xed0] sm:$0xf]  ;;  %v14329_v45 = vld [vmem:[#allocation13 + $0x944] sm:$0xf0] }
 0x5c6   :  { %8811 = vmatpush.bf16.msra.mxu2 %v12386_v35  ;;  %8824 = vmatpush.bf16.msra.mxu3 %v12450_v40  ;;  %v14495_v35 = vld [vmem:[#allocation13 + $0xe74] sm:$0xf0]  ;;  %v13385_v40 = vld [vmem:[#allocation13 + $0xef0] sm:$0xf]  ;;  %v12721_v29 = vld [vmem:[#allocation13 + $0x9c0] sm:$0xf]  ;;  %v13306_v36 = vor.u32 %v14491_v38, %v13305_v16 }
 0x5c7   :  { %v13322_v43 = vor.u32 %v14495_v35, %v13321_v19  ;;  %v14507_v0 = vld [vmem:[#allocation13 + $0xed4] sm:$0xf0]  ;;  %v14489_v19 = vld [vmem:[#allocation13 + $0xe44] sm:$0xf0]  ;;  %v12713_v55 = vld [vmem:[#allocation13 + $0x9b0] sm:$0xf] }
 0x5c8   :  { %8941 = vmatpush.bf16.msra.mxu0 %v13026_v63  ;;  %8954 = vmatpush.bf16.msra.mxu1 %v13090_v4  ;;  %v13386_v63 = vor.u32 %v14511_v31, %v13385_v40  ;;  %v13313_v4 = vld [vmem:[#allocation13 + $0xe60] sm:$0xf]  ;;  %v12722_v40 = vor.u32 %v14345_v59, %v12721_v29  ;;  %v14505_v6 = vld [vmem:[#allocation13 + $0xec4] sm:$0xf0]  ;;  %v14327_v12 = vld [vmem:[#allocation13 + $0x934] sm:$0xf0] }
 0x5c9   :  { %v13314_v7 = vor.u32 %v14493_v61, %v13313_v4  ;;  %v13361_v31 = vld [vmem:[#allocation13 + $0xec0] sm:$0xf]  ;;  %v14343_v27 = vld [vmem:[#allocation13 + $0x9b4] sm:$0xf0]  ;;  %v13289_v4 = vld [vmem:[#allocation13 + $0xe30] sm:$0xf] }
 0x5ca   :  { %8812 = vmatpush.bf16.msra.mxu2 %v12378_v54  ;;  %8825 = vmatpush.bf16.msra.mxu3 %v12442_v21  ;;  %v13377_v54 = vld [vmem:[#allocation13 + $0xee0] sm:$0xf]  ;;  %v14509_v21 = vld [vmem:[#allocation13 + $0xee4] sm:$0xf0]  ;;  %v14487_v61 = vld [vmem:[#allocation13 + $0xe34] sm:$0xf0] }
 0x5cb   :  { %v13378_v56 = vor.u32 %v14509_v21, %v13377_v54  ;;  %v13353_v54 = vld [vmem:[#allocation13 + $0xeb0] sm:$0xf]  ;;  %v14503_v21 = vld [vmem:[#allocation13 + $0xeb4] sm:$0xf0]  ;;  %v13281_v38 = vld [vmem:[#allocation13 + $0xe20] sm:$0xf] }
 0x5cc   :  { %8942 = vmatpush.bf16.msra.mxu0 %v13018_v33  ;;  %8955 = vmatpush.bf16.msra.mxu1 %v13082_v50  ;;  %v12666_v33 = vor.u32 %v14331_v34, %v12665_v11  ;;  %v12730_v50 = vor.u32 %v14347_v47, %v12729_v52  ;;  %v12641_v11 = vld [vmem:[#allocation13 + $0x920] sm:$0xf]  ;;  %v14325_v52 = vld [vmem:[#allocation13 + $0x924] sm:$0xf0]  ;;  %v13354_v16 = vor.u32 %v14503_v21, %v13353_v54  ;;  %v12697_v29 = vld [vmem:[#allocation13 + $0x990] sm:$0xf] }
 0x5cd   :  { %v12705_v47 = vld [vmem:[#allocation13 + $0x9a0] sm:$0xf]  ;;  %v14339_v59 = vld [vmem:[#allocation13 + $0x994] sm:$0xf0] }
 0x5ce   :  { %8813 = vmatpush.bf16.msra.mxu2 %v12370_v41  ;;  %8826 = vmatpush.bf16.msra.mxu3 %v12434_v14  ;;  %v12657_v41 = vld [vmem:[#allocation13 + $0x940] sm:$0xf] }
 0x5cf   :  { %v5946_v14 = vld [vmem:[#allocation14] sm:$0x3]  ;;  %v12658_v35 = vor.u32 %v14329_v45, %v12657_v41  ;;  %v14501_v41 = vld [vmem:[#allocation13 + $0xea4] sm:$0xf0]  ;;  %v14323_v45 = vld [vmem:[#allocation13 + $0x914] sm:$0xf0] }
 0x5d0   :  { %8943 = vmatpush.bf16.msra.mxu0 %v13010_v28  ;;  %8956 = vmatpush.bf16.msra.mxu1 %v13074_v49 }
 0x5d1   :  { %8814 = vmatmul.bf16.vlgmr.msra.gmra.mxu2 %v16457_v26  ;;  %8827 = vmatmul.bf16.vlgmr.msra.gmra.mxu3 %v16460_v48 }
 0x5d2   :  { %8858 = vmatpush.bf16.msrb.mxu2 %v12682_v10  ;;  %8871 = vmatpush.bf16.msrb.mxu3 %v12746_v32  ;;  %v13370_v10 = vor.u32 %v14507_v0, %v13369_v18  ;;  %v5948_v32 = vperm.slane %v5946_v14, 0  ;;  %v14485_v18 = vld [vmem:[#allocation13 + $0xe24] sm:$0xf0]  ;;  %v13345_v0 = vld [vmem:[#allocation13 + $0xea0] sm:$0xf] }
 0x5d3   :  { %8944 = vmatmul.bf16.vlgmr.msra.gmra.mxu0 %v16465_v25  ;;  %8957 = vmatmul.bf16.vlgmr.msra.gmra.mxu1 %v16467_v58  ;;  %v12633_v14 = vld [vmem:[#allocation13 + $0x910] sm:$0xf] }
 0x5d4   :  { %8988 = vmatpush.bf16.msrb.mxu0 %v13322_v43  ;;  %9001 = vmatpush.bf16.msrb.mxu1 %v13386_v63  ;;  %v8633_v28 = vpop.f32.mrf.mxu2  ;;  %v8646_v49 = vpop.f32.mrf.mxu3  ;;  %v13298_v43 = vor.u32 %v14489_v19, %v13297_v46  ;;  %v13362_v63 = vor.u32 %v14505_v6, %v13361_v31  ;;  %v13346_v46 = vor.u32 %v14501_v41, %v13345_v0  ;;  %v13273_v19 = vld [vmem:[#allocation13 + $0xe10] sm:$0xf]  ;;  %v14062_v0 = vld [vmem:[#allocation13 + $0xf4] sm:$0xf]  ;;  %v11595_v41 = vld [vmem:[#allocation13 + $0xf8] sm:$0xf0] }
 0x5d5   :  { %v8634_v9 = vadd.f32 %v8633_v28, %v5948_v32  ;;  %v13282_v32 = vor.u32 %v14485_v18, %v13281_v38  ;;  %v12634_v31 = vor.u32 %v14323_v45, %v12633_v14  ;;  %v12698_v6 = vor.u32 %v14339_v59, %v12697_v29  ;;  %v14337_v28 = vld [vmem:[#allocation13 + $0x984] sm:$0xf0]  ;;  %v14046_v38 = vld [vmem:[#allocation13 + $0x74] sm:$0xf]  ;;  %v11531_v18 = vld [vmem:[#allocation13 + $0x78] sm:$0xf0] }
 0x5d6   :  { %8859 = vmatpush.bf16.msrb.mxu2 %v12674_v57  ;;  %8872 = vmatpush.bf16.msrb.mxu3 %v12738_v20  ;;  %v12650_v57 = vor.u32 %v14327_v12, %v12649_v22  ;;  %v12714_v20 = vor.u32 %v14343_v27, %v12713_v55  ;;  %v14499_v22 = vld [vmem:[#allocation13 + $0xe94] sm:$0xf0]  ;;  %v12625_v12 = vld [vmem:[#allocation13 + $0x900] sm:$0xf]  ;;  %v14321_v55 = vld [vmem:[#allocation13 + $0x904] sm:$0xf0] }
 0x5d7   :  { %v16471_v34 = vadd.f32 %v8646_v49, %v8634_v9  ;;  %v12689_v27 = vld [vmem:[#allocation13 + $0x980] sm:$0xf]  ;;  %v12937_v49 = vld [vmem:[#allocation13 + $0xb70] sm:$0xf]  ;;  %v14399_v9 = vld [vmem:[#allocation13 + $0xb74] sm:$0xf0]  ;;  %v12626_v54 = vor.u32 %v14321_v55, %v12625_v12 }
 0x5d8   :  { %8989 = vmatpush.bf16.msrb.mxu0 %v13314_v7  ;;  %9002 = vmatpush.bf16.msrb.mxu1 %v13378_v56  ;;  %v14341_v7 = vld [vmem:[#allocation13 + $0x9a4] sm:$0xf0]  ;;  %v13290_v56 = vor.u32 %v14487_v61, %v13289_v4  ;;  %v5986_v4 = vunpack.c.l.b16 %v16376_v42  ;;  %v12690_v21 = vor.u32 %v14337_v28, %v12689_v27  ;;  %v12929_v14 = vld [vmem:[#allocation13 + $0xb60] sm:$0xf]  ;;  %v14060_v27 = vld [vmem:[#allocation13 + $0xe4] sm:$0xf] }
 0x5d9   :  { %v14397_v29 = vld [vmem:[#allocation13 + $0xb64] sm:$0xf0]  ;;  %v12993_v59 = vld [vmem:[#allocation13 + $0xbe0] sm:$0xf]  ;;  %v11587_v28 = vld [vmem:[#allocation13 + $0xe8] sm:$0xf0] }
 0x5da   :  { %8860 = vmatpush.bf16.msrb.mxu2 %v12666_v33  ;;  %8873 = vmatpush.bf16.msrb.mxu3 %v12730_v50  ;;  %v12642_v33 = vor.u32 %v14325_v52, %v12641_v11  ;;  %v12706_v50 = vor.u32 %v14341_v7, %v12705_v47  ;;  %v13265_v11 = vld [vmem:[#allocation13 + $0xe00] sm:$0xf]  ;;  %v14481_v52 = vld [vmem:[#allocation13 + $0xe04] sm:$0xf0]  ;;  %v12938_v7 = vor.u32 %v14399_v9, %v12937_v49  ;;  %v12921_v49 = vld [vmem:[#allocation13 + $0xb50] sm:$0xf] }
 0x5db   :  { %v13329_v47 = vld [vmem:[#allocation13 + $0xe80] sm:$0xf]  ;;  %v16475_v45 = vpack.c.b16 %v5986_v4, %v5986_v4  ;;  %v12930_v12 = vor.u32 %v14397_v29, %v12929_v14  ;;  %v14395_v9 = vld [vmem:[#allocation13 + $0xb54] sm:$0xf0]  ;;  %v11507_v29 = vld [vmem:[#allocation13 + $0x48] sm:$0xf0] }
 0x5dc   :  { %8990 = vmatpush.bf16.msrb.mxu0 %v13306_v36  ;;  %9003 = vmatpush.bf16.msrb.mxu1 %v13370_v10  ;;  %v8635_v36 = vpop.f32.mrf.mxu2  ;;  %v8648_v10 = vpop.f32.mrf.mxu3 }
 0x5dd   :  { %v14413_v36 = vld [vmem:[#allocation13 + $0xbe4] sm:$0xf0] }
 0x5de   :  { %8861 = vmatpush.bf16.msrb.mxu2 %v12658_v35  ;;  %8874 = vmatpush.bf16.msrb.mxu3 %v12722_v40  ;;  %v14483_v35 = vld [vmem:[#allocation13 + $0xe14] sm:$0xf0]  ;;  %v13337_v40 = vld [vmem:[#allocation13 + $0xe90] sm:$0xf]  ;;  %v12994_v55 = vor.u32 %v14413_v36, %v12993_v59 }
 0x5df   :  { %v13274_v61 = vor.u32 %v14483_v35, %v13273_v19  ;;  %v5997_v35 = vunpack.c.h.b16 %v16449_v8 }
 0x5e0   :  { %8991 = vmatpush.bf16.msrb.mxu0 %v13298_v43  ;;  %9004 = vmatpush.bf16.msrb.mxu1 %v13362_v63  ;;  %v13001_v43 = vld [vmem:[#allocation13 + $0xbf0] sm:$0xf]  ;;  %v14415_v63 = vld [vmem:[#allocation13 + $0xbf4] sm:$0xf0] }
 0x5e1   :  { %v16488_v4 = vpack.c.b16 %v5997_v35, %v5997_v35  ;;  %v14391_v35 = vld [vmem:[#allocation13 + $0xb34] sm:$0xf0] }
 0x5e2   :  { %8862 = vmatpush.bf16.msrb.mxu2 %v12650_v57  ;;  %8875 = vmatpush.bf16.msrb.mxu3 %v12714_v20  ;;  %v13338_v57 = vor.u32 %v14499_v22, %v13337_v40  ;;  %v5987_v20 = vunpack.c.h.b16 %v16376_v42  ;;  %v11523_v22 = vld [vmem:[#allocation13 + $0x68] sm:$0xf0] }
 0x5e4   :  { %8992 = vmatpush.bf16.msrb.mxu0 %v13290_v56  ;;  %9005 = vmatpush.bf16.msrb.mxu1 %v13354_v16  ;;  %v13002_v56 = vor.u32 %v14415_v63, %v13001_v43  ;;  %v14497_v16 = vld [vmem:[#allocation13 + $0xe84] sm:$0xf0]  ;;  %v16478_v10 = vpack.c.b16 %v5987_v20, %v5987_v20  ;;  %v12985_v43 = vld [vmem:[#allocation13 + $0xbd0] sm:$0xf]  ;;  %v14042_v20 = vld [vmem:[#allocation13 + $0x54] sm:$0xf] }
 0x5e5   :  { %v13330_v19 = vor.u32 %v14497_v16, %v13329_v47  ;;  %v12913_v16 = vld [vmem:[#allocation13 + $0xb40] sm:$0xf] }
 0x5e6   :  { %8863 = vmatpush.bf16.msrb.mxu2 %v12642_v33  ;;  %8876 = vmatpush.bf16.msrb.mxu3 %v12706_v50  ;;  %v8659_v33 = vpop.f32.mrf.mxu2  ;;  %v8672_v50 = vpop.f32.mrf.mxu3 }
 0x5e7   :  { %v8660_v42 = vadd.f32 %v8659_v33, %v16471_v34  ;;  %v14044_v34 = vld [vmem:[#allocation13 + $0x64] sm:$0xf]  ;;  %v14409_v33 = vld [vmem:[#allocation13 + $0xbc4] sm:$0xf0] }
 0x5e8   :  { %8993 = vmatpush.bf16.msrb.mxu0 %v13282_v32  ;;  %9006 = vmatpush.bf16.msrb.mxu1 %v13346_v46  ;;  %v5996_v32 = vunpack.c.l.b16 %v16449_v8  ;;  %v13266_v46 = vor.u32 %v14481_v52, %v13265_v11  ;;  %v14411_v8 = vld [vmem:[#allocation13 + $0xbd4] sm:$0xf0] }
 0x5e9   :  { %v16482_v40 = vadd.f32 %v8672_v50, %v8660_v42  ;;  %v12986_v11 = vor.u32 %v14411_v8, %v12985_v43  ;;  %v14040_v42 = vld [vmem:[#allocation13 + $0x44] sm:$0xf]  ;;  %v14054_v43 = vld [vmem:[#allocation13 + $0xb4] sm:$0xf]  ;;  %v11563_v8 = vld [vmem:[#allocation13 + $0xb8] sm:$0xf0] }
 0x5ea   :  { %8864 = vmatpush.bf16.msrb.mxu2 %v12634_v31  ;;  %8877 = vmatpush.bf16.msrb.mxu3 %v12698_v6  ;;  %v11534_v31 = vor.u32 %v14046_v38, %v11531_v18  ;;  %v11598_v6 = vor.u32 %v14062_v0, %v11595_v41  ;;  %v16486_v63 = vpack.c.b16 %v5996_v32, %v5996_v32  ;;  %v14393_v38 = vld [vmem:[#allocation13 + $0xb44] sm:$0xf0]  ;;  %v12977_v18 = vld [vmem:[#allocation13 + $0xbc0] sm:$0xf]  ;;  %v14056_v32 = vld [vmem:[#allocation13 + $0xc4] sm:$0xf] }
 0x5eb   :  { %v12914_v59 = vor.u32 %v14393_v38, %v12913_v16  ;;  %v12978_v36 = vor.u32 %v14409_v33, %v12977_v18  ;;  %v14036_v16 = vld [vmem:[#allocation13 + $0x24] sm:$0xf]  ;;  %v11491_v38 = vld [vmem:[#allocation13 + $0x28] sm:$0xf0] }
 0x5ec   :  { %8994 = vmatpush.bf16.msrb.mxu0 %v13274_v61  ;;  %9007 = vmatpush.bf16.msrb.mxu1 %v13338_v57  ;;  %v11526_v61 = vor.u32 %v14044_v34, %v11523_v22  ;;  %v11590_v57 = vor.u32 %v14060_v27, %v11587_v28  ;;  %v11510_v34 = vor.u32 %v14040_v42, %v11507_v29  ;;  %v14387_v42 = vld [vmem:[#allocation13 + $0xb14] sm:$0xf0]  ;;  %v12953_v29 = vld [vmem:[#allocation13 + $0xb90] sm:$0xf] }
 0x5ee   :  { %8865 = vmatpush.bf16.msrb.mxu2 %v12626_v54  ;;  %8878 = vmatpush.bf16.msrb.mxu3 %v12690_v21  ;;  %v11515_v54 = vld [vmem:[#allocation13 + $0x58] sm:$0xf0]  ;;  %v12922_v21 = vor.u32 %v14395_v9, %v12921_v49  ;;  %v8661_v52 = vpop.f32.mrf.mxu2  ;;  %v8674_v47 = vpop.f32.mrf.mxu3 }
 0x5ef   :  { %v11518_v50 = vor.u32 %v14042_v20, %v11515_v54  ;;  %v14389_v20 = vld [vmem:[#allocation13 + $0xb24] sm:$0xf0]  ;;  %v12961_v54 = vld [vmem:[#allocation13 + $0xba0] sm:$0xf]  ;;  %v11566_v47 = vor.u32 %v14054_v43, %v11563_v8  ;;  %v14463_v43 = vld [vmem:[#allocation13 + $0xd74] sm:$0xf0] }
 0x5f0   :  { %8995 = vmatpush.bf16.msrb.mxu0 %v13266_v46  ;;  %9008 = vmatpush.bf16.msrb.mxu1 %v13330_v19  ;;  %v16492_v41 = vpop.f32.mrf.mxu0  ;;  %v16494_v14 = vpop.f32.mrf.mxu1  ;;  %v11571_v46 = vld [vmem:[#allocation13 + $0xc8] sm:$0xf0]  ;;  %v12905_v19 = vld [vmem:[#allocation13 + $0xb30] sm:$0xf] }
 0x5f1   :  { %8866 = vmatmul.bf16.vlgmr.msrb.gmra.mxu2 %v16475_v45  ;;  %8879 = vmatmul.bf16.vlgmr.msrb.gmra.mxu3 %v16478_v10  ;;  %v11574_v22 = vor.u32 %v14056_v32, %v11571_v46  ;;  %v12906_v27 = vor.u32 %v14391_v35, %v12905_v19  ;;  %v14034_v46 = vld [vmem:[#allocation13 + $0x14] sm:$0xf]  ;;  %v11483_v19 = vld [vmem:[#allocation13 + $0x18] sm:$0xf0]  ;;  %v13257_v8 = vld [vmem:[#allocation13 + $0xdf0] sm:$0xf] }
 0x5f2   :  { %8910 = vmatpush.bf16.msra.mxu2 %v12938_v7  ;;  %8923 = vmatpush.bf16.msra.mxu3 %v13002_v56  ;;  %v14058_v7 = vld [vmem:[#allocation13 + $0xd4] sm:$0xf]  ;;  %v11579_v56 = vld [vmem:[#allocation13 + $0xd8] sm:$0xf0] }
 0x5f3   :  { %8996 = vmatmul.bf16.vlgmr.msrb.gmra.mxu0 %v16486_v63  ;;  %9009 = vmatmul.bf16.vlgmr.msrb.gmra.mxu1 %v16488_v4  ;;  %v11582_v0 = vor.u32 %v14058_v7, %v11579_v56  ;;  %v14050_v35 = vld [vmem:[#allocation13 + $0x94] sm:$0xf] }
 0x5f4   :  { %9040 = vmatpush.bf16.msra.mxu0 %v11534_v31  ;;  %9053 = vmatpush.bf16.msra.mxu1 %v11598_v6  ;;  %v12969_v31 = vld [vmem:[#allocation13 + $0xbb0] sm:$0xf]  ;;  %v14407_v6 = vld [vmem:[#allocation13 + $0xbb4] sm:$0xf0] }
 0x5f5   :  { %v12970_v28 = vor.u32 %v14407_v6, %v12969_v31 }
 0x5f6   :  { %8911 = vmatpush.bf16.msra.mxu2 %v12930_v12  ;;  %8924 = vmatpush.bf16.msra.mxu3 %v12994_v55  ;;  %v14038_v12 = vld [vmem:[#allocation13 + $0x34] sm:$0xf]  ;;  %v11499_v55 = vld [vmem:[#allocation13 + $0x38] sm:$0xf0]  ;;  %v8685_v49 = vpop.f32.mrf.mxu2  ;;  %v8698_v9 = vpop.f32.mrf.mxu3 }
 0x5f7   :  { %v11502_v52 = vor.u32 %v14038_v12, %v11499_v55  ;;  %v11547_v12 = vld [vmem:[#allocation13 + $0x98] sm:$0xf0]  ;;  %v12881_v55 = vld [vmem:[#allocation13 + $0xb00] sm:$0xf] }
 0x5f8   :  { %9041 = vmatpush.bf16.msra.mxu0 %v11526_v61  ;;  %9054 = vmatpush.bf16.msra.mxu1 %v11590_v57  ;;  %v12897_v61 = vld [vmem:[#allocation13 + $0xb20] sm:$0xf]  ;;  %v8686_v57 = vadd.f32 %v8685_v49, %v16482_v40  ;;  %v8739_v7 = vpop.f32.mrf.mxu0  ;;  %v8752_v56 = vpop.f32.mrf.mxu1  ;;  %v12889_v40 = vld [vmem:[#allocation13 + $0xb10] sm:$0xf]  ;;  %v14401_v49 = vld [vmem:[#allocation13 + $0xb84] sm:$0xf0] }
 0x5f9   :  { %v12898_v18 = vor.u32 %v14389_v20, %v12897_v61  ;;  %v12890_v31 = vor.u32 %v14387_v42, %v12889_v40  ;;  %v14479_v61 = vld [vmem:[#allocation13 + $0xdf4] sm:$0xf0]  ;;  %v11550_v20 = vor.u32 %v14050_v35, %v11547_v12  ;;  %v14032_v56 = vld [vmem:[#allocation13 + $0x4] sm:$0xf]  ;;  %v14110_v40 = vld [vmem:[#allocation13 + $0x274] sm:$0xf] }
 0x5fa   :  { %8912 = vmatpush.bf16.msra.mxu2 %v12922_v21  ;;  %8925 = vmatpush.bf16.msra.mxu3 %v12986_v11  ;;  %v14405_v21 = vld [vmem:[#allocation13 + $0xba4] sm:$0xf0]  ;;  %v16497_v11 = vadd.f32 %v8698_v9, %v8686_v57  ;;  %v13193_v9 = vld [vmem:[#allocation13 + $0xd70] sm:$0xf]  ;;  %v11486_v57 = vor.u32 %v14034_v46, %v11483_v19  ;;  %v11787_v42 = vld [vmem:[#allocation13 + $0x278] sm:$0xf0] }
 0x5fb   :  { %v12962_v33 = vor.u32 %v14405_v21, %v12961_v54  ;;  %v13249_v46 = vld [vmem:[#allocation13 + $0xde0] sm:$0xf]  ;;  %v14477_v19 = vld [vmem:[#allocation13 + $0xde4] sm:$0xf0]  ;;  %v14108_v12 = vld [vmem:[#allocation13 + $0x264] sm:$0xf] }
 0x5fc   :  { %9042 = vmatpush.bf16.msra.mxu0 %v11518_v50  ;;  %9055 = vmatpush.bf16.msra.mxu1 %v11582_v0  ;;  %v14052_v50 = vld [vmem:[#allocation13 + $0xa4] sm:$0xf]  ;;  %v11555_v0 = vld [vmem:[#allocation13 + $0xa8] sm:$0xf0] }
 0x5fd   :  { %v11558_v32 = vor.u32 %v14052_v50, %v11555_v0  ;;  %v13258_v50 = vor.u32 %v14479_v61, %v13257_v8  ;;  %v11539_v0 = vld [vmem:[#allocation13 + $0x88] sm:$0xf0] }
 0x5fe   :  { %8913 = vmatpush.bf16.msra.mxu2 %v12914_v59  ;;  %8926 = vmatpush.bf16.msra.mxu3 %v12978_v36  ;;  %v14403_v59 = vld [vmem:[#allocation13 + $0xb94] sm:$0xf0]  ;;  %v11494_v36 = vor.u32 %v14036_v16, %v11491_v38  ;;  %v11475_v16 = vld [vmem:[#allocation13 + $0x8] sm:$0xf0]  ;;  %v14048_v38 = vld [vmem:[#allocation13 + $0x84] sm:$0xf] }
 0x5ff   :  { %v12954_v6 = vor.u32 %v14403_v59, %v12953_v29  ;;  %v14126_v29 = vld [vmem:[#allocation13 + $0x2f4] sm:$0xf]  ;;  %v11851_v59 = vld [vmem:[#allocation13 + $0x2f8] sm:$0xf0] }
 0x600   :  { %9043 = vmatpush.bf16.msra.mxu0 %v11510_v34  ;;  %9056 = vmatpush.bf16.msra.mxu1 %v11574_v22  ;;  %v8687_v34 = vpop.f32.mrf.mxu2  ;;  %v8700_v22 = vpop.f32.mrf.mxu3 }
 0x601   :  { %v16499_v54 = vpop.f32.mrf.mxu0  ;;  %v16501_v21 = vpop.f32.mrf.mxu1  ;;  %v11790_v34 = vor.u32 %v14110_v40, %v11787_v42  ;;  %v11854_v22 = vor.u32 %v14126_v29, %v11851_v59  ;;  %v17059_v40 = vld [vmem:[#allocation52_spill] sm:$0xff]  ;;  %v13233_v59 = vld [vmem:[#allocation13 + $0xdc0] sm:$0xf] }
 0x602   :  { %8914 = vmatpush.bf16.msra.mxu2 %v12906_v27  ;;  %8927 = vmatpush.bf16.msra.mxu3 %v12970_v28  ;;  %v14385_v27 = vld [vmem:[#allocation13 + $0xb04] sm:$0xf0]  ;;  %v12945_v28 = vld [vmem:[#allocation13 + $0xb80] sm:$0xf] }
 0x603   :  { %v12946_v7 = vor.u32 %v14401_v49, %v12945_v28  ;;  %v13250_v28 = vor.u32 %v14477_v19, %v13249_v46  ;;  %v14124_v49 = vld [vmem:[#allocation13 + $0x2e4] sm:$0xf]  ;;  %v14457_v29 = vld [vmem:[#allocation13 + $0xd44] sm:$0xf0] }
 0x604   :  { %9044 = vmatpush.bf16.msra.mxu0 %v11502_v52  ;;  %9057 = vmatpush.bf16.msra.mxu1 %v11566_v47  ;;  %v5990_v52 = vunpack.c.l.b16 %v16400_v13  ;;  %v12882_v47 = vor.u32 %v14385_v27, %v12881_v55  ;;  %v11779_v55 = vld [vmem:[#allocation13 + $0x268] sm:$0xf0]  ;;  %v14104_v19 = vld [vmem:[#allocation13 + $0x244] sm:$0xf] }
 0x605   :  { %v17060_v42 = vld [vmem:[#allocation36_spill] sm:$0xff] }
 0x606   :  { %8915 = vmatpush.bf16.msra.mxu2 %v12898_v18  ;;  %8928 = vmatpush.bf16.msra.mxu3 %v12962_v33  ;;  %v5991_v18 = vunpack.c.h.b16 %v16400_v13  ;;  %v13194_v33 = vor.u32 %v14463_v43, %v13193_v9  ;;  %v16505_v35 = vpack.c.b16 %v5990_v52, %v5990_v52  ;;  %v11843_v9 = vld [vmem:[#allocation13 + $0x2e8] sm:$0xf0]  ;;  %v13177_v43 = vld [vmem:[#allocation13 + $0xd50] sm:$0xf]  ;;  %v14475_v52 = vld [vmem:[#allocation13 + $0xdd4] sm:$0xf0] }
 0x608   :  { %9045 = vmatpush.bf16.msra.mxu0 %v11494_v36  ;;  %9058 = vmatpush.bf16.msra.mxu1 %v11558_v32  ;;  %v13185_v36 = vld [vmem:[#allocation13 + $0xd60] sm:$0xf]  ;;  %v14461_v32 = vld [vmem:[#allocation13 + $0xd64] sm:$0xf0]  ;;  %v16507_v13 = vpack.c.b16 %v5991_v18, %v5991_v18 }
 0x609   :  { %v13186_v27 = vor.u32 %v14461_v32, %v13185_v36  ;;  %v8791_v8 = vpop.f32.mrf.mxu0  ;;  %v8804_v61 = vpop.f32.mrf.mxu1  ;;  %v14473_v36 = vld [vmem:[#allocation13 + $0xdc4] sm:$0xf0] }
 0x60a   :  { %8916 = vmatpush.bf16.msra.mxu2 %v12890_v31  ;;  %8929 = vmatpush.bf16.msra.mxu3 %v12954_v6  ;;  %v11478_v31 = vor.u32 %v14032_v56, %v11475_v16  ;;  %v11542_v6 = vor.u32 %v14048_v38, %v11539_v0  ;;  %v14106_v56 = vld [vmem:[#allocation13 + $0x254] sm:$0xf]  ;;  %v11771_v16 = vld [vmem:[#allocation13 + $0x258] sm:$0xf0]  ;;  %v13169_v0 = vld [vmem:[#allocation13 + $0xd40] sm:$0xf] }
 0x60b   :  { %v11774_v32 = vor.u32 %v14106_v56, %v11771_v16  ;;  %v14118_v16 = vld [vmem:[#allocation13 + $0x2b4] sm:$0xf] }
 0x60c   :  { %9046 = vmatpush.bf16.msra.mxu0 %v11486_v57  ;;  %9059 = vmatpush.bf16.msra.mxu1 %v11550_v20  ;;  %v14459_v57 = vld [vmem:[#allocation13 + $0xd54] sm:$0xf0]  ;;  %v13241_v20 = vld [vmem:[#allocation13 + $0xdd0] sm:$0xf] }
 0x60d   :  { %v13178_v38 = vor.u32 %v14459_v57, %v13177_v43  ;;  %v13242_v18 = vor.u32 %v14475_v52, %v13241_v20  ;;  %v14102_v57 = vld [vmem:[#allocation13 + $0x234] sm:$0xf]  ;;  %v11755_v20 = vld [vmem:[#allocation13 + $0x238] sm:$0xf0] }
 0x60e   :  { %8917 = vmatpush.bf16.msra.mxu2 %v12882_v47  ;;  %8930 = vmatpush.bf16.msra.mxu3 %v12946_v7  ;;  %v11782_v47 = vor.u32 %v14108_v12, %v11779_v55  ;;  %v11846_v7 = vor.u32 %v14124_v49, %v11843_v9  ;;  %v11827_v12 = vld [vmem:[#allocation13 + $0x2c8] sm:$0xf0]  ;;  %v13161_v55 = vld [vmem:[#allocation13 + $0xd30] sm:$0xf]  ;;  %v14471_v49 = vld [vmem:[#allocation13 + $0xdb4] sm:$0xf0] }
 0x610   :  { %9047 = vmatpush.bf16.msra.mxu0 %v11478_v31  ;;  %9060 = vmatpush.bf16.msra.mxu1 %v11542_v6  ;;  %v11763_v31 = vld [vmem:[#allocation13 + $0x248] sm:$0xf0]  ;;  %v13170_v6 = vor.u32 %v14457_v29, %v13169_v0  ;;  %v13217_v0 = vld [vmem:[#allocation13 + $0xda0] sm:$0xf]  ;;  %v11758_v29 = vor.u32 %v14102_v57, %v11755_v20  ;;  %v11739_v57 = vld [vmem:[#allocation13 + $0x218] sm:$0xf0] }
 0x611   :  { %8918 = vmatmul.bf16.vlgmr.msra.gmra.mxu2 %v16505_v35  ;;  %8931 = vmatmul.bf16.vlgmr.msra.gmra.mxu3 %v16507_v13  ;;  %v16513_v9 = vpop.f32.mrf.mxu0  ;;  %v16515_v43 = vpop.f32.mrf.mxu1  ;;  %v11766_v8 = vor.u32 %v14104_v19, %v11763_v31  ;;  %v14116_v31 = vld [vmem:[#allocation13 + $0x2a4] sm:$0xf]  ;;  %v14114_v20 = vld [vmem:[#allocation13 + $0x294] sm:$0xf] }
 0x612   :  { %8962 = vmatpush.bf16.msrb.mxu2 %v13194_v33  ;;  %8975 = vmatpush.bf16.msrb.mxu3 %v13258_v50  ;;  %v14122_v33 = vld [vmem:[#allocation13 + $0x2d4] sm:$0xf]  ;;  %v11835_v50 = vld [vmem:[#allocation13 + $0x2d8] sm:$0xf0] }
 0x613   :  { %9048 = vmatmul.bf16.vlgmr.msra.gmra.mxu0 %v17059_v40  ;;  %9061 = vmatmul.bf16.vlgmr.msra.gmra.mxu1 %v17060_v42  ;;  %v11838_v46 = vor.u32 %v14122_v33, %v11835_v50  ;;  %v14453_v50 = vld [vmem:[#allocation13 + $0xd24] sm:$0xf0] }
 0x614   :  { %9092 = vmatpush.bf16.msrb.mxu0 %v11790_v34  ;;  %9105 = vmatpush.bf16.msrb.mxu1 %v11854_v22  ;;  %v13234_v34 = vor.u32 %v14473_v36, %v13233_v59  ;;  %v14120_v22 = vld [vmem:[#allocation13 + $0x2c4] sm:$0xf]  ;;  %v8724_v56 = vpop.f32.mrf.mxu3  ;;  %v14469_v40 = vld [vmem:[#allocation13 + $0xda4] sm:$0xf0] }
 0x615   :  { %v11830_v61 = vor.u32 %v14120_v22, %v11827_v12  ;;  %v14100_v36 = vld [vmem:[#allocation13 + $0x224] sm:$0xf]  ;;  %v13218_v19 = vor.u32 %v14469_v40, %v13217_v0  ;;  %v13209_v12 = vld [vmem:[#allocation13 + $0xd90] sm:$0xf]  ;;  %v14527_v40 = vld [vmem:[#allocation13 + $0xf74] sm:$0xf0] }
 0x616   :  { %8963 = vmatpush.bf16.msrb.mxu2 %v13186_v27  ;;  %8976 = vmatpush.bf16.msrb.mxu3 %v13250_v28  ;;  %v14455_v27 = vld [vmem:[#allocation13 + $0xd34] sm:$0xf0]  ;;  %v13225_v28 = vld [vmem:[#allocation13 + $0xdb0] sm:$0xf] }
 0x617   :  { %v13162_v52 = vor.u32 %v14455_v27, %v13161_v55  ;;  %v14467_v55 = vld [vmem:[#allocation13 + $0xd94] sm:$0xf0]  ;;  %v13449_v0 = vld [vmem:[#allocation13 + $0xf70] sm:$0xf] }
 0x618   :  { %9093 = vmatpush.bf16.msrb.mxu0 %v11782_v47  ;;  %9106 = vmatpush.bf16.msrb.mxu1 %v11846_v7  ;;  %v13226_v47 = vor.u32 %v14471_v49, %v13225_v28  ;;  %v8711_v7 = vpop.f32.mrf.mxu2 }
 0x619   :  { %v8712_v33 = vadd.f32 %v8711_v7, %v16497_v11  ;;  %v14451_v11 = vld [vmem:[#allocation13 + $0xd14] sm:$0xf0]  ;;  %v8843_v27 = vpop.f32.mrf.mxu0  ;;  %v8856_v28 = vpop.f32.mrf.mxu1  ;;  %v13210_v7 = vor.u32 %v14467_v55, %v13209_v12  ;;  %v11795_v12 = vld [vmem:[#allocation13 + $0x288] sm:$0xf0]  ;;  %v14174_v55 = vld [vmem:[#allocation13 + $0x474] sm:$0xf] }
 0x61a   :  { %8964 = vmatpush.bf16.msrb.mxu2 %v13178_v38  ;;  %8977 = vmatpush.bf16.msrb.mxu3 %v13242_v18  ;;  %v11819_v38 = vld [vmem:[#allocation13 + $0x2b8] sm:$0xf0]  ;;  %v13153_v18 = vld [vmem:[#allocation13 + $0xd20] sm:$0xf]  ;;  %v14190_v28 = vld [vmem:[#allocation13 + $0x4f4] sm:$0xf] }
 0x61b   :  { %v8725_v42 = vadd.f32 %v8724_v56, %v8712_v33  ;;  %v11822_v59 = vor.u32 %v14118_v16, %v11819_v38  ;;  %v11803_v16 = vld [vmem:[#allocation13 + $0x298] sm:$0xf0]  ;;  %v13137_v38 = vld [vmem:[#allocation13 + $0xd00] sm:$0xf] }
 0x61c   :  { %9094 = vmatpush.bf16.msrb.mxu0 %v11774_v32  ;;  %9107 = vmatpush.bf16.msrb.mxu1 %v11838_v46  ;;  %v11747_v32 = vld [vmem:[#allocation13 + $0x228] sm:$0xf0]  ;;  %v13154_v46 = vor.u32 %v14453_v50, %v13153_v18  ;;  %v8726_v56 = vpop.f32.mrf.mxu3  ;;  %v14449_v18 = vld [vmem:[#allocation13 + $0xd04] sm:$0xf0]  ;;  %v13201_v33 = vld [vmem:[#allocation13 + $0xd80] sm:$0xf] }
 0x61d   :  { %v8738_v22 = vadd.f32 %v16492_v41, %v8725_v42  ;;  %v11750_v49 = vor.u32 %v14100_v36, %v11747_v32  ;;  %v14465_v50 = vld [vmem:[#allocation13 + $0xd84] sm:$0xf0]  ;;  %v13513_v42 = vld [vmem:[#allocation13 + $0xff0] sm:$0xf]  ;;  %v5994_v36 = vunpack.c.l.b16 %v16444_v62  ;;  %v13138_v32 = vor.u32 %v14449_v18, %v13137_v38  ;;  %v12043_v27 = vld [vmem:[#allocation13 + $0x478] sm:$0xf0] }
 0x61e   :  { %8965 = vmatpush.bf16.msrb.mxu2 %v13170_v6  ;;  %8978 = vmatpush.bf16.msrb.mxu3 %v13234_v34  ;;  %v11811_v6 = vld [vmem:[#allocation13 + $0x2a8] sm:$0xf0]  ;;  %v13145_v34 = vld [vmem:[#allocation13 + $0xd10] sm:$0xf]  ;;  %v12046_v56 = vor.u32 %v14174_v55, %v12043_v27  ;;  %v14172_v38 = vld [vmem:[#allocation13 + $0x464] sm:$0xf] }
 0x61f   :  { %v12035_v18 = vld [vmem:[#allocation13 + $0x468] sm:$0xf0]  ;;  %v13489_v55 = vld [vmem:[#allocation13 + $0xfc0] sm:$0xf]  ;;  %v14537_v27 = vld [vmem:[#allocation13 + $0xfc4] sm:$0xf0] }
 0x620   :  { %9095 = vmatpush.bf16.msrb.mxu0 %v11766_v8  ;;  %9108 = vmatpush.bf16.msrb.mxu1 %v11830_v61  ;;  %v11814_v8 = vor.u32 %v14116_v31, %v11811_v6  ;;  %v14098_v61 = vld [vmem:[#allocation13 + $0x214] sm:$0xf]  ;;  %v8713_v41 = vpop.f32.mrf.mxu2  ;;  %v11731_v31 = vld [vmem:[#allocation13 + $0x208] sm:$0xf0]  ;;  %v14112_v6 = vld [vmem:[#allocation13 + $0x284] sm:$0xf] }
 0x621   :  { %v11798_v41 = vor.u32 %v14112_v6, %v11795_v12  ;;  %v14521_v12 = vld [vmem:[#allocation13 + $0xf44] sm:$0xf0] }
 0x622   :  { %8966 = vmatpush.bf16.msrb.mxu2 %v13162_v52  ;;  %8979 = vmatpush.bf16.msrb.mxu3 %v13226_v47  ;;  %v16520_v52 = vadd.f32 %v16494_v14, %v8738_v22  ;;  %v13146_v47 = vor.u32 %v14451_v11, %v13145_v34  ;;  %v11806_v14 = vor.u32 %v14114_v20, %v11803_v16  ;;  %v5995_v34 = vunpack.c.h.b16 %v16444_v62  ;;  %v14541_v20 = vld [vmem:[#allocation13 + $0xfe4] sm:$0xf0] }
 0x623   :  { %v13450_v22 = vor.u32 %v14527_v40, %v13449_v0  ;;  %v14188_v0 = vld [vmem:[#allocation13 + $0x4e4] sm:$0xf]  ;;  %v12099_v40 = vld [vmem:[#allocation13 + $0x4e8] sm:$0xf0] }
 0x624   :  { %9096 = vmatpush.bf16.msrb.mxu0 %v11758_v29  ;;  %9109 = vmatpush.bf16.msrb.mxu1 %v11822_v59  ;;  %v14543_v29 = vld [vmem:[#allocation13 + $0xff4] sm:$0xf0]  ;;  %v11742_v59 = vor.u32 %v14098_v61, %v11739_v57  ;;  %v14525_v61 = vld [vmem:[#allocation13 + $0xf64] sm:$0xf0]  ;;  %v13505_v57 = vld [vmem:[#allocation13 + $0xfe0] sm:$0xf]  ;;  %v16526_v62 = vpack.c.b16 %v5995_v34, %v5995_v34 }
 0x625   :  { %v13514_v11 = vor.u32 %v14543_v29, %v13513_v42  ;;  %v13433_v42 = vld [vmem:[#allocation13 + $0xf50] sm:$0xf]  ;;  %v14523_v29 = vld [vmem:[#allocation13 + $0xf54] sm:$0xf0]  ;;  %v14186_v34 = vld [vmem:[#allocation13 + $0x4d4] sm:$0xf] }
 0x626   :  { %8967 = vmatpush.bf16.msrb.mxu2 %v13154_v46  ;;  %8980 = vmatpush.bf16.msrb.mxu3 %v13218_v19  ;;  %v13202_v46 = vor.u32 %v14465_v50, %v13201_v33  ;;  %v14096_v19 = vld [vmem:[#allocation13 + $0x204] sm:$0xf]  ;;  %v13506_v50 = vor.u32 %v14541_v20, %v13505_v57  ;;  %v13490_v20 = vor.u32 %v14537_v27, %v13489_v55  ;;  %v12003_v27 = vld [vmem:[#allocation13 + $0x428] sm:$0xf0] }
 0x627   :  { %v14164_v55 = vld [vmem:[#allocation13 + $0x424] sm:$0xf] }
 0x628   :  { %9097 = vmatpush.bf16.msrb.mxu0 %v11750_v49  ;;  %9110 = vmatpush.bf16.msrb.mxu1 %v11814_v8  ;;  %v12107_v49 = vld [vmem:[#allocation13 + $0x4f8] sm:$0xf0]  ;;  %v13441_v8 = vld [vmem:[#allocation13 + $0xf60] sm:$0xf] }
 0x629   :  { %v12110_v16 = vor.u32 %v14190_v28, %v12107_v49  ;;  %v13442_v33 = vor.u32 %v14525_v61, %v13441_v8  ;;  %v14168_v8 = vld [vmem:[#allocation13 + $0x444] sm:$0xf]  ;;  %v12019_v61 = vld [vmem:[#allocation13 + $0x448] sm:$0xf0] }
 0x62a   :  { %8968 = vmatpush.bf16.msrb.mxu2 %v13146_v47  ;;  %8981 = vmatpush.bf16.msrb.mxu3 %v13210_v7  ;;  %v16524_v47 = vpack.c.b16 %v5994_v36, %v5994_v36  ;;  %v11734_v7 = vor.u32 %v14096_v19, %v11731_v31  ;;  %v12038_v36 = vor.u32 %v14172_v38, %v12035_v18  ;;  %v12027_v19 = vld [vmem:[#allocation13 + $0x458] sm:$0xf0]  ;;  %v14535_v38 = vld [vmem:[#allocation13 + $0xfb4] sm:$0xf0] }
 0x62b   :  { %v13434_v31 = vor.u32 %v14523_v29, %v13433_v42 }
 0x62c   :  { %9098 = vmatpush.bf16.msrb.mxu0 %v11742_v59  ;;  %9111 = vmatpush.bf16.msrb.mxu1 %v11806_v14  ;;  %v13497_v59 = vld [vmem:[#allocation13 + $0xfd0] sm:$0xf]  ;;  %v14539_v14 = vld [vmem:[#allocation13 + $0xfd4] sm:$0xf0] }
 0x62d   :  { %v13498_v6 = vor.u32 %v14539_v14, %v13497_v59 }
 0x62e   :  { %8969 = vmatpush.bf16.msrb.mxu2 %v13138_v32  ;;  %8982 = vmatpush.bf16.msrb.mxu3 %v13202_v46  ;;  %v12102_v32 = vor.u32 %v14188_v0, %v12099_v40  ;;  %v14170_v46 = vld [vmem:[#allocation13 + $0x454] sm:$0xf]  ;;  %v12011_v40 = vld [vmem:[#allocation13 + $0x438] sm:$0xf0] }
 0x62f   :  { %v12030_v28 = vor.u32 %v14170_v46, %v12027_v19  ;;  %v14166_v0 = vld [vmem:[#allocation13 + $0x434] sm:$0xf]  ;;  %v13409_v46 = vld [vmem:[#allocation13 + $0xf20] sm:$0xf] }
 0x630   :  { %9099 = vmatpush.bf16.msrb.mxu0 %v11734_v7  ;;  %9112 = vmatpush.bf16.msrb.mxu1 %v11798_v41  ;;  %v14184_v7 = vld [vmem:[#allocation13 + $0x4c4] sm:$0xf]  ;;  %v12083_v41 = vld [vmem:[#allocation13 + $0x4c8] sm:$0xf0]  ;;  %v16534_v18 = vpop.f32.mrf.mxu1 }
 0x631   :  { %8970 = vmatmul.bf16.vlgmr.msrb.gmra.mxu2 %v16524_v47  ;;  %8983 = vmatmul.bf16.vlgmr.msrb.gmra.mxu3 %v16526_v62 }
 0x632   :  { %9014 = vmatpush.bf16.msra.mxu2 %v13450_v22  ;;  %9027 = vmatpush.bf16.msra.mxu3 %v13514_v11  ;;  %v12091_v22 = vld [vmem:[#allocation13 + $0x4d8] sm:$0xf0]  ;;  %v13425_v11 = vld [vmem:[#allocation13 + $0xf40] sm:$0xf] }
 0x633   :  { %9100 = vmatmul.bf16.vlgmr.msrb.gmra.mxu0 %v16274_v5  ;;  %9113 = vmatmul.bf16.vlgmr.msrb.gmra.mxu1 %v16276_v60  ;;  %v12094_v49 = vor.u32 %v14186_v34, %v12091_v22  ;;  %v13426_v57 = vor.u32 %v14521_v12, %v13425_v11  ;;  %v13481_v5 = vld [vmem:[#allocation13 + $0xfb0] sm:$0xf]  ;;  %v16532_v60 = vpop.f32.mrf.mxu0  ;;  %v14533_v34 = vld [vmem:[#allocation13 + $0xfa4] sm:$0xf0]  ;;  %v12014_v11 = vor.u32 %v14166_v0, %v12011_v40  ;;  %v14178_v0 = vld [vmem:[#allocation13 + $0x494] sm:$0xf] }
 0x634   :  { %9144 = vmatpush.bf16.msra.mxu0 %v12046_v56  ;;  %9157 = vmatpush.bf16.msra.mxu1 %v12110_v16  ;;  %v13417_v56 = vld [vmem:[#allocation13 + $0xf30] sm:$0xf]  ;;  %v14519_v16 = vld [vmem:[#allocation13 + $0xf34] sm:$0xf0]  ;;  %v13482_v29 = vor.u32 %v14535_v38, %v13481_v5  ;;  %v8763_v59 = vpop.f32.mrf.mxu2  ;;  %v8776_v14 = vpop.f32.mrf.mxu3  ;;  %v12006_v5 = vor.u32 %v14164_v55, %v12003_v27 }
 0x635   :  { %v13418_v42 = vor.u32 %v14519_v16, %v13417_v56  ;;  %v8764_v19 = vadd.f32 %v8763_v59, %v16520_v52  ;;  %v14515_v52 = vld [vmem:[#allocation13 + $0xf14] sm:$0xf0] }
 0x636   :  { %9015 = vmatpush.bf16.msra.mxu2 %v13442_v33  ;;  %9028 = vmatpush.bf16.msra.mxu3 %v13506_v50  ;;  %v12022_v33 = vor.u32 %v14168_v8, %v12019_v61  ;;  %v12086_v50 = vor.u32 %v14184_v7, %v12083_v41  ;;  %v14180_v8 = vld [vmem:[#allocation13 + $0x4a4] sm:$0xf]  ;;  %v12067_v61 = vld [vmem:[#allocation13 + $0x4a8] sm:$0xf0]  ;;  %v13465_v7 = vld [vmem:[#allocation13 + $0xf90] sm:$0xf] }
 0x637   :  { %v8777_v22 = vadd.f32 %v8776_v14, %v8764_v19  ;;  %v14531_v41 = vld [vmem:[#allocation13 + $0xf94] sm:$0xf0]  ;;  %v12070_v38 = vor.u32 %v14180_v8, %v12067_v61  ;;  %v12059_v14 = vld [vmem:[#allocation13 + $0x498] sm:$0xf0]  ;;  %v14529_v19 = vld [vmem:[#allocation13 + $0xf84] sm:$0xf0]  ;;  %v5999_v61 = vunpack.c.h.b16 %v16453_v15 }
 0x638   :  { %9145 = vmatpush.bf16.msra.mxu0 %v12038_v36  ;;  %9158 = vmatpush.bf16.msra.mxu1 %v12102_v32  ;;  %v14182_v36 = vld [vmem:[#allocation13 + $0x4b4] sm:$0xf]  ;;  %v12075_v32 = vld [vmem:[#allocation13 + $0x4b8] sm:$0xf0]  ;;  %v8908_v16 = vpop.f32.mrf.mxu1  ;;  %v14176_v8 = vld [vmem:[#allocation13 + $0x484] sm:$0xf] }
 0x639   :  { %v12078_v12 = vor.u32 %v14182_v36, %v12075_v32  ;;  %v13393_v36 = vld [vmem:[#allocation13 + $0xf00] sm:$0xf]  ;;  %v14513_v32 = vld [vmem:[#allocation13 + $0xf04] sm:$0xf0]  ;;  %v12363_v16 = vld [vmem:[#allocation13 + $0x6f8] sm:$0xf0] }
 0x63a   :  { %9016 = vmatpush.bf16.msra.mxu2 %v13434_v31  ;;  %9029 = vmatpush.bf16.msra.mxu3 %v13498_v6  ;;  %v14517_v31 = vld [vmem:[#allocation13 + $0xf24] sm:$0xf0]  ;;  %v13473_v6 = vld [vmem:[#allocation13 + $0xfa0] sm:$0xf]  ;;  %v13394_v55 = vor.u32 %v14513_v32, %v13393_v36  ;;  %v12291_v36 = vld [vmem:[#allocation13 + $0x668] sm:$0xf0] }
 0x63b   :  { %v8895_v56 = vpop.f32.mrf.mxu0 }
 0x63c   :  { %9146 = vmatpush.bf16.msra.mxu0 %v12030_v28  ;;  %9159 = vmatpush.bf16.msra.mxu1 %v12094_v49  ;;  %v13410_v28 = vor.u32 %v14517_v31, %v13409_v46  ;;  %v13474_v49 = vor.u32 %v14533_v34, %v13473_v6  ;;  %v8778_v59 = vpop.f32.mrf.mxu3  ;;  %v13457_v46 = vld [vmem:[#allocation13 + $0xf80] sm:$0xf]  ;;  %v14078_v31 = vld [vmem:[#allocation13 + $0x174] sm:$0xf]  ;;  %v11659_v6 = vld [vmem:[#allocation13 + $0x178] sm:$0xf0] }
 0x63d   :  { %v14094_v34 = vld [vmem:[#allocation13 + $0x1f4] sm:$0xf]  ;;  %v13458_v27 = vor.u32 %v14529_v19, %v13457_v46  ;;  %v14252_v19 = vld [vmem:[#allocation13 + $0x6e4] sm:$0xf] }
 0x63e   :  { %9017 = vmatpush.bf16.msra.mxu2 %v13426_v57  ;;  %9030 = vmatpush.bf16.msra.mxu3 %v13490_v20  ;;  %v13401_v57 = vld [vmem:[#allocation13 + $0xf10] sm:$0xf]  ;;  %v8790_v20 = vadd.f32 %v16499_v54, %v8777_v22  ;;  %v8765_v54 = vpop.f32.mrf.mxu2  ;;  %v11723_v22 = vld [vmem:[#allocation13 + $0x1f8] sm:$0xf0]  ;;  %v14254_v56 = vld [vmem:[#allocation13 + $0x6f4] sm:$0xf] }
 0x63f   :  { %v12366_v59 = vor.u32 %v14254_v56, %v12363_v16  ;;  %v14232_v16 = vld [vmem:[#allocation13 + $0x644] sm:$0xf] }
 0x640   :  { %9147 = vmatpush.bf16.msra.mxu0 %v12022_v33  ;;  %9160 = vmatpush.bf16.msra.mxu1 %v12086_v50  ;;  %v14162_v33 = vld [vmem:[#allocation13 + $0x414] sm:$0xf]  ;;  %v11995_v50 = vld [vmem:[#allocation13 + $0x418] sm:$0xf0]  ;;  %v16539_v40 = vadd.f32 %v16501_v21, %v8790_v20  ;;  %v12062_v21 = vor.u32 %v14178_v0, %v12059_v14  ;;  %v11726_v20 = vor.u32 %v14094_v34, %v11723_v22  ;;  %v14236_v14 = vld [vmem:[#allocation13 + $0x664] sm:$0xf] }
 0x641   :  { %v11643_v34 = vld [vmem:[#allocation13 + $0x158] sm:$0xf0]  ;;  %v14090_v22 = vld [vmem:[#allocation13 + $0x1d4] sm:$0xf] }
 0x642   :  { %9018 = vmatpush.bf16.msra.mxu2 %v13418_v42  ;;  %9031 = vmatpush.bf16.msra.mxu3 %v13482_v29  ;;  %v13402_v42 = vor.u32 %v14515_v52, %v13401_v57  ;;  %v13466_v29 = vor.u32 %v14531_v41, %v13465_v7  ;;  %v11662_v57 = vor.u32 %v14078_v31, %v11659_v6  ;;  %v12051_v52 = vld [vmem:[#allocation13 + $0x488] sm:$0xf0]  ;;  %v14238_v7 = vld [vmem:[#allocation13 + $0x674] sm:$0xf]  ;;  %v12299_v41 = vld [vmem:[#allocation13 + $0x678] sm:$0xf0] }
 0x643   :  { %v12302_v54 = vor.u32 %v14238_v7, %v12299_v41  ;;  %v12355_v31 = vld [vmem:[#allocation13 + $0x6e8] sm:$0xf0]  ;;  %v14074_v6 = vld [vmem:[#allocation13 + $0x154] sm:$0xf] }
 0x644   :  { %9148 = vmatpush.bf16.msra.mxu0 %v12014_v11  ;;  %9161 = vmatpush.bf16.msra.mxu1 %v12078_v12  ;;  %v11998_v11 = vor.u32 %v14162_v33, %v11995_v50  ;;  %v5998_v12 = vunpack.c.l.b16 %v16453_v15  ;;  %v14092_v33 = vld [vmem:[#allocation13 + $0x1e4] sm:$0xf]  ;;  %v11715_v50 = vld [vmem:[#allocation13 + $0x1e8] sm:$0xf0]  ;;  %v16545_v15 = vpack.c.b16 %v5999_v61, %v5999_v61  ;;  %v12347_v61 = vld [vmem:[#allocation13 + $0x6d8] sm:$0xf0] }
 0x645   :  { %v11718_v46 = vor.u32 %v14092_v33, %v11715_v50  ;;  %v11699_v7 = vld [vmem:[#allocation13 + $0x1c8] sm:$0xf0]  ;;  %v14248_v50 = vld [vmem:[#allocation13 + $0x6c4] sm:$0xf] }
 0x646   :  { %9019 = vmatpush.bf16.msra.mxu2 %v13410_v28  ;;  %9032 = vmatpush.bf16.msra.mxu3 %v13474_v49  ;;  %v14160_v28 = vld [vmem:[#allocation13 + $0x404] sm:$0xf]  ;;  %v11987_v49 = vld [vmem:[#allocation13 + $0x408] sm:$0xf0]  ;;  %v16543_v0 = vpack.c.b16 %v5998_v12, %v5998_v12  ;;  %v12358_v12 = vor.u32 %v14252_v19, %v12355_v31  ;;  %v12267_v19 = vld [vmem:[#allocation13 + $0x638] sm:$0xf0] }
 0x648   :  { %9149 = vmatpush.bf16.msra.mxu0 %v12006_v5  ;;  %9162 = vmatpush.bf16.msra.mxu1 %v12070_v38  ;;  %v14076_v5 = vld [vmem:[#allocation13 + $0x164] sm:$0xf]  ;;  %v11651_v38 = vld [vmem:[#allocation13 + $0x168] sm:$0xf0] }
 0x649   :  { %v11654_v32 = vor.u32 %v14076_v5, %v11651_v38  ;;  %v12275_v5 = vld [vmem:[#allocation13 + $0x648] sm:$0xf0] }
 0x64a   :  { %9020 = vmatpush.bf16.msra.mxu2 %v13402_v42  ;;  %9033 = vmatpush.bf16.msra.mxu3 %v13466_v29  ;;  %v11990_v42 = vor.u32 %v14160_v28, %v11987_v49  ;;  %v12054_v29 = vor.u32 %v14176_v8, %v12051_v52  ;;  %v11646_v28 = vor.u32 %v14074_v6, %v11643_v34  ;;  %v14250_v8 = vld [vmem:[#allocation13 + $0x6d4] sm:$0xf]  ;;  %v14088_v52 = vld [vmem:[#allocation13 + $0x1c4] sm:$0xf] }
 0x64b   :  { %v12350_v56 = vor.u32 %v14250_v8, %v12347_v61  ;;  %v11702_v33 = vor.u32 %v14088_v52, %v11699_v7  ;;  %v12259_v52 = vld [vmem:[#allocation13 + $0x628] sm:$0xf0] }
 0x64c   :  { %9150 = vmatpush.bf16.msra.mxu0 %v11998_v11  ;;  %9163 = vmatpush.bf16.msra.mxu1 %v12062_v21  ;;  %v11707_v11 = vld [vmem:[#allocation13 + $0x1d8] sm:$0xf0]  ;;  %v12294_v21 = vor.u32 %v14236_v14, %v12291_v36  ;;  %v12278_v36 = vor.u32 %v14232_v16, %v12275_v5  ;;  %v12323_v16 = vld [vmem:[#allocation13 + $0x6a8] sm:$0xf0]  ;;  %v14066_v5 = vld [vmem:[#allocation13 + $0x114] sm:$0xf] }
 0x64d   :  { %v11710_v49 = vor.u32 %v14090_v22, %v11707_v11  ;;  %v14246_v11 = vld [vmem:[#allocation13 + $0x6b4] sm:$0xf] }
 0x64e   :  { %9021 = vmatpush.bf16.msra.mxu2 %v13394_v55  ;;  %9034 = vmatpush.bf16.msra.mxu3 %v13458_v27  ;;  %v14234_v55 = vld [vmem:[#allocation13 + $0x654] sm:$0xf]  ;;  %v12283_v27 = vld [vmem:[#allocation13 + $0x658] sm:$0xf0] }
 0x64f   :  { %v12286_v41 = vor.u32 %v14234_v55, %v12283_v27  ;;  %v11619_v27 = vld [vmem:[#allocation13 + $0x128] sm:$0xf0] }
 0x650   :  { %9151 = vmatpush.bf16.msra.mxu0 %v11990_v42  ;;  %9164 = vmatpush.bf16.msra.mxu1 %v12054_v29  ;;  %v12339_v42 = vld [vmem:[#allocation13 + $0x6c8] sm:$0xf0]  ;;  %v14070_v29 = vld [vmem:[#allocation13 + $0x134] sm:$0xf]  ;;  %v16553_v14 = vpop.f32.mrf.mxu1 }
 0x651   :  { %9022 = vmatmul.bf16.vlgmr.msra.gmra.mxu2 %v16543_v0  ;;  %9035 = vmatmul.bf16.vlgmr.msra.gmra.mxu3 %v16545_v15 }
 0x652   :  { %9066 = vmatpush.bf16.msrb.mxu2 %v11662_v57  ;;  %9079 = vmatpush.bf16.msrb.mxu3 %v11726_v20  ;;  %v14072_v57 = vld [vmem:[#allocation13 + $0x144] sm:$0xf]  ;;  %v11635_v20 = vld [vmem:[#allocation13 + $0x148] sm:$0xf0] }
 0x653   :  { %9152 = vmatmul.bf16.vlgmr.msra.gmra.mxu0 %v16278_v24  ;;  %9165 = vmatmul.bf16.vlgmr.msra.gmra.mxu1 %v16280_v17  ;;  %v11638_v38 = vor.u32 %v14072_v57, %v11635_v20  ;;  %v14086_v24 = vld [vmem:[#allocation13 + $0x1b4] sm:$0xf]  ;;  %v16551_v17 = vpop.f32.mrf.mxu0  ;;  %v14228_v20 = vld [vmem:[#allocation13 + $0x624] sm:$0xf] }
 0x654   :  { %9196 = vmatpush.bf16.msrb.mxu0 %v12302_v54  ;;  %9209 = vmatpush.bf16.msrb.mxu1 %v12366_v59  ;;  %v11627_v54 = vld [vmem:[#allocation13 + $0x138] sm:$0xf0]  ;;  %v8815_v34 = vpop.f32.mrf.mxu2  ;;  %v8828_v22 = vpop.f32.mrf.mxu3 }
 0x655   :  { %v11691_v59 = vld [vmem:[#allocation13 + $0x1b8] sm:$0xf0]  ;;  %v11630_v31 = vor.u32 %v14070_v29, %v11627_v54  ;;  %v8816_v55 = vadd.f32 %v8815_v34, %v16539_v40  ;;  %v12262_v54 = vor.u32 %v14228_v20, %v12259_v52  ;;  %v14224_v20 = vld [vmem:[#allocation13 + $0x604] sm:$0xf]  ;;  %v12243_v52 = vld [vmem:[#allocation13 + $0x608] sm:$0xf0] }
 0x656   :  { %9067 = vmatpush.bf16.msrb.mxu2 %v11654_v32  ;;  %9080 = vmatpush.bf16.msrb.mxu3 %v11718_v46  ;;  %v12342_v32 = vor.u32 %v14248_v50, %v12339_v42  ;;  %v14230_v46 = vld [vmem:[#allocation13 + $0x634] sm:$0xf]  ;;  %v11694_v6 = vor.u32 %v14086_v24, %v11691_v59  ;;  %v11611_v40 = vld [vmem:[#allocation13 + $0x118] sm:$0xf0] }
 0x657   :  { %v8829_v8 = vadd.f32 %v8828_v22, %v8816_v55  ;;  %v12270_v61 = vor.u32 %v14230_v46, %v12267_v19  ;;  %v11675_v50 = vld [vmem:[#allocation13 + $0x198] sm:$0xf0]  ;;  %v14226_v59 = vld [vmem:[#allocation13 + $0x614] sm:$0xf]  ;;  %v11614_v19 = vor.u32 %v14066_v5, %v11611_v40  ;;  %v14064_v22 = vld [vmem:[#allocation13 + $0x104] sm:$0xf] }
 0x658   :  { %9197 = vmatpush.bf16.msrb.mxu0 %v12294_v21  ;;  %9210 = vmatpush.bf16.msrb.mxu1 %v12358_v12  ;;  %v12331_v21 = vld [vmem:[#allocation13 + $0x6b8] sm:$0xf0]  ;;  %v14068_v12 = vld [vmem:[#allocation13 + $0x124] sm:$0xf]  ;;  %v8960_v29 = vpop.f32.mrf.mxu1  ;;  %v14142_v55 = vld [vmem:[#allocation13 + $0x374] sm:$0xf] }
 0x659   :  { %v12334_v57 = vor.u32 %v14246_v11, %v12331_v21  ;;  %v11622_v7 = vor.u32 %v14068_v12, %v11619_v27  ;;  %v12315_v34 = vld [vmem:[#allocation13 + $0x698] sm:$0xf0]  ;;  %v11603_v11 = vld [vmem:[#allocation13 + $0x108] sm:$0xf0]  ;;  %v14080_v21 = vld [vmem:[#allocation13 + $0x184] sm:$0xf] }
 0x65a   :  { %9068 = vmatpush.bf16.msrb.mxu2 %v11646_v28  ;;  %9081 = vmatpush.bf16.msrb.mxu3 %v11710_v49  ;;  %v14084_v28 = vld [vmem:[#allocation13 + $0x1a4] sm:$0xf]  ;;  %v11683_v49 = vld [vmem:[#allocation13 + $0x1a8] sm:$0xf0]  ;;  %v11915_v27 = vld [vmem:[#allocation13 + $0x378] sm:$0xf0] }
 0x65b   :  { %v8947_v42 = vpop.f32.mrf.mxu0  ;;  %v11667_v12 = vld [vmem:[#allocation13 + $0x188] sm:$0xf0]  ;;  %v14302_v5 = vld [vmem:[#allocation13 + $0x874] sm:$0xf]  ;;  %v14156_v29 = vld [vmem:[#allocation13 + $0x3e4] sm:$0xf] }
 0x65c   :  { %9198 = vmatpush.bf16.msrb.mxu0 %v12286_v41  ;;  %9211 = vmatpush.bf16.msrb.mxu1 %v12350_v56  ;;  %v11686_v41 = vor.u32 %v14084_v28, %v11683_v49  ;;  %v14244_v56 = vld [vmem:[#allocation13 + $0x6a4] sm:$0xf]  ;;  %v14158_v28 = vld [vmem:[#allocation13 + $0x3f4] sm:$0xf]  ;;  %v11979_v49 = vld [vmem:[#allocation13 + $0x3f8] sm:$0xf0] }
 0x65d   :  { %v12326_v24 = vor.u32 %v14244_v56, %v12323_v16  ;;  %v11982_v56 = vor.u32 %v14158_v28, %v11979_v49  ;;  %v12307_v16 = vld [vmem:[#allocation13 + $0x688] sm:$0xf0]  ;;  %v14318_v40 = vld [vmem:[#allocation13 + $0x8f4] sm:$0xf]  ;;  %v11963_v28 = vld [vmem:[#allocation13 + $0x3d8] sm:$0xf0] }
 0x65e   :  { %9069 = vmatpush.bf16.msrb.mxu2 %v11638_v38  ;;  %9082 = vmatpush.bf16.msrb.mxu3 %v11702_v33  ;;  %v8842_v38 = vadd.f32 %v16513_v9, %v8829_v8  ;;  %v14082_v33 = vld [vmem:[#allocation13 + $0x194] sm:$0xf]  ;;  %v8817_v9 = vpop.f32.mrf.mxu2  ;;  %v11907_v42 = vld [vmem:[#allocation13 + $0x368] sm:$0xf0] }
 0x660   :  { %9199 = vmatpush.bf16.msrb.mxu0 %v12278_v36  ;;  %9212 = vmatpush.bf16.msrb.mxu1 %v12342_v32  ;;  %v12251_v36 = vld [vmem:[#allocation13 + $0x618] sm:$0xf0]  ;;  %v14242_v32 = vld [vmem:[#allocation13 + $0x694] sm:$0xf]  ;;  %v16558_v46 = vadd.f32 %v16515_v43, %v8842_v38 }
 0x661   :  { %v12254_v8 = vor.u32 %v14226_v59, %v12251_v36  ;;  %v12318_v43 = vor.u32 %v14242_v32, %v12315_v34  ;;  %v12555_v38 = vld [vmem:[#allocation13 + $0x878] sm:$0xf0]  ;;  %v14316_v34 = vld [vmem:[#allocation13 + $0x8e4] sm:$0xf] }
 0x662   :  { %9070 = vmatpush.bf16.msrb.mxu2 %v11630_v31  ;;  %9083 = vmatpush.bf16.msrb.mxu3 %v11694_v6  ;;  %v11678_v31 = vor.u32 %v14082_v33, %v11675_v50  ;;  %v8830_v6 = vpop.f32.mrf.mxu3  ;;  %v12619_v33 = vld [vmem:[#allocation13 + $0x8f8] sm:$0xf0]  ;;  %v14140_v50 = vld [vmem:[#allocation13 + $0x364] sm:$0xf]  ;;  %v12558_v36 = vor.u32 %v14302_v5, %v12555_v38  ;;  %v11955_v5 = vld [vmem:[#allocation13 + $0x3c8] sm:$0xf0] }
 0x663   :  { %v12622_v32 = vor.u32 %v14318_v40, %v12619_v33  ;;  %v11910_v9 = vor.u32 %v14140_v50, %v11907_v42  ;;  %v14296_v33 = vld [vmem:[#allocation13 + $0x844] sm:$0xf]  ;;  %v12531_v50 = vld [vmem:[#allocation13 + $0x848] sm:$0xf0] }
 0x664   :  { %9200 = vmatpush.bf16.msrb.mxu0 %v12270_v61  ;;  %9213 = vmatpush.bf16.msrb.mxu1 %v12334_v57  ;;  %v11606_v61 = vor.u32 %v14064_v22, %v11603_v11  ;;  %v11670_v57 = vor.u32 %v14080_v21, %v11667_v12  ;;  %v12611_v22 = vld [vmem:[#allocation13 + $0x8e8] sm:$0xf0]  ;;  %v14138_v11 = vld [vmem:[#allocation13 + $0x354] sm:$0xf]  ;;  %v17062_v12 = vld [vmem:[#allocation55_spill] sm:$0xff] }
 0x665   :  { %v17061_v21 = vld [vmem:[#allocation37_spill] sm:$0xff] }
 0x666   :  { %9071 = vmatpush.bf16.msrb.mxu2 %v11622_v7  ;;  %9084 = vmatpush.bf16.msrb.mxu3 %v11686_v41  ;;  %v14240_v7 = vld [vmem:[#allocation13 + $0x684] sm:$0xf]  ;;  %v11918_v41 = vor.u32 %v14142_v55, %v11915_v27  ;;  %v11899_v55 = vld [vmem:[#allocation13 + $0x358] sm:$0xf0]  ;;  %v14154_v27 = vld [vmem:[#allocation13 + $0x3d4] sm:$0xf] }
 0x667   :  { %v12310_v59 = vor.u32 %v14240_v7, %v12307_v16  ;;  %v12603_v7 = vld [vmem:[#allocation13 + $0x8d8] sm:$0xf0]  ;;  %v14152_v16 = vld [vmem:[#allocation13 + $0x3c4] sm:$0xf] }
 0x668   :  { %9201 = vmatpush.bf16.msrb.mxu0 %v12262_v54  ;;  %9214 = vmatpush.bf16.msrb.mxu1 %v12326_v24  ;;  %v11971_v54 = vld [vmem:[#allocation13 + $0x3e8] sm:$0xf0]  ;;  %v12246_v24 = vor.u32 %v14224_v20, %v12243_v52  ;;  %v11966_v20 = vor.u32 %v14154_v27, %v11963_v28  ;;  %v14314_v52 = vld [vmem:[#allocation13 + $0x8d4] sm:$0xf]  ;;  %v12587_v27 = vld [vmem:[#allocation13 + $0x8b8] sm:$0xf0] }
 0x669   :  { %v11974_v6 = vor.u32 %v14156_v29, %v11971_v54  ;;  %v12606_v40 = vor.u32 %v14314_v52, %v12603_v7  ;;  %v11958_v29 = vor.u32 %v14152_v16, %v11955_v5  ;;  %v14312_v54 = vld [vmem:[#allocation13 + $0x8c4] sm:$0xf] }
 0x66a   :  { %9072 = vmatpush.bf16.msrb.mxu2 %v11614_v19  ;;  %9085 = vmatpush.bf16.msrb.mxu3 %v11678_v31  ;;  %v14300_v19 = vld [vmem:[#allocation13 + $0x864] sm:$0xf]  ;;  %v12547_v31 = vld [vmem:[#allocation13 + $0x868] sm:$0xf0] }
 0x66b   :  { %v12550_v49 = vor.u32 %v14300_v19, %v12547_v31  ;;  %v12534_v31 = vor.u32 %v14296_v33, %v12531_v50  ;;  %v14132_v28 = vld [vmem:[#allocation13 + $0x324] sm:$0xf]  ;;  %v14146_v50 = vld [vmem:[#allocation13 + $0x394] sm:$0xf] }
 0x66c   :  { %9202 = vmatpush.bf16.msrb.mxu0 %v12254_v8  ;;  %9215 = vmatpush.bf16.msrb.mxu1 %v12318_v43  ;;  %v12614_v8 = vor.u32 %v14316_v34, %v12611_v22  ;;  %v14298_v43 = vld [vmem:[#allocation13 + $0x854] sm:$0xf]  ;;  %v12523_v34 = vld [vmem:[#allocation13 + $0x838] sm:$0xf0]  ;;  %v14292_v7 = vld [vmem:[#allocation13 + $0x824] sm:$0xf] }
 0x66d   :  { %v14308_v5 = vld [vmem:[#allocation13 + $0x8a4] sm:$0xf] }
 0x66e   :  { %9073 = vmatpush.bf16.msrb.mxu2 %v11606_v61  ;;  %9086 = vmatpush.bf16.msrb.mxu3 %v11670_v57  ;;  %v12539_v61 = vld [vmem:[#allocation13 + $0x858] sm:$0xf0]  ;;  %v11902_v57 = vor.u32 %v14138_v11, %v11899_v55  ;;  %v14310_v55 = vld [vmem:[#allocation13 + $0x8b4] sm:$0xf] }
 0x66f   :  { %v12542_v38 = vor.u32 %v14298_v43, %v12539_v61  ;;  %v14148_v43 = vld [vmem:[#allocation13 + $0x3a4] sm:$0xf]  ;;  %v11939_v61 = vld [vmem:[#allocation13 + $0x3a8] sm:$0xf0]  ;;  %v12590_v52 = vor.u32 %v14310_v55, %v12587_v27  ;;  %v14206_v27 = vld [vmem:[#allocation13 + $0x574] sm:$0xf] }
 0x670   :  { %9203 = vmatpush.bf16.msrb.mxu0 %v12246_v24  ;;  %9216 = vmatpush.bf16.msrb.mxu1 %v12310_v59  ;;  %v12595_v24 = vld [vmem:[#allocation13 + $0x8c8] sm:$0xf0]  ;;  %v14134_v59 = vld [vmem:[#allocation13 + $0x334] sm:$0xf]  ;;  %v16566_v19 = vpop.f32.mrf.mxu1  ;;  %v11942_v16 = vor.u32 %v14148_v43, %v11939_v61 }
 0x671   :  { %9074 = vmatmul.bf16.vlgmr.msrb.gmra.mxu2 %v17061_v21  ;;  %9087 = vmatmul.bf16.vlgmr.msrb.gmra.mxu3 %v17062_v12  ;;  %v11923_v55 = vld [vmem:[#allocation13 + $0x388] sm:$0xf0] }
 0x672   :  { %9118 = vmatpush.bf16.msra.mxu2 %v11918_v41  ;;  %9131 = vmatpush.bf16.msra.mxu3 %v11982_v56  ;;  %v14136_v41 = vld [vmem:[#allocation13 + $0x344] sm:$0xf]  ;;  %v11891_v56 = vld [vmem:[#allocation13 + $0x348] sm:$0xf0] }
 0x673   :  { %9204 = vmatmul.bf16.vlgmr.msrb.gmra.mxu0 %v16317_v30  ;;  %9217 = vmatmul.bf16.vlgmr.msrb.gmra.mxu1 %v16319_v2  ;;  %v11894_v42 = vor.u32 %v14136_v41, %v11891_v56  ;;  %v14150_v30 = vld [vmem:[#allocation13 + $0x3b4] sm:$0xf]  ;;  %v16564_v2 = vpop.f32.mrf.mxu0  ;;  %v12515_v41 = vld [vmem:[#allocation13 + $0x828] sm:$0xf0] }
 0x674   :  { %9248 = vmatpush.bf16.msra.mxu0 %v12558_v36  ;;  %9261 = vmatpush.bf16.msra.mxu1 %v12622_v32  ;;  %v11883_v36 = vld [vmem:[#allocation13 + $0x338] sm:$0xf0]  ;;  %v8867_v21 = vpop.f32.mrf.mxu2  ;;  %v8880_v12 = vpop.f32.mrf.mxu3 }
 0x675   :  { %v11947_v32 = vld [vmem:[#allocation13 + $0x3b8] sm:$0xf0]  ;;  %v11886_v22 = vor.u32 %v14134_v59, %v11883_v36  ;;  %v14290_v36 = vld [vmem:[#allocation13 + $0x814] sm:$0xf] }
 0x676   :  { %9119 = vmatpush.bf16.msra.mxu2 %v11910_v9  ;;  %9132 = vmatpush.bf16.msra.mxu3 %v11974_v6  ;;  %v12598_v9 = vor.u32 %v14312_v54, %v12595_v24  ;;  %v14294_v6 = vld [vmem:[#allocation13 + $0x834] sm:$0xf]  ;;  %v11950_v11 = vor.u32 %v14150_v30, %v11947_v32  ;;  %v12518_v24 = vor.u32 %v14292_v7, %v12515_v41  ;;  %v12507_v30 = vld [vmem:[#allocation13 + $0x818] sm:$0xf0]  ;;  %v14304_v7 = vld [vmem:[#allocation13 + $0x884] sm:$0xf] }
 0x677   :  { %v14306_v32 = vld [vmem:[#allocation13 + $0x894] sm:$0xf]  ;;  %v12510_v43 = vor.u32 %v14290_v36, %v12507_v30  ;;  %v14364_v30 = vld [vmem:[#allocation13 + $0xa64] sm:$0xf] }
 0x678   :  { %9249 = vmatpush.bf16.msra.mxu0 %v12550_v49  ;;  %9262 = vmatpush.bf16.msra.mxu1 %v12614_v8  ;;  %v8868_v49 = vadd.f32 %v8867_v21, %v16558_v46  ;;  %v11875_v8 = vld [vmem:[#allocation13 + $0x328] sm:$0xf0]  ;;  %v11867_v46 = vld [vmem:[#allocation13 + $0x318] sm:$0xf0]  ;;  %v9012_v54 = vpop.f32.mrf.mxu1 }
 0x679   :  { %v11878_v56 = vor.u32 %v14132_v28, %v11875_v8  ;;  %v11859_v21 = vld [vmem:[#allocation13 + $0x308] sm:$0xf0]  ;;  %v12171_v28 = vld [vmem:[#allocation13 + $0x578] sm:$0xf0] }
 0x67a   :  { %9120 = vmatpush.bf16.msra.mxu2 %v11902_v57  ;;  %9133 = vmatpush.bf16.msra.mxu3 %v11966_v20  ;;  %v8881_v57 = vadd.f32 %v8880_v12, %v8868_v49  ;;  %v12526_v20 = vor.u32 %v14294_v6, %v12523_v34  ;;  %v14144_v12 = vld [vmem:[#allocation13 + $0x384] sm:$0xf]  ;;  %v14222_v49 = vld [vmem:[#allocation13 + $0x5f4] sm:$0xf]  ;;  %v12235_v8 = vld [vmem:[#allocation13 + $0x5f8] sm:$0xf0]  ;;  %v12174_v41 = vor.u32 %v14206_v27, %v12171_v28 }
 0x67b   :  { %v14362_v28 = vld [vmem:[#allocation13 + $0xa54] sm:$0xf] }
 0x67c   :  { %9250 = vmatpush.bf16.msra.mxu0 %v12542_v38  ;;  %9263 = vmatpush.bf16.msra.mxu1 %v12606_v40  ;;  %v12579_v38 = vld [vmem:[#allocation13 + $0x8a8] sm:$0xf0]  ;;  %v14130_v40 = vld [vmem:[#allocation13 + $0x314] sm:$0xf]  ;;  %v8894_v33 = vadd.f32 %v16532_v60, %v8881_v57  ;;  %v8869_v60 = vpop.f32.mrf.mxu2  ;;  %v8882_v34 = vpop.f32.mrf.mxu3  ;;  %v11926_v57 = vor.u32 %v14144_v12, %v11923_v55  ;;  %v12219_v12 = vld [vmem:[#allocation13 + $0x5d8] sm:$0xf0] }
 0x67d   :  { %v12582_v59 = vor.u32 %v14308_v5, %v12579_v38  ;;  %v14366_v5 = vld [vmem:[#allocation13 + $0xa74] sm:$0xf]  ;;  %v12811_v38 = vld [vmem:[#allocation13 + $0xa78] sm:$0xf0]  ;;  %v14380_v60 = vld [vmem:[#allocation13 + $0xae4] sm:$0xf] }
 0x67e   :  { %9121 = vmatpush.bf16.msra.mxu2 %v11894_v42  ;;  %9134 = vmatpush.bf16.msra.mxu3 %v11958_v29  ;;  %v11931_v42 = vld [vmem:[#allocation13 + $0x398] sm:$0xf0]  ;;  %v8999_v29 = vpop.f32.mrf.mxu0  ;;  %v12867_v34 = vld [vmem:[#allocation13 + $0xae8] sm:$0xf0] }
 0x67f   :  { %v11934_v6 = vor.u32 %v14146_v50, %v11931_v42  ;;  %v12163_v50 = vld [vmem:[#allocation13 + $0x568] sm:$0xf0]  ;;  %v14220_v42 = vld [vmem:[#allocation13 + $0x5e4] sm:$0xf]  ;;  %v12870_v27 = vor.u32 %v14380_v60, %v12867_v34 }
 0x680   :  { %9251 = vmatpush.bf16.msra.mxu0 %v12534_v31  ;;  %9264 = vmatpush.bf16.msra.mxu1 %v12598_v9  ;;  %v16571_v31 = vadd.f32 %v16534_v18, %v8894_v33  ;;  %v11870_v9 = vor.u32 %v14130_v40, %v11867_v46  ;;  %v14382_v40 = vld [vmem:[#allocation13 + $0xaf4] sm:$0xf]  ;;  %v12875_v33 = vld [vmem:[#allocation13 + $0xaf8] sm:$0xf0]  ;;  %v14204_v46 = vld [vmem:[#allocation13 + $0x564] sm:$0xf] }
 0x681   :  { %v12227_v29 = vld [vmem:[#allocation13 + $0x5e8] sm:$0xf0]  ;;  %v12878_v36 = vor.u32 %v14382_v40, %v12875_v33  ;;  %v14376_v33 = vld [vmem:[#allocation13 + $0xac4] sm:$0xf] }
 0x682   :  { %9122 = vmatpush.bf16.msra.mxu2 %v11886_v22  ;;  %9135 = vmatpush.bf16.msra.mxu3 %v11950_v11  ;;  %v12571_v22 = vld [vmem:[#allocation13 + $0x898] sm:$0xf0]  ;;  %v14128_v11 = vld [vmem:[#allocation13 + $0x304] sm:$0xf] }
 0x683   :  { %v12574_v18 = vor.u32 %v14306_v32, %v12571_v22  ;;  %v11862_v61 = vor.u32 %v14128_v11, %v11859_v21  ;;  %v12803_v32 = vld [vmem:[#allocation13 + $0xa68] sm:$0xf0]  ;;  %v14202_v22 = vld [vmem:[#allocation13 + $0x554] sm:$0xf]  ;;  %v12155_v11 = vld [vmem:[#allocation13 + $0x558] sm:$0xf0] }
 0x684   :  { %9252 = vmatpush.bf16.msra.mxu0 %v12526_v20  ;;  %9265 = vmatpush.bf16.msra.mxu1 %v12590_v52  ;;  %v14288_v20 = vld [vmem:[#allocation13 + $0x804] sm:$0xf]  ;;  %v12499_v52 = vld [vmem:[#allocation13 + $0x808] sm:$0xf0]  ;;  %v14218_v21 = vld [vmem:[#allocation13 + $0x5d4] sm:$0xf]  ;;  %v12806_v55 = vor.u32 %v14364_v30, %v12803_v32 }
 0x685   :  { %v12502_v54 = vor.u32 %v14288_v20, %v12499_v52  ;;  %v12211_v20 = vld [vmem:[#allocation13 + $0x5c8] sm:$0xf0]  ;;  %v14358_v30 = vld [vmem:[#allocation13 + $0xa34] sm:$0xf]  ;;  %v12779_v32 = vld [vmem:[#allocation13 + $0xa38] sm:$0xf0] }
 0x686   :  { %9123 = vmatpush.bf16.msra.mxu2 %v11878_v56  ;;  %9136 = vmatpush.bf16.msra.mxu3 %v11942_v16  ;;  %v12238_v56 = vor.u32 %v14222_v49, %v12235_v8  ;;  %v12563_v16 = vld [vmem:[#allocation13 + $0x888] sm:$0xf0]  ;;  %v12795_v49 = vld [vmem:[#allocation13 + $0xa58] sm:$0xf0]  ;;  %v12158_v8 = vor.u32 %v14202_v22, %v12155_v11  ;;  %v14374_v22 = vld [vmem:[#allocation13 + $0xab4] sm:$0xf] }
 0x687   :  { %v12798_v52 = vor.u32 %v14362_v28, %v12795_v49  ;;  %v12843_v11 = vld [vmem:[#allocation13 + $0xab8] sm:$0xf0]  ;;  %v14212_v28 = vld [vmem:[#allocation13 + $0x5a4] sm:$0xf]  ;;  %v12195_v49 = vld [vmem:[#allocation13 + $0x5a8] sm:$0xf0] }
 0x688   :  { %9253 = vmatpush.bf16.msra.mxu0 %v12518_v24  ;;  %9266 = vmatpush.bf16.msra.mxu1 %v12582_v59  ;;  %v12566_v24 = vor.u32 %v14304_v7, %v12563_v16  ;;  %v12814_v59 = vor.u32 %v14366_v5, %v12811_v38  ;;  %v14360_v16 = vld [vmem:[#allocation13 + $0xa44] sm:$0xf]  ;;  %v12787_v5 = vld [vmem:[#allocation13 + $0xa48] sm:$0xf0] }
 0x68a   :  { %9124 = vmatpush.bf16.msra.mxu2 %v11870_v9  ;;  %9137 = vmatpush.bf16.msra.mxu3 %v11934_v6  ;;  %v12166_v9 = vor.u32 %v14204_v46, %v12163_v50  ;;  %v12230_v6 = vor.u32 %v14220_v42, %v12227_v29  ;;  %v12851_v46 = vld [vmem:[#allocation13 + $0xac8] sm:$0xf0]  ;;  %v12139_v50 = vld [vmem:[#allocation13 + $0x538] sm:$0xf0] }
 0x68b   :  { %v12203_v42 = vld [vmem:[#allocation13 + $0x5b8] sm:$0xf0] }
 0x68c   :  { %9254 = vmatpush.bf16.msra.mxu0 %v12510_v43  ;;  %9267 = vmatpush.bf16.msra.mxu1 %v12574_v18  ;;  %v12222_v43 = vor.u32 %v14218_v21, %v12219_v12  ;;  %v14378_v18 = vld [vmem:[#allocation13 + $0xad4] sm:$0xf]  ;;  %v14196_v21 = vld [vmem:[#allocation13 + $0x524] sm:$0xf] }
 0x68e   :  { %9125 = vmatpush.bf16.msra.mxu2 %v11862_v61  ;;  %9138 = vmatpush.bf16.msra.mxu3 %v11926_v57  ;;  %v12859_v61 = vld [vmem:[#allocation13 + $0xad8] sm:$0xf0]  ;;  %v14216_v57 = vld [vmem:[#allocation13 + $0x5c4] sm:$0xf] }
 0x68f   :  { %v12862_v7 = vor.u32 %v14378_v18, %v12859_v61  ;;  %v12214_v40 = vor.u32 %v14216_v57, %v12211_v20  ;;  %v12846_v18 = vor.u32 %v14374_v22, %v12843_v11  ;;  %v14356_v61 = vld [vmem:[#allocation13 + $0xa24] sm:$0xf]  ;;  %v12198_v57 = vor.u32 %v14212_v28, %v12195_v49 }
 0x690   :  { %9255 = vmatpush.bf16.msra.mxu0 %v12502_v54  ;;  %9268 = vmatpush.bf16.msra.mxu1 %v12566_v24  ;;  %v9049_v29 = vpop.f32.mrf.mxu0  ;;  %v9062_v54 = vpop.f32.mrf.mxu1  ;;  %v14372_v20 = vld [vmem:[#allocation13 + $0xaa4] sm:$0xf] }
 0x691   :  { %9126 = vmatmul.bf16.vlgmr.msra.gmra.mxu2 %v16351_v23  ;;  %9139 = vmatmul.bf16.vlgmr.msra.gmra.mxu3 %v16353_v53  ;;  %v14200_v23 = vld [vmem:[#allocation13 + $0x544] sm:$0xf]  ;;  %v12147_v53 = vld [vmem:[#allocation13 + $0x548] sm:$0xf0] }
 0x692   :  { %9170 = vmatpush.bf16.msrb.mxu2 %v12174_v41  ;;  %9183 = vmatpush.bf16.msrb.mxu3 %v12238_v56  ;;  %v14625_v41 = vld [vmem:[#allocation14] sm:$0x3]  ;;  %v12150_v38 = vor.u32 %v14200_v23, %v12147_v53  ;;  %v12771_v23 = vld [vmem:[#allocation13 + $0xa28] sm:$0xf0]  ;;  %v14368_v28 = vld [vmem:[#allocation13 + $0xa84] sm:$0xf] }
 0x693   :  { %9256 = vmatmul.bf16.vlgmr.msra.gmra.mxu0 %v16365_v44  ;;  %9269 = vmatmul.bf16.vlgmr.msra.gmra.mxu1 %v16367_v51  ;;  %v5949_v56 = vperm.slane %v14625_v41, 1  ;;  %v14198_v44 = vld [vmem:[#allocation13 + $0x534] sm:$0xf] }
 0x694   :  { %9300 = vmatpush.bf16.msrb.mxu0 %v12814_v59  ;;  %9313 = vmatpush.bf16.msrb.mxu1 %v12878_v36  ;;  %v14214_v51 = vld [vmem:[#allocation13 + $0x5b4] sm:$0xf]  ;;  %v12790_v59 = vor.u32 %v14360_v16, %v12787_v5  ;;  %v12854_v36 = vor.u32 %v14376_v33, %v12851_v46  ;;  %v8919_v60 = vpop.f32.mrf.mxu2  ;;  %v8932_v34 = vpop.f32.mrf.mxu3  ;;  %v12187_v16 = vld [vmem:[#allocation13 + $0x598] sm:$0xf0] }
 0x695   :  { %v9050_v24 = vadd.f32 %v9049_v29, %v5949_v56  ;;  %v14210_v56 = vld [vmem:[#allocation13 + $0x594] sm:$0xf] }
 0x696   :  { %9171 = vmatpush.bf16.msrb.mxu2 %v12166_v9  ;;  %9184 = vmatpush.bf16.msrb.mxu3 %v12230_v6  ;;  %v12142_v9 = vor.u32 %v14198_v44, %v12139_v50  ;;  %v12206_v6 = vor.u32 %v14214_v51, %v12203_v42  ;;  %v14354_v46 = vld [vmem:[#allocation13 + $0xa14] sm:$0xf]  ;;  %v12763_v44 = vld [vmem:[#allocation13 + $0xa18] sm:$0xf0]  ;;  %v12190_v29 = vor.u32 %v14210_v56, %v12187_v16 }
 0x697   :  { %v16577_v12 = vadd.f32 %v9062_v54, %v9050_v24  ;;  %v14370_v50 = vld [vmem:[#allocation13 + $0xa94] sm:$0xf]  ;;  %v12827_v24 = vld [vmem:[#allocation13 + $0xa98] sm:$0xf0]  ;;  %v12766_v22 = vor.u32 %v14354_v46, %v12763_v44  ;;  %v14444_v46 = vld [vmem:[#allocation13 + $0xce4] sm:$0xf] }
 0x698   :  { %9301 = vmatpush.bf16.msrb.mxu0 %v12806_v55  ;;  %9314 = vmatpush.bf16.msrb.mxu1 %v12870_v27  ;;  %v8920_v55 = vadd.f32 %v8919_v60, %v16571_v31  ;;  %v12131_v27 = vld [vmem:[#allocation13 + $0x528] sm:$0xf0]  ;;  %v12123_v31 = vld [vmem:[#allocation13 + $0x518] sm:$0xf0]  ;;  %v9051_v5 = vpop.f32.mrf.mxu0  ;;  %v14286_v60 = vld [vmem:[#allocation13 + $0x7f4] sm:$0xf] }
 0x699   :  { %v12134_v53 = vor.u32 %v14196_v21, %v12131_v27  ;;  %v12755_v27 = vld [vmem:[#allocation13 + $0xa08] sm:$0xf0]  ;;  %v14428_v5 = vld [vmem:[#allocation13 + $0xc64] sm:$0xf] }
 0x69a   :  { %9172 = vmatpush.bf16.msrb.mxu2 %v12158_v8  ;;  %9185 = vmatpush.bf16.msrb.mxu3 %v12222_v43  ;;  %v8933_v8 = vadd.f32 %v8932_v34, %v8920_v55  ;;  %v12782_v43 = vor.u32 %v14358_v30, %v12779_v32  ;;  %v14208_v30 = vld [vmem:[#allocation13 + $0x584] sm:$0xf]  ;;  %v12179_v32 = vld [vmem:[#allocation13 + $0x588] sm:$0xf0]  ;;  %v12491_v34 = vld [vmem:[#allocation13 + $0x7f8] sm:$0xf0] }
 0x69b   :  { %v12182_v21 = vor.u32 %v14208_v30, %v12179_v32  ;;  %v14352_v55 = vld [vmem:[#allocation13 + $0xa04] sm:$0xf]  ;;  %v13123_v44 = vld [vmem:[#allocation13 + $0xce8] sm:$0xf0] }
 0x69c   :  { %9302 = vmatpush.bf16.msrb.mxu0 %v12798_v52  ;;  %9315 = vmatpush.bf16.msrb.mxu1 %v12862_v7  ;;  %v12835_v52 = vld [vmem:[#allocation13 + $0xaa8] sm:$0xf0]  ;;  %v14194_v7 = vld [vmem:[#allocation13 + $0x514] sm:$0xf]  ;;  %v8946_v41 = vadd.f32 %v16551_v17, %v8933_v8  ;;  %v8921_v17 = vpop.f32.mrf.mxu2  ;;  %v8934_v54 = vpop.f32.mrf.mxu3  ;;  %v12494_v8 = vor.u32 %v14286_v60, %v12491_v34  ;;  %v14280_v60 = vld [vmem:[#allocation13 + $0x7c4] sm:$0xf] }
 0x69d   :  { %v12838_v33 = vor.u32 %v14372_v20, %v12835_v52  ;;  %v12126_v42 = vor.u32 %v14194_v7, %v12123_v31  ;;  %v12419_v20 = vld [vmem:[#allocation13 + $0x768] sm:$0xf0]  ;;  %v14284_v52 = vld [vmem:[#allocation13 + $0x7e4] sm:$0xf]  ;;  %v12475_v17 = vld [vmem:[#allocation13 + $0x7d8] sm:$0xf0] }
 0x69e   :  { %9173 = vmatpush.bf16.msrb.mxu2 %v12150_v38  ;;  %9186 = vmatpush.bf16.msrb.mxu3 %v12214_v40  ;;  %v9064_v38 = vpop.f32.mrf.mxu1  ;;  %v12774_v40 = vor.u32 %v14356_v61, %v12771_v23  ;;  %v16582_v51 = vadd.f32 %v16553_v14, %v8946_v41  ;;  %v12830_v14 = vor.u32 %v14370_v50, %v12827_v24  ;;  %v13067_v61 = vld [vmem:[#allocation13 + $0xc78] sm:$0xf0]  ;;  %v14446_v23 = vld [vmem:[#allocation13 + $0xcf4] sm:$0xf]  ;;  %v12483_v7 = vld [vmem:[#allocation13 + $0x7e8] sm:$0xf0] }
 0x69f   :  { %v12758_v41 = vor.u32 %v14352_v55, %v12755_v27  ;;  %v13059_v38 = vld [vmem:[#allocation13 + $0xc68] sm:$0xf0]  ;;  %v14266_v50 = vld [vmem:[#allocation13 + $0x754] sm:$0xf]  ;;  %v13126_v24 = vor.u32 %v14444_v46, %v13123_v44 }
 0x6a0   :  { %9303 = vmatpush.bf16.msrb.mxu0 %v12790_v59  ;;  %9316 = vmatpush.bf16.msrb.mxu1 %v12854_v36  ;;  %v14192_v59 = vld [vmem:[#allocation13 + $0x504] sm:$0xf]  ;;  %v12115_v36 = vld [vmem:[#allocation13 + $0x508] sm:$0xf0]  ;;  %v13062_v54 = vor.u32 %v14428_v5, %v13059_v38 }
 0x6a1   :  { %v12118_v11 = vor.u32 %v14192_v59, %v12115_v36  ;;  %v14426_v59 = vld [vmem:[#allocation13 + $0xc54] sm:$0xf]  ;;  %v13051_v36 = vld [vmem:[#allocation13 + $0xc58] sm:$0xf0]  ;;  %v12467_v34 = vld [vmem:[#allocation13 + $0x7c8] sm:$0xf0] }
 0x6a2   :  { %9174 = vmatpush.bf16.msrb.mxu2 %v12142_v9  ;;  %9187 = vmatpush.bf16.msrb.mxu3 %v12206_v6  ;;  %v14270_v9 = vld [vmem:[#allocation13 + $0x774] sm:$0xf]  ;;  %v12427_v6 = vld [vmem:[#allocation13 + $0x778] sm:$0xf0]  ;;  %v12470_v27 = vor.u32 %v14280_v60, %v12467_v34  ;;  %v14260_v5 = vld [vmem:[#allocation13 + $0x724] sm:$0xf] }
 0x6a3   :  { %v12430_v49 = vor.u32 %v14270_v9, %v12427_v6  ;;  %v14442_v9 = vld [vmem:[#allocation13 + $0xcd4] sm:$0xf]  ;;  %v13115_v6 = vld [vmem:[#allocation13 + $0xcd8] sm:$0xf0]  ;;  %v12451_v46 = vld [vmem:[#allocation13 + $0x7a8] sm:$0xf0] }
 0x6a4   :  { %9304 = vmatpush.bf16.msrb.mxu0 %v12782_v43  ;;  %9317 = vmatpush.bf16.msrb.mxu1 %v12846_v18  ;;  %v12819_v43 = vld [vmem:[#allocation13 + $0xa88] sm:$0xf0]  ;;  %v14430_v18 = vld [vmem:[#allocation13 + $0xc74] sm:$0xf] }
 0x6a5   :  { %v12822_v31 = vor.u32 %v14368_v28, %v12819_v43  ;;  %v13070_v56 = vor.u32 %v14430_v18, %v13067_v61  ;;  %v14440_v28 = vld [vmem:[#allocation13 + $0xcc4] sm:$0xf]  ;;  %v12395_v43 = vld [vmem:[#allocation13 + $0x738] sm:$0xf0] }
 0x6a6   :  { %9175 = vmatpush.bf16.msrb.mxu2 %v12134_v53  ;;  %9188 = vmatpush.bf16.msrb.mxu3 %v12198_v57  ;;  %v13131_v53 = vld [vmem:[#allocation13 + $0xcf8] sm:$0xf0]  ;;  %v14268_v57 = vld [vmem:[#allocation13 + $0x764] sm:$0xf] }
 0x6a7   :  { %v13134_v16 = vor.u32 %v14446_v23, %v13131_v53  ;;  %v12459_v18 = vld [vmem:[#allocation13 + $0x7b8] sm:$0xf0] }
 0x6a8   :  { %9305 = vmatpush.bf16.msrb.mxu0 %v12774_v40  ;;  %9318 = vmatpush.bf16.msrb.mxu1 %v12838_v33  ;;  %v12422_v40 = vor.u32 %v14268_v57, %v12419_v20  ;;  %v12486_v33 = vor.u32 %v14284_v52, %v12483_v7  ;;  %v14422_v57 = vld [vmem:[#allocation13 + $0xc34] sm:$0xf]  ;;  %v13035_v20 = vld [vmem:[#allocation13 + $0xc38] sm:$0xf0] }
 0x6aa   :  { %9176 = vmatpush.bf16.msrb.mxu2 %v12126_v42  ;;  %9189 = vmatpush.bf16.msrb.mxu3 %v12190_v29  ;;  %v12411_v42 = vld [vmem:[#allocation13 + $0x758] sm:$0xf0]  ;;  %v14282_v29 = vld [vmem:[#allocation13 + $0x7d4] sm:$0xf] }
 0x6ab   :  { %v12414_v30 = vor.u32 %v14266_v50, %v12411_v42  ;;  %v12478_v32 = vor.u32 %v14282_v29, %v12475_v17  ;;  %v13038_v50 = vor.u32 %v14422_v57, %v13035_v20  ;;  %v14420_v29 = vld [vmem:[#allocation13 + $0xc24] sm:$0xf]  ;;  %v13027_v17 = vld [vmem:[#allocation13 + $0xc28] sm:$0xf0]  ;;  %v14350_v57 = vld [vmem:[#allocation13 + $0x9f4] sm:$0xf] }
 0x6ac   :  { %9306 = vmatpush.bf16.msrb.mxu0 %v12766_v22  ;;  %9319 = vmatpush.bf16.msrb.mxu1 %v12830_v14  ;;  %v13054_v22 = vor.u32 %v14426_v59, %v13051_v36  ;;  %v13118_v14 = vor.u32 %v14442_v9, %v13115_v6  ;;  %v14436_v59 = vld [vmem:[#allocation13 + $0xca4] sm:$0xf]  ;;  %v13091_v36 = vld [vmem:[#allocation13 + $0xca8] sm:$0xf0]  ;;  %v14274_v9 = vld [vmem:[#allocation13 + $0x794] sm:$0xf]  ;;  %v13030_v60 = vor.u32 %v14420_v29, %v13027_v17 }
 0x6ad   :  { %v12443_v6 = vld [vmem:[#allocation13 + $0x798] sm:$0xf0]  ;;  %v13094_v34 = vor.u32 %v14436_v59, %v13091_v36  ;;  %v12675_v29 = vld [vmem:[#allocation13 + $0x968] sm:$0xf0]  ;;  %v14348_v17 = vld [vmem:[#allocation13 + $0x9e4] sm:$0xf] }
 0x6ae   :  { %9177 = vmatpush.bf16.msrb.mxu2 %v12118_v11  ;;  %9190 = vmatpush.bf16.msrb.mxu3 %v12182_v21  ;;  %v14424_v11 = vld [vmem:[#allocation13 + $0xc44] sm:$0xf]  ;;  %v13043_v21 = vld [vmem:[#allocation13 + $0xc48] sm:$0xf0]  ;;  %v12747_v20 = vld [vmem:[#allocation13 + $0x9f8] sm:$0xf0] }
 0x6af   :  { %v13046_v23 = vor.u32 %v14424_v11, %v13043_v21  ;;  %v14434_v11 = vld [vmem:[#allocation13 + $0xc94] sm:$0xf] }
 0x6b0   :  { %9307 = vmatpush.bf16.msrb.mxu0 %v12758_v41  ;;  %9320 = vmatpush.bf16.msrb.mxu1 %v12822_v31  ;;  %v16590_v61 = vpop.f32.mrf.mxu1 }
 0x6b1   :  { %9178 = vmatmul.bf16.vlgmr.msrb.gmra.mxu2 %v16415_v3  ;;  %9191 = vmatmul.bf16.vlgmr.msrb.gmra.mxu3 %v16417_v37  ;;  %v14264_v3 = vld [vmem:[#allocation13 + $0x744] sm:$0xf]  ;;  %v12403_v37 = vld [vmem:[#allocation13 + $0x748] sm:$0xf0] }
 0x6b2   :  { %9222 = vmatpush.bf16.msra.mxu2 %v12430_v49  ;;  %9235 = vmatpush.bf16.msra.mxu3 %v12494_v8  ;;  %v12406_v55 = vor.u32 %v14264_v3, %v12403_v37  ;;  %v13107_v49 = vld [vmem:[#allocation13 + $0xcc8] sm:$0xf0]  ;;  %v14262_v8 = vld [vmem:[#allocation13 + $0x734] sm:$0xf] }
 0x6b3   :  { %9308 = vmatmul.bf16.vlgmr.msrb.gmra.mxu0 %v16435_v1  ;;  %9321 = vmatmul.bf16.vlgmr.msrb.gmra.mxu1 %v16437_v39  ;;  %v14278_v1 = vld [vmem:[#allocation13 + $0x7b4] sm:$0xf]  ;;  %v16588_v39 = vpop.f32.mrf.mxu0  ;;  %v13110_v53 = vor.u32 %v14440_v28, %v13107_v49  ;;  %v12398_v52 = vor.u32 %v14262_v8, %v12395_v43  ;;  %v13083_v49 = vld [vmem:[#allocation13 + $0xc98] sm:$0xf0]  ;;  %v14256_v8 = vld [vmem:[#allocation13 + $0x704] sm:$0xf] }
 0x6b4   :  { %9352 = vmatpush.bf16.msra.mxu0 %v13070_v56  ;;  %9365 = vmatpush.bf16.msra.mxu1 %v13134_v16  ;;  %v12462_v7 = vor.u32 %v14278_v1, %v12459_v18  ;;  %v8971_v41 = vpop.f32.mrf.mxu2  ;;  %v8984_v31 = vpop.f32.mrf.mxu3  ;;  %v14438_v56 = vld [vmem:[#allocation13 + $0xcb4] sm:$0xf]  ;;  %v13099_v16 = vld [vmem:[#allocation13 + $0xcb8] sm:$0xf0]  ;;  %v12371_v43 = vld [vmem:[#allocation13 + $0x708] sm:$0xf0] }
 0x6b5   :  { %v8972_v38 = vadd.f32 %v8971_v41, %v16582_v51  ;;  %v13102_v42 = vor.u32 %v14438_v56, %v13099_v16  ;;  %v12379_v51 = vld [vmem:[#allocation13 + $0x718] sm:$0xf0]  ;;  %v14272_v1 = vld [vmem:[#allocation13 + $0x784] sm:$0xf]  ;;  %v12435_v18 = vld [vmem:[#allocation13 + $0x788] sm:$0xf0] }
 0x6b6   :  { %9223 = vmatpush.bf16.msra.mxu2 %v12422_v40  ;;  %9236 = vmatpush.bf16.msra.mxu3 %v12486_v33  ;;  %v12387_v40 = vld [vmem:[#allocation13 + $0x728] sm:$0xf0]  ;;  %v14276_v33 = vld [vmem:[#allocation13 + $0x7a4] sm:$0xf]  ;;  %v12438_v41 = vor.u32 %v14272_v1, %v12435_v18 }
 0x6b7   :  { %v8985_v44 = vadd.f32 %v8984_v31, %v8972_v38  ;;  %v14416_v31 = vld [vmem:[#allocation13 + $0xc04] sm:$0xf]  ;;  %v13011_v56 = vld [vmem:[#allocation13 + $0xc08] sm:$0xf0]  ;;  %v12750_v38 = vor.u32 %v14350_v57, %v12747_v20 }
 0x6b8   :  { %9353 = vmatpush.bf16.msra.mxu0 %v13062_v54  ;;  %9366 = vmatpush.bf16.msra.mxu1 %v13126_v24  ;;  %v12390_v54 = vor.u32 %v14260_v5, %v12387_v40  ;;  %v12454_v24 = vor.u32 %v14276_v33, %v12451_v46  ;;  %v9116_v37 = vpop.f32.mrf.mxu1  ;;  %v14432_v16 = vld [vmem:[#allocation13 + $0xc84] sm:$0xf]  ;;  %v13075_v40 = vld [vmem:[#allocation13 + $0xc88] sm:$0xf0]  ;;  %v14494_v33 = vld [vmem:[#allocation13 + $0xe74] sm:$0xf] }
 0x6b9   :  { %v13323_v46 = vld [vmem:[#allocation13 + $0xe78] sm:$0xf0]  ;;  %v13078_v59 = vor.u32 %v14432_v16, %v13075_v40  ;;  %v13379_v37 = vld [vmem:[#allocation13 + $0xee8] sm:$0xf0]  ;;  %v14344_v1 = vld [vmem:[#allocation13 + $0x9c4] sm:$0xf] }
 0x6ba   :  { %9224 = vmatpush.bf16.msra.mxu2 %v12414_v30  ;;  %9237 = vmatpush.bf16.msra.mxu3 %v12478_v32  ;;  %v14258_v30 = vld [vmem:[#allocation13 + $0x714] sm:$0xf]  ;;  %v8998_v32 = vadd.f32 %v16564_v2, %v8985_v44  ;;  %v13326_v36 = vor.u32 %v14494_v33, %v13323_v46  ;;  %v12723_v18 = vld [vmem:[#allocation13 + $0x9c8] sm:$0xf0]  ;;  %v14488_v57 = vld [vmem:[#allocation13 + $0xe44] sm:$0xf] }
 0x6bb   :  { %v9103_v3 = vpop.f32.mrf.mxu0  ;;  %v14510_v44 = vld [vmem:[#allocation13 + $0xef4] sm:$0xf]  ;;  %v13299_v20 = vld [vmem:[#allocation13 + $0xe48] sm:$0xf0]  ;;  %v12715_v16 = vld [vmem:[#allocation13 + $0x9b8] sm:$0xf0] }
 0x6bc   :  { %9354 = vmatpush.bf16.msra.mxu0 %v13054_v22  ;;  %9367 = vmatpush.bf16.msra.mxu1 %v13118_v14  ;;  %v14418_v22 = vld [vmem:[#allocation13 + $0xc14] sm:$0xf]  ;;  %v13019_v14 = vld [vmem:[#allocation13 + $0xc18] sm:$0xf0]  ;;  %v16595_v21 = vadd.f32 %v16566_v19, %v8998_v32  ;;  %v8973_v2 = vpop.f32.mrf.mxu2  ;;  %v8986_v28 = vpop.f32.mrf.mxu3  ;;  %v13086_v19 = vor.u32 %v14434_v11, %v13083_v49  ;;  %v14492_v32 = vld [vmem:[#allocation13 + $0xe64] sm:$0xf] }
 0x6bd   :  { %v14508_v3 = vld [vmem:[#allocation13 + $0xee4] sm:$0xf]  ;;  %v13307_v2 = vld [vmem:[#allocation13 + $0xe58] sm:$0xf0]  ;;  %v14486_v33 = vld [vmem:[#allocation13 + $0xe34] sm:$0xf] }
 0x6be   :  { %9225 = vmatpush.bf16.msra.mxu2 %v12406_v55  ;;  %9238 = vmatpush.bf16.msra.mxu3 %v12470_v27  ;;  %v12382_v55 = vor.u32 %v14258_v30, %v12379_v51  ;;  %v12446_v27 = vor.u32 %v14274_v9, %v12443_v6  ;;  %v13315_v51 = vld [vmem:[#allocation13 + $0xe68] sm:$0xf0]  ;;  %v13291_v46 = vld [vmem:[#allocation13 + $0xe38] sm:$0xf0] }
 0x6bf   :  { %v13318_v11 = vor.u32 %v14492_v32, %v13315_v51  ;;  %v13294_v32 = vor.u32 %v14486_v33, %v13291_v46  ;;  %v14480_v33 = vld [vmem:[#allocation13 + $0xe04] sm:$0xf] }
 0x6c0   :  { %9355 = vmatpush.bf16.msra.mxu0 %v13046_v23  ;;  %9368 = vmatpush.bf16.msra.mxu1 %v13110_v53  ;;  %v14334_v23 = vld [vmem:[#allocation13 + $0x974] sm:$0xf]  ;;  %v12683_v53 = vld [vmem:[#allocation13 + $0x978] sm:$0xf0] }
 0x6c1   :  { %v12686_v5 = vor.u32 %v14334_v23, %v12683_v53 }
 0x6c2   :  { %9226 = vmatpush.bf16.msra.mxu2 %v12398_v52  ;;  %9239 = vmatpush.bf16.msra.mxu3 %v12462_v7  ;;  %v13022_v52 = vor.u32 %v14418_v22, %v13019_v14  ;;  %v12374_v7 = vor.u32 %v14256_v8, %v12371_v43  ;;  %v14346_v22 = vld [vmem:[#allocation13 + $0x9d4] sm:$0xf]  ;;  %v12731_v14 = vld [vmem:[#allocation13 + $0x9d8] sm:$0xf0] }
 0x6c3   :  { %v12734_v49 = vor.u32 %v14346_v22, %v12731_v14  ;;  %v14506_v8 = vld [vmem:[#allocation13 + $0xed4] sm:$0xf]  ;;  %v13371_v43 = vld [vmem:[#allocation13 + $0xed8] sm:$0xf0] }
 0x6c4   :  { %9356 = vmatpush.bf16.msra.mxu0 %v13038_v50  ;;  %9369 = vmatpush.bf16.msra.mxu1 %v13102_v42  ;;  %v13387_v50 = vld [vmem:[#allocation13 + $0xef8] sm:$0xf0]  ;;  %v14332_v42 = vld [vmem:[#allocation13 + $0x964] sm:$0xf]  ;;  %v13374_v53 = vor.u32 %v14506_v8, %v13371_v43  ;;  %v14322_v22 = vld [vmem:[#allocation13 + $0x914] sm:$0xf] }
 0x6c5   :  { %v13390_v30 = vor.u32 %v14510_v44, %v13387_v50  ;;  %v12678_v9 = vor.u32 %v14332_v42, %v12675_v29  ;;  %v12635_v14 = vld [vmem:[#allocation13 + $0x918] sm:$0xf0]  ;;  %v14482_v8 = vld [vmem:[#allocation13 + $0xe14] sm:$0xf] }
 0x6c6   :  { %9227 = vmatpush.bf16.msra.mxu2 %v12390_v54  ;;  %9240 = vmatpush.bf16.msra.mxu3 %v12454_v24  ;;  %v12739_v54 = vld [vmem:[#allocation13 + $0x9e8] sm:$0xf0]  ;;  %v13014_v24 = vor.u32 %v14416_v31, %v13011_v56  ;;  %v14326_v31 = vld [vmem:[#allocation13 + $0x934] sm:$0xf]  ;;  %v12651_v56 = vld [vmem:[#allocation13 + $0x938] sm:$0xf0] }
 0x6c7   :  { %v12742_v6 = vor.u32 %v14348_v17, %v12739_v54  ;;  %v12654_v44 = vor.u32 %v14326_v31, %v12651_v56  ;;  %v14502_v17 = vld [vmem:[#allocation13 + $0xeb4] sm:$0xf]  ;;  %v13355_v54 = vld [vmem:[#allocation13 + $0xeb8] sm:$0xf0] }
 0x6c8   :  { %9357 = vmatpush.bf16.msra.mxu0 %v13030_v60  ;;  %9370 = vmatpush.bf16.msra.mxu1 %v13094_v34  ;;  %v14330_v60 = vld [vmem:[#allocation13 + $0x954] sm:$0xf]  ;;  %v12667_v34 = vld [vmem:[#allocation13 + $0x958] sm:$0xf0]  ;;  %v13358_v51 = vor.u32 %v14502_v17, %v13355_v54  ;;  %v14496_v17 = vld [vmem:[#allocation13 + $0xe84] sm:$0xf] }
 0x6c9   :  { %v12670_v28 = vor.u32 %v14330_v60, %v12667_v34  ;;  %v14500_v60 = vld [vmem:[#allocation13 + $0xea4] sm:$0xf]  ;;  %v13347_v34 = vld [vmem:[#allocation13 + $0xea8] sm:$0xf0]  ;;  %v13275_v43 = vld [vmem:[#allocation13 + $0xe18] sm:$0xf0] }
 0x6ca   :  { %9228 = vmatpush.bf16.msra.mxu2 %v12382_v55  ;;  %9241 = vmatpush.bf16.msra.mxu3 %v12446_v27  ;;  %v13382_v55 = vor.u32 %v14508_v3, %v13379_v37  ;;  %v14490_v27 = vld [vmem:[#allocation13 + $0xe54] sm:$0xf]  ;;  %v13003_v56 = vld [vmem:[#allocation13 + $0xbf8] sm:$0xf0]  ;;  %v13331_v54 = vld [vmem:[#allocation13 + $0xe88] sm:$0xf0] }
 0x6cb   :  { %v13310_v23 = vor.u32 %v14490_v27, %v13307_v2  ;;  %v14414_v31 = vld [vmem:[#allocation13 + $0xbf4] sm:$0xf] }
 0x6cc   :  { %9358 = vmatpush.bf16.msra.mxu0 %v13022_v52  ;;  %9371 = vmatpush.bf16.msra.mxu1 %v13086_v19  ;;  %v12726_v19 = vor.u32 %v14344_v1, %v12723_v18 }
 0x6ce   :  { %9229 = vmatpush.bf16.msra.mxu2 %v12374_v7  ;;  %9242 = vmatpush.bf16.msra.mxu3 %v12438_v41  ;;  %v14504_v7 = vld [vmem:[#allocation13 + $0xec4] sm:$0xf]  ;;  %v13363_v41 = vld [vmem:[#allocation13 + $0xec8] sm:$0xf0] }
 0x6cf   :  { %v13366_v40 = vor.u32 %v14504_v7, %v13363_v41  ;;  %v14398_v7 = vld [vmem:[#allocation13 + $0xb74] sm:$0xf]  ;;  %v12939_v41 = vld [vmem:[#allocation13 + $0xb78] sm:$0xf0] }
 0x6d0   :  { %9359 = vmatpush.bf16.msra.mxu0 %v13014_v24  ;;  %9372 = vmatpush.bf16.msra.mxu1 %v13078_v59  ;;  %v14324_v24 = vld [vmem:[#allocation13 + $0x924] sm:$0xf]  ;;  %v12643_v59 = vld [vmem:[#allocation13 + $0x928] sm:$0xf0]  ;;  %v12942_v46 = vor.u32 %v14398_v7, %v12939_v41 }
 0x6d1   :  { %9230 = vmatmul.bf16.vlgmr.msra.gmra.mxu2 %v16457_v26  ;;  %9243 = vmatmul.bf16.vlgmr.msra.gmra.mxu3 %v16460_v48  ;;  %v14328_v26 = vld [vmem:[#allocation13 + $0x944] sm:$0xf]  ;;  %v12659_v48 = vld [vmem:[#allocation13 + $0x948] sm:$0xf0]  ;;  %v12646_v3 = vor.u32 %v14324_v24, %v12643_v59 }
 0x6d2   :  { %9274 = vmatpush.bf16.msrb.mxu2 %v12686_v5  ;;  %9287 = vmatpush.bf16.msrb.mxu3 %v12750_v38  ;;  %v12662_v52 = vor.u32 %v14328_v26, %v12659_v48  ;;  %v16603_v5 = vpop.f32.mrf.mxu1  ;;  %v13302_v38 = vor.u32 %v14488_v57, %v13299_v20  ;;  %v14498_v26 = vld [vmem:[#allocation13 + $0xe94] sm:$0xf]  ;;  %v12638_v48 = vor.u32 %v14322_v22, %v12635_v14  ;;  %v14320_v57 = vld [vmem:[#allocation13 + $0x904] sm:$0xf]  ;;  %v12627_v20 = vld [vmem:[#allocation13 + $0x908] sm:$0xf0] }
 0x6d3   :  { %9360 = vmatmul.bf16.vlgmr.msra.gmra.mxu0 %v16465_v25  ;;  %9373 = vmatmul.bf16.vlgmr.msra.gmra.mxu1 %v16467_v58  ;;  %v14342_v25 = vld [vmem:[#allocation13 + $0x9b4] sm:$0xf]  ;;  %v16601_v58 = vpop.f32.mrf.mxu0  ;;  %v14396_v24 = vld [vmem:[#allocation13 + $0xb64] sm:$0xf]  ;;  %v12931_v59 = vld [vmem:[#allocation13 + $0xb68] sm:$0xf0] }
 0x6d4   :  { %9404 = vmatpush.bf16.msrb.mxu0 %v13326_v36  ;;  %9417 = vmatpush.bf16.msrb.mxu1 %v13390_v30  ;;  %v12718_v50 = vor.u32 %v14342_v25, %v12715_v16  ;;  %v16605_v42 = vpop.f32.mrf.mxu2  ;;  %v16607_v29 = vpop.f32.mrf.mxu3  ;;  %v14340_v36 = vld [vmem:[#allocation13 + $0x9a4] sm:$0xf]  ;;  %v12707_v30 = vld [vmem:[#allocation13 + $0x9a8] sm:$0xf0]  ;;  %v13278_v25 = vor.u32 %v14482_v8, %v13275_v43  ;;  %v12987_v22 = vld [vmem:[#allocation13 + $0xbd8] sm:$0xf0] }
 0x6d5   :  { %v12710_v37 = vor.u32 %v14340_v36, %v12707_v30  ;;  %v14412_v36 = vld [vmem:[#allocation13 + $0xbe4] sm:$0xf]  ;;  %v12995_v30 = vld [vmem:[#allocation13 + $0xbe8] sm:$0xf0]  ;;  %v14390_v43 = vld [vmem:[#allocation13 + $0xb34] sm:$0xf] }
 0x6d6   :  { %9275 = vmatpush.bf16.msrb.mxu2 %v12678_v9  ;;  %9288 = vmatpush.bf16.msrb.mxu3 %v12742_v6  ;;  %v14484_v9 = vld [vmem:[#allocation13 + $0xe24] sm:$0xf]  ;;  %v13283_v6 = vld [vmem:[#allocation13 + $0xe28] sm:$0xf0] }
 0x6d7   :  { %v14550_v14 = vld [vmem:[%s16700_s7 + $0x30] sm:$0xff]  ;;  %v14404_v41 = vld [vmem:[#allocation13 + $0xba4] sm:$0xf] }
 0x6d8   :  { %9405 = vmatpush.bf16.msrb.mxu0 %v13318_v11  ;;  %9418 = vmatpush.bf16.msrb.mxu1 %v13382_v55  ;;  %v14338_v11 = vld [vmem:[#allocation13 + $0x994] sm:$0xf]  ;;  %v12699_v55 = vld [vmem:[#allocation13 + $0x998] sm:$0xf0] }
 0x6d9   :  { %v12702_v1 = vor.u32 %v14338_v11, %v12699_v55 }
 0x6da   :  { %9276 = vmatpush.bf16.msrb.mxu2 %v12670_v28  ;;  %9289 = vmatpush.bf16.msrb.mxu3 %v12734_v49  ;;  %v9168_v2 = vpop.f32.mrf.mxu1  ;;  %v13286_v28 = vor.u32 %v14484_v9, %v13283_v6  ;;  %v13350_v49 = vor.u32 %v14500_v60, %v13347_v34  ;;  %v14551_v9 = vld [vmem:[%s16700_s7 + $0x38] sm:$0xff]  ;;  %v12934_v6 = vor.u32 %v14396_v24, %v12931_v59 }
 0x6db   :  { %v9155_v27 = vpop.f32.mrf.mxu0  ;;  %v12923_v60 = vld [vmem:[#allocation13 + $0xb58] sm:$0xf0]  ;;  %v14410_v34 = vld [vmem:[#allocation13 + $0xbd4] sm:$0xf]  ;;  %v12915_v2 = vld [vmem:[#allocation13 + $0xb48] sm:$0xf0] }
 0x6dc   :  { %9406 = vmatpush.bf16.msrb.mxu0 %v13310_v23  ;;  %9419 = vmatpush.bf16.msrb.mxu1 %v13374_v53  ;;  %v9025_v18 = vpop.f32.mrf.mxu2  ;;  %v9038_v23 = vpop.f32.mrf.mxu3  ;;  %v13339_v53 = vld [vmem:[#allocation13 + $0xe98] sm:$0xf0]  ;;  %v12990_v55 = vor.u32 %v14410_v34, %v12987_v22  ;;  %v14392_v27 = vld [vmem:[#allocation13 + $0xb44] sm:$0xf]  ;;  %v14478_v34 = vld [vmem:[#allocation13 + $0xdf4] sm:$0xf] }
 0x6dd   :  { %v13342_v16 = vor.u32 %v14498_v26, %v13339_v53  ;;  %v12907_v26 = vld [vmem:[#allocation13 + $0xb38] sm:$0xf0] }
 0x6de   :  { %9277 = vmatpush.bf16.msrb.mxu2 %v12662_v52  ;;  %9290 = vmatpush.bf16.msrb.mxu3 %v12726_v19  ;;  %v14336_v52 = vld [vmem:[#allocation13 + $0x984] sm:$0xf]  ;;  %v12691_v19 = vld [vmem:[#allocation13 + $0x988] sm:$0xf0]  ;;  %v12910_v23 = vor.u32 %v14390_v43, %v12907_v26  ;;  %v13259_v22 = vld [vmem:[#allocation13 + $0xdf8] sm:$0xf0] }
 0x6df   :  { %v14458_v43 = vld [vmem:[#allocation13 + $0xd54] sm:$0xf]  ;;  %v13179_v26 = vld [vmem:[#allocation13 + $0xd58] sm:$0xf0] }
 0x6e0   :  { %9407 = vmatpush.bf16.msrb.mxu0 %v13302_v38  ;;  %9420 = vmatpush.bf16.msrb.mxu1 %v13366_v40  ;;  %v12630_v38 = vor.u32 %v14320_v57, %v12627_v20  ;;  %v12694_v40 = vor.u32 %v14336_v52, %v12691_v19  ;;  %v14388_v52 = vld [vmem:[#allocation13 + $0xb24] sm:$0xf]  ;;  %v12899_v19 = vld [vmem:[#allocation13 + $0xb28] sm:$0xf0] }
 0x6e2   :  { %9278 = vmatpush.bf16.msrb.mxu2 %v12654_v44  ;;  %9291 = vmatpush.bf16.msrb.mxu3 %v12718_v50  ;;  %v13006_v44 = vor.u32 %v14414_v31, %v13003_v56  ;;  %v13267_v50 = vld [vmem:[#allocation13 + $0xe08] sm:$0xf0] }
 0x6e3   :  { %v12963_v31 = vld [vmem:[#allocation13 + $0xba8] sm:$0xf0] }
 0x6e4   :  { %9408 = vmatpush.bf16.msrb.mxu0 %v13294_v32  ;;  %9421 = vmatpush.bf16.msrb.mxu1 %v13358_v51  ;;  %v13270_v32 = vor.u32 %v14480_v33, %v13267_v50  ;;  %v13334_v51 = vor.u32 %v14496_v17, %v13331_v54  ;;  %v12891_v33 = vld [vmem:[#allocation13 + $0xb18] sm:$0xf0]  ;;  %v14546_v54 = vld [vmem:[%s16700_s7 + $0x10] sm:$0xff] }
 0x6e5   :  { %v12955_v50 = vld [vmem:[#allocation13 + $0xb98] sm:$0xf0] }
 0x6e6   :  { %9279 = vmatpush.bf16.msrb.mxu2 %v12646_v3  ;;  %9292 = vmatpush.bf16.msrb.mxu3 %v12710_v37  ;;  %v12998_v3 = vor.u32 %v14412_v36, %v12995_v30  ;;  %v14394_v37 = vld [vmem:[#allocation13 + $0xb54] sm:$0xf]  ;;  %v9024_v36 = vadd.f32 %v16605_v42, %v16595_v21 }
 0x6e7   :  { %v12926_v11 = vor.u32 %v14394_v37, %v12923_v60  ;;  %v14462_v37 = vld [vmem:[#allocation13 + $0xd74] sm:$0xf]  ;;  %v13195_v60 = vld [vmem:[#allocation13 + $0xd78] sm:$0xf0] }
 0x6e8   :  { %9409 = vmatpush.bf16.msrb.mxu0 %v13286_v28  ;;  %9422 = vmatpush.bf16.msrb.mxu1 %v13350_v49  ;;  %v14549_v28 = vld [vmem:[%s16700_s7 + $0x28] sm:$0xff]  ;;  %v12918_v49 = vor.u32 %v14392_v27, %v12915_v2  ;;  %v9037_v21 = vadd.f32 %v16607_v29, %v9024_v36 }
 0x6e9   :  { %v14460_v27 = vld [vmem:[#allocation13 + $0xd64] sm:$0xf]  ;;  %v13187_v2 = vld [vmem:[#allocation13 + $0xd68] sm:$0xf0] }
 0x6ea   :  { %9280 = vmatpush.bf16.msrb.mxu2 %v12638_v48  ;;  %9293 = vmatpush.bf16.msrb.mxu3 %v12702_v1  ;;  %v14406_v48 = vld [vmem:[#allocation13 + $0xbb4] sm:$0xf]  ;;  %v12971_v1 = vld [vmem:[#allocation13 + $0xbb8] sm:$0xf0] }
 0x6eb   :  { %v12974_v53 = vor.u32 %v14406_v48, %v12971_v1  ;;  %v14474_v48 = vld [vmem:[#allocation13 + $0xdd4] sm:$0xf]  ;;  %v13243_v1 = vld [vmem:[#allocation13 + $0xdd8] sm:$0xf0] }
 0x6ec   :  { %9410 = vmatpush.bf16.msrb.mxu0 %v13278_v25  ;;  %9423 = vmatpush.bf16.msrb.mxu1 %v13342_v16  ;;  %v14547_v25 = vld [vmem:[%s16700_s7 + $0x18] sm:$0xff]  ;;  %v12902_v16 = vor.u32 %v14388_v52, %v12899_v19  ;;  %v14472_v52 = vld [vmem:[#allocation13 + $0xdc4] sm:$0xf]  ;;  %v13235_v19 = vld [vmem:[#allocation13 + $0xdc8] sm:$0xf0] }
 0x6ee   :  { %9281 = vmatpush.bf16.msrb.mxu2 %v12630_v38  ;;  %9294 = vmatpush.bf16.msrb.mxu3 %v12694_v40  ;;  %v12966_v38 = vor.u32 %v14404_v41, %v12963_v31  ;;  %v14386_v40 = vld [vmem:[#allocation13 + $0xb14] sm:$0xf]  ;;  %v13238_v41 = vor.u32 %v14472_v52, %v13235_v19  ;;  %v13163_v31 = vld [vmem:[#allocation13 + $0xd38] sm:$0xf0]  ;;  %v14520_v52 = vld [vmem:[#allocation13 + $0xf44] sm:$0xf] }
 0x6ef   :  { %v12894_v24 = vor.u32 %v14386_v40, %v12891_v33  ;;  %v14452_v33 = vld [vmem:[#allocation13 + $0xd24] sm:$0xf]  ;;  %v13427_v19 = vld [vmem:[#allocation13 + $0xf48] sm:$0xf0] }
 0x6f0   :  { %9411 = vmatpush.bf16.msrb.mxu0 %v13270_v32  ;;  %9424 = vmatpush.bf16.msrb.mxu1 %v13334_v51  ;;  %v16622_v18 = vpop.f32.mrf.mxu0  ;;  %v14384_v51 = vld [vmem:[#allocation13 + $0xb04] sm:$0xf] }
 0x6f1   :  { %9282 = vmatmul.bf16.vlgmr.msrb.gmra.mxu2 %v16475_v45  ;;  %9295 = vmatmul.bf16.vlgmr.msrb.gmra.mxu3 %v16478_v10  ;;  %v14408_v45 = vld [vmem:[#allocation13 + $0xbc4] sm:$0xf]  ;;  %v12979_v10 = vld [vmem:[#allocation13 + $0xbc8] sm:$0xf0] }
 0x6f2   :  { %9326 = vmatpush.bf16.msra.mxu2 %v12942_v46  ;;  %9339 = vmatpush.bf16.msra.mxu3 %v13006_v44  ;;  %v12982_v8 = vor.u32 %v14408_v45, %v12979_v10  ;;  %v14402_v44 = vld [vmem:[#allocation13 + $0xb94] sm:$0xf]  ;;  %v14476_v45 = vld [vmem:[#allocation13 + $0xde4] sm:$0xf]  ;;  %v13251_v10 = vld [vmem:[#allocation13 + $0xde8] sm:$0xf0] }
 0x6f3   :  { %9412 = vmatmul.bf16.vlgmr.msrb.gmra.mxu0 %v16486_v63  ;;  %9425 = vmatmul.bf16.vlgmr.msrb.gmra.mxu1 %v16488_v4  ;;  %v16624_v63 = vpop.f32.mrf.mxu1  ;;  %v14548_v4 = vld [vmem:[%s16700_s7 + $0x20] sm:$0xff]  ;;  %v12958_v30 = vor.u32 %v14402_v44, %v12955_v50  ;;  %v13254_v29 = vor.u32 %v14476_v45, %v13251_v10 }
 0x6f4   :  { %9592 = vmatpush.bf16.msra.mxu0 %v14551_v9  ;;  %v9075_v57 = vpop.f32.mrf.mxu2  ;;  %v9088_v20 = vpop.f32.mrf.mxu3  ;;  %v12883_v9 = vld [vmem:[#allocation13 + $0xb08] sm:$0xf0]  ;;  %v13515_v45 = vld [vmem:[#allocation13 + $0xff8] sm:$0xf0] }
 0x6f5   :  { %v9076_v7 = vadd.f32 %v9075_v57, %v16577_v12  ;;  %v14456_v57 = vld [vmem:[#allocation13 + $0xd44] sm:$0xf] }
 0x6f6   :  { %9327 = vmatpush.bf16.msra.mxu2 %v12934_v6  ;;  %9340 = vmatpush.bf16.msra.mxu3 %v12998_v3  ;;  %v14400_v6 = vld [vmem:[#allocation13 + $0xb84] sm:$0xf]  ;;  %v12947_v3 = vld [vmem:[#allocation13 + $0xb88] sm:$0xf0] }
 0x6f7   :  { %v9089_v56 = vadd.f32 %v9088_v20, %v9076_v7  ;;  %v12950_v42 = vor.u32 %v14400_v6, %v12947_v3  ;;  %v13171_v20 = vld [vmem:[#allocation13 + $0xd48] sm:$0xf0] }
 0x6f8   :  { %9593 = vmatpush.bf16.msra.mxu0 %v14550_v14  ;;  %v9207_v17 = vpop.f32.mrf.mxu0  ;;  %v12886_v14 = vor.u32 %v14384_v51, %v12883_v9  ;;  %v13174_v7 = vor.u32 %v14456_v57, %v13171_v20  ;;  %v14466_v51 = vld [vmem:[#allocation13 + $0xd94] sm:$0xf]  ;;  %v13211_v9 = vld [vmem:[#allocation13 + $0xd98] sm:$0xf0] }
 0x6f9   :  { %v9102_v46 = vadd.f32 %v16588_v39, %v9089_v56  ;;  %v14470_v56 = vld [vmem:[#allocation13 + $0xdb4] sm:$0xf]  ;;  %v14468_v17 = vld [vmem:[#allocation13 + $0xda4] sm:$0xf] }
 0x6fa   :  { %9328 = vmatpush.bf16.msra.mxu2 %v12926_v11  ;;  %9341 = vmatpush.bf16.msra.mxu3 %v12990_v55  ;;  %v13198_v11 = vor.u32 %v14462_v37, %v13195_v60  ;;  %v13262_v55 = vor.u32 %v14478_v34, %v13259_v22  ;;  %v13214_v34 = vor.u32 %v14466_v51, %v13211_v9  ;;  %v14448_v22 = vld [vmem:[#allocation13 + $0xd04] sm:$0xf]  ;;  %v13403_v51 = vld [vmem:[#allocation13 + $0xf18] sm:$0xf0] }
 0x6fb   :  { %v9220_v12 = vpop.f32.mrf.mxu1  ;;  %v16638_v59 = vadd.f32 %v16590_v61, %v9102_v46  ;;  %v14545_v61 = vld [vmem:[%s16700_s7 + $0x8] sm:$0xff] }
 0x6fc   :  { %9594 = vmatpush.bf16.msra.mxu0 %v14549_v28  ;;  %v9077_v39 = vpop.f32.mrf.mxu2  ;;  %v9090_v32 = vpop.f32.mrf.mxu3  ;;  %v14544_v28 = vld [vmem:[%s16700_s7] sm:$0xff]  ;;  %v13155_v46 = vld [vmem:[#allocation13 + $0xd28] sm:$0xf0] }
 0x6fd   :  { %v13219_v12 = vld [vmem:[#allocation13 + $0xda8] sm:$0xf0]  ;;  %v14450_v39 = vld [vmem:[#allocation13 + $0xd14] sm:$0xf]  ;;  %v13147_v32 = vld [vmem:[#allocation13 + $0xd18] sm:$0xf0] }
 0x6fe   :  { %9329 = vmatpush.bf16.msra.mxu2 %v12918_v49  ;;  %9342 = vmatpush.bf16.msra.mxu3 %v12982_v8  ;;  %v9456_v49 = vmax.f32 %v9037_v21, 0.0  ;;  %v13190_v8 = vor.u32 %v14460_v27, %v13187_v2  ;;  %v13150_v60 = vor.u32 %v14450_v39, %v13147_v32  ;;  %v13451_v27 = vld [vmem:[#allocation13 + $0xf78] sm:$0xf0]  ;;  %v14542_v2 = vld [vmem:[#allocation13 + $0xff4] sm:$0xf] }
 0x6ff   :  { %v14514_v32 = vld [vmem:[#allocation13 + $0xf14] sm:$0xf] }
 0x700   :  { %9595 = vmatpush.bf16.msra.mxu0 %v14548_v4  ;;  %v9458_v4 = vpack.c.bf16 %v9456_v49, %v9456_v49  ;;  %v13518_v49 = vor.u32 %v14542_v2, %v13515_v45 }
 0x702   :  { %9330 = vmatpush.bf16.msra.mxu2 %v12910_v23  ;;  %9343 = vmatpush.bf16.msra.mxu3 %v12974_v53  ;;  %v13182_v23 = vor.u32 %v14458_v43, %v13179_v26  ;;  %v13246_v53 = vor.u32 %v14474_v48, %v13243_v1  ;;  %v14540_v43 = vld [vmem:[#allocation13 + $0xfe4] sm:$0xf]  ;;  %v13507_v26 = vld [vmem:[#allocation13 + $0xfe8] sm:$0xf0]  ;;  %v14522_v1 = vld [vmem:[#allocation13 + $0xf54] sm:$0xf] }
 0x703   :  { %v13510_v48 = vor.u32 %v14540_v43, %v13507_v26 }
 0x704   :  { %9596 = vmatpush.bf16.msra.mxu0 %v14547_v25  ;;  %v13227_v25 = vld [vmem:[#allocation13 + $0xdb8] sm:$0xf0] }
 0x705   :  { %v13230_v40 = vor.u32 %v14470_v56, %v13227_v25  ;;  %v14518_v56 = vld [vmem:[#allocation13 + $0xf34] sm:$0xf]  ;;  %v13419_v25 = vld [vmem:[#allocation13 + $0xf38] sm:$0xf0] }
 0x706   :  { %9331 = vmatpush.bf16.msra.mxu2 %v12902_v16  ;;  %9344 = vmatpush.bf16.msra.mxu3 %v12966_v38 }
 0x708   :  { %9597 = vmatpush.bf16.msra.mxu0 %v14546_v54 }
 0x70a   :  { %9332 = vmatpush.bf16.msra.mxu2 %v12894_v24  ;;  %9345 = vmatpush.bf16.msra.mxu3 %v12958_v30  ;;  %v13158_v24 = vor.u32 %v14452_v33, %v13155_v46  ;;  %v13222_v30 = vor.u32 %v14468_v17, %v13219_v12  ;;  %v14532_v17 = vld [vmem:[#allocation13 + $0xfa4] sm:$0xf]  ;;  %v13475_v12 = vld [vmem:[#allocation13 + $0xfa8] sm:$0xf0] }
 0x70b   :  { %v13478_v39 = vor.u32 %v14532_v17, %v13475_v12  ;;  %v14555_v17 = vld [vmem:[%s16700_s7 + $0x58] sm:$0xff]  ;;  %v14554_v12 = vld [vmem:[%s16700_s7 + $0x50] sm:$0xff] }
 0x70c   :  { %9598 = vmatpush.bf16.msra.mxu0 %v14545_v61  ;;  %v13139_v61 = vld [vmem:[#allocation13 + $0xd08] sm:$0xf0] }
 0x70e   :  { %9333 = vmatpush.bf16.msra.mxu2 %v12886_v14  ;;  %9346 = vmatpush.bf16.msra.mxu3 %v12950_v42 }
 0x710   :  { %9599 = vmatpush.bf16.msra.mxu0 %v14544_v28  ;;  %v16653_v16 = vpop.f32.mrf.mxu1 }
 0x711   :  { %9334 = vmatmul.bf16.vlgmr.msra.gmra.mxu2 %v16505_v35  ;;  %9347 = vmatmul.bf16.vlgmr.msra.gmra.mxu3 %v16507_v13  ;;  %v14454_v35 = vld [vmem:[#allocation13 + $0xd34] sm:$0xf]  ;;  %v16651_v13 = vpop.f32.mrf.mxu0 }
 0x712   :  { %9378 = vmatpush.bf16.msrb.mxu2 %v13198_v11  ;;  %9391 = vmatpush.bf16.msrb.mxu3 %v13262_v55  ;;  %v13166_v38 = vor.u32 %v14454_v35, %v13163_v31  ;;  %v13203_v11 = vld [vmem:[#allocation13 + $0xd88] sm:$0xf0]  ;;  %v14526_v55 = vld [vmem:[#allocation13 + $0xf74] sm:$0xf]  ;;  %v13430_v35 = vor.u32 %v14520_v52, %v13427_v19 }
 0x713   :  { %9600 = vmatmul.bf16.vlgmr.msra.gmra.mxu0 %v9458_v4  ;;  %v13454_v28 = vor.u32 %v14526_v55, %v13451_v27  ;;  %v13435_v4 = vld [vmem:[#allocation13 + $0xf58] sm:$0xf0] }
 0x714   :  { %v9127_v44 = vpop.f32.mrf.mxu2  ;;  %v9140_v50 = vpop.f32.mrf.mxu3  ;;  %v13438_v57 = vor.u32 %v14522_v1, %v13435_v4 }
 0x715   :  { %v9128_v54 = vadd.f32 %v9127_v44, %v16638_v59  ;;  %v14464_v59 = vld [vmem:[#allocation13 + $0xd84] sm:$0xf] }
 0x716   :  { %9379 = vmatpush.bf16.msrb.mxu2 %v13190_v8  ;;  %9392 = vmatpush.bf16.msrb.mxu3 %v13254_v29  ;;  %v13206_v10 = vor.u32 %v14464_v59, %v13203_v11  ;;  %v14524_v8 = vld [vmem:[#allocation13 + $0xf64] sm:$0xf]  ;;  %v13443_v29 = vld [vmem:[#allocation13 + $0xf68] sm:$0xf0] }
 0x717   :  { %v9141_v36 = vadd.f32 %v9140_v50, %v9128_v54  ;;  %v14516_v44 = vld [vmem:[#allocation13 + $0xf24] sm:$0xf]  ;;  %v13411_v50 = vld [vmem:[#allocation13 + $0xf28] sm:$0xf0] }
 0x718   :  { %v9272_v37 = vpop.f32.mrf.mxu1  ;;  %v14512_v59 = vld [vmem:[#allocation13 + $0xf04] sm:$0xf] }
 0x719   :  { %v9154_v6 = vadd.f32 %v16601_v58, %v9141_v36  ;;  %v9259_v3 = vpop.f32.mrf.mxu0  ;;  %v13142_v58 = vor.u32 %v14448_v22, %v13139_v61 }
 0x71a   :  { %9380 = vmatpush.bf16.msrb.mxu2 %v13182_v23  ;;  %9393 = vmatpush.bf16.msrb.mxu3 %v13246_v53  ;;  %v14538_v23 = vld [vmem:[#allocation13 + $0xfd4] sm:$0xf]  ;;  %v13499_v53 = vld [vmem:[#allocation13 + $0xfd8] sm:$0xf0] }
 0x71b   :  { %v9167_v14 = vadd.f32 %v16603_v5, %v9154_v6  ;;  %v13446_v5 = vor.u32 %v14524_v8, %v13443_v29  ;;  %v13502_v20 = vor.u32 %v14538_v23, %v13499_v53  ;;  %v14530_v6 = vld [vmem:[#allocation13 + $0xf94] sm:$0xf]  ;;  %v13467_v3 = vld [vmem:[#allocation13 + $0xf98] sm:$0xf0] }
 0x71c   :  { %v9129_v21 = vpop.f32.mrf.mxu2  ;;  %v9142_v42 = vpop.f32.mrf.mxu3  ;;  %v13470_v61 = vor.u32 %v14530_v6, %v13467_v3 }
 0x71d   :  { %v13395_v21 = vld [vmem:[#allocation13 + $0xf08] sm:$0xf0]  ;;  %v14528_v42 = vld [vmem:[#allocation13 + $0xf84] sm:$0xf] }
 0x71e   :  { %9381 = vmatpush.bf16.msrb.mxu2 %v13174_v7  ;;  %9394 = vmatpush.bf16.msrb.mxu3 %v13238_v41  ;;  %v14536_v7 = vld [vmem:[#allocation13 + $0xfc4] sm:$0xf]  ;;  %v13491_v41 = vld [vmem:[#allocation13 + $0xfc8] sm:$0xf0]  ;;  %v13398_v2 = vor.u32 %v14512_v59, %v13395_v21 }
 0x71f   :  { %v13494_v31 = vor.u32 %v14536_v7, %v13491_v41 }
 0x722   :  { %9382 = vmatpush.bf16.msrb.mxu2 %v13166_v38  ;;  %9395 = vmatpush.bf16.msrb.mxu3 %v13230_v40  ;;  %v14534_v38 = vld [vmem:[#allocation13 + $0xfb4] sm:$0xf]  ;;  %v13422_v40 = vor.u32 %v14518_v56, %v13419_v25 }
 0x726   :  { %9383 = vmatpush.bf16.msrb.mxu2 %v13158_v24  ;;  %9396 = vmatpush.bf16.msrb.mxu3 %v13222_v30  ;;  %v13414_v30 = vor.u32 %v14516_v44, %v13411_v50  ;;  %v14556_v50 = vld [vmem:[%s16700_s7 + $0x60] sm:$0xff] }
 0x72a   :  { %9384 = vmatpush.bf16.msrb.mxu2 %v13150_v60  ;;  %9397 = vmatpush.bf16.msrb.mxu3 %v13214_v34  ;;  %v13406_v60 = vor.u32 %v14514_v32, %v13403_v51  ;;  %v14552_v51 = vld [vmem:[%s16700_s7 + $0x40] sm:$0xff] }
 0x72e   :  { %9385 = vmatpush.bf16.msrb.mxu2 %v13142_v58  ;;  %9398 = vmatpush.bf16.msrb.mxu3 %v13206_v10 }
 0x730   :  { %v9322_v33 = vpop.f32.mrf.mxu1 }
 0x731   :  { %9386 = vmatmul.bf16.vlgmr.msrb.gmra.mxu2 %v16524_v47  ;;  %9399 = vmatmul.bf16.vlgmr.msrb.gmra.mxu3 %v16526_v62  ;;  %v13483_v47 = vld [vmem:[#allocation13 + $0xfb8] sm:$0xf0]  ;;  %v9309_v62 = vpop.f32.mrf.mxu0 }
 0x732   :  { %9430 = vmatpush.bf16.msra.mxu2 %v13454_v28  ;;  %9443 = vmatpush.bf16.msra.mxu3 %v13518_v49  ;;  %v13486_v46 = vor.u32 %v14534_v38, %v13483_v47 }
 0x734   :  { %v9179_v54 = vpop.f32.mrf.mxu2  ;;  %v9192_v24 = vpop.f32.mrf.mxu3 }
 0x735   :  { %v9180_v36 = vadd.f32 %v9179_v54, %v9167_v14  ;;  %v13459_v14 = vld [vmem:[#allocation13 + $0xf88] sm:$0xf0] }
 0x736   :  { %9431 = vmatpush.bf16.msra.mxu2 %v13446_v5  ;;  %9444 = vmatpush.bf16.msra.mxu3 %v13510_v48  ;;  %v13462_v45 = vor.u32 %v14528_v42, %v13459_v14 }
 0x737   :  { %v9193_v9 = vadd.f32 %v9192_v24, %v9180_v36 }
 0x738   :  { %v9324_v22 = vpop.f32.mrf.mxu1 }
 0x739   :  { %v9206_v37 = vadd.f32 %v16622_v18, %v9193_v9  ;;  %v9311_v34 = vpop.f32.mrf.mxu0  ;;  %v14563_v9 = vld [vmem:[#allocation17 + $0x18] sm:$0xff] }
 0x73a   :  { %9432 = vmatpush.bf16.msra.mxu2 %v13438_v57  ;;  %9445 = vmatpush.bf16.msra.mxu3 %v13502_v20  ;;  %v14561_v34 = vld [vmem:[#allocation17 + $0x8] sm:$0xff] }
 0x73b   :  { %v9219_v11 = vadd.f32 %v16624_v63, %v9206_v37  ;;  %v14562_v37 = vld [vmem:[#allocation17 + $0x10] sm:$0xff] }
 0x73c   :  { %v9181_v55 = vpop.f32.mrf.mxu2  ;;  %v9194_v27 = vpop.f32.mrf.mxu3 }
 0x73d   :  { %v14560_v27 = vld [vmem:[#allocation17] sm:$0xff] }
 0x73e   :  { %9433 = vmatpush.bf16.msra.mxu2 %v13430_v35  ;;  %9446 = vmatpush.bf16.msra.mxu3 %v13494_v31 }
 0x742   :  { %9434 = vmatpush.bf16.msra.mxu2 %v13422_v40  ;;  %9447 = vmatpush.bf16.msra.mxu3 %v13486_v46  ;;  %v14558_v40 = vld [vmem:[%s16700_s7 + $0x70] sm:$0xff]  ;;  %v14557_v46 = vld [vmem:[%s16700_s7 + $0x68] sm:$0xff] }
 0x746   :  { %9435 = vmatpush.bf16.msra.mxu2 %v13414_v30  ;;  %9448 = vmatpush.bf16.msra.mxu3 %v13478_v39  ;;  %v14553_v39 = vld [vmem:[%s16700_s7 + $0x48] sm:$0xff] }
 0x74a   :  { %9436 = vmatpush.bf16.msra.mxu2 %v13406_v60  ;;  %9449 = vmatpush.bf16.msra.mxu3 %v13470_v61 }
 0x74e   :  { %9437 = vmatpush.bf16.msra.mxu2 %v13398_v2  ;;  %9450 = vmatpush.bf16.msra.mxu3 %v13462_v45  ;;  %v14585_v2 = vld [vmem:[#allocation16] ss:$0 sm:$0xff] }
 0x750   :  { %v9361_v18 = vpop.f32.mrf.mxu0  ;;  %v9374_v58 = vpop.f32.mrf.mxu1 }
 0x751   :  { %9438 = vmatmul.bf16.vlgmr.msra.gmra.mxu2 %v16543_v0  ;;  %9451 = vmatmul.bf16.vlgmr.msra.gmra.mxu3 %v16545_v15 }
 0x752   :  { %9664 = vmatpush.bf16.msrb.mxu2 %v14563_v9 }
 0x754   :  { %v9231_v10 = vpop.f32.mrf.mxu2  ;;  %v9244_v28 = vpop.f32.mrf.mxu3 }
 0x755   :  { %v9232_v49 = vadd.f32 %v9231_v10, %v9219_v11 }
 0x756   :  { %9665 = vmatpush.bf16.msrb.mxu2 %v14562_v37 }
 0x757   :  { %v9245_v8 = vadd.f32 %v9244_v28, %v9232_v49 }
 0x758   :  { %v9363_v29 = vpop.f32.mrf.mxu0  ;;  %v9376_v43 = vpop.f32.mrf.mxu1 }
 0x759   :  { %v9258_v63 = vadd.f32 %v16651_v13, %v9245_v8  ;;  %v14586_v8 = vld [vmem:[#allocation19] ss:$0 sm:$0xff] }
 0x75a   :  { %9666 = vmatpush.bf16.msrb.mxu2 %v14561_v34 }
 0x75b   :  { %v9271_v26 = vadd.f32 %v16653_v16, %v9258_v63  ;;  %v14559_v16 = vld [vmem:[%s16700_s7 + $0x78] sm:$0xff]  ;;  %v9673_v63 = vld [vmem:[#allocation20] sm:$0xff]  ;;  %s14924_s7 = smov [#allocation22]  }
 0x75c   :  { %v9233_v5 = vpop.f32.mrf.mxu2  ;;  %v9246_v48 = vpop.f32.mrf.mxu3  ;;  %9605 = vmatpush.bf16.msra.mxu1 %v14559_v16  ;;  %vm9674_vm4 = vcmp.eq.f32.partialorder %v9673_v63, 0.0  ;;  %s9692_s2 = sshll.u32 %s14924_s7, 4  ;;  %s9693_s2 = int_to_ptr.vmem [resolvable:$true] %s9692_s2 }
 0x75e   :  { %9667 = vmatpush.bf16.msrb.mxu2 %v14560_v27 }
 0x760   :  { %9606 = vmatpush.bf16.msra.mxu1 %v14558_v40 }
 0x764   :  { %9607 = vmatpush.bf16.msra.mxu1 %v14557_v46 }
 0x768   :  { %9608 = vmatpush.bf16.msra.mxu1 %v14556_v50 }
 0x76c   :  { %9609 = vmatpush.bf16.msra.mxu1 %v14555_v17 }
 0x770   :  { %v9413_v1 = vpop.f32.mrf.mxu0  ;;  %v9426_v4 = vpop.f32.mrf.mxu1  ;;  %9610 = vmatpush.bf16.msra.mxu1 %v14554_v12 }
 0x774   :  { %v9283_v23 = vpop.f32.mrf.mxu2  ;;  %v9296_v0 = vpop.f32.mrf.mxu3  ;;  %9611 = vmatpush.bf16.msra.mxu1 %v14553_v39 }
 0x775   :  { %v9284_v53 = vadd.f32 %v9283_v23, %v9271_v26 }
 0x777   :  { %v9297_v15 = vadd.f32 %v9296_v0, %v9284_v53 }
 0x778   :  { %v9415_v20 = vpop.f32.mrf.mxu0  ;;  %v9428_v52 = vpop.f32.mrf.mxu1  ;;  %9612 = vmatpush.bf16.msra.mxu1 %v14552_v51 }
 0x779   :  { %v9310_v57 = vadd.f32 %v9309_v62, %v9297_v15 }
 0x77b   :  { %v9323_v19 = vadd.f32 %v9322_v33, %v9310_v57 }
 0x77c   :  { %v9285_v7 = vpop.f32.mrf.mxu2  ;;  %v9298_v41 = vpop.f32.mrf.mxu3 }
 0x790   :  { %v9601_v35 = vpop.f32.mrf.mxu0 }
 0x791   :  { %v9602_v45 = vadd.f32 %v14585_v2, %v9601_v35 }
 0x794   :  { %v9335_v13 = vpop.f32.mrf.mxu2  ;;  %v9348_v56 = vpop.f32.mrf.mxu3 }
 0x795   :  { %v9336_v31 = vadd.f32 %v9335_v13, %v9323_v19 }
 0x797   :  { %v9349_v25 = vadd.f32 %v9348_v56, %v9336_v31 }
 0x798   :  { %v9603_v47 = vpop.f32.mrf.mxu0 }
 0x799   :  { %v9362_v38 = vadd.f32 %v9361_v18, %v9349_v25 }
 0x79b   :  { %v9375_v62 = vadd.f32 %v9374_v58, %v9362_v38 }
 0x79c   :  { %v9337_v33 = vpop.f32.mrf.mxu2  ;;  %v9350_v44 = vpop.f32.mrf.mxu3 }
 0x7b4   :  { %v9387_v54 = vpop.f32.mrf.mxu2  ;;  %v9400_v36 = vpop.f32.mrf.mxu3 }
 0x7b5   :  { %v9388_v24 = vadd.f32 %v9387_v54, %v9375_v62 }
 0x7b7   :  { %v9401_v30 = vadd.f32 %v9400_v36, %v9388_v24 }
 0x7b9   :  { %v9414_v32 = vadd.f32 %v9413_v1, %v9401_v30 }
 0x7bb   :  { %v9427_v6 = vadd.f32 %v9426_v4, %v9414_v32 }
 0x7bc   :  { %v9389_v3 = vpop.f32.mrf.mxu2  ;;  %v9402_v60 = vpop.f32.mrf.mxu3 }
 0x7d4   :  { %v9439_v22 = vpop.f32.mrf.mxu2  ;;  %v9452_v59 = vpop.f32.mrf.mxu3 }
 0x7d5   :  { %v9440_v61 = vadd.f32 %v9439_v22, %v9427_v6 }
 0x7d7   :  { %v9453_v21 = vadd.f32 %v9452_v59, %v9440_v61 }
 0x7d9   :  { %v9457_v42 = vmax.f32 %v9453_v21, 0.0 }
 0x7db   :  { %v9459_v14 = vpack.c.bf16 %v9457_v42, %v9457_v42 }
 0x7dc   :  { %v9441_v11 = vpop.f32.mrf.mxu2  ;;  %v9454_v55 = vpop.f32.mrf.mxu3 }
 0x7dd   :  { %9613 = vmatmul.bf16.vlgmr.msra.gmra.mxu1 %v9459_v14 }
 0x85a   :  { %v9614_v18 = vpop.f32.mrf.mxu1 }
 0x85b   :  { %v9615_v58 = vadd.f32 %v9614_v18, %v9602_v45 }
 0x85d   :  { %v9618_v10 = vmax.f32 %v9615_v58, 0.0 }
 0x85f   :  { %v9619_v28 = vpack.c.bf16 %v9618_v10, %v9618_v10 }
 0x861   :  { %13599 = vmatmul.msk.bf16.vlgmr.msrb.gmra.mxu2 %vm9656_vm3, %v9619_v28 }
 0x862   :  { %v9616_v49 = vpop.f32.mrf.mxu1 }
 0x8e4   :  { %v9669_v29 = vpop.f32.mrf.mxu2 }
 0x8e5   :  { %v9670_v43 = vadd.f32 %v14586_v8, %v9669_v29 }
 0x8e7   :  { %v9675_v26 = vsel %vm9674_vm4, -inf, %v9670_v43 }
 0x8e8   :  { %9676 = vmax.xlane.f32.xlu0 %v9675_v26 }
 0x8ec   :  { %v9671_v5 = vpop.f32.mrf.mxu2 }
 0x95b   :  { %v9677_v48 = vpop.xlane.xlu0 %9676 }
 0x95c   :  { %v9678_v1 = vsub.f32 %v9675_v26, %v9677_v48 }
 0x95e   :  { %v9679_v4 = vmul.f32 1.442695, %v9678_v1 }
 0x960   :  { %14621 = vpow2.f32 %v9679_v4 }
 0x966   :  { %v14622_v23 = vpop.eup %14621 }
 0x967   :  { %9681 = vadd.xlane.f32.xlu0 %v14622_v23 }
 0x9da   :  { %v9682_v0 = vpop.xlane.xlu0 %9681 }
 0x9db   :  { %14623 = vlog2.f32 %v9682_v0 }
 0x9e1   :  { %v14624_v53 = vpop.eup %14623 }
 0x9e2   :  { %v9684_v15 = vmul.f32 0.6931472, %v14624_v53 }
 0x9e4   :  { %v9685_v57 = vsub.f32 %v9678_v1, %v9684_v15 }
 0x9e6   :  { %9686 = vst [vmem:[#allocation22] sm:$0xff] %v9685_v57 }
 0x9e7   :  { %9697 = dma.vmem_to_hbm [thread:$0]  %s9693_s2, 128, %s9695_s1, [#allocation7]  }
 0x9e8   :  { %14902 = dma.done.wait [#allocation7], 128  }
 0x9e9   :  { %14903 = vsyncadd [#allocation7], 4294967168 }
 0x9ea   :  { %9702 = vsyncpa [#allocation6], 1 }
 0x9eb   :  { %9703 = vsyncpa [#allocation9], 1 }
 0x9ec   :  { %9704 = vsyncpa [#allocation12], 1 }
 0x9ed   :  { %9705 = vsyncpa [#allocation15], 1 }
 0x9ee   :  { %9706 = vsyncpa [#allocation18], 1 }
 0x9ef   :  { %9707 = vsyncpa [#allocation21], 1 }
 0x9f0   :  { %9708 = vsyncpa [#allocation7], 1 }

</bundles_post_ra>
